<compile_context>
chip_gen: v6e
topology: v6e:2x2x1
jax: 0.10.0
libtpu: 0.0.40
codegen_flags: <defaults>
</compile_context>

<pallas_src>
import functools

import jax
import jax.numpy as jnp
from jax import lax
from jax.experimental import pallas as pl
from jax.experimental.pallas import tpu as pltpu

BN_EPS = 1e-5


def _rup(v, m):
    return ((v + m - 1) // m) * m


def inception_paths_kernel(x_ref, w1x_ref, b2a_ref, b3a_ref, w2b_ref, w3b_ref,
                           w4_ref, cat_ref, stat_ref, s2_ref, s3_ref, *, H, W):
    f32, bf16 = jnp.float32, jnp.bfloat16
    Cin = x_ref.shape[1]
    HW = x_ref.shape[2]
    cA = w1x_ref.shape[1]
    c2_0 = b2a_ref.shape[1]
    c3_0 = b3a_ref.shape[1]
    c1 = cA - c2_0 - c3_0
    c2_1 = w2b_ref.shape[1]
    c3_1 = w3b_ref.shape[1]
    c4 = w4_ref.shape[1]
    Ctot = c1 + c2_1 + c3_1 + c4
    Cpad = cat_ref.shape[2]
    Wp2 = s2_ref.shape[1]
    Wp3 = s3_ref.shape[1]

    # ---- input image: (Cin, HW) f32 -> (HW, Cin) via XLU transpose ----
    xc = x_ref[0]
    xt = jnp.transpose(xc)                               # (HW, Cin) f32
    x_bf = xt.astype(bf16)

    # ---- fused 1x1 convs (p1 | path-2 reduce | path-3 reduce): one matmul ---
    r = jnp.dot(x_bf, w1x_ref[...], preferred_element_type=f32)     # (HW, cA)
    p1 = r[:, 0:c1]
    h2 = jnp.maximum(r[:, c1:c1 + c2_0] + b2a_ref[...], 0.0)        # (HW, c2_0)
    h3 = jnp.maximum(r[:, c1 + c2_0:cA] + b3a_ref[...], 0.0)        # (HW, c3_0)

    # ---- path 2: 3x3 conv as ONE matmul (K = 9*c2_0) over a (ky,kx)-grouped
    #      im2col scratch.  s2[r, c, (ky*3+kx)*c2_0 + ch] = h2pad[r+ky, c-1+kx]
    #      (h2pad = h2 zero-padded by 1); output pixel (y, x) is row y of the
    #      matmul at padded column x+1.  Halo-only zeroing: only padded row 0 /
    #      H-1 and padded columns 1 / W (the cells that reach kept output
    #      columns) are zeroed; cols 0 and >= W+2 are discarded garbage. ----
    h2_3d = h2.reshape(H, W, c2_0)
    K2 = 9 * c2_0
    zc2 = jnp.zeros((H, 1, K2), f32)
    zr2 = jnp.zeros((1, Wp2, K2), f32)
    s2_ref[:, 1:2, :] = zc2
    s2_ref[:, W:W + 1, :] = zc2
    s2_ref[0:1, :, :] = zr2
    s2_ref[H - 1:H, :, :] = zr2
    for ky in range(3):
        r0 = max(0, 1 - ky)
        r1 = min(H, H + 1 - ky)
        if r1 <= r0:
            continue
        src = h2_3d[r0 + ky - 1:r1 + ky - 1]
        for kx in range(3):
            g = ky * 3 + kx
            s2_ref[r0:r1, 2 - kx:W + 2 - kx, g * c2_0:(g + 1) * c2_0] = src
    patch2 = s2_ref[...].reshape(H * Wp2, K2).astype(bf16)
    p2 = jnp.dot(patch2, w2b_ref[...], preferred_element_type=f32)
    p2 = p2.reshape(H, Wp2, c2_1)[:, 1:W + 1, :].reshape(HW, c2_1)

    # ---- path 3: 5x5 conv as ONE matmul (K = 25*c3_0), same scheme ----
    h3_3d = h3.reshape(H, W, c3_0)
    K3 = 25 * c3_0
    zc3 = jnp.zeros((H, 2, K3), f32)
    zr3 = jnp.zeros((2, Wp3, K3), f32)
    s3_ref[:, 2:4, :] = zc3
    s3_ref[:, W:W + 2, :] = zc3
    s3_ref[0:2, :, :] = zr3
    s3_ref[H - 2:H, :, :] = zr3
    for ky in range(5):
        r0 = max(0, 2 - ky)
        r1 = min(H, H + 2 - ky)
        if r1 <= r0:
            continue
        src = h3_3d[r0 + ky - 2:r1 + ky - 2]
        for kx in range(5):
            g = ky * 5 + kx
            s3_ref[r0:r1, 4 - kx:W + 4 - kx, g * c3_0:(g + 1) * c3_0] = src
    patch3 = s3_ref[...].reshape(H * Wp3, K3).astype(bf16)
    p3 = jnp.dot(patch3, w3b_ref[...], preferred_element_type=f32)
    p3 = p3.reshape(H, Wp3, c3_1)[:, 2:W + 2, :].reshape(HW, c3_1)

    # ---- path 4: 3x3 stride-1 pad-1 maxpool, fully register-resident ----
    ninf1 = jnp.full((1, Cin), -jnp.inf, f32)
    ninfW = jnp.full((W, Cin), -jnp.inf, f32)
    w_idx = lax.broadcasted_iota(jnp.int32, (HW, Cin), 0) % W
    left = jnp.where(w_idx > 0,
                     jnp.concatenate([ninf1, xt[:HW - 1]], axis=0), -jnp.inf)
    right = jnp.where(w_idx < W - 1,
                      jnp.concatenate([xt[1:], ninf1], axis=0), -jnp.inf)
    cm = jnp.maximum(jnp.maximum(left, xt), right)           # column (W) max
    up = jnp.concatenate([ninfW, cm[:HW - W]], axis=0)
    down = jnp.concatenate([cm[W:], ninfW], axis=0)
    pooled = jnp.maximum(jnp.maximum(up, cm), down)           # row (H) max
    p4 = jnp.dot(pooled.astype(bf16), w4_ref[...], preferred_element_type=f32)

    # ---- assemble the full lane-dense (HW, Cpad) slab in registers, one
    #      unmasked bf16 store, plus per-image sum / sum^2 for global BN ----
    pieces = [p1, p2, p3, p4]
    if Cpad > Ctot:
        pieces.append(jnp.zeros((HW, Cpad - Ctot), f32))
    cat = jnp.concatenate(pieces, axis=1)                     # (HW, Cpad) f32
    cat_ref[0] = cat.astype(bf16)
    stat_ref[0] = jnp.concatenate(
        [jnp.sum(cat, axis=0, keepdims=True),
         jnp.sum(cat * cat, axis=0, keepdims=True)], axis=0)  # (2, Cpad)


def bn_relu_transpose_kernel(cat_ref, scale_ref, shift_ref, o_ref):
    # cat_ref: (1, tm, Cpad) bf16; scale/shift: (Ctot, 1) f32; o_ref: (1, Ctot, tm)
    Ctot = scale_ref.shape[0]
    xt = jnp.transpose(cat_ref[0].astype(jnp.float32))        # (Cpad, tm)
    o_ref[0] = jnp.maximum(xt[0:Ctot, :] * scale_ref[...] + shift_ref[...], 0.0)


def inception_forward(x_nchw, params):
    """x_nchw: (N, Cin, H, W) float32 -> (N, Ctot, H, W) float32."""
    (w1, w2a, b2a, w2b, w3a, b3a, w3b, w4, gamma, beta) = params
    N, Cin, H, W = x_nchw.shape
    c1 = w1.shape[0]
    c2_0, c2_1 = w2a.shape[0], w2b.shape[0]
    c3_0, c3_1 = w3a.shape[0], w3b.shape[0]
    c4 = w4.shape[0]
    Ctot = c1 + c2_1 + c3_1 + c4
    cA = c1 + c2_0 + c3_0
    HW = H * W
    P = N * HW
    f32, bf16 = jnp.float32, jnp.bfloat16
    Cpad = _rup(Ctot, 128)          # lane-dense (unmasked) cat / stat stores
    Wp2 = _rup(W + 2, 8)            # 8-aligned padded width for the 3x3 scratch
    Wp3 = _rup(W + 4, 8)            # 8-aligned padded width for the 5x5 scratch

    # Layout glue: free reshape of x (no XLA transpose of activations), fused /
    # (ky,kx)-flattened matmul weight layouts, bf16 MXU weights.
    x_in = x_nchw.reshape(N, Cin, HW).astype(f32)
    w1x = jnp.concatenate([w1[:, :, 0, 0].T, w2a[:, :, 0, 0].T,
                           w3a[:, :, 0, 0].T], axis=1).astype(bf16)   # (Cin, cA)
    w2bf = jnp.transpose(w2b, (2, 3, 1, 0)).reshape(9 * c2_0, c2_1).astype(bf16)
    w3bf = jnp.transpose(w3b, (2, 3, 1, 0)).reshape(25 * c3_0, c3_1).astype(bf16)
    w4m = w4[:, :, 0, 0].T.astype(bf16)                               # (Cin, c4)
    b2a2 = b2a.reshape(1, c2_0).astype(f32)
    b3a2 = b3a.reshape(1, c3_0).astype(f32)

    flops = 2 * N * (HW * Cin * cA
                     + H * Wp2 * (9 * c2_0) * c2_1
                     + H * Wp3 * (25 * c3_0) * c3_1
                     + HW * Cin * c4)
    bytes_accessed = (x_in.size * 4
                      + (w1x.size + w2bf.size + w3bf.size + w4m.size) * 2
                      + (b2a2.size + b3a2.size) * 4
                      + N * HW * Cpad * 2 + N * 2 * Cpad * 4)

    kernel = functools.partial(inception_paths_kernel, H=H, W=W)
    cat, stats = pl.pallas_call(
        kernel,
        out_shape=(jax.ShapeDtypeStruct((N, HW, Cpad), bf16),
                   jax.ShapeDtypeStruct((N, 2, Cpad), f32)),
        grid=(N,),
        in_specs=[
            pl.BlockSpec((1, Cin, HW), lambda n: (n, 0, 0)),
            pl.BlockSpec((Cin, cA), lambda n: (0, 0)),
            pl.BlockSpec((1, c2_0), lambda n: (0, 0)),
            pl.BlockSpec((1, c3_0), lambda n: (0, 0)),
            pl.BlockSpec((9 * c2_0, c2_1), lambda n: (0, 0)),
            pl.BlockSpec((25 * c3_0, c3_1), lambda n: (0, 0)),
            pl.BlockSpec((Cin, c4), lambda n: (0, 0)),
        ],
        out_specs=(
            pl.BlockSpec((1, HW, Cpad), lambda n: (n, 0, 0)),
            pl.BlockSpec((1, 2, Cpad), lambda n: (n, 0, 0)),
        ),
        scratch_shapes=[
            pltpu.VMEM((H, Wp2, 9 * c2_0), f32),    # (ky,kx)-grouped 3x3 im2col
            pltpu.VMEM((H, Wp3, 25 * c3_0), f32),   # (ky,kx)-grouped 5x5 im2col
        ],
        compiler_params=pltpu.CompilerParams(
            dimension_semantics=("parallel",),
            vmem_limit_bytes=32 * 1024 * 1024),
        cost_estimate=pl.CostEstimate(flops=int(flops), transcendentals=0,
                                      bytes_accessed=int(bytes_accessed)),
    )(x_in, w1x, b2a2, b3a2, w2bf, w3bf, w4m)
    # TODO(synk): batch/row-block the grid (and bf16 scratch) for real Inception
    # sizes so v7x gets >=4 grid steps per core within its 64 MiB VMEM.

    # ---- BatchNorm finalize: global batch stats from per-image partial sums.
    s = jnp.sum(stats[:, :, :Ctot], axis=0)          # (2, Ctot)
    mean = s[0] / P
    var = jnp.maximum(s[1] / P - mean * mean, 0.0)   # guard E[x^2]-mean^2 cancel
    inv = lax.rsqrt(var + BN_EPS)
    g = gamma.astype(f32)
    scale = (g * inv).reshape(Ctot, 1)
    shift = (beta.astype(f32) - mean * g * inv).reshape(Ctot, 1)

    # ---- second pass: BN-apply + ReLU fused with the (HW, C) -> (C, HW)
    #      transpose, so the result is already NCHW and every store is
    #      lane-dense (lane dim = tm >= 128).
    tm = HW
    for cand in (2048, 1024, 512, 256, 128):
        if HW % cand == 0:
            tm = cand
            break
    y = pl.pallas_call(
        bn_relu_transpose_kernel,
        out_shape=jax.ShapeDtypeStruct((N, Ctot, HW), f32),
        grid=(N, HW // tm),
        in_specs=[
            pl.BlockSpec((1, tm, Cpad), lambda n, i: (n, i, 0)),
            pl.BlockSpec((Ctot, 1), lambda n, i: (0, 0)),
            pl.BlockSpec((Ctot, 1), lambda n, i: (0, 0)),
        ],
        out_specs=pl.BlockSpec((1, Ctot, tm), lambda n, i: (n, 0, i)),
        compiler_params=pltpu.CompilerParams(
            dimension_semantics=("parallel", "parallel"),
            vmem_limit_bytes=32 * 1024 * 1024),
    )(cat, scale, shift)

    return y.reshape(N, Ctot, H, W)


def inception_reference(x, params):
    """Pure-JAX reference mirroring the PyTorch forward (training-mode BN)."""
    (w1, w2a, b2a, w2b, w3a, b3a, w3b, w4, gamma, beta) = params

    def conv(inp, w, pad):
        return lax.conv_general_dilated(
            inp, w, (1, 1), [(pad, pad), (pad, pad)],
            dimension_numbers=("NCHW", "OIHW", "NCHW"))

    p1 = conv(x, w1, 0)
    h2 = jax.nn.relu(conv(x, w2a, 0) + b2a[None, :, None, None])
    p2 = conv(h2, w2b, 1)
    h3 = jax.nn.relu(conv(x, w3a, 0) + b3a[None, :, None, None])
    p3 = conv(h3, w3b, 2)
    xp = lax.reduce_window(x, -jnp.inf, lax.max, (1, 1, 3, 3), (1, 1, 1, 1),
                           [(0, 0), (0, 0), (1, 1), (1, 1)])
    p4 = conv(xp, w4, 0)
    cat = jnp.concatenate([p1, p2, p3, p4], axis=1)
    mean = cat.mean(axis=(0, 2, 3), keepdims=True)
    var = cat.var(axis=(0, 2, 3), keepdims=True)  # biased, as torch BN training
    y = gamma[None, :, None, None] * (cat - mean) / jnp.sqrt(var + BN_EPS) \
        + beta[None, :, None, None]
    return jax.nn.relu(y)


if __name__ == "__main__":
    # Small Inception config: in=8, c1=8, c2=(8,16), c3=(4,8), c4=8 -> Ctot=40
    N, Cin, H, W = 2, 8, 16, 16
    c1, c2, c3, c4 = 8, (8, 16), (4, 8), 8
    Ctot = c1 + c2[1] + c3[1] + c4

    key = jax.random.PRNGKey(0)
    ks = jax.random.split(key, 9)
    f32 = jnp.float32
    w1 = 0.1 * jax.random.normal(ks[0], (c1, Cin, 1, 1), f32)
    w2a = 0.1 * jax.random.normal(ks[1], (c2[0], Cin, 1, 1), f32)
    b2a = 0.1 * jax.random.normal(ks[2], (c2[0],), f32)
    w2b = 0.1 * jax.random.normal(ks[3], (c2[1], c2[0], 3, 3), f32)
    w3a = 0.1 * jax.random.normal(ks[4], (c3[0], Cin, 1, 1), f32)
    b3a = 0.1 * jax.random.normal(ks[5], (c3[0],), f32)
    w3b = 0.1 * jax.random.normal(ks[6], (c3[1], c3[0], 5, 5), f32)
    w4 = 0.1 * jax.random.normal(ks[7], (c4, Cin, 1, 1), f32)
    gamma = jnp.ones((Ctot,), f32)   # torch BatchNorm2d default weight
    beta = jnp.zeros((Ctot,), f32)   # torch BatchNorm2d default bias
    params = (w1, w2a, b2a, w2b, w3a, b3a, w3b, w4, gamma, beta)

    x = jax.random.normal(ks[8], (N, Cin, H, W), f32)

    out = inception_forward(x, params)
    out = jax.block_until_ready(out)
    assert out.shape == (N, Ctot, H, W), out.shape

    ref = jax.block_until_ready(inception_reference(x, params))
    # bf16 MXU inputs + bf16 cat slab (f32 accumulation / stats) -> relaxed tol.
    assert jnp.allclose(out, ref, atol=5e-2, rtol=5e-2), (
        float(jnp.max(jnp.abs(out - ref))))

    print("KERNEL_OK")
</pallas_src>

<mosaic_0001>
module attributes {stable_mosaic.version = 11 : i64} {
  func.func @inception_paths_kernel(%arg0: i32, %arg1: memref<1x8x256xf32, #tpu.memory_space<vmem>>, %arg2: memref<8x20xbf16, #tpu.memory_space<vmem>>, %arg3: memref<1x8xf32, #tpu.memory_space<vmem>>, %arg4: memref<1x4xf32, #tpu.memory_space<vmem>>, %arg5: memref<72x16xbf16, #tpu.memory_space<vmem>>, %arg6: memref<100x8xbf16, #tpu.memory_space<vmem>>, %arg7: memref<8x8xbf16, #tpu.memory_space<vmem>>, %arg8: memref<1x256x128xbf16, #tpu.memory_space<vmem>>, %arg9: memref<1x2x128xf32, #tpu.memory_space<vmem>>, %arg10: memref<16x24x72xf32, #tpu.memory_space<vmem>>, %arg11: memref<16x24x100xf32, #tpu.memory_space<vmem>>) attributes {dimension_semantics = [#tpu.dimension_semantics<parallel>], iteration_bounds = array<i64: 2>, scalar_prefetch = 0 : i64, scratch_operands = 2 : i64, tpu.core_type = #tpu.core_type<tc>, window_params = [{transform_indices = @transform_0, window_bounds = array<i64: 1, 8, 256>}, {pipeline_mode = #tpu.pipeline_mode<synchronous>, transform_indices = @transform_1, window_bounds = array<i64: 8, 20>}, {pipeline_mode = #tpu.pipeline_mode<synchronous>, transform_indices = @transform_2, window_bounds = array<i64: 1, 8>}, {pipeline_mode = #tpu.pipeline_mode<synchronous>, transform_indices = @transform_3, window_bounds = array<i64: 1, 4>}, {pipeline_mode = #tpu.pipeline_mode<synchronous>, transform_indices = @transform_4, window_bounds = array<i64: 72, 16>}, {pipeline_mode = #tpu.pipeline_mode<synchronous>, transform_indices = @transform_5, window_bounds = array<i64: 100, 8>}, {pipeline_mode = #tpu.pipeline_mode<synchronous>, transform_indices = @transform_6, window_bounds = array<i64: 8, 8>}, {transform_indices = @transform_7, window_bounds = array<i64: 1, 256, 128>}, {transform_indices = @transform_8, window_bounds = array<i64: 1, 2, 128>}]} {
    %c0 = arith.constant 0 : index
    %c0_0 = arith.constant 0 : index
    %c0_1 = arith.constant 0 : index
    %0 = vector.load %arg1[%c0, %c0_0, %c0_1] : memref<1x8x256xf32, #tpu.memory_space<vmem>>, vector<1x8x256xf32>
    %1 = vector.shape_cast %0 : vector<1x8x256xf32> to vector<8x256xf32>
    %2 = tpu.transpose %1, [1, 0] : vector<8x256xf32> -> vector<256x8xf32>
    %3 = arith.truncf %2 : vector<256x8xf32> to vector<256x8xbf16>
    %c0_2 = arith.constant 0 : index
    %c0_3 = arith.constant 0 : index
    %4 = vector.load %arg2[%c0_2, %c0_3] : memref<8x20xbf16, #tpu.memory_space<vmem>>, vector<8x20xbf16>
    %cst = arith.constant dense<0.000000e+00> : vector<256x20xf32>
    %5 = tpu.matmul %3, %4, %cst {dimension_numbers = #tpu.dot_dimension_numbers<[1], [0], [0], [1], [0, 0, 1, 1], [], []>} : vector<256x8xbf16>, vector<8x20xbf16>, vector<256x20xf32> -> vector<256x20xf32>
    %6 = vector.extract_strided_slice %5 {offsets = [0, 0], sizes = [256, 8], strides = [1, 1]} : vector<256x20xf32> to vector<256x8xf32>
    %7 = vector.extract_strided_slice %5 {offsets = [0, 8], sizes = [256, 8], strides = [1, 1]} : vector<256x20xf32> to vector<256x8xf32>
    %c0_4 = arith.constant 0 : index
    %c0_5 = arith.constant 0 : index
    %8 = vector.load %arg3[%c0_4, %c0_5] : memref<1x8xf32, #tpu.memory_space<vmem>>, vector<1x8xf32>
    %9 = vector.broadcast %8 : vector<1x8xf32> to vector<256x8xf32>
    %10 = arith.addf %7, %9 : vector<256x8xf32>
    %cst_6 = arith.constant 0.000000e+00 : f32
    %11 = vector.broadcast %cst_6 : f32 to vector<256x8xf32>
    %12 = arith.maximumf %10, %11 : vector<256x8xf32>
    %13 = vector.extract_strided_slice %5 {offsets = [0, 16], sizes = [256, 4], strides = [1, 1]} : vector<256x20xf32> to vector<256x4xf32>
    %c0_7 = arith.constant 0 : index
    %c0_8 = arith.constant 0 : index
    %14 = vector.load %arg4[%c0_7, %c0_8] : memref<1x4xf32, #tpu.memory_space<vmem>>, vector<1x4xf32>
    %15 = vector.broadcast %14 : vector<1x4xf32> to vector<256x4xf32>
    %16 = arith.addf %13, %15 : vector<256x4xf32>
    %cst_9 = arith.constant 0.000000e+00 : f32
    %17 = vector.broadcast %cst_9 : f32 to vector<256x4xf32>
    %18 = arith.maximumf %16, %17 : vector<256x4xf32>
    %19 = vector.shape_cast %12 : vector<256x8xf32> to vector<16x16x8xf32>
    %cst_10 = arith.constant 0.000000e+00 : f32
    %20 = vector.broadcast %cst_10 : f32 to vector<16x1x72xf32>
    %cst_11 = arith.constant 0.000000e+00 : f32
    %21 = vector.broadcast %cst_11 : f32 to vector<1x24x72xf32>
    %c0_12 = arith.constant 0 : index
    %c1 = arith.constant 1 : index
    %c0_13 = arith.constant 0 : index
    %22 = vector.load %arg10[%c0_12, %c1, %c0_13] : memref<16x24x72xf32, #tpu.memory_space<vmem>>, vector<16x1x72xf32>
    tpu.vector_store %arg10[%c0_12, %c1, %c0_13], %20 {strides = array<i32>} : memref<16x24x72xf32, #tpu.memory_space<vmem>>, vector<16x1x72xf32>,
    %c0_14 = arith.constant 0 : index
    %c16 = arith.constant 16 : index
    %c0_15 = arith.constant 0 : index
    %23 = vector.load %arg10[%c0_14, %c16, %c0_15] : memref<16x24x72xf32, #tpu.memory_space<vmem>>, vector<16x1x72xf32>
    tpu.vector_store %arg10[%c0_14, %c16, %c0_15], %20 {strides = array<i32>} : memref<16x24x72xf32, #tpu.memory_space<vmem>>, vector<16x1x72xf32>,
    %c0_16 = arith.constant 0 : index
    %c0_17 = arith.constant 0 : index
    %c0_18 = arith.constant 0 : index
    %24 = vector.load %arg10[%c0_16, %c0_17, %c0_18] : memref<16x24x72xf32, #tpu.memory_space<vmem>>, vector<1x24x72xf32>
    tpu.vector_store %arg10[%c0_16, %c0_17, %c0_18], %21 {strides = array<i32>} : memref<16x24x72xf32, #tpu.memory_space<vmem>>, vector<1x24x72xf32>,
    %c15 = arith.constant 15 : index
    %c0_19 = arith.constant 0 : index
    %c0_20 = arith.constant 0 : index
    %25 = vector.load %arg10[%c15, %c0_19, %c0_20] : memref<16x24x72xf32, #tpu.memory_space<vmem>>, vector<1x24x72xf32>
    tpu.vector_store %arg10[%c15, %c0_19, %c0_20], %21 {strides = array<i32>} : memref<16x24x72xf32, #tpu.memory_space<vmem>>, vector<1x24x72xf32>,
    %26 = vector.extract_strided_slice %19 {offsets = [0, 0, 0], sizes = [15, 16, 8], strides = [1, 1, 1]} : vector<16x16x8xf32> to vector<15x16x8xf32>
    %c1_21 = arith.constant 1 : index
    %c2 = arith.constant 2 : index
    %c0_22 = arith.constant 0 : index
    %27 = vector.load %arg10[%c1_21, %c2, %c0_22] : memref<16x24x72xf32, #tpu.memory_space<vmem>>, vector<15x16x8xf32>
    tpu.vector_store %arg10[%c1_21, %c2, %c0_22], %26 {strides = array<i32>} : memref<16x24x72xf32, #tpu.memory_space<vmem>>, vector<15x16x8xf32>,
    %c1_23 = arith.constant 1 : index
    %c1_24 = arith.constant 1 : index
    %c8 = arith.constant 8 : index
    %28 = vector.load %arg10[%c1_23, %c1_24, %c8] : memref<16x24x72xf32, #tpu.memory_space<vmem>>, vector<15x16x8xf32>
    tpu.vector_store %arg10[%c1_23, %c1_24, %c8], %26 {strides = array<i32>} : memref<16x24x72xf32, #tpu.memory_space<vmem>>, vector<15x16x8xf32>,
    %c1_25 = arith.constant 1 : index
    %c0_26 = arith.constant 0 : index
    %c16_27 = arith.constant 16 : index
    %29 = vector.load %arg10[%c1_25, %c0_26, %c16_27] : memref<16x24x72xf32, #tpu.memory_space<vmem>>, vector<15x16x8xf32>
    tpu.vector_store %arg10[%c1_25, %c0_26, %c16_27], %26 {strides = array<i32>} : memref<16x24x72xf32, #tpu.memory_space<vmem>>, vector<15x16x8xf32>,
    %c0_28 = arith.constant 0 : index
    %c2_29 = arith.constant 2 : index
    %c24 = arith.constant 24 : index
    %30 = vector.load %arg10[%c0_28, %c2_29, %c24] : memref<16x24x72xf32, #tpu.memory_space<vmem>>, vector<16x16x8xf32>
    tpu.vector_store %arg10[%c0_28, %c2_29, %c24], %19 {strides = array<i32>} : memref<16x24x72xf32, #tpu.memory_space<vmem>>, vector<16x16x8xf32>,
    %c0_30 = arith.constant 0 : index
    %c1_31 = arith.constant 1 : index
    %c32 = arith.constant 32 : index
    %31 = vector.load %arg10[%c0_30, %c1_31, %c32] : memref<16x24x72xf32, #tpu.memory_space<vmem>>, vector<16x16x8xf32>
    tpu.vector_store %arg10[%c0_30, %c1_31, %c32], %19 {strides = array<i32>} : memref<16x24x72xf32, #tpu.memory_space<vmem>>, vector<16x16x8xf32>,
    %c0_32 = arith.constant 0 : index
    %c0_33 = arith.constant 0 : index
    %c40 = arith.constant 40 : index
    %32 = vector.load %arg10[%c0_32, %c0_33, %c40] : memref<16x24x72xf32, #tpu.memory_space<vmem>>, vector<16x16x8xf32>
    tpu.vector_store %arg10[%c0_32, %c0_33, %c40], %19 {strides = array<i32>} : memref<16x24x72xf32, #tpu.memory_space<vmem>>, vector<16x16x8xf32>,
    %33 = vector.extract_strided_slice %19 {offsets = [1, 0, 0], sizes = [15, 16, 8], strides = [1, 1, 1]} : vector<16x16x8xf32> to vector<15x16x8xf32>
    %c0_34 = arith.constant 0 : index
    %c2_35 = arith.constant 2 : index
    %c48 = arith.constant 48 : index
    %34 = vector.load %arg10[%c0_34, %c2_35, %c48] : memref<16x24x72xf32, #tpu.memory_space<vmem>>, vector<15x16x8xf32>
    tpu.vector_store %arg10[%c0_34, %c2_35, %c48], %33 {strides = array<i32>} : memref<16x24x72xf32, #tpu.memory_space<vmem>>, vector<15x16x8xf32>,
    %c0_36 = arith.constant 0 : index
    %c1_37 = arith.constant 1 : index
    %c56 = arith.constant 56 : index
    %35 = vector.load %arg10[%c0_36, %c1_37, %c56] : memref<16x24x72xf32, #tpu.memory_space<vmem>>, vector<15x16x8xf32>
    tpu.vector_store %arg10[%c0_36, %c1_37, %c56], %33 {strides = array<i32>} : memref<16x24x72xf32, #tpu.memory_space<vmem>>, vector<15x16x8xf32>,
    %c0_38 = arith.constant 0 : index
    %c0_39 = arith.constant 0 : index
    %c64 = arith.constant 64 : index
    %36 = vector.load %arg10[%c0_38, %c0_39, %c64] : memref<16x24x72xf32, #tpu.memory_space<vmem>>, vector<15x16x8xf32>
    tpu.vector_store %arg10[%c0_38, %c0_39, %c64], %33 {strides = array<i32>} : memref<16x24x72xf32, #tpu.memory_space<vmem>>, vector<15x16x8xf32>,
    %c0_40 = arith.constant 0 : index
    %c0_41 = arith.constant 0 : index
    %c0_42 = arith.constant 0 : index
    %37 = vector.load %arg10[%c0_40, %c0_41, %c0_42] : memref<16x24x72xf32, #tpu.memory_space<vmem>>, vector<16x24x72xf32>
    %38 = vector.shape_cast %37 : vector<16x24x72xf32> to vector<384x72xf32>
    %39 = arith.truncf %38 : vector<384x72xf32> to vector<384x72xbf16>
    %c0_43 = arith.constant 0 : index
    %c0_44 = arith.constant 0 : index
    %40 = vector.load %arg5[%c0_43, %c0_44] : memref<72x16xbf16, #tpu.memory_space<vmem>>, vector<72x16xbf16>
    %cst_45 = arith.constant dense<0.000000e+00> : vector<384x16xf32>
    %41 = tpu.matmul %39, %40, %cst_45 {dimension_numbers = #tpu.dot_dimension_numbers<[1], [0], [0], [1], [0, 0, 1, 1], [], []>} : vector<384x72xbf16>, vector<72x16xbf16>, vector<384x16xf32> -> vector<384x16xf32>
    %42 = vector.shape_cast %41 : vector<384x16xf32> to vector<16x24x16xf32>
    %43 = vector.extract_strided_slice %42 {offsets = [0, 1, 0], sizes = [16, 16, 16], strides = [1, 1, 1]} : vector<16x24x16xf32> to vector<16x16x16xf32>
    %44 = vector.shape_cast %43 : vector<16x16x16xf32> to vector<256x16xf32>
    %45 = vector.shape_cast %18 : vector<256x4xf32> to vector<16x16x4xf32>
    %cst_46 = arith.constant 0.000000e+00 : f32
    %46 = vector.broadcast %cst_46 : f32 to vector<16x2x100xf32>
    %cst_47 = arith.constant 0.000000e+00 : f32
    %47 = vector.broadcast %cst_47 : f32 to vector<2x24x100xf32>
    %c0_48 = arith.constant 0 : index
    %c2_49 = arith.constant 2 : index
    %c0_50 = arith.constant 0 : index
    %48 = vector.load %arg11[%c0_48, %c2_49, %c0_50] : memref<16x24x100xf32, #tpu.memory_space<vmem>>, vector<16x2x100xf32>
    tpu.vector_store %arg11[%c0_48, %c2_49, %c0_50], %46 {strides = array<i32>} : memref<16x24x100xf32, #tpu.memory_space<vmem>>, vector<16x2x100xf32>,
    %c0_51 = arith.constant 0 : index
    %c16_52 = arith.constant 16 : index
    %c0_53 = arith.constant 0 : index
    %49 = vector.load %arg11[%c0_51, %c16_52, %c0_53] : memref<16x24x100xf32, #tpu.memory_space<vmem>>, vector<16x2x100xf32>
    tpu.vector_store %arg11[%c0_51, %c16_52, %c0_53], %46 {strides = array<i32>} : memref<16x24x100xf32, #tpu.memory_space<vmem>>, vector<16x2x100xf32>,
    %c0_54 = arith.constant 0 : index
    %c0_55 = arith.constant 0 : index
    %c0_56 = arith.constant 0 : index
    %50 = vector.load %arg11[%c0_54, %c0_55, %c0_56] : memref<16x24x100xf32, #tpu.memory_space<vmem>>, vector<2x24x100xf32>
    tpu.vector_store %arg11[%c0_54, %c0_55, %c0_56], %47 {strides = array<i32>} : memref<16x24x100xf32, #tpu.memory_space<vmem>>, vector<2x24x100xf32>,
    %c14 = arith.constant 14 : index
    %c0_57 = arith.constant 0 : index
    %c0_58 = arith.constant 0 : index
    %51 = vector.load %arg11[%c14, %c0_57, %c0_58] : memref<16x24x100xf32, #tpu.memory_space<vmem>>, vector<2x24x100xf32>
    tpu.vector_store %arg11[%c14, %c0_57, %c0_58], %47 {strides = array<i32>} : memref<16x24x100xf32, #tpu.memory_space<vmem>>, vector<2x24x100xf32>,
    %52 = vector.extract_strided_slice %45 {offsets = [0, 0, 0], sizes = [14, 16, 4], strides = [1, 1, 1]} : vector<16x16x4xf32> to vector<14x16x4xf32>
    %c2_59 = arith.constant 2 : index
    %c4 = arith.constant 4 : index
    %c0_60 = arith.constant 0 : index
    %53 = vector.load %arg11[%c2_59, %c4, %c0_60] : memref<16x24x100xf32, #tpu.memory_space<vmem>>, vector<14x16x4xf32>
    tpu.vector_store %arg11[%c2_59, %c4, %c0_60], %52 {strides = array<i32>} : memref<16x24x100xf32, #tpu.memory_space<vmem>>, vector<14x16x4xf32>,
    %c2_61 = arith.constant 2 : index
    %c3 = arith.constant 3 : index
    %c4_62 = arith.constant 4 : index
    %54 = vector.load %arg11[%c2_61, %c3, %c4_62] : memref<16x24x100xf32, #tpu.memory_space<vmem>>, vector<14x16x4xf32>
    tpu.vector_store %arg11[%c2_61, %c3, %c4_62], %52 {strides = array<i32>} : memref<16x24x100xf32, #tpu.memory_space<vmem>>, vector<14x16x4xf32>,
    %c2_63 = arith.constant 2 : index
    %c2_64 = arith.constant 2 : index
    %c8_65 = arith.constant 8 : index
    %55 = vector.load %arg11[%c2_63, %c2_64, %c8_65] : memref<16x24x100xf32, #tpu.memory_space<vmem>>, vector<14x16x4xf32>
    tpu.vector_store %arg11[%c2_63, %c2_64, %c8_65], %52 {strides = array<i32>} : memref<16x24x100xf32, #tpu.memory_space<vmem>>, vector<14x16x4xf32>,
    %c2_66 = arith.constant 2 : index
    %c1_67 = arith.constant 1 : index
    %c12 = arith.constant 12 : index
    %56 = vector.load %arg11[%c2_66, %c1_67, %c12] : memref<16x24x100xf32, #tpu.memory_space<vmem>>, vector<14x16x4xf32>
    tpu.vector_store %arg11[%c2_66, %c1_67, %c12], %52 {strides = array<i32>} : memref<16x24x100xf32, #tpu.memory_space<vmem>>, vector<14x16x4xf32>,
    %c2_68 = arith.constant 2 : index
    %c0_69 = arith.constant 0 : index
    %c16_70 = arith.constant 16 : index
    %57 = vector.load %arg11[%c2_68, %c0_69, %c16_70] : memref<16x24x100xf32, #tpu.memory_space<vmem>>, vector<14x16x4xf32>
    tpu.vector_store %arg11[%c2_68, %c0_69, %c16_70], %52 {strides = array<i32>} : memref<16x24x100xf32, #tpu.memory_space<vmem>>, vector<14x16x4xf32>,
    %58 = vector.extract_strided_slice %45 {offsets = [0, 0, 0], sizes = [15, 16, 4], strides = [1, 1, 1]} : vector<16x16x4xf32> to vector<15x16x4xf32>
    %c1_71 = arith.constant 1 : index
    %c4_72 = arith.constant 4 : index
    %c20 = arith.constant 20 : index
    %59 = vector.load %arg11[%c1_71, %c4_72, %c20] : memref<16x24x100xf32, #tpu.memory_space<vmem>>, vector<15x16x4xf32>
    tpu.vector_store %arg11[%c1_71, %c4_72, %c20], %58 {strides = array<i32>} : memref<16x24x100xf32, #tpu.memory_space<vmem>>, vector<15x16x4xf32>,
    %c1_73 = arith.constant 1 : index
    %c3_74 = arith.constant 3 : index
    %c24_75 = arith.constant 24 : index
    %60 = vector.load %arg11[%c1_73, %c3_74, %c24_75] : memref<16x24x100xf32, #tpu.memory_space<vmem>>, vector<15x16x4xf32>
    tpu.vector_store %arg11[%c1_73, %c3_74, %c24_75], %58 {strides = array<i32>} : memref<16x24x100xf32, #tpu.memory_space<vmem>>, vector<15x16x4xf32>,
    %c1_76 = arith.constant 1 : index
    %c2_77 = arith.constant 2 : index
    %c28 = arith.constant 28 : index
    %61 = vector.load %arg11[%c1_76, %c2_77, %c28] : memref<16x24x100xf32, #tpu.memory_space<vmem>>, vector<15x16x4xf32>
    tpu.vector_store %arg11[%c1_76, %c2_77, %c28], %58 {strides = array<i32>} : memref<16x24x100xf32, #tpu.memory_space<vmem>>, vector<15x16x4xf32>,
    %c1_78 = arith.constant 1 : index
    %c1_79 = arith.constant 1 : index
    %c32_80 = arith.constant 32 : index
    %62 = vector.load %arg11[%c1_78, %c1_79, %c32_80] : memref<16x24x100xf32, #tpu.memory_space<vmem>>, vector<15x16x4xf32>
    tpu.vector_store %arg11[%c1_78, %c1_79, %c32_80], %58 {strides = array<i32>} : memref<16x24x100xf32, #tpu.memory_space<vmem>>, vector<15x16x4xf32>,
    %c1_81 = arith.constant 1 : index
    %c0_82 = arith.constant 0 : index
    %c36 = arith.constant 36 : index
    %63 = vector.load %arg11[%c1_81, %c0_82, %c36] : memref<16x24x100xf32, #tpu.memory_space<vmem>>, vector<15x16x4xf32>
    tpu.vector_store %arg11[%c1_81, %c0_82, %c36], %58 {strides = array<i32>} : memref<16x24x100xf32, #tpu.memory_space<vmem>>, vector<15x16x4xf32>,
    %c0_83 = arith.constant 0 : index
    %c4_84 = arith.constant 4 : index
    %c40_85 = arith.constant 40 : index
    %64 = vector.load %arg11[%c0_83, %c4_84, %c40_85] : memref<16x24x100xf32, #tpu.memory_space<vmem>>, vector<16x16x4xf32>
    tpu.vector_store %arg11[%c0_83, %c4_84, %c40_85], %45 {strides = array<i32>} : memref<16x24x100xf32, #tpu.memory_space<vmem>>, vector<16x16x4xf32>,
    %c0_86 = arith.constant 0 : index
    %c3_87 = arith.constant 3 : index
    %c44 = arith.constant 44 : index
    %65 = vector.load %arg11[%c0_86, %c3_87, %c44] : memref<16x24x100xf32, #tpu.memory_space<vmem>>, vector<16x16x4xf32>
    tpu.vector_store %arg11[%c0_86, %c3_87, %c44], %45 {strides = array<i32>} : memref<16x24x100xf32, #tpu.memory_space<vmem>>, vector<16x16x4xf32>,
    %c0_88 = arith.constant 0 : index
    %c2_89 = arith.constant 2 : index
    %c48_90 = arith.constant 48 : index
    %66 = vector.load %arg11[%c0_88, %c2_89, %c48_90] : memref<16x24x100xf32, #tpu.memory_space<vmem>>, vector<16x16x4xf32>
    tpu.vector_store %arg11[%c0_88, %c2_89, %c48_90], %45 {strides = array<i32>} : memref<16x24x100xf32, #tpu.memory_space<vmem>>, vector<16x16x4xf32>,
    %c0_91 = arith.constant 0 : index
    %c1_92 = arith.constant 1 : index
    %c52 = arith.constant 52 : index
    %67 = vector.load %arg11[%c0_91, %c1_92, %c52] : memref<16x24x100xf32, #tpu.memory_space<vmem>>, vector<16x16x4xf32>
    tpu.vector_store %arg11[%c0_91, %c1_92, %c52], %45 {strides = array<i32>} : memref<16x24x100xf32, #tpu.memory_space<vmem>>, vector<16x16x4xf32>,
    %c0_93 = arith.constant 0 : index
    %c0_94 = arith.constant 0 : index
    %c56_95 = arith.constant 56 : index
    %68 = vector.load %arg11[%c0_93, %c0_94, %c56_95] : memref<16x24x100xf32, #tpu.memory_space<vmem>>, vector<16x16x4xf32>
    tpu.vector_store %arg11[%c0_93, %c0_94, %c56_95], %45 {strides = array<i32>} : memref<16x24x100xf32, #tpu.memory_space<vmem>>, vector<16x16x4xf32>,
    %69 = vector.extract_strided_slice %45 {offsets = [1, 0, 0], sizes = [15, 16, 4], strides = [1, 1, 1]} : vector<16x16x4xf32> to vector<15x16x4xf32>
    %c0_96 = arith.constant 0 : index
    %c4_97 = arith.constant 4 : index
    %c60 = arith.constant 60 : index
    %70 = vector.load %arg11[%c0_96, %c4_97, %c60] : memref<16x24x100xf32, #tpu.memory_space<vmem>>, vector<15x16x4xf32>
    tpu.vector_store %arg11[%c0_96, %c4_97, %c60], %69 {strides = array<i32>} : memref<16x24x100xf32, #tpu.memory_space<vmem>>, vector<15x16x4xf32>,
    %c0_98 = arith.constant 0 : index
    %c3_99 = arith.constant 3 : index
    %c64_100 = arith.constant 64 : index
    %71 = vector.load %arg11[%c0_98, %c3_99, %c64_100] : memref<16x24x100xf32, #tpu.memory_space<vmem>>, vector<15x16x4xf32>
    tpu.vector_store %arg11[%c0_98, %c3_99, %c64_100], %69 {strides = array<i32>} : memref<16x24x100xf32, #tpu.memory_space<vmem>>, vector<15x16x4xf32>,
    %c0_101 = arith.constant 0 : index
    %c2_102 = arith.constant 2 : index
    %c68 = arith.constant 68 : index
    %72 = vector.load %arg11[%c0_101, %c2_102, %c68] : memref<16x24x100xf32, #tpu.memory_space<vmem>>, vector<15x16x4xf32>
    tpu.vector_store %arg11[%c0_101, %c2_102, %c68], %69 {strides = array<i32>} : memref<16x24x100xf32, #tpu.memory_space<vmem>>, vector<15x16x4xf32>,
    %c0_103 = arith.constant 0 : index
    %c1_104 = arith.constant 1 : index
    %c72 = arith.constant 72 : index
    %73 = vector.load %arg11[%c0_103, %c1_104, %c72] : memref<16x24x100xf32, #tpu.memory_space<vmem>>, vector<15x16x4xf32>
    tpu.vector_store %arg11[%c0_103, %c1_104, %c72], %69 {strides = array<i32>} : memref<16x24x100xf32, #tpu.memory_space<vmem>>, vector<15x16x4xf32>,
    %c0_105 = arith.constant 0 : index
    %c0_106 = arith.constant 0 : index
    %c76 = arith.constant 76 : index
    %74 = vector.load %arg11[%c0_105, %c0_106, %c76] : memref<16x24x100xf32, #tpu.memory_space<vmem>>, vector<15x16x4xf32>
    tpu.vector_store %arg11[%c0_105, %c0_106, %c76], %69 {strides = array<i32>} : memref<16x24x100xf32, #tpu.memory_space<vmem>>, vector<15x16x4xf32>,
    %75 = vector.extract_strided_slice %45 {offsets = [2, 0, 0], sizes = [14, 16, 4], strides = [1, 1, 1]} : vector<16x16x4xf32> to vector<14x16x4xf32>
    %c0_107 = arith.constant 0 : index
    %c4_108 = arith.constant 4 : index
    %c80 = arith.constant 80 : index
    %76 = vector.load %arg11[%c0_107, %c4_108, %c80] : memref<16x24x100xf32, #tpu.memory_space<vmem>>, vector<14x16x4xf32>
    tpu.vector_store %arg11[%c0_107, %c4_108, %c80], %75 {strides = array<i32>} : memref<16x24x100xf32, #tpu.memory_space<vmem>>, vector<14x16x4xf32>,
    %c0_109 = arith.constant 0 : index
    %c3_110 = arith.constant 3 : index
    %c84 = arith.constant 84 : index
    %77 = vector.load %arg11[%c0_109, %c3_110, %c84] : memref<16x24x100xf32, #tpu.memory_space<vmem>>, vector<14x16x4xf32>
    tpu.vector_store %arg11[%c0_109, %c3_110, %c84], %75 {strides = array<i32>} : memref<16x24x100xf32, #tpu.memory_space<vmem>>, vector<14x16x4xf32>,
    %c0_111 = arith.constant 0 : index
    %c2_112 = arith.constant 2 : index
    %c88 = arith.constant 88 : index
    %78 = vector.load %arg11[%c0_111, %c2_112, %c88] : memref<16x24x100xf32, #tpu.memory_space<vmem>>, vector<14x16x4xf32>
    tpu.vector_store %arg11[%c0_111, %c2_112, %c88], %75 {strides = array<i32>} : memref<16x24x100xf32, #tpu.memory_space<vmem>>, vector<14x16x4xf32>,
    %c0_113 = arith.constant 0 : index
    %c1_114 = arith.constant 1 : index
    %c92 = arith.constant 92 : index
    %79 = vector.load %arg11[%c0_113, %c1_114, %c92] : memref<16x24x100xf32, #tpu.memory_space<vmem>>, vector<14x16x4xf32>
    tpu.vector_store %arg11[%c0_113, %c1_114, %c92], %75 {strides = array<i32>} : memref<16x24x100xf32, #tpu.memory_space<vmem>>, vector<14x16x4xf32>,
    %c0_115 = arith.constant 0 : index
    %c0_116 = arith.constant 0 : index
    %c96 = arith.constant 96 : index
    %80 = vector.load %arg11[%c0_115, %c0_116, %c96] : memref<16x24x100xf32, #tpu.memory_space<vmem>>, vector<14x16x4xf32>
    tpu.vector_store %arg11[%c0_115, %c0_116, %c96], %75 {strides = array<i32>} : memref<16x24x100xf32, #tpu.memory_space<vmem>>, vector<14x16x4xf32>,
    %c0_117 = arith.constant 0 : index
    %c0_118 = arith.constant 0 : index
    %c0_119 = arith.constant 0 : index
    %81 = vector.load %arg11[%c0_117, %c0_118, %c0_119] : memref<16x24x100xf32, #tpu.memory_space<vmem>>, vector<16x24x100xf32>
    %82 = vector.shape_cast %81 : vector<16x24x100xf32> to vector<384x100xf32>
    %83 = arith.truncf %82 : vector<384x100xf32> to vector<384x100xbf16>
    %c0_120 = arith.constant 0 : index
    %c0_121 = arith.constant 0 : index
    %84 = vector.load %arg6[%c0_120, %c0_121] : memref<100x8xbf16, #tpu.memory_space<vmem>>, vector<100x8xbf16>
    %cst_122 = arith.constant dense<0.000000e+00> : vector<384x8xf32>
    %85 = tpu.matmul %83, %84, %cst_122 {dimension_numbers = #tpu.dot_dimension_numbers<[1], [0], [0], [1], [0, 0, 1, 1], [], []>} : vector<384x100xbf16>, vector<100x8xbf16>, vector<384x8xf32> -> vector<384x8xf32>
    %86 = vector.shape_cast %85 : vector<384x8xf32> to vector<16x24x8xf32>
    %87 = vector.extract_strided_slice %86 {offsets = [0, 2, 0], sizes = [16, 16, 8], strides = [1, 1, 1]} : vector<16x24x8xf32> to vector<16x16x8xf32>
    %88 = vector.shape_cast %87 : vector<16x16x8xf32> to vector<256x8xf32>
    %cst_123 = arith.constant 0xFF800000 : f32
    %89 = vector.broadcast %cst_123 : f32 to vector<1x8xf32>
    %cst_124 = arith.constant 0xFF800000 : f32
    %90 = vector.broadcast %cst_124 : f32 to vector<16x8xf32>
    %91 = tpu.iota {dimensions = array<i32: 0>} : vector<256x8xi32>
    %c16_i32 = arith.constant 16 : i32
    %c0_i32 = arith.constant 0 : i32
    %92 = arith.cmpi eq, %c16_i32, %c0_i32 : i32
    %c1_i32 = arith.constant 1 : i32
    %93 = arith.select %92, %c1_i32, %c16_i32 : i32
    %94 = vector.broadcast %93 : i32 to vector<256x8xi32>
    %95 = arith.remsi %91, %94 : vector<256x8xi32>
    %c0_i32_125 = arith.constant 0 : i32
    %96 = vector.broadcast %c0_i32_125 : i32 to vector<256x8xi32>
    %97 = arith.cmpi ne, %95, %96 : vector<256x8xi32>
    %c0_i32_126 = arith.constant 0 : i32
    %98 = vector.broadcast %c0_i32_126 : i32 to vector<256x8xi32>
    %99 = arith.cmpi slt, %95, %98 : vector<256x8xi32>
    %c0_i32_127 = arith.constant 0 : i32
    %100 = arith.cmpi slt, %93, %c0_i32_127 : i32
    %101 = vector.broadcast %100 : i1 to vector<256x8xi1>
    %102 = vector.broadcast %101 : vector<256x8xi1> to vector<256x8xi1>
    %103 = arith.xori %99, %102 : vector<256x8xi1>
    %104 = arith.andi %103, %97 : vector<256x8xi1>
    %105 = vector.broadcast %93 : i32 to vector<256x8xi32>
    %106 = arith.addi %95, %105 : vector<256x8xi32>
    %107 = arith.select %104, %106, %95 : vector<256x8xi1>, vector<256x8xi32>
    %c0_i32_128 = arith.constant 0 : i32
    %108 = vector.broadcast %c0_i32_128 : i32 to vector<256x8xi32>
    %109 = arith.cmpi sgt, %107, %108 : vector<256x8xi32>
    %110 = vector.extract_strided_slice %2 {offsets = [0, 0], sizes = [255, 8], strides = [1, 1]} : vector<256x8xf32> to vector<255x8xf32>
    %111 = tpu.concatenate %89, %110 in 0 : vector<1x8xf32>, vector<255x8xf32> -> vector<256x8xf32>
    %cst_129 = arith.constant 0xFF800000 : f32
    %112 = vector.broadcast %cst_129 : f32 to vector<256x8xf32>
    %113 = arith.select %109, %111, %112 : vector<256x8xi1>, vector<256x8xf32>
    %c15_i32 = arith.constant 15 : i32
    %114 = vector.broadcast %c15_i32 : i32 to vector<256x8xi32>
    %115 = arith.cmpi slt, %107, %114 : vector<256x8xi32>
    %116 = vector.extract_strided_slice %2 {offsets = [1, 0], sizes = [255, 8], strides = [1, 1]} : vector<256x8xf32> to vector<255x8xf32>
    %117 = tpu.concatenate %116, %89 in 0 : vector<255x8xf32>, vector<1x8xf32> -> vector<256x8xf32>
    %cst_130 = arith.constant 0xFF800000 : f32
    %118 = vector.broadcast %cst_130 : f32 to vector<256x8xf32>
    %119 = arith.select %115, %117, %118 : vector<256x8xi1>, vector<256x8xf32>
    %120 = arith.maximumf %113, %2 : vector<256x8xf32>
    %121 = arith.maximumf %120, %119 : vector<256x8xf32>
    %122 = vector.extract_strided_slice %121 {offsets = [0, 0], sizes = [240, 8], strides = [1, 1]} : vector<256x8xf32> to vector<240x8xf32>
    %123 = tpu.concatenate %90, %122 in 0 : vector<16x8xf32>, vector<240x8xf32> -> vector<256x8xf32>
    %124 = vector.extract_strided_slice %121 {offsets = [16, 0], sizes = [240, 8], strides = [1, 1]} : vector<256x8xf32> to vector<240x8xf32>
    %125 = tpu.concatenate %124, %90 in 0 : vector<240x8xf32>, vector<16x8xf32> -> vector<256x8xf32>
    %126 = arith.maximumf %123, %121 : vector<256x8xf32>
    %127 = arith.maximumf %126, %125 : vector<256x8xf32>
    %128 = arith.truncf %127 : vector<256x8xf32> to vector<256x8xbf16>
    %c0_131 = arith.constant 0 : index
    %c0_132 = arith.constant 0 : index
    %129 = vector.load %arg7[%c0_131, %c0_132] : memref<8x8xbf16, #tpu.memory_space<vmem>>, vector<8x8xbf16>
    %cst_133 = arith.constant dense<0.000000e+00> : vector<256x8xf32>
    %130 = tpu.matmul %128, %129, %cst_133 {dimension_numbers = #tpu.dot_dimension_numbers<[1], [0], [0], [1], [0, 0, 1, 1], [], []>} : vector<256x8xbf16>, vector<8x8xbf16>, vector<256x8xf32> -> vector<256x8xf32>
    %cst_134 = arith.constant 0.000000e+00 : f32
    %131 = vector.broadcast %cst_134 : f32 to vector<256x88xf32>
    %132 = tpu.concatenate %6, %44, %88, %130, %131 in 1 : vector<256x8xf32>, vector<256x16xf32>, vector<256x8xf32>, vector<256x8xf32>, vector<256x88xf32> -> vector<256x128xf32>
    %133 = arith.truncf %132 : vector<256x128xf32> to vector<256x128xbf16>
    %c0_135 = arith.constant 0 : index
    %c0_136 = arith.constant 0 : index
    %c0_137 = arith.constant 0 : index
    %134 = vector.load %arg8[%c0_135, %c0_136, %c0_137] : memref<1x256x128xbf16, #tpu.memory_space<vmem>>, vector<1x256x128xbf16>
    %135 = vector.shape_cast %134 : vector<1x256x128xbf16> to vector<256x128xbf16>
    %136 = vector.shape_cast %133 : vector<256x128xbf16> to vector<1x256x128xbf16>
    tpu.vector_store %arg8[%c0_135, %c0_136, %c0_137], %136 {strides = array<i32>} : memref<1x256x128xbf16, #tpu.memory_space<vmem>>, vector<1x256x128xbf16>,
    %cst_138 = arith.constant dense<0.000000e+00> : vector<128xf32>
    %137 = vector.multi_reduction <add>, %132, %cst_138 [0] : vector<256x128xf32> to vector<128xf32>
    %138 = vector.shape_cast %137 : vector<128xf32> to vector<1x128xf32>
    %139 = arith.mulf %132, %132 : vector<256x128xf32>
    %cst_139 = arith.constant dense<0.000000e+00> : vector<128xf32>
    %140 = vector.multi_reduction <add>, %139, %cst_139 [0] : vector<256x128xf32> to vector<128xf32>
    %141 = vector.shape_cast %140 : vector<128xf32> to vector<1x128xf32>
    %142 = tpu.concatenate %138, %141 in 0 : vector<1x128xf32>, vector<1x128xf32> -> vector<2x128xf32>
    %c0_140 = arith.constant 0 : index
    %c0_141 = arith.constant 0 : index
    %c0_142 = arith.constant 0 : index
    %143 = vector.load %arg9[%c0_140, %c0_141, %c0_142] : memref<1x2x128xf32, #tpu.memory_space<vmem>>, vector<1x2x128xf32>
    %144 = vector.shape_cast %143 : vector<1x2x128xf32> to vector<2x128xf32>
    %145 = vector.shape_cast %142 : vector<2x128xf32> to vector<1x2x128xf32>
    tpu.vector_store %arg9[%c0_140, %c0_141, %c0_142], %145 {strides = array<i32>} : memref<1x2x128xf32, #tpu.memory_space<vmem>>, vector<1x2x128xf32>,
    return
  }
  func.func @transform_0(%arg0: i32) -> (i32, i32, i32) {
    %c0_i32 = arith.constant 0 : i32
    %c0_i32_0 = arith.constant 0 : i32
    %c0_i32_1 = arith.constant 0 : i32
    return %arg0, %c0_i32, %c0_i32_0 : i32, i32, i32
  }
  func.func @transform_1(%arg0: i32) -> (i32, i32) {
    %c0_i32 = arith.constant 0 : i32
    %c0_i32_0 = arith.constant 0 : i32
    %c0_i32_1 = arith.constant 0 : i32
    return %c0_i32, %c0_i32_0 : i32, i32
  }
  func.func @transform_2(%arg0: i32) -> (i32, i32) {
    %c0_i32 = arith.constant 0 : i32
    %c0_i32_0 = arith.constant 0 : i32
    %c0_i32_1 = arith.constant 0 : i32
    return %c0_i32, %c0_i32_0 : i32, i32
  }
  func.func @transform_3(%arg0: i32) -> (i32, i32) {
    %c0_i32 = arith.constant 0 : i32
    %c0_i32_0 = arith.constant 0 : i32
    %c0_i32_1 = arith.constant 0 : i32
    return %c0_i32, %c0_i32_0 : i32, i32
  }
  func.func @transform_4(%arg0: i32) -> (i32, i32) {
    %c0_i32 = arith.constant 0 : i32
    %c0_i32_0 = arith.constant 0 : i32
    %c0_i32_1 = arith.constant 0 : i32
    return %c0_i32, %c0_i32_0 : i32, i32
  }
  func.func @transform_5(%arg0: i32) -> (i32, i32) {
    %c0_i32 = arith.constant 0 : i32
    %c0_i32_0 = arith.constant 0 : i32
    %c0_i32_1 = arith.constant 0 : i32
    return %c0_i32, %c0_i32_0 : i32, i32
  }
  func.func @transform_6(%arg0: i32) -> (i32, i32) {
    %c0_i32 = arith.constant 0 : i32
    %c0_i32_0 = arith.constant 0 : i32
    %c0_i32_1 = arith.constant 0 : i32
    return %c0_i32, %c0_i32_0 : i32, i32
  }
  func.func @transform_7(%arg0: i32) -> (i32, i32, i32) {
    %c0_i32 = arith.constant 0 : i32
    %c0_i32_0 = arith.constant 0 : i32
    %c0_i32_1 = arith.constant 0 : i32
    return %arg0, %c0_i32, %c0_i32_0 : i32, i32, i32
  }
  func.func @transform_8(%arg0: i32) -> (i32, i32, i32) {
    %c0_i32 = arith.constant 0 : i32
    %c0_i32_0 = arith.constant 0 : i32
    %c0_i32_1 = arith.constant 0 : i32
    return %arg0, %c0_i32, %c0_i32_0 : i32, i32, i32
  }
}

</mosaic_0001>

<bundles_post_ra>
// kernel: tpu_custom_call.1
= control target key start
LH: loop header
LB: loop body
LE: loop exit
PB: predicated region body
PF: predicated region fallthrough
CT: control target
= control target key end

     0   :  { %14 = vsyncpa [#allocation5], 0  ;;  %s14514_s0 = inlined_call_operand.vmem [shape: f32[2,8,256], index: 0, kind: input, shape index: {}]   ;;  %s14515_s1 = inlined_call_operand.vmem [shape: bf16[8,20], index: 1, kind: input, shape index: {}]   ;;  %s14516_s2 = inlined_call_operand.vmem [shape: f32[1,8], index: 2, kind: input, shape index: {}]   ;;  %s14517_s3 = inlined_call_operand.vmem [shape: f32[1,4], index: 3, kind: input, shape index: {}]   ;;  %s14518_s4 = inlined_call_operand.vmem [shape: bf16[72,16], index: 4, kind: input, shape index: {}]   ;;  %s14519_s5 = inlined_call_operand.vmem [shape: bf16[100,8], index: 5, kind: input, shape index: {}]   ;;  %s14520_s6 = inlined_call_operand.vmem [shape: bf16[8,8], index: 6, kind: input, shape index: {}]   ;;  %s14521_s7 = inlined_call_operand.hbm [shape: bf16[2,256,128], index: 7, kind: output, shape index: {0}]   ;;  %s14522_s8 = inlined_call_operand.hbm [shape: f32[2,2,128], index: 8, kind: output, shape index: {1}]  }
   0x1   :  { %16 = vsyncpa [#allocation5 + $0x1], 0 }
   0x2   :  { %17 = vsyncpa [#allocation7], 0 }
   0x3   :  { %19 = vsyncpa [#allocation7 + $0x1], 0  ;;  %s8781_s27 = smov 0   ;;  %s8783_s28 = smov 0  }
   0x4   :  { %s8785_s29 = smov 0   ;;  %s8787_s30 = smov 0  }
   0x5 LB: > { %s8802_s9 = sadd.s32 4294967295, %s8707_s30   ;;  %s7894_s10 = sadd.s32 4294967294, %s8707_s30   ;;  %s8707_s30 = sphi %s8787_s30, %s15044_s30   ;;  %s8703_s29 = sphi %s8785_s29, %s15043_s29   ;;  %s8699_s28 = sphi %s8783_s28, %s15042_s28   ;;  %s8695_s27 = sphi %s8781_s27, %s15041_s27  }
   0x6   : > { %s8806_s11 = sadd.s32 1, %s8707_s30   ;;  %s184_s12 = sadd.s32 1, %s8703_s29 }
   0x7   : > { %s181_s13 = ssub.s32 %s8707_s30, %s8806_s11  ;;  %p194_p0 = scmp.ne.s32.totalorder %s8703_s29, %s8699_s28 }
   0x8   : > { %p182_p1 = scmp.eq.s32.totalorder %s181_s13, 0  ;;  %p195_p2 = scmp.eq.s32.totalorder %s8802_s9, 1 }
   0x9   : > { %p200_p3 = scmp.ne.s32.totalorder %s8699_s28, %s8695_s27  ;;  %p201_p4 = scmp.eq.s32.totalorder %s7894_s10, 1 }
   0xa   : > { %s8817_s14 = scalar_select %p182_p1, %s8703_s29, %s184_s12  }
   0xb   : > { %p8819_p5 = por %p195_p2, %p194_p0  ;;  %p8823_p6 = por %p201_p4, %p200_p3 }
   0xc   : > { %p7897_p7 = scmp.ge.s32.totalorder %s8707_s30, 1  ;;  %p271_p8 = scmp.lt.s32.totalorder %s8707_s30, 3 }
   0xe   : > { %p272_p9 = pnand %p7897_p7, %p271_p8 }
  0x10   : > { %275 = sbr.rel (%p272_p9) target bundleno = 2967 (0xb97), region = 48 }
  0x15   : > { %p310_p10 = scmp.lt.s32.totalorder %s8802_s9, 1  ;;  %v398_v3 = vld [vmem:[%s14515_s1] sm:$0xf]  ;;  %vm448_vm0 = vcmask 1043456   ;;  %s8709_s26 = smov 16   ;;  %v5928_v7 = vlaneseq  ;;  %vm6409_vm1 = vcmask 1040384  }
  0x16   : > { %8448 = vmatprep.subr.msk.bf16.mxu0 %vm448_vm0, %v398_v3  ;;  %v450_v4 = vsel %vm448_vm0, %v398_v3, 0  ;;  %v7919_v5 = vld [vmem:[%s14517_s3] ss:$0 sm:$0xff]  ;;  %s8710_s13 = smov 8   ;;  %vm399_vm3 = vcmask 64512   ;;  %vm2311_vm4 = vcmask 1046528  }
  0x17   : > { %s311_s17 = scalar_select %p310_p10, %s8802_s9, 1  ;;  %8259 = vmatpush3.bf16.msra.mxu0 %v450_v4  ;;  %692 = vrot.lane.b32.xlu1 %v7919_v5, %s8709_s26  ;;  %v7918_v6 = vld [vmem:[%s14516_s2] ss:$0 sm:$0xff]  ;;  %v8847_v8 = vshrl.u32 %v5928_v7, 7 }
  0x18   : > { %s8714_s19 = smov 32   ;;  %s8715_s20 = smov 40  }
  0x19   : > { %s8035_s18 = sshll.u32 %s311_s17, 4  ;;  %14643 = vst [vmem:[#allocation10_spill] sm:$0xff] %v8847_v8  ;;  %v8850_v9 = vadd.s32 32, %v8847_v8  ;;  %v8853_v10 = vadd.s32 16, %v8847_v8  ;;  %v8856_v11 = vadd.s32 136, %v8847_v8  ;;  %v8861_v14 = vadd.s32 144, %v8847_v8 }
  0x1a   : > { %s314_s21 = scalar_lea.vmem %s14514_s0, %s8035_s18  ;;  %v8864_v15 = vadd.s32 24, %v8847_v8  ;;  %v8867_v16 = vadd.s32 40, %v8847_v8  ;;  %v8871_v18 = vadd.s32 152, %v8847_v8  ;;  %v8874_v19 = vadd.s32 64, %v8847_v8  ;;  %s8712_s17 = smov 120  }
  0x1b   : > { %v316_v0 = vld [vmem:[%s314_s21] sm:$0xff]  ;;  %v317_v1 = vld [vmem:[%s314_s21 + $0x8] sm:$0xff]  ;;  %v5993_v12 = vand.u32 15, %v8850_v9  ;;  %v5979_v13 = vand.u32 15, %v8853_v10  ;;  %v6084_v17 = vand.u32 15, %v8856_v11  ;;  %v8877_v20 = vadd.s32 72, %v8847_v8 }
  0x1c   : > { %v8522_v2 = vpack.i.bf16 %v317_v1, %v316_v0  ;;  %v8880_v21 = vadd.s32 48, %v8847_v8  ;;  %v8883_v22 = vadd.s32 56, %v8847_v8  ;;  %v8886_v23 = vadd.s32 80, %v8847_v8  ;;  %s8713_s18 = smov 24   ;;  %s8716_s21 = smov 48  }
  0x1d   : > { %v8889_v24 = vadd.s32 160, %v8847_v8  ;;  %v8892_v25 = vadd.s32 8, %v8847_v8  ;;  %v5965_v26 = vand.u32 15, %v8847_v8  ;;  %v8896_v27 = vadd.s32 88, %v8847_v8  ;;  %s8717_s22 = smov 56   ;;  %s8718_s23 = smov 112  }
  0x1e   : > { %8523 = vxpose.xlu0.b32.start.end [1/1] (short) %v8522_v2, 128  ;;  %v8899_v28 = vadd.s32 96, %v8847_v8  ;;  %v8902_v29 = vadd.s32 112, %v8847_v8  ;;  %v6091_v30 = vand.u32 15, %v8861_v14  ;;  %v5986_v31 = vand.u32 15, %v8864_v15  ;;  %s8719_s10 = smov 116   ;;  %s14639_s25 = smov 4  }
  0x1f   : > { %v8908_v33 = vadd.s32 104, %v8847_v8  ;;  %v6098_v34 = vand.u32 15, %v8871_v18  ;;  %v8917_v40 = vadd.s32 120, %v8847_v8  ;;  %vm8921_vm2 = vcmp.gt.s32.totalorder %v5965_v26, 0  ;;  %s8725_s12 = smov 36   ;;  %s8726_s24 = smov 44  }
  0x20   : > { %v8929_v47 = vadd.s32 128, %v8847_v8  ;;  %v8933_v49 = vadd.s32 168, %v8847_v8  ;;  %v8936_v50 = vadd.s32 176, %v8847_v8  ;;  %v8939_v51 = vadd.s32 184, %v8847_v8 }
  0x21   : > { %v8942_v53 = vadd.s32 192, %v8847_v8  ;;  %v8945_v54 = vadd.s32 200, %v8847_v8  ;;  %v8948_v55 = vadd.s32 208, %v8847_v8  ;;  %v8951_v56 = vadd.s32 216, %v8847_v8 }
  0x22   : > { %v8958_v61 = vadd.s32 224, %v8847_v8  ;;  %v8961_v62 = vadd.s32 232, %v8847_v8  ;;  %vm8976_vm5 = vcmp.gt.s32.totalorder %v5979_v13, 0  ;;  %vm8980_vm6 = vcmp.lt.s32.totalorder %v6084_v17, 15 }
  0x23   : > { %vm9000_vm7 = vcmp.gt.s32.totalorder %v6091_v30, 0  ;;  %vm9020_vm8 = vcmp.gt.s32.totalorder %v5993_v12, 0  ;;  %vm9038_vm9 = vcmp.lt.s32.totalorder %v5986_v31, 15  ;;  %vm9060_vm10 = vcmp.lt.s32.totalorder %v6098_v34, 15 }
  0x24   : > { %v14676_v12 = vand.u32 15, %v8883_v22 }
  0x26   : > { %vm9135_vm14 = vcmp.lt.s32.totalorder %v14676_v12, 15 }
  0x83   : > { %619 = vrot.lane.b32.xlu0 %v7918_v6, %s8710_s13 }
  0x9a   : > { %v8524_v52 = vpop.trf.xlu0 }
  0x9b   : > { %v8525_v57 = vunpack.i.l.bf16 %v8524_v52  ;;  %v8954_v59 = vunpack.i.h.bf16 %v8524_v52 }
  0x9d   : > { %v6410_v63 = vrot.slane %v8525_v57, 7  ;;  %v14523_v5 = vrot.slane %v8954_v59, 7  ;;  %v6570_v17 = vrot.slane %v8525_v57, 1 }
  0x9e   : > { %v8529_v3 = vpop.trf.xlu0 }
  0x9f   : > { %v8970_v11 = vunpack.i.h.bf16 %v8529_v3  ;;  %v8972_v26 = vunpack.i.l.bf16 %v8529_v3  ;;  %v6505_v4 = vsel %vm6409_vm1, -inf, %v6410_v63  ;;  %v14524_v3 = vrot.slane %v8954_v59, 1 }
  0xa0   : > { %v6506_v6 = vsel %vm8921_vm2, %v6505_v4, -inf }
  0xa1   : > { %14646 = vst [vmem:[#allocation11_spill] sm:$0xff] %v8972_v26  ;;  %v6443_v10 = vrot.slane %v8970_v11, 7  ;;  %v6411_v13 = vrot.slane %v8972_v26, 7  ;;  %v6571_v2 = vrot.slane %v8972_v26, 1  ;;  %v6603_v1 = vrot.slane %v8970_v11, 1 }
  0xa2   : > { %v8534_v0 = vpop.trf.xlu0  ;;  %v382_v41 = vpack.c.bf16 %v8972_v26, %v8525_v57 }
  0xa3   : > { %v8996_v7 = vunpack.i.h.bf16 %v8534_v0  ;;  %v8535_v60 = vunpack.i.l.bf16 %v8534_v0  ;;  %v6444_v48 = vsel %vm6409_vm1, %v14523_v5, %v6443_v10  ;;  %v9011_v43 = vsel %vm6409_vm1, %v6410_v63, %v6411_v13 }
  0xa4   : > { %8260 = vmatprep.mubr.msk.bf16.mxu0 %vm399_vm3, %v382_v41  ;;  %14653 = vst [vmem:[#allocation12_spill] sm:$0xff] %v9011_v43  ;;  %v9014_v0 = vsel %vm2311_vm4, %v6570_v17, %v6571_v2  ;;  %v9027_v63 = vsel %vm2311_vm4, %v14524_v3, %v6603_v1  ;;  %v6715_v17 = vmax.f32 %v6444_v48, %v8970_v11 }
  0xa5   : > { %14654 = vst [vmem:[#allocation13_spill] sm:$0xff] %v9014_v0  ;;  %v6445_v14 = vrot.slane %v8996_v7, 7  ;;  %v6605_v30 = vrot.slane %v8996_v7, 1  ;;  %v6413_v4 = vrot.slane %v8535_v60, 7  ;;  %v6573_v45 = vrot.slane %v8535_v60, 1 }
  0xa6   : > { %v8539_v46 = vpop.trf.xlu0  ;;  %v9030_v5 = vmax.f32 %v6506_v6, %v8525_v57 }
  0xa7   : > { %v9034_v39 = vunpack.i.h.bf16 %v8539_v46  ;;  %v8540_v9 = vunpack.i.l.bf16 %v8539_v46  ;;  %v6414_v36 = vsel %vm6409_vm1, %v6411_v13, %v6413_v4  ;;  %v6606_v3 = vsel %vm2311_vm4, %v6603_v1, %v6605_v30 }
  0xa8   : > { %14657 = vst [vmem:[#allocation14_spill] sm:$0xff] %v9030_v5  ;;  %v6446_v48 = vsel %vm6409_vm1, %v6443_v10, %v6445_v14  ;;  %v9046_v57 = vsel %vm2311_vm4, %v6571_v2, %v6573_v45  ;;  %v6508_v13 = vsel %vm8976_vm5, %v6414_v36, -inf  ;;  %v6683_v1 = vsel %vm8980_vm6, %v6606_v3, -inf }
  0xa9   : > { %14660 = vst [vmem:[#allocation15_spill] sm:$0xff] %v9046_v57  ;;  %v6607_v44 = vrot.slane %v9034_v39, 1  ;;  %v6415_v46 = vrot.slane %v8540_v9, 7  ;;  %v6575_v38 = vrot.slane %v8540_v9, 1  ;;  %v383_v31 = vpack.c.bf16 %v8540_v9, %v8535_v60 }
  0xaa   : > { %v8544_v15 = vpop.trf.xlu0  ;;  %v6700_v52 = vmax.f32 %v6508_v13, %v8535_v60  ;;  %v9067_v36 = vmax.f32 %v6715_v17, %v6683_v1  ;;  %v14664_v43 = vrot.slane %v9034_v39, 7  ;;  %v14665_v17 = vand.u32 15, %v8880_v21 }
  0xab   : > { %v9056_v10 = vunpack.i.h.bf16 %v8544_v15  ;;  %v8545_v2 = vunpack.i.l.bf16 %v8544_v15  ;;  %8261 = vmatmul.mubr.msk.bf16.vlgmr.msra.gmra.mxu0 %vm399_vm3, %v383_v31  ;;  %v6416_v37 = vsel %vm6409_vm1, %v6413_v4, %v6415_v46  ;;  %v6576_v35 = vsel %vm2311_vm4, %v6573_v45, %v6575_v38 }
  0xac   : > { %v6701_v34 = vmax.f32 %v6416_v37, %v8540_v9  ;;  %v9071_v26 = vmax.f32 %v6700_v52, %v6576_v35  ;;  %v9076_v31 = vsel %vm6409_vm1, %v6445_v14, %v14664_v43  ;;  %v6524_v45 = vsel %vm9000_vm7, %v6446_v48, -inf }
  0xad   : > { %v14527_v3 = vrot.slane %v9056_v10, 1  ;;  %v6417_v15 = vrot.slane %v8545_v2, 7  ;;  %v6577_v6 = vrot.slane %v8545_v2, 1  ;;  %vm9085_vm11 = vcmp.gt.s32.totalorder %v14665_v17, 0 }
  0xae   : > { %v8549_v18 = vpop.trf.xlu0  ;;  %14663 = vst [vmem:[#allocation16_spill] sm:$0xff] %v9071_v26  ;;  %v14668_v35 = vand.u32 15, %v8867_v16  ;;  %v6608_v9 = vsel %vm2311_vm4, %v6605_v30, %v6607_v44 }
  0xaf   : > { %v6418_v60 = vsel %vm6409_vm1, %v6415_v46, %v6417_v15  ;;  %v9081_v4 = vunpack.i.h.bf16 %v8549_v18  ;;  %v8550_v43 = vunpack.i.l.bf16 %v8549_v18  ;;  %v6578_v14 = vsel %vm2311_vm4, %v6575_v38, %v6577_v6 }
  0xb0   : > { %vm9091_vm12 = vcmp.lt.s32.totalorder %v14668_v35, 15  ;;  %v6510_v58 = vsel %vm9020_vm8, %v6418_v60, -inf  ;;  %v6669_v41 = vsel %vm9038_vm9, %v6578_v14, -inf  ;;  %v9115_v16 = vsel %vm2311_vm4, %v6607_v44, %v14527_v3 }
  0xb1   : > { %v6702_v48 = vmax.f32 %v6510_v58, %v8545_v2  ;;  %v6419_v1 = vrot.slane %v8550_v43, 7  ;;  %v6579_v52 = vrot.slane %v8550_v43, 1  ;;  %v384_v35 = vpack.c.bf16 %v8550_v43, %v8545_v2 }
  0xb2   : > { %v8554_v17 = vpop.trf.xlu0  ;;  %v9110_v58 = vmax.f32 %v6701_v34, %v6669_v41 }
  0xb3   : > { %v9105_v18 = vunpack.i.h.bf16 %v8554_v17  ;;  %v8555_v38 = vunpack.i.l.bf16 %v8554_v17  ;;  %v6420_v30 = vsel %vm6409_vm1, %v6417_v15, %v6419_v1  ;;  %8264 = vmatprep.mubr.msk.bf16.mxu0 %vm399_vm3, %v384_v35  ;;  %v6580_v60 = vsel %vm2311_vm4, %v6577_v6, %v6579_v52 }
  0xb4   : > { %14671 = vst [vmem:[#allocation17_spill] sm:$0xff] %v9110_v58  ;;  %v6703_v2 = vmax.f32 %v6420_v30, %v8550_v43  ;;  %v14672_v17 = vand.u32 15, %v8874_v19  ;;  %v9125_v35 = vmax.f32 %v6702_v48, %v6580_v60  ;;  %v6716_v43 = vmax.f32 %v6524_v45, %v8996_v7 }
  0xb5   : > { %v6421_v46 = vrot.slane %v8555_v38, 7  ;;  %v6581_v6 = vrot.slane %v8555_v38, 1 }
  0xb6   : > { %vm9121_vm13 = vcmp.gt.s32.totalorder %v14672_v17, 0  ;;  %v8559_v34 = vpop.trf.xlu0  ;;  %14675 = vst [vmem:[#allocation18_spill] sm:$0xff] %v9125_v35  ;;  %v6764_v60 = vmax.f32 %v9071_v26, %v9125_v35 }
  0xb7   : > { %v9131_v41 = vunpack.i.h.bf16 %v8559_v34  ;;  %v8560_v30 = vunpack.i.l.bf16 %v8559_v34  ;;  %v6422_v17 = vsel %vm6409_vm1, %v6419_v1, %v6421_v46  ;;  %v6582_v48 = vsel %vm2311_vm4, %v6579_v52, %v6581_v6 }
  0xb8   : > { %v6512_v1 = vsel %vm9085_vm11, %v6422_v17, -inf  ;;  %v6671_v52 = vsel %vm9091_vm12, %v6582_v48, -inf  ;;  %v14680_v48 = vand.u32 15, %v8877_v20 }
  0xb9   : > { %v6423_v3 = vrot.slane %v8560_v30, 7  ;;  %v6583_v22 = vrot.slane %v8560_v30, 1  ;;  %v385_v21 = vpack.c.bf16 %v8560_v30, %v8555_v38  ;;  %v6704_v26 = vmax.f32 %v6512_v1, %v8555_v38 }
  0xba   : > { %v8564_v12 = vpop.trf.xlu0  ;;  %v9158_v5 = vmax.f32 %v6703_v2, %v6671_v52  ;;  %vm9164_vm15 = vcmp.lt.s32.totalorder %v14680_v48, 15  ;;  %v9172_v2 = vmax.f32 %v6716_v43, %v6608_v9 }
  0xbb   : > { %v9153_v44 = vunpack.i.h.bf16 %v8564_v12  ;;  %v8565_v14 = vunpack.i.l.bf16 %v8564_v12  ;;  %8265 = vmatmul.mubr.msk.bf16.gmra.mxu0 %vm399_vm3, %v385_v21  ;;  %v6424_v34 = vsel %vm6409_vm1, %v6421_v46, %v6423_v3  ;;  %v6584_v45 = vsel %vm2311_vm4, %v6581_v6, %v6583_v22 }
  0xbc   : > { %14679 = vst [vmem:[#allocation19_spill] sm:$0xff] %v9158_v5  ;;  %v6705_v21 = vmax.f32 %v6424_v34, %v8560_v30  ;;  %v9168_v46 = vmax.f32 %v6704_v26, %v6584_v45  ;;  %v6765_v38 = vmax.f32 %v9110_v58, %v9158_v5 }
  0xbd   : > { %v6425_v17 = vrot.slane %v8565_v14, 7  ;;  %v6585_v0 = vrot.slane %v8565_v14, 1 }
  0xbe   : > { %v8569_v37 = vpop.trf.xlu0  ;;  %v6766_v30 = vmax.f32 %v9125_v35, %v9168_v46 }
  0xbf   : > { %v6426_v6 = vsel %vm6409_vm1, %v6423_v3, %v6425_v17  ;;  %v9175_v1 = vunpack.i.h.bf16 %v8569_v37  ;;  %v8570_v20 = vunpack.i.l.bf16 %v8569_v37  ;;  %v6586_v48 = vsel %vm2311_vm4, %v6583_v22, %v6585_v0 }
  0xc0   : > { %v6514_v52 = vsel %vm9121_vm13, %v6426_v6, -inf  ;;  %v14683_v3 = vand.u32 15, %v8886_v23 }
  0xc1   : > { %v6706_v26 = vmax.f32 %v6514_v52, %v8565_v14  ;;  %v6427_v15 = vrot.slane %v8570_v20, 7  ;;  %v6587_v37 = vrot.slane %v8570_v20, 1  ;;  %v386_v6 = vpack.c.bf16 %v8570_v20, %v8565_v14 }
  0xc2   : > { %vm9188_vm2 = vcmp.gt.s32.totalorder %v14683_v3, 0  ;;  %v8574_v22 = vpop.trf.xlu0  ;;  %v6673_v52 = vsel %vm9135_vm14, %v6586_v48, -inf  ;;  %v9202_v3 = vmax.f32 %v6764_v60, %v9168_v46  ;;  %v14692_v14 = vand.u32 15, %v8899_v28 }
  0xc3   : > { %v9194_v42 = vunpack.i.h.bf16 %v8574_v22  ;;  %v8575_v45 = vunpack.i.l.bf16 %v8574_v22  ;;  %v6428_v34 = vsel %vm6409_vm1, %v6425_v17, %v6427_v15  ;;  %v6588_v9 = vsel %vm2311_vm4, %v6585_v0, %v6587_v37  ;;  %8268 = vmatprep.mubr.msk.bf16.mxu0 %vm399_vm3, %v386_v6 }
  0xc4   : > { %v9199_v23 = vmax.f32 %v6705_v21, %v6673_v52  ;;  %14686 = vst [vmem:[#allocation20_spill] sm:$0xff] %v9202_v3  ;;  %v6707_v13 = vmax.f32 %v6428_v34, %v8570_v20  ;;  %v9204_v35 = vmax.f32 %v6706_v26, %v6588_v9  ;;  %v14688_v20 = vand.u32 15, %v8896_v27 }
  0xc5   : > { %v6429_v48 = vrot.slane %v8575_v45, 7  ;;  %v6589_v22 = vrot.slane %v8575_v45, 1  ;;  %vm9234_vm6 = vcmp.gt.s32.totalorder %v14692_v14, 0 }
  0xc6   : > { %v8579_v58 = vpop.trf.xlu0  ;;  %v6767_v0 = vmax.f32 %v9158_v5, %v9199_v23  ;;  %v9211_v17 = vmax.f32 %v6765_v38, %v9199_v23  ;;  %vm9217_vm5 = vcmp.lt.s32.totalorder %v14688_v20, 15  ;;  %v9225_v6 = vmax.f32 %v6766_v30, %v9204_v35 }
  0xc7   : > { %v9213_v21 = vunpack.i.h.bf16 %v8579_v58  ;;  %v8580_v60 = vunpack.i.l.bf16 %v8579_v58  ;;  %v6590_v34 = vsel %vm2311_vm4, %v6587_v37, %v6589_v22  ;;  %v6430_v38 = vsel %vm6409_vm1, %v6427_v15, %v6429_v48 }
  0xc8   : > { %14687 = vst [vmem:[#allocation21_spill] sm:$0xff] %v9211_v17  ;;  %14691 = vst [vmem:[#allocation22_spill] sm:$0xff] %v9225_v6  ;;  %v6675_v52 = vsel %vm9164_vm15, %v6590_v34, -inf }
  0xc9   : > { %v6431_v20 = vrot.slane %v8580_v60, 7  ;;  %v9238_v9 = vmax.f32 %v6707_v13, %v6675_v52  ;;  %v6591_v30 = vrot.slane %v8580_v60, 1  ;;  %v387_v3 = vpack.c.bf16 %v8580_v60, %v8575_v45 }
  0xca   : > { %v8584_v19 = vpop.trf.xlu0  ;;  %v6516_v13 = vsel %vm9188_vm2, %v6430_v38, -inf  ;;  %v14721_v38 = vpack.c.bf16 %v8970_v11, %v8954_v59 }
  0xcb   : > { %v9242_v15 = vunpack.i.h.bf16 %v8584_v19  ;;  %v8585_v34 = vunpack.i.l.bf16 %v8584_v19  ;;  %8269 = vmatmul.mubr.msk.bf16.gmra.mxu0 %vm399_vm3, %v387_v3  ;;  %v9246_v27 = vmax.f32 %v6767_v0, %v9238_v9  ;;  %v6432_v28 = vsel %vm6409_vm1, %v6429_v48, %v6431_v20 }
  0xcc   : > { %v6592_v14 = vsel %vm2311_vm4, %v6589_v22, %v6591_v30  ;;  %v6708_v19 = vmax.f32 %v6516_v13, %v8575_v45  ;;  %v6709_v0 = vmax.f32 %v6432_v28, %v8580_v60  ;;  %v6768_v48 = vmax.f32 %v9168_v46, %v9204_v35 }
  0xcd   : > { %14695 = vst [vmem:[#allocation23_spill] sm:$0xff] %v9246_v27  ;;  %v6433_v12 = vrot.slane %v8585_v34, 7  ;;  %v6593_v17 = vrot.slane %v8585_v34, 1  ;;  %v14697_v22 = vand.u32 15, %v8908_v33  ;;  %v6769_v45 = vmax.f32 %v9199_v23, %v9238_v9 }
  0xce   : > { %v8589_v5 = vpop.trf.xlu0  ;;  %v9267_v58 = vmax.f32 %v6708_v19, %v6592_v14  ;;  %v14700_v46 = vand.u32 15, %v8902_v29  ;;  %v14707_v33 = vand.u32 15, %v8929_v47 }
  0xcf   : > { %v9258_v57 = vunpack.i.h.bf16 %v8589_v5  ;;  %v8590_v43 = vunpack.i.l.bf16 %v8589_v5  ;;  %vm9262_vm7 = vcmp.lt.s32.totalorder %v14697_v22, 15  ;;  %v6594_v52 = vsel %vm2311_vm4, %v6591_v30, %v6593_v17 }
  0xd0   : > { %v6434_v60 = vsel %vm6409_vm1, %v6431_v20, %v6433_v12  ;;  %vm9274_vm8 = vcmp.gt.s32.totalorder %v14700_v46, 0  ;;  %v6677_v23 = vsel %vm9217_vm5, %v6594_v52, -inf  ;;  %v9285_v29 = vmax.f32 %v6768_v48, %v9267_v58 }
  0xd1   : > { %14696 = vst [vmem:[#allocation24_spill] sm:$0xff] %v9258_v57  ;;  %v6435_v13 = vrot.slane %v8590_v43, 7  ;;  %v6595_v22 = vrot.slane %v8590_v43, 1  ;;  %v388_v14 = vpack.c.bf16 %v8590_v43, %v8585_v34  ;;  %v14704_v20 = vand.u32 15, %v8917_v40 }
  0xd2   : > { %v8594_v30 = vpop.trf.xlu0  ;;  %14703 = vst [vmem:[#allocation25_spill] sm:$0xff] %v9285_v29  ;;  %vm9297_vm11 = vcmp.gt.s32.totalorder %v14707_v33, 0  ;;  %v6741_v26 = vmax.f32 %v6709_v0, %v6677_v23  ;;  %v6518_v40 = vsel %vm9234_vm6, %v6434_v60, -inf  ;;  %v6770_v0 = vmax.f32 %v9204_v35, %v9267_v58 }
  0xd3   : > { %vm9289_vm9 = vcmp.lt.s32.totalorder %v14704_v20, 15  ;;  %v9293_v3 = vunpack.i.h.bf16 %v8594_v30  ;;  %v8595_v5 = vunpack.i.l.bf16 %v8594_v30  ;;  %8272 = vmatprep.mubr.msk.bf16.mxu0 %vm399_vm3, %v388_v14  ;;  %v6436_v52 = vsel %vm6409_vm1, %v6433_v12, %v6435_v13 }
  0xd4   : > { %v6596_v48 = vsel %vm2311_vm4, %v6593_v17, %v6595_v22  ;;  %v9308_v27 = vmax.f32 %v6769_v45, %v6741_v26  ;;  %v6710_v8 = vmax.f32 %v6518_v40, %v8585_v34  ;;  %v6711_v57 = vmax.f32 %v6436_v52, %v8590_v43 }
  0xd5   : > { %v6469_v20 = vrot.slane %v9293_v3, 7  ;;  %v6629_v30 = vrot.slane %v9293_v3, 1  ;;  %v6437_v19 = vrot.slane %v8595_v5, 7  ;;  %v6597_v47 = vrot.slane %v8595_v5, 1 }
  0xd6   : > { %v8599_v33 = vpop.trf.xlu0  ;;  %14710 = vst [vmem:[#allocation26_spill] sm:$0xff] %v9308_v27  ;;  %v14711_v12 = vand.u32 15, %v8889_v24  ;;  %v6742_v23 = vmax.f32 %v6710_v8, %v6596_v48  ;;  %v6771_v34 = vmax.f32 %v9238_v9, %v6741_v26  ;;  %v14714_v43 = vand.u32 15, %v8933_v49 }
  0xd7   : > { %v9318_v17 = vunpack.i.h.bf16 %v8599_v33  ;;  %v8600_v60 = vunpack.i.l.bf16 %v8599_v33  ;;  %v6598_v45 = vsel %vm2311_vm4, %v6595_v22, %v6597_v47  ;;  %v6438_v9 = vsel %vm6409_vm1, %v6435_v13, %v6437_v19 }
  0xd8   : > { %vm9314_vm12 = vcmp.gt.s32.totalorder %v14711_v12, 0  ;;  %vm9326_vm13 = vcmp.lt.s32.totalorder %v14714_v43, 15  ;;  %v6679_v22 = vsel %vm9262_vm7, %v6598_v45, -inf  ;;  %v9335_v8 = vmax.f32 %v6770_v0, %v6742_v23 }
  0xd9   : > { %v6439_v52 = vrot.slane %v8600_v60, 7  ;;  %v6599_v40 = vrot.slane %v8600_v60, 1  ;;  %v389_v12 = vpack.c.bf16 %v8600_v60, %v8595_v5  ;;  %v6743_v49 = vmax.f32 %v6711_v57, %v6679_v22 }
  0xda   : > { %14717 = vst [vmem:[#allocation27_spill] sm:$0xff] %v9335_v8  ;;  %v6520_v43 = vsel %vm9274_vm8, %v6438_v9, -inf  ;;  %v14718_v24 = vand.u32 15, %v8936_v50  ;;  %v14722_v57 = vrot.slane %v8954_v59, 1  ;;  %v6772_v0 = vmax.f32 %v9267_v58, %v6742_v23 }
  0xdb   : > { %8273 = vmatmul.mubr.msk.bf16.gmra.mxu0 %vm399_vm3, %v389_v12  ;;  %v6440_v48 = vsel %vm6409_vm1, %v6437_v19, %v6439_v52  ;;  %v6600_v14 = vsel %vm2311_vm4, %v6597_v47, %v6599_v40  ;;  %v6712_v19 = vmax.f32 %v6520_v43, %v8595_v5  ;;  %v9357_v47 = vmax.f32 %v6771_v34, %v6743_v49 }
  0xdc   : > { %vm9345_vm14 = vcmp.gt.s32.totalorder %v14718_v24, 0  ;;  %8276 = vmatprep.mubr.msk.bf16.mxu0 %vm399_vm3, %v14721_v38  ;;  %v6602_v13 = vsel %vm2311_vm4, %v6599_v40, %v14722_v57  ;;  %v6713_v28 = vmax.f32 %v6440_v48, %v8600_v60  ;;  %v6773_v45 = vmax.f32 %v6741_v26, %v6743_v49 }
  0xdd   : > { %14723 = vst [vmem:[#allocation28_spill] sm:$0xff] %v9357_v47  ;;  %v6681_v50 = vsel %vm9289_vm9, %v6602_v13, -inf  ;;  %v14724_v24 = vrot.slane %v8954_v59, 7  ;;  %v14725_v12 = vand.u32 15, %v8939_v51  ;;  %v6744_v5 = vmax.f32 %v6712_v19, %v6600_v14 }
  0xde   : > { %v6745_v60 = vmax.f32 %v6713_v28, %v6681_v50  ;;  %v14728_v46 = vsel %vm9060_vm10, %v9115_v16, -inf  ;;  %v14729_v26 = vmax.f32 %v9076_v31, %v9034_v39  ;;  %v14730_v40 = vrot.slane %v9056_v10, 7 }
  0xdf   : > { %v6442_v11 = vsel %vm6409_vm1, %v6439_v52, %v14724_v24  ;;  %vm9366_vm15 = vcmp.lt.s32.totalorder %v14725_v12, 15  ;;  %v14731_v14 = vrot.slane %v9034_v39, 7  ;;  %v14732_v9 = vrot.slane %v9081_v4, 7 }
  0xe0   : > { %v6522_v58 = vsel %vm9297_vm11, %v6442_v11, -inf  ;;  %v6749_v34 = vmax.f32 %v14729_v26, %v14728_v46  ;;  %v14733_v32 = vmov %v14730_v40  ;;  %v14734_v31 = vand.u32 15, %v8942_v53 }
  0xe1   : > { %v6714_v52 = vmax.f32 %v6522_v58, %v8954_v59  ;;  %v6450_v6 = vsel %vm6409_vm1, %v14731_v14, %v14730_v40  ;;  %v6452_v16 = vsel %vm6409_vm1, %v14733_v32, %v14732_v9  ;;  %v9398_v43 = vmax.f32 %v6772_v0, %v6744_v5 }
  0xe2   : > { %vm9394_vm10 = vcmp.gt.s32.totalorder %v14734_v31, 0  ;;  %v9400_v59 = vmax.f32 %v6773_v45, %v6745_v60  ;;  %v6774_v38 = vmax.f32 %v6742_v23, %v6744_v5  ;;  %v6775_v57 = vmax.f32 %v6743_v49, %v6745_v60 }
  0xe3   : > { %14737 = vst [vmem:[#allocation29_spill] sm:$0xff] %v9398_v43  ;;  %v14739_v13 = vand.u32 15, %v8945_v54  ;;  %v6746_v28 = vmax.f32 %v6714_v52, %v9027_v63  ;;  %v6777_v53 = vmax.f32 %v6745_v60, %v9067_v36  ;;  %v6526_v50 = vsel %vm9314_vm12, %v6450_v6, -inf }
  0xe4   : > { %14738 = vst [vmem:[#allocation30_spill] sm:$0xff] %v9400_v59  ;;  %v14742_v0 = vrot.slane %v9081_v4, 1  ;;  %v14743_v45 = vrot.slane %v9056_v10, 1  ;;  %v9420_v49 = vmax.f32 %v6775_v57, %v9067_v36  ;;  %v14745_v24 = vrot.slane %v9105_v18, 1 }
  0xe5   : > { %vm9404_vm2 = vcmp.lt.s32.totalorder %v14739_v13, 15  ;;  %v6718_v37 = vmax.f32 %v6526_v50, %v9056_v10  ;;  %v14747_v12 = vand.u32 15, %v8948_v55  ;;  %v14750_v58 = vpack.c.bf16 %v9034_v39, %v8996_v7 }
  0xe6   : > { %v6612_v23 = vsel %vm2311_vm4, %v14743_v45, %v14742_v0  ;;  %14744 = vst [vmem:[#allocation31_spill] sm:$0xff] %v9420_v49  ;;  %v14746_v63 = vmov %v14742_v0  ;;  %v9438_v46 = vmax.f32 %v6774_v38, %v6746_v28  ;;  %v6776_v26 = vmax.f32 %v6744_v5, %v6746_v28 }
  0xe7   : > { %v6614_v11 = vsel %vm2311_vm4, %v14746_v63, %v14745_v24  ;;  %vm9430_vm5 = vcmp.gt.s32.totalorder %v14747_v12, 0  ;;  %8277 = vmatmul.mubr.msk.bf16.gmra.mxu0 %vm399_vm3, %v14750_v58  ;;  %v9440_v52 = vmax.f32 %v6777_v53, %v6749_v34  ;;  %v14753_v55 = vpack.c.bf16 %v9081_v4, %v9056_v10 }
  0xe8   : > { %14751 = vst [vmem:[#allocation32_spill] sm:$0xff] %v9438_v46  ;;  %v6687_v40 = vsel %vm9326_vm13, %v6614_v11, -inf  ;;  %v6719_v14 = vmax.f32 %v6452_v16, %v9081_v4  ;;  %v6750_v6 = vmax.f32 %v6718_v37, %v6612_v23  ;;  %v6778_v39 = vmax.f32 %v6746_v28, %v9172_v2 }
  0xe9   : > { %14752 = vst [vmem:[#allocation33_spill] sm:$0xff] %v9440_v52  ;;  %8280 = vmatprep.mubr.msk.bf16.mxu0 %vm399_vm3, %v14753_v55  ;;  %v6779_v7 = vmax.f32 %v9067_v36, %v6749_v34  ;;  %v14754_v9 = vand.u32 15, %v8951_v56  ;;  %v9460_v10 = vmax.f32 %v6776_v26, %v9172_v2  ;;  %v14758_v32 = vrot.slane %v9105_v18, 7 }
  0xea   : > { %v14759_v16 = vrot.slane %v9081_v4, 7  ;;  %v14760_v36 = vrot.slane %v9131_v41, 7  ;;  %v6751_v57 = vmax.f32 %v6719_v14, %v6687_v40  ;;  %v9472_v13 = vmax.f32 %v6778_v39, %v6750_v6 }
  0xeb   : > { %vm9453_vm6 = vcmp.lt.s32.totalorder %v14754_v9, 15  ;;  %14757 = vst [vmem:[#allocation34_spill] sm:$0xff] %v9460_v10  ;;  %v14761_v56 = vmov %v14758_v32  ;;  %v14763_v53 = vrot.slane %v9131_v41, 1  ;;  %v14764_v50 = vmov %v14745_v24 }
  0xec   : > { %v6454_v31 = vsel %vm6409_vm1, %v14759_v16, %v14758_v32  ;;  %v6456_v38 = vsel %vm6409_vm1, %v14761_v56, %v14760_v36  ;;  %14762 = vst [vmem:[#allocation35_spill] sm:$0xff] %v9472_v13  ;;  %v14765_v0 = vand.u32 15, %v8958_v61  ;;  %v14768_v24 = vrot.slane %v9153_v44, 1 }
  0xed   : > { %v6528_v28 = vsel %vm9345_vm14, %v6454_v31, -inf  ;;  %v6616_v4 = vsel %vm2311_vm4, %v14764_v50, %v14763_v53  ;;  %v14769_v33 = vmov %v14763_v53  ;;  %v6721_v37 = vmax.f32 %v6456_v38, %v9131_v41 }
  0xee   : > { %vm9483_vm7 = vcmp.gt.s32.totalorder %v14765_v0, 0  ;;  %v6618_v63 = vsel %vm2311_vm4, %v14769_v33, %v14768_v24  ;;  %v6720_v11 = vmax.f32 %v6528_v28, %v9105_v18  ;;  %v9496_v12 = vmax.f32 %v6779_v7, %v6751_v57 }
  0xef   : > { %v6689_v61 = vsel %vm9366_vm15, %v6618_v63, -inf  ;;  %v6780_v58 = vmax.f32 %v9172_v2, %v6750_v6  ;;  %v6781_v26 = vmax.f32 %v6749_v34, %v6751_v57  ;;  %v14771_v40 = vand.u32 15, %v8961_v62 }
  0xf0   : > { %14770 = vst [vmem:[#allocation36_spill] sm:$0xff] %v9496_v12  ;;  %v6752_v14 = vmax.f32 %v6720_v11, %v6616_v4  ;;  %v6753_v39 = vmax.f32 %v6721_v37, %v6689_v61  ;;  %v14774_v9 = vrot.slane %v9153_v44, 7  ;;  %v14775_v32 = vmov %v14760_v36 }
  0xf1   : > { %vm9503_vm8 = vcmp.lt.s32.totalorder %v14771_v40, 15  ;;  %v14776_v22 = vrot.slane %v9175_v1, 7  ;;  %v14778_v31 = vrot.slane %v9175_v1, 1  ;;  %v14779_v36 = vmov %v14768_v24 }
  0xf2   : > { %v6458_v7 = vsel %vm6409_vm1, %v14775_v32, %v14774_v9  ;;  %v14777_v16 = vmov %v14774_v9  ;;  %v14780_v38 = vrot.slane %v9194_v42, 1  ;;  %v14782_v50 = vpack.c.bf16 %v9131_v41, %v9105_v18 }
  0xf3   : > { %v6460_v2 = vsel %vm6409_vm1, %v14777_v16, %v14776_v22  ;;  %v6530_v34 = vsel %vm9394_vm10, %v6458_v7, -inf  ;;  %v6620_v56 = vsel %vm2311_vm4, %v14779_v36, %v14778_v31  ;;  %v14781_v28 = vmov %v14778_v31 }
  0xf4   : > { %v6622_v53 = vsel %vm2311_vm4, %v14781_v28, %v14780_v38  ;;  %8281 = vmatmul.mubr.msk.bf16.gmra.mxu0 %vm399_vm3, %v14782_v50  ;;  %v9535_v4 = vmax.f32 %v6780_v58, %v6752_v14  ;;  %v9537_v48 = vmax.f32 %v6781_v26, %v6753_v39  ;;  %v6722_v24 = vmax.f32 %v6530_v34, %v9153_v44 }
  0xf5   : > { %v6691_v0 = vsel %vm9404_vm2, %v6622_v53, -inf  ;;  %v14785_v33 = vpack.c.bf16 %v9175_v1, %v9153_v44  ;;  %v6723_v63 = vmax.f32 %v6460_v2, %v9175_v1  ;;  %v6782_v11 = vmax.f32 %v6750_v6, %v6752_v14 }
  0xf6   : > { %14783 = vst [vmem:[#allocation37_spill] sm:$0xff] %v9535_v4  ;;  %14784 = vst [vmem:[#allocation38_spill] sm:$0xff] %v9537_v48  ;;  %v6783_v18 = vmax.f32 %v6751_v57, %v6753_v39  ;;  %v14786_v41 = vrot.slane %v9194_v42, 7  ;;  %v14787_v37 = vmov %v14776_v22  ;;  %v6754_v58 = vmax.f32 %v6722_v24, %v6620_v56 }
  0xf7   : > { %8284 = vmatprep.mubr.msk.bf16.mxu0 %vm399_vm3, %v14785_v33  ;;  %v14788_v26 = vrot.slane %v9213_v21, 7  ;;  %v6755_v57 = vmax.f32 %v6723_v63, %v6691_v0  ;;  %v14790_v9 = vrot.slane %v9213_v21, 1  ;;  %v14791_v1 = vmov %v14780_v38  ;;  %v14801_v63 = vld [vmem:[#allocation24_spill] sm:$0xff] }
  0xf8   : > { %v6462_v61 = vsel %vm6409_vm1, %v14787_v37, %v14786_v41  ;;  %v14789_v44 = vmov %v14786_v41  ;;  %v14792_v7 = vrot.slane %v9242_v15, 1  ;;  %v14794_v34 = vand.u32 15, %v8892_v25 }
  0xf9   : > { %v6464_v40 = vsel %vm6409_vm1, %v14789_v44, %v14788_v26  ;;  %v6532_v6 = vsel %vm9430_vm5, %v6462_v61, -inf  ;;  %v6624_v32 = vsel %vm2311_vm4, %v14791_v1, %v14790_v9  ;;  %v14793_v22 = vmov %v14790_v9 }
  0xfa   : > { %v6626_v16 = vsel %vm2311_vm4, %v14793_v22, %v14792_v7  ;;  %v6724_v2 = vmax.f32 %v6532_v6, %v9194_v42  ;;  %vm9574_vm9 = vcmp.lt.s32.totalorder %v14794_v34, 15  ;;  %v9578_v31 = vmax.f32 %v6782_v11, %v6754_v58  ;;  %v14811_v34 = vld [vmem:[#allocation10_spill] sm:$0xff] }
  0xfb   : > { %v6693_v36 = vsel %vm9453_vm6, %v6626_v16, -inf  ;;  %v6725_v56 = vmax.f32 %v6464_v40, %v9213_v21  ;;  %v6784_v38 = vmax.f32 %v6752_v14, %v6754_v58  ;;  %v9583_v28 = vmax.f32 %v6783_v18, %v6755_v57 }
  0xfc   : > { %14797 = vst [vmem:[#allocation39_spill] sm:$0xff] %v9578_v31  ;;  %v6756_v53 = vmax.f32 %v6724_v2, %v6624_v32  ;;  %v6785_v50 = vmax.f32 %v6753_v39, %v6755_v57  ;;  %v14799_v0 = vrot.slane %v9242_v15, 7  ;;  %v14800_v25 = vmov %v14788_v26 }
  0xfd   : > { %14798 = vst [vmem:[#allocation40_spill] sm:$0xff] %v9583_v28  ;;  %v6757_v33 = vmax.f32 %v6725_v56, %v6693_v36  ;;  %v14802_v11 = vrot.slane %v14801_v63, 7  ;;  %v14804_v18 = vrot.slane %v14801_v63, 1  ;;  %v14805_v39 = vmov %v14792_v7 }
  0xfe   : > { %v6466_v24 = vsel %vm6409_vm1, %v14800_v25, %v14799_v0  ;;  %v14803_v41 = vmov %v14799_v0  ;;  %v9604_v26 = vmax.f32 %v6784_v38, %v6756_v53  ;;  %v14808_v6 = vpack.c.bf16 %v9213_v21, %v9194_v42 }
  0xff   : > { %v6468_v5 = vsel %vm6409_vm1, %v14803_v41, %v14802_v11  ;;  %v6534_v14 = vsel %vm9483_vm7, %v6466_v24, -inf  ;;  %v6628_v37 = vsel %vm2311_vm4, %v14805_v39, %v14804_v18  ;;  %v14807_v44 = vmov %v14804_v18 }
 0x100   : > { %14806 = vst [vmem:[#allocation24_spill] sm:$0xff] %v9604_v26  ;;  %v6630_v40 = vsel %vm2311_vm4, %v14807_v44, %v6629_v30  ;;  %v6726_v45 = vmax.f32 %v6534_v14, %v9242_v15  ;;  %8285 = vmatmul.mubr.msk.bf16.gmra.mxu0 %vm399_vm3, %v14808_v6  ;;  %v9616_v9 = vmax.f32 %v6785_v50, %v6757_v33  ;;  %v5959_v36 = vadd.s32 240, %v14811_v34 }
 0x101   : > { %v6695_v1 = vsel %vm9503_vm8, %v6630_v40, -inf  ;;  %v6727_v32 = vmax.f32 %v6468_v5, %v14801_v63  ;;  %v6786_v7 = vmax.f32 %v6754_v58, %v6756_v53  ;;  %v14810_v22 = vpack.c.bf16 %v14801_v63, %v9242_v15  ;;  %v14817_v40 = vld [vmem:[#allocation13_spill] sm:$0xff] }
 0x102   : > { %14809 = vst [vmem:[#allocation41_spill] sm:$0xff] %v9616_v9  ;;  %v6758_v16 = vmax.f32 %v6726_v45, %v6628_v37  ;;  %v6787_v2 = vmax.f32 %v6755_v57, %v6757_v33  ;;  %v5960_v42 = vadd.s32 248, %v14811_v34  ;;  %v14812_v55 = vmov %v14802_v11  ;;  %v14816_v37 = vld [vmem:[#allocation15_spill] sm:$0xff]  ;;  %v14818_v45 = vld [vmem:[#allocation14_spill] sm:$0xff] }
 0x103   : > { %8288 = vmatprep.mubr.msk.bf16.mxu0 %vm399_vm3, %v14810_v22  ;;  %v6759_v56 = vmax.f32 %v6727_v32, %v6695_v1  ;;  %v6470_v58 = vsel %vm6409_vm1, %v14812_v55, %v6469_v20  ;;  %v14813_v15 = vrot.slane %v9318_v17, 7  ;;  %v6175_v50 = vand.u32 15, %v5959_v36  ;;  %v14819_v1 = vld [vmem:[#allocation12_spill] sm:$0xff]  ;;  %v14820_v32 = vld [vmem:[#allocation11_spill] sm:$0xff]  ;;  %v14826_v55 = vld [vmem:[#allocation17_spill] sm:$0xff] }
 0x104   : > { %v9639_v38 = vmax.f32 %v6786_v7, %v6758_v16  ;;  %v6182_v0 = vand.u32 15, %v5960_v42  ;;  %v6631_v25 = vrot.slane %v9318_v17, 1  ;;  %v6788_v41 = vmax.f32 %v6756_v53, %v6758_v16  ;;  %v14824_v36 = vld [vmem:[#allocation16_spill] sm:$0xff] }
 0x105   : > { %v6472_v57 = vsel %vm6409_vm1, %v6469_v20, %v14813_v15  ;;  %v9642_v24 = vmax.f32 %v6787_v2, %v6759_v56  ;;  %v6789_v63 = vmax.f32 %v6757_v33, %v6759_v56  ;;  %vm6375_vm11 = vcmp.gt.s32.totalorder %v6175_v50, 0  ;;  %v14829_v50 = vld [vmem:[#allocation18_spill] sm:$0xff] }
 0x106   : > { %14814 = vst [vmem:[#allocation10_spill] sm:$0xff] %v9639_v38  ;;  %v6729_v11 = vmax.f32 %v6472_v57, %v9318_v17  ;;  %vm6569_vm12 = vcmp.lt.s32.totalorder %v6182_v0, 15  ;;  %v6632_v5 = vsel %vm2311_vm4, %v6629_v30, %v6631_v25  ;;  %v6665_v20 = vsel %vm2311_vm4, %v6631_v25, -inf  ;;  %v14830_v25 = vld [vmem:[#allocation19_spill] sm:$0xff] }
 0x107   : > { %14815 = vst [vmem:[#allocation42_spill] sm:$0xff] %v9642_v24  ;;  %v6536_v18 = vsel %vm6375_vm11, %v6470_v58, -inf  ;;  %v6697_v39 = vsel %vm6569_vm12, %v6665_v20, -inf  ;;  %v6667_v44 = vsel %vm9574_vm9, %v14816_v37, -inf  ;;  %v6730_v6 = vmax.f32 %v14818_v45, %v14817_v40 }
 0x108   : > { %v6728_v53 = vmax.f32 %v6536_v18, %v9293_v3  ;;  %v6761_v33 = vmax.f32 %v6729_v11, %v6697_v39  ;;  %v14821_v30 = vmax.f32 %v14819_v1, %v14820_v32  ;;  %v14822_v22 = vpack.c.bf16 %v9318_v17, %v9293_v3 }
 0x109   : > { %v9667_v42 = vmax.f32 %v6730_v6, %v14824_v36  ;;  %vm759_vm13 = vcmask 581632   ;;  %vm792_vm14 = vcmask 588800   ;;  %vm951_vm15 = vcmask 130112  }
 0x10a   : > { %v6731_v7 = vmax.f32 %v14821_v30, %v6667_v44  ;;  %8289 = vmatmul.mubr.msk.bf16.gmra.mxu0 %vm399_vm3, %v14822_v22  ;;  %v6760_v2 = vmax.f32 %v6728_v53, %v6632_v5  ;;  %v9664_v34 = vmax.f32 %v6789_v63, %v6761_v33  ;;  %v6791_v60 = vmax.f32 %v6759_v56, %v6761_v33 }
 0x10b   : > { %14825 = vst [vmem:[#allocation13_spill] sm:$0xff] %v9667_v42  ;;  %v6792_v0 = vmax.f32 %v9667_v42, %v14829_v50  ;;  %vm1072_vm10 = vcmask 195712   ;;  %vm1201_vm2 = vcmask 261312   ;;  %vm1330_vm5 = vcmask 326912  }
 0x10c   : > { %14823 = vst [vmem:[#allocation15_spill] sm:$0xff] %v9664_v34  ;;  %v9670_v58 = vmax.f32 %v6731_v7, %v14826_v55  ;;  %v9672_v15 = vmax.f32 %v6788_v41, %v6760_v2  ;;  %v6790_v57 = vmax.f32 %v6758_v16, %v6760_v2  ;;  %v14540_v41 = vmov 0.0   ;;  %v9750_v16 = vpop.permute.xlu0 %619 }
 0x10d   : > { %762 = vst.msk [vmem:[#allocation2 + $0x31] sm:$0x1] %vm759_vm13, %v14540_v41  ;;  %760 = vst.msk [vmem:[#allocation2 + $0x1] sm:$0x1] %vm759_vm13, %v14540_v41  ;;  %vm1459_vm6 = vcmask 392512   ;;  %vm1582_vm7 = vcmask 458112  }
 0x10e   : > { %14827 = vst [vmem:[#allocation14_spill] sm:$0xff] %v9670_v58  ;;  %14828 = vst [vmem:[#allocation12_spill] sm:$0xff] %v9672_v15  ;;  %v6793_v3 = vmax.f32 %v9670_v58, %v14830_v25  ;;  %v9682_v11 = vpack.c.bf16 %v6791_v60, %v6790_v57  ;;  %vm1703_vm8 = vcmask 523712   ;;  %vm2392_vm9 = vcmask 812032  }
 0x10f   : > { %761 = vst.msk [vmem:[#allocation2 + $0x19] sm:$0x1] %vm759_vm13, %v14540_v41  ;;  %763 = vst.msk [vmem:[#allocation2 + $0x49] sm:$0x1] %vm759_vm13, %v14540_v41  ;;  %vm2425_vm11 = vcmask 818176   ;;  %vm1824_vm12 = vcmask 589312  }
 0x110   : > { %14831 = vst [vmem:[#allocation11_spill] sm:$0xff] %v9682_v11  ;;  %v9684_v63 = vpack.c.bf16 %v6793_v3, %v6792_v0  ;;  %764 = vst.msk [vmem:[#allocation2 + $0x61] sm:$0x1] %vm759_vm13, %v14540_v41 }
 0x111   : > { %765 = vst.msk [vmem:[#allocation2 + $0x79] sm:$0x1] %vm759_vm13, %v14540_v41  ;;  %766 = vst.msk [vmem:[#allocation2 + $0x91] sm:$0x1] %vm759_vm13, %v14540_v41 }
 0x112   : > { %14832 = vst [vmem:[#allocation16_spill] sm:$0xff] %v9684_v63  ;;  %767 = vst.msk [vmem:[#allocation2 + $0xa9] sm:$0x1] %vm759_vm13, %v14540_v41 }
 0x113   : > { %768 = vst.msk [vmem:[#allocation2 + $0xc1] sm:$0x1] %vm759_vm13, %v14540_v41  ;;  %769 = vst.msk [vmem:[#allocation2 + $0xd9] sm:$0x1] %vm759_vm13, %v14540_v41 }
 0x114   : > { %770 = vst.msk [vmem:[#allocation2 + $0xf1] sm:$0x1] %vm759_vm13, %v14540_v41  ;;  %771 = vst.msk [vmem:[#allocation2 + $0x109] sm:$0x1] %vm759_vm13, %v14540_v41 }
 0x115   : > { %772 = vst.msk [vmem:[#allocation2 + $0x121] sm:$0x1] %vm759_vm13, %v14540_v41  ;;  %773 = vst.msk [vmem:[#allocation2 + $0x139] sm:$0x1] %vm759_vm13, %v14540_v41 }
 0x116   : > { %774 = vst.msk [vmem:[#allocation2 + $0x151] sm:$0x1] %vm759_vm13, %v14540_v41  ;;  %775 = vst.msk [vmem:[#allocation2 + $0x169] sm:$0x1] %vm759_vm13, %v14540_v41 }
 0x117   : > { %776 = vst.msk [vmem:[#allocation2 + $0x10] sm:$0x1] %vm759_vm13, %v14540_v41  ;;  %777 = vst.msk [vmem:[#allocation2 + $0x28] sm:$0x1] %vm759_vm13, %v14540_v41 }
 0x118   : > { %778 = vst.msk [vmem:[#allocation2 + $0x40] sm:$0x1] %vm759_vm13, %v14540_v41  ;;  %779 = vst.msk [vmem:[#allocation2 + $0x58] sm:$0x1] %vm759_vm13, %v14540_v41 }
 0x119   : > { %780 = vst.msk [vmem:[#allocation2 + $0x70] sm:$0x1] %vm759_vm13, %v14540_v41  ;;  %781 = vst.msk [vmem:[#allocation2 + $0x88] sm:$0x1] %vm759_vm13, %v14540_v41 }
 0x11a   : > { %782 = vst.msk [vmem:[#allocation2 + $0xa0] sm:$0x1] %vm759_vm13, %v14540_v41  ;;  %783 = vst.msk [vmem:[#allocation2 + $0xb8] sm:$0x1] %vm759_vm13, %v14540_v41 }
 0x11b   : > { %784 = vst.msk [vmem:[#allocation2 + $0xd0] sm:$0x1] %vm759_vm13, %v14540_v41  ;;  %785 = vst.msk [vmem:[#allocation2 + $0xe8] sm:$0x1] %vm759_vm13, %v14540_v41 }
 0x11c   : > { %786 = vst.msk [vmem:[#allocation2 + $0x100] sm:$0x1] %vm759_vm13, %v14540_v41  ;;  %787 = vst.msk [vmem:[#allocation2 + $0x118] sm:$0x1] %vm759_vm13, %v14540_v41 }
 0x11d   : > { %788 = vst.msk [vmem:[#allocation2 + $0x130] sm:$0x1] %vm759_vm13, %v14540_v41  ;;  %789 = vst.msk [vmem:[#allocation2 + $0x148] sm:$0x1] %vm759_vm13, %v14540_v41 }
 0x11e   : > { %790 = vst.msk [vmem:[#allocation2 + $0x160] sm:$0x1] %vm759_vm13, %v14540_v41  ;;  %791 = vst.msk [vmem:[#allocation2 + $0x178] sm:$0x1] %vm759_vm13, %v14540_v41  ;;  %vm2552_vm13 = vcmask 31744  }
 0x11f   : > { %793 = vst.msk [vmem:[#allocation2] sm:$0xff] %vm792_vm14, %v14540_v41  ;;  %794 = vst.msk [vmem:[#allocation2 + $0x8] sm:$0xff] %vm792_vm14, %v14540_v41 }
 0x120   : > { %795 = vst.msk [vmem:[#allocation2 + $0x10] sm:$0xff] %vm792_vm14, %v14540_v41  ;;  %797 = vst.msk [vmem:[#allocation2 + $0x168] sm:$0xff] %vm792_vm14, %v14540_v41 }
 0x121   : > { %798 = vst.msk [vmem:[#allocation2 + $0x170] sm:$0xff] %vm792_vm14, %v14540_v41  ;;  %799 = vst.msk [vmem:[#allocation2 + $0x178] sm:$0xff] %vm792_vm14, %v14540_v41 }
 0x16b   : > { %v9752_v5 = vpop.f32.mrf.mxu0 }
 0x16c   : > { %14833 = vst [vmem:[#allocation17_spill] sm:$0xff] %v9752_v5  ;;  %v624_v20 = vadd.f32 %v9752_v5, %v9750_v16 }
 0x16d   : > { %v9756_v18 = vpop.f32.mrf.mxu0 }
 0x16e   : > { %14834 = vst [vmem:[#allocation18_spill] sm:$0xff] %v9756_v18  ;;  %v9758_v39 = vmax.f32 %v624_v20, 0.0  ;;  %v622_v37 = vadd.f32 %v9750_v16, %v9756_v18 }
 0x16f   : > { %v9762_v44 = vpop.f32.mrf.mxu0 }
 0x170   : > { %14835 = vst [vmem:[#allocation19_spill] sm:$0xff] %v9762_v44  ;;  %986 = vrot.lane.b32.xlu0 %v9758_v39, %s8710_s13  ;;  %834 = vrot.lane.b32.xlu1 %v9758_v39, %s8712_s17  ;;  %v9768_v53 = vmax.f32 %v622_v37, 0.0  ;;  %v625_v33 = vadd.f32 %v9762_v44, %v9750_v16 }
 0x171   : > { %v9806_v45 = vpop.f32.mrf.mxu0 }
 0x172   : > { %v9776_v40 = vmax.f32 %v625_v33, 0.0  ;;  %14836 = vst [vmem:[#allocation43_spill] sm:$0xff] %v9806_v45  ;;  %v623_v6 = vadd.f32 %v9750_v16, %v9806_v45 }
 0x174   : > { %1109 = vrot.lane.b32.xlu0 %v9758_v39, %s8709_s26  ;;  %830 = vrot.lane.b32.xlu1 %v9768_v53, %s8712_s17  ;;  %v9820_v32 = vmax.f32 %v623_v6, 0.0 }
 0x178   : > { %1238 = vrot.lane.b32.xlu0 %v9758_v39, %s8713_s18  ;;  %836 = vrot.lane.b32.xlu1 %v9776_v40, %s8712_s17 }
 0x17b   : > { %v9814_v1 = vpop.f32.mrf.mxu0 }
 0x17c   : > { %1367 = vrot.lane.b32.xlu0 %v9758_v39, %s8714_s19  ;;  %988 = vrot.lane.b32.xlu1 %v9776_v40, %s8710_s13  ;;  %14837 = vst [vmem:[#allocation44_spill] sm:$0xff] %v9814_v1  ;;  %v628_v30 = vadd.f32 %v9814_v1, %v9750_v16 }
 0x17d   : > { %v9838_v22 = vpop.f32.mrf.mxu0 }
 0x17e   : > { %v9828_v7 = vmax.f32 %v628_v30, 0.0  ;;  %14838 = vst [vmem:[#allocation45_spill] sm:$0xff] %v9838_v22  ;;  %v626_v2 = vadd.f32 %v9750_v16, %v9838_v22 }
 0x17f   : > { %v9852_v36 = vpop.f32.mrf.mxu0 }
 0x180   : > { %1492 = vrot.lane.b32.xlu0 %v9758_v39, %s8715_s20  ;;  %1111 = vrot.lane.b32.xlu1 %v9776_v40, %s8709_s26  ;;  %v9850_v60 = vmax.f32 %v626_v2, 0.0  ;;  %14839 = vst [vmem:[#allocation46_spill] sm:$0xff] %v9852_v36  ;;  %v629_v55 = vadd.f32 %v9852_v36, %v9750_v16 }
 0x181   : > { %v9864_v57 = vpop.f32.mrf.mxu0 }
 0x182   : > { %14840 = vst [vmem:[#allocation47_spill] sm:$0xff] %v9864_v57  ;;  %v9866_v50 = vmax.f32 %v629_v55, 0.0  ;;  %v627_v20 = vadd.f32 %v9750_v16, %v9864_v57 }
 0x184   : > { %982 = vrot.lane.b32.xlu0 %v9768_v53, %s8710_s13  ;;  %1240 = vrot.lane.b32.xlu1 %v9776_v40, %s8713_s18  ;;  %v9898_v33 = vmax.f32 %v627_v20, 0.0 }
 0x188   : > { %1105 = vrot.lane.b32.xlu0 %v9768_v53, %s8709_s26  ;;  %1369 = vrot.lane.b32.xlu1 %v9776_v40, %s8714_s19 }
 0x18b   : > { %v9868_v0 = vpop.f32.mrf.mxu0 }
 0x18c   : > { %1234 = vrot.lane.b32.xlu0 %v9768_v53, %s8713_s18  ;;  %1494 = vrot.lane.b32.xlu1 %v9776_v40, %s8715_s20  ;;  %14841 = vst [vmem:[#allocation48_spill] sm:$0xff] %v9868_v0  ;;  %v632_v25 = vadd.f32 %v9868_v0, %v9750_v16 }
 0x18d   : > { %v9892_v37 = vpop.f32.mrf.mxu0 }
 0x18e   : > { %v9880_v3 = vmax.f32 %v632_v25, 0.0  ;;  %14842 = vst [vmem:[#allocation49_spill] sm:$0xff] %v9892_v37  ;;  %v630_v6 = vadd.f32 %v9750_v16, %v9892_v37 }
 0x18f   : > { %v9912_v2 = vpop.f32.mrf.mxu0 }
 0x190   : > { %1363 = vrot.lane.b32.xlu0 %v9768_v53, %s8714_s19  ;;  %832 = vrot.lane.b32.xlu1 %v9820_v32, %s8712_s17  ;;  %v9906_v30 = vmax.f32 %v630_v6, 0.0  ;;  %14843 = vst [vmem:[#allocation50_spill] sm:$0xff] %v9912_v2  ;;  %v633_v17 = vadd.f32 %v9912_v2, %v9750_v16 }
 0x191   : > { %v9918_v55 = vpop.f32.mrf.mxu0 }
 0x192   : > { %14844 = vst [vmem:[#allocation51_spill] sm:$0xff] %v9918_v55  ;;  %v9944_v56 = vmax.f32 %v633_v17, 0.0 }
 0x194   : > { %984 = vrot.lane.b32.xlu1 %v9820_v32, %s8710_s13  ;;  %994 = vrot.lane.b32.xlu0 %v9828_v7, %s8710_s13 }
 0x198   : > { %1107 = vrot.lane.b32.xlu1 %v9820_v32, %s8709_s26  ;;  %1117 = vrot.lane.b32.xlu0 %v9828_v7, %s8709_s26 }
 0x19b   : > { %v9920_v25 = vpop.f32.mrf.mxu0 }
 0x19c   : > { %1236 = vrot.lane.b32.xlu1 %v9820_v32, %s8713_s18  ;;  %1246 = vrot.lane.b32.xlu0 %v9828_v7, %s8713_s18  ;;  %14845 = vst [vmem:[#allocation52_spill] sm:$0xff] %v9920_v25  ;;  %v636_v20 = vadd.f32 %v9920_v25, %v9750_v16 }
 0x19d   : > { %v9946_v14 = vpop.f32.mrf.mxu0 }
 0x19e   : > { %v9932_v6 = vmax.f32 %v636_v20, 0.0  ;;  %14846 = vst [vmem:[#allocation53_spill] sm:$0xff] %v9946_v14  ;;  %v9952_v20 = vpop.permute.xlu1 %692  ;;  %v634_v21 = vadd.f32 %v9750_v16, %v9946_v14 }
 0x19f   : > { %v9962_v62 = vpop.f32.mrf.mxu0 }
 0x1a0   : > { %1365 = vrot.lane.b32.xlu1 %v9820_v32, %s8714_s19  ;;  %1375 = vrot.lane.b32.xlu0 %v9828_v7, %s8714_s19  ;;  %v9960_v17 = vmax.f32 %v634_v21, 0.0  ;;  %14847 = vst [vmem:[#allocation54_spill] sm:$0xff] %v9962_v62 }
 0x1a1   : > { %v9972_v35 = vpop.f32.mrf.mxu0 }
 0x1a2   : > { %14848 = vst [vmem:[#allocation55_spill] sm:$0xff] %v9972_v35 }
 0x1a4   : > { %842 = vrot.lane.b32.xlu1 %v9828_v7, %s8712_s17  ;;  %990 = vrot.lane.b32.xlu0 %v9850_v60, %s8710_s13 }
 0x1a7   : > { %v9983_v51 = vpop.f32.mrf.mxu0 }
 0x1a8   : > { %1113 = vrot.lane.b32.xlu0 %v9850_v60, %s8709_s26  ;;  %838 = vrot.lane.b32.xlu1 %v9850_v60, %s8712_s17  ;;  %14849 = vst [vmem:[#allocation56_spill] sm:$0xff] %v9983_v51 }
 0x1a9   : > { %v10014_v15 = vpop.f32.mrf.mxu0 }
 0x1aa   : > { %14850 = vst [vmem:[#allocation57_spill] sm:$0xff] %v10014_v15 }
 0x1ab   : > { %v10030_v9 = vpop.f32.mrf.mxu0 }
 0x1ac   : > { %1242 = vrot.lane.b32.xlu0 %v9850_v60, %s8713_s18  ;;  %844 = vrot.lane.b32.xlu1 %v9866_v50, %s8712_s17  ;;  %14851 = vst [vmem:[#allocation58_spill] sm:$0xff] %v10030_v9  ;;  %v641_v43 = vadd.f32 %v10030_v9, %v9750_v16 }
 0x1ad   : > { %v10042_v28 = vpop.f32.mrf.mxu0 }
 0x1ae   : > { %14852 = vst [vmem:[#allocation59_spill] sm:$0xff] %v10042_v28 }
 0x1b0   : > { %1371 = vrot.lane.b32.xlu0 %v9850_v60, %s8714_s19  ;;  %996 = vrot.lane.b32.xlu1 %v9866_v50, %s8710_s13 }
 0x1b4   : > { %1119 = vrot.lane.b32.xlu1 %v9866_v50, %s8709_s26  ;;  %1002 = vrot.lane.b32.xlu0 %v9880_v3, %s8710_s13 }
 0x1b8   : > { %1248 = vrot.lane.b32.xlu1 %v9866_v50, %s8713_s18  ;;  %1125 = vrot.lane.b32.xlu0 %v9880_v3, %s8709_s26 }
 0x1bc   : > { %1377 = vrot.lane.b32.xlu1 %v9866_v50, %s8714_s19  ;;  %1254 = vrot.lane.b32.xlu0 %v9880_v3, %s8713_s18 }
 0x1c0   : > { %840 = vrot.lane.b32.xlu1 %v9898_v33, %s8712_s17  ;;  %1383 = vrot.lane.b32.xlu0 %v9880_v3, %s8714_s19 }
 0x1c4   : > { %992 = vrot.lane.b32.xlu1 %v9898_v33, %s8710_s13  ;;  %998 = vrot.lane.b32.xlu0 %v9906_v30, %s8710_s13 }
 0x1c8   : > { %1115 = vrot.lane.b32.xlu1 %v9898_v33, %s8709_s26  ;;  %1121 = vrot.lane.b32.xlu0 %v9906_v30, %s8709_s26 }
 0x1cc   : > { %1244 = vrot.lane.b32.xlu1 %v9898_v33, %s8713_s18  ;;  %1250 = vrot.lane.b32.xlu0 %v9906_v30, %s8713_s18 }
 0x1d0   : > { %1373 = vrot.lane.b32.xlu1 %v9898_v33, %s8714_s19  ;;  %1379 = vrot.lane.b32.xlu0 %v9906_v30, %s8714_s19 }
 0x1d4   : > { %850 = vrot.lane.b32.xlu1 %v9880_v3, %s8712_s17  ;;  %1010 = vrot.lane.b32.xlu0 %v9932_v6, %s8710_s13 }
 0x1d8   : > { %846 = vrot.lane.b32.xlu1 %v9906_v30, %s8712_s17  ;;  %1133 = vrot.lane.b32.xlu0 %v9932_v6, %s8709_s26 }
 0x1dc   : > { %852 = vrot.lane.b32.xlu1 %v9944_v56, %s8712_s17  ;;  %1262 = vrot.lane.b32.xlu0 %v9932_v6, %s8713_s18 }
 0x1e0   : > { %1004 = vrot.lane.b32.xlu1 %v9944_v56, %s8710_s13  ;;  %1391 = vrot.lane.b32.xlu0 %v9932_v6, %s8714_s19 }
 0x1e2   : > { %v987_v61 = vpop.permute.xlu0 %986  ;;  %v835_v19 = vpop.permute.xlu1 %834 }
 0x1e3   : > { %923 = vst.msk [vmem:[#allocation2 + $0x32] sm:$0xff] %vm399_vm3, %v835_v19  ;;  %v631_v19 = vadd.f32 %v9750_v16, %v9918_v55 }
 0x1e4   : > { %954 = vst.msk [vmem:[#allocation2 + $0x31] sm:$0xff] %vm951_vm15, %v9758_v39  ;;  %1127 = vrot.lane.b32.xlu1 %v9944_v56, %s8709_s26  ;;  %1006 = vrot.lane.b32.xlu0 %v9960_v17, %s8710_s13 }
 0x1e5   : > { %1075 = vst.msk [vmem:[#allocation2 + $0x30] sm:$0xff] %vm1072_vm10, %v987_v61 }
 0x1e6   : > { %v1110_v21 = vpop.permute.xlu0 %1109  ;;  %v831_v23 = vpop.permute.xlu1 %830 }
 0x1e7   : > { %921 = vst.msk [vmem:[#allocation2 + $0x1a] sm:$0xff] %vm399_vm3, %v831_v23  ;;  %v9992_v23 = vmax.f32 %v631_v19, 0.0 }
 0x1e8   : > { %952 = vst.msk [vmem:[#allocation2 + $0x19] sm:$0xff] %vm951_vm15, %v9768_v53  ;;  %1256 = vrot.lane.b32.xlu1 %v9944_v56, %s8713_s18  ;;  %1129 = vrot.lane.b32.xlu0 %v9960_v17, %s8709_s26  ;;  %v640_v53 = vadd.f32 %v9983_v51, %v9750_v16 }
 0x1ea   : > { %v1239_v54 = vpop.permute.xlu0 %1238  ;;  %v837_v61 = vpop.permute.xlu1 %836 }
 0x1eb   : > { %924 = vst.msk [vmem:[#allocation2 + $0x3a] sm:$0xff] %vm399_vm3, %v837_v61  ;;  %v10001_v61 = vmax.f32 %v640_v53, 0.0 }
 0x1ec   : > { %955 = vst.msk [vmem:[#allocation2 + $0x39] sm:$0xff] %vm951_vm15, %v9776_v40  ;;  %1385 = vrot.lane.b32.xlu1 %v9944_v56, %s8714_s19  ;;  %1258 = vrot.lane.b32.xlu0 %v9960_v17, %s8713_s18 }
 0x1ee   : > { %v1368_v41 = vpop.permute.xlu0 %1367  ;;  %v989_v63 = vpop.permute.xlu1 %988 }
 0x1ef   : > { %1076 = vst.msk [vmem:[#allocation2 + $0x38] sm:$0xff] %vm1072_vm10, %v989_v63 }
 0x1f0   : > { %848 = vrot.lane.b32.xlu1 %v9992_v23, %s8712_s17  ;;  %1387 = vrot.lane.b32.xlu0 %v9960_v17, %s8714_s19 }
 0x1f2   : > { %v10003_v42 = vpop.permute.xlu0 %1492  ;;  %v1112_v58 = vpop.permute.xlu1 %1111 }
 0x1f4   : > { %1000 = vrot.lane.b32.xlu1 %v9992_v23, %s8710_s13  ;;  %1018 = vrot.lane.b32.xlu0 %v10001_v61, %s8710_s13 }
 0x1f6   : > { %v983_v19 = vpop.permute.xlu0 %982  ;;  %v1241_v11 = vpop.permute.xlu1 %1240 }
 0x1f7   : > { %1073 = vst.msk [vmem:[#allocation2 + $0x18] sm:$0xff] %vm1072_vm10, %v983_v19  ;;  %v638_v19 = vadd.f32 %v9750_v16, %v10014_v15 }
 0x1f8   : > { %1123 = vrot.lane.b32.xlu1 %v9992_v23, %s8709_s26  ;;  %1141 = vrot.lane.b32.xlu0 %v10001_v61, %s8709_s26 }
 0x1fa   : > { %v1106_v63 = vpop.permute.xlu0 %1105  ;;  %v1370_v53 = vpop.permute.xlu1 %1369 }
 0x1fb   : > { %1202 = vst.msk [vmem:[#allocation2 + $0x2] sm:$0xff] %vm1201_vm2, %v1106_v63  ;;  %v10028_v63 = vmax.f32 %v638_v19, 0.0 }
 0x1fc   : > { %1252 = vrot.lane.b32.xlu1 %v9992_v23, %s8713_s18  ;;  %1270 = vrot.lane.b32.xlu0 %v10001_v61, %s8713_s18 }
 0x1fe   : > { %v1235_v34 = vpop.permute.xlu0 %1234  ;;  %v1495_v38 = vpop.permute.xlu1 %1494 }
 0x1ff   : > { %1331 = vst.msk [vmem:[#allocation2 + $0x1] sm:$0xff] %vm1330_vm5, %v1235_v34  ;;  %v637_v34 = vadd.f32 %v9962_v62, %v9750_v16 }
 0x200   : > { %1381 = vrot.lane.b32.xlu1 %v9992_v23, %s8714_s19  ;;  %1399 = vrot.lane.b32.xlu0 %v10001_v61, %s8714_s19 }
 0x202   : > { %v1364_v24 = vpop.permute.xlu0 %1363  ;;  %v833_v26 = vpop.permute.xlu1 %832 }
 0x203   : > { %1460 = vst.msk [vmem:[#allocation2] sm:$0xff] %vm1459_vm6, %v1364_v24 }
 0x204   : > { %922 = vst.msk [vmem:[#allocation2 + $0x22] sm:$0xff] %vm399_vm3, %v833_v26  ;;  %858 = vrot.lane.b32.xlu1 %v9932_v6, %s8712_s17  ;;  %1014 = vrot.lane.b32.xlu0 %v10028_v63, %s8710_s13  ;;  %v10053_v26 = vmax.f32 %v637_v34, 0.0 }
 0x205   : > { %953 = vst.msk [vmem:[#allocation2 + $0x21] sm:$0xff] %vm951_vm15, %v9820_v32 }
 0x206   : > { %v985_v19 = vpop.permute.xlu1 %984  ;;  %v995_v31 = vpop.permute.xlu0 %994 }
 0x207   : > { %1074 = vst.msk [vmem:[#allocation2 + $0x20] sm:$0xff] %vm1072_vm10, %v985_v19 }
 0x208   : > { %1204 = vst.msk [vmem:[#allocation2 + $0x1a] sm:$0xff] %vm1201_vm2, %v1110_v21  ;;  %1205 = vst.msk [vmem:[#allocation2 + $0x22] sm:$0xff] %vm1201_vm2, %v1112_v58  ;;  %854 = vrot.lane.b32.xlu1 %v9960_v17, %s8712_s17  ;;  %1137 = vrot.lane.b32.xlu0 %v10028_v63, %s8709_s26  ;;  %v10059_v58 = vpop.f32.mrf.mxu0 }
 0x209   : > { %1333 = vst.msk [vmem:[#allocation2 + $0x19] sm:$0xff] %vm1330_vm5, %v1239_v54  ;;  %1334 = vst.msk [vmem:[#allocation2 + $0x21] sm:$0xff] %vm1330_vm5, %v1241_v11  ;;  %v644_v54 = vadd.f32 %v10059_v58, %v9750_v16 }
 0x20a   : > { %1462 = vst.msk [vmem:[#allocation2 + $0x18] sm:$0xff] %vm1459_vm6, %v1368_v41  ;;  %1463 = vst.msk [vmem:[#allocation2 + $0x20] sm:$0xff] %vm1459_vm6, %v1370_v53  ;;  %v1108_v24 = vpop.permute.xlu1 %1107  ;;  %v10057_v32 = vpop.permute.xlu0 %1117 }
 0x20b   : > { %14853 = vst [vmem:[#allocation60_spill] sm:$0xff] %v10059_v58  ;;  %1203 = vst.msk [vmem:[#allocation2 + $0xa] sm:$0xff] %vm1201_vm2, %v1108_v24  ;;  %v10075_v21 = vmax.f32 %v644_v54, 0.0 }
 0x20c   : > { %860 = vrot.lane.b32.xlu1 %v10053_v26, %s8712_s17  ;;  %1266 = vrot.lane.b32.xlu0 %v10028_v63, %s8713_s18 }
 0x20e   : > { %v1237_v11 = vpop.permute.xlu1 %1236  ;;  %v10068_v41 = vpop.permute.xlu0 %1246 }
 0x20f   : > { %1332 = vst.msk [vmem:[#allocation2 + $0x9] sm:$0xff] %vm1330_vm5, %v1237_v11  ;;  %v10097_v11 = vpop.f32.mrf.mxu0 }
 0x210   : > { %1012 = vrot.lane.b32.xlu1 %v10053_v26, %s8710_s13  ;;  %1395 = vrot.lane.b32.xlu0 %v10028_v63, %s8714_s19  ;;  %14854 = vst [vmem:[#allocation61_spill] sm:$0xff] %v10097_v11 }
 0x211   : > { %v10122_v4 = vpop.f32.mrf.mxu0 }
 0x212   : > { %v1366_v53 = vpop.permute.xlu1 %1365  ;;  %v10077_v34 = vpop.permute.xlu0 %1375  ;;  %14855 = vst [vmem:[#allocation62_spill] sm:$0xff] %v10122_v4 }
 0x213   : > { %1461 = vst.msk [vmem:[#allocation2 + $0x8] sm:$0xff] %vm1459_vm6, %v1366_v53  ;;  %v642_v53 = vadd.f32 %v9750_v16, %v10097_v11  ;;  %v10130_v48 = vpop.f32.mrf.mxu0 }
 0x214   : > { %1135 = vrot.lane.b32.xlu1 %v10053_v26, %s8709_s26  ;;  %1026 = vrot.lane.b32.xlu0 %v10075_v21, %s8710_s13  ;;  %1583 = vst.msk [vmem:[#allocation2 + $0x2] sm:$0xff] %vm1582_vm7, %v10003_v42  ;;  %1584 = vst.msk [vmem:[#allocation2 + $0xa] sm:$0xff] %vm1582_vm7, %v1495_v38  ;;  %v635_v42 = vadd.f32 %v9750_v16, %v9972_v35 }
 0x215   : > { %14856 = vst [vmem:[#allocation63_spill] sm:$0xff] %v10130_v48 }
 0x216   : > { %v843_v19 = vpop.permute.xlu1 %842  ;;  %v991_v24 = vpop.permute.xlu0 %990 }
 0x217   : > { %927 = vst.msk [vmem:[#allocation2 + $0x62] sm:$0xff] %vm399_vm3, %v843_v19 }
 0x218   : > { %958 = vst.msk [vmem:[#allocation2 + $0x61] sm:$0xff] %vm951_vm15, %v9828_v7  ;;  %1264 = vrot.lane.b32.xlu1 %v10053_v26, %s8713_s18  ;;  %1149 = vrot.lane.b32.xlu0 %v10075_v21, %s8709_s26 }
 0x219   : > { %1079 = vst.msk [vmem:[#allocation2 + $0x60] sm:$0xff] %vm1072_vm10, %v995_v31  ;;  %v10108_v31 = vmax.f32 %v635_v42, 0.0 }
 0x21a   : > { %v1114_v54 = vpop.permute.xlu0 %1113  ;;  %v839_v38 = vpop.permute.xlu1 %838 }
 0x21b   : > { %1206 = vst.msk [vmem:[#allocation2 + $0x32] sm:$0xff] %vm1201_vm2, %v1114_v54 }
 0x21c   : > { %925 = vst.msk [vmem:[#allocation2 + $0x4a] sm:$0xff] %vm399_vm3, %v839_v38  ;;  %1393 = vrot.lane.b32.xlu1 %v10053_v26, %s8714_s19  ;;  %1278 = vrot.lane.b32.xlu0 %v10075_v21, %s8713_s18 }
 0x21d   : > { %956 = vst.msk [vmem:[#allocation2 + $0x49] sm:$0xff] %vm951_vm15, %v9850_v60 }
 0x21e   : > { %1077 = vst.msk [vmem:[#allocation2 + $0x48] sm:$0xff] %vm1072_vm10, %v991_v24  ;;  %v1243_v19 = vpop.permute.xlu0 %1242  ;;  %v845_v54 = vpop.permute.xlu1 %844  ;;  %v10120_v24 = vmax.f32 %v642_v53, 0.0 }
 0x21f   : > { %1335 = vst.msk [vmem:[#allocation2 + $0x31] sm:$0xff] %vm1330_vm5, %v1243_v19 }
 0x220   : > { %928 = vst.msk [vmem:[#allocation2 + $0x6a] sm:$0xff] %vm399_vm3, %v845_v54  ;;  %856 = vrot.lane.b32.xlu1 %v10108_v31, %s8712_s17  ;;  %1407 = vrot.lane.b32.xlu0 %v10075_v21, %s8714_s19 }
 0x221   : > { %959 = vst.msk [vmem:[#allocation2 + $0x69] sm:$0xff] %vm951_vm15, %v9866_v50 }
 0x222   : > { %v1372_v42 = vpop.permute.xlu0 %1371  ;;  %v997_v38 = vpop.permute.xlu1 %996 }
 0x223   : > { %1464 = vst.msk [vmem:[#allocation2 + $0x30] sm:$0xff] %vm1459_vm6, %v1372_v42 }
 0x224   : > { %1080 = vst.msk [vmem:[#allocation2 + $0x68] sm:$0xff] %vm1072_vm10, %v997_v38  ;;  %1008 = vrot.lane.b32.xlu1 %v10108_v31, %s8710_s13  ;;  %1022 = vrot.lane.b32.xlu0 %v10120_v24, %s8710_s13  ;;  %v10138_v38 = vpop.f32.mrf.mxu0 }
 0x225   : > { %14857 = vst [vmem:[#allocation64_spill] sm:$0xff] %v10138_v38  ;;  %v648_v13 = vadd.f32 %v10138_v38, %v9750_v16 }
 0x226   : > { %v1120_v19 = vpop.permute.xlu1 %1119  ;;  %v1003_v54 = vpop.permute.xlu0 %1002 }
 0x227   : > { %v10152_v52 = vmax.f32 %v648_v13, 0.0 }
 0x228   : > { %1131 = vrot.lane.b32.xlu1 %v10108_v31, %s8709_s26  ;;  %1145 = vrot.lane.b32.xlu0 %v10120_v24, %s8709_s26 }
 0x22a   : > { %v1249_v53 = vpop.permute.xlu1 %1248  ;;  %v10136_v42 = vpop.permute.xlu0 %1125 }
 0x22c   : > { %1260 = vrot.lane.b32.xlu1 %v10108_v31, %s8713_s18  ;;  %1274 = vrot.lane.b32.xlu0 %v10120_v24, %s8713_s18 }
 0x22e   : > { %v1378_v12 = vpop.permute.xlu1 %1377  ;;  %v10146_v10 = vpop.permute.xlu0 %1254 }
 0x230   : > { %1389 = vrot.lane.b32.xlu1 %v10108_v31, %s8714_s19  ;;  %1403 = vrot.lane.b32.xlu0 %v10120_v24, %s8714_s19 }
 0x232   : > { %v841_v46 = vpop.permute.xlu1 %840  ;;  %v10154_v49 = vpop.permute.xlu0 %1383 }
 0x233   : > { %926 = vst.msk [vmem:[#allocation2 + $0x52] sm:$0xff] %vm399_vm3, %v841_v46  ;;  %v10176_v46 = vmax.f32 %v641_v43, 0.0 }
 0x234   : > { %957 = vst.msk [vmem:[#allocation2 + $0x51] sm:$0xff] %vm951_vm15, %v9898_v33  ;;  %866 = vrot.lane.b32.xlu1 %v10001_v61, %s8712_s17  ;;  %882 = vrot.lane.b32.xlu0 %v10152_v52, %s8712_s17 }
 0x236   : > { %v993_v59 = vpop.permute.xlu1 %992  ;;  %v999_v13 = vpop.permute.xlu0 %998 }
 0x237   : > { %1078 = vst.msk [vmem:[#allocation2 + $0x50] sm:$0xff] %vm1072_vm10, %v993_v59 }
 0x238   : > { %1208 = vst.msk [vmem:[#allocation2 + $0x4a] sm:$0xff] %vm1201_vm2, %v10057_v32  ;;  %1209 = vst.msk [vmem:[#allocation2 + $0x52] sm:$0xff] %vm1201_vm2, %v1120_v19  ;;  %862 = vrot.lane.b32.xlu1 %v10028_v63, %s8712_s17  ;;  %1034 = vrot.lane.b32.xlu0 %v10152_v52, %s8710_s13  ;;  %v10187_v19 = vpop.f32.mrf.mxu0 }
 0x239   : > { %1337 = vst.msk [vmem:[#allocation2 + $0x49] sm:$0xff] %vm1330_vm5, %v10068_v41  ;;  %1338 = vst.msk [vmem:[#allocation2 + $0x51] sm:$0xff] %vm1330_vm5, %v1249_v53 }
 0x23a   : > { %1466 = vst.msk [vmem:[#allocation2 + $0x48] sm:$0xff] %vm1459_vm6, %v10077_v34  ;;  %1467 = vst.msk [vmem:[#allocation2 + $0x50] sm:$0xff] %vm1459_vm6, %v1378_v12  ;;  %v1116_v59 = vpop.permute.xlu1 %1115  ;;  %v1122_v32 = vpop.permute.xlu0 %1121  ;;  %v646_v12 = vadd.f32 %v9750_v16, %v10187_v19 }
 0x23b   : > { %1207 = vst.msk [vmem:[#allocation2 + $0x3a] sm:$0xff] %vm1201_vm2, %v1116_v59  ;;  %1210 = vst.msk [vmem:[#allocation2 + $0x62] sm:$0xff] %vm1201_vm2, %v1122_v32 }
 0x23c   : > { %868 = vrot.lane.b32.xlu1 %v10176_v46, %s8712_s17  ;;  %1157 = vrot.lane.b32.xlu0 %v10152_v52, %s8709_s26  ;;  %14858 = vst [vmem:[#allocation65_spill] sm:$0xff] %v10187_v19  ;;  %v10203_v59 = vmax.f32 %v646_v12, 0.0  ;;  %v639_v12 = vadd.f32 %v9750_v16, %v10042_v28 }
 0x23e   : > { %v1245_v41 = vpop.permute.xlu1 %1244  ;;  %v1251_v43 = vpop.permute.xlu0 %1250 }
 0x23f   : > { %1336 = vst.msk [vmem:[#allocation2 + $0x39] sm:$0xff] %vm1330_vm5, %v1245_v41  ;;  %1339 = vst.msk [vmem:[#allocation2 + $0x61] sm:$0xff] %vm1330_vm5, %v1251_v43  ;;  %v10207_v43 = vpop.f32.mrf.mxu0 }
 0x240   : > { %1020 = vrot.lane.b32.xlu1 %v10176_v46, %s8710_s13  ;;  %1286 = vrot.lane.b32.xlu0 %v10152_v52, %s8713_s18  ;;  %14859 = vst [vmem:[#allocation66_spill] sm:$0xff] %v10207_v43 }
 0x241   : > { %v10221_v8 = vpop.f32.mrf.mxu0 }
 0x242   : > { %v1374_v34 = vpop.permute.xlu1 %1373  ;;  %v1380_v53 = vpop.permute.xlu0 %1379  ;;  %14860 = vst [vmem:[#allocation67_spill] sm:$0xff] %v10221_v8 }
 0x243   : > { %1465 = vst.msk [vmem:[#allocation2 + $0x38] sm:$0xff] %vm1459_vm6, %v1374_v34  ;;  %1468 = vst.msk [vmem:[#allocation2 + $0x60] sm:$0xff] %vm1459_vm6, %v1380_v53  ;;  %v10235_v29 = vpop.f32.mrf.mxu0 }
 0x244   : > { %1143 = vrot.lane.b32.xlu1 %v10176_v46, %s8709_s26  ;;  %1415 = vrot.lane.b32.xlu0 %v10152_v52, %s8714_s19  ;;  %14861 = vst [vmem:[#allocation68_spill] sm:$0xff] %v10235_v29 }
 0x246   : > { %v851_v32 = vpop.permute.xlu1 %850  ;;  %v10205_v41 = vpop.permute.xlu0 %1010 }
 0x247   : > { %931 = vst.msk [vmem:[#allocation2 + $0x92] sm:$0xff] %vm399_vm3, %v851_v32 }
 0x248   : > { %962 = vst.msk [vmem:[#allocation2 + $0x91] sm:$0xff] %vm951_vm15, %v9880_v3  ;;  %1272 = vrot.lane.b32.xlu1 %v10176_v46, %s8713_s18  ;;  %1030 = vrot.lane.b32.xlu0 %v10203_v59, %s8710_s13 }
 0x249   : > { %1083 = vst.msk [vmem:[#allocation2 + $0x90] sm:$0xff] %vm1072_vm10, %v1003_v54  ;;  %v10231_v54 = vmax.f32 %v639_v12, 0.0 }
 0x24a   : > { %v847_v34 = vpop.permute.xlu1 %846  ;;  %v10219_v53 = vpop.permute.xlu0 %1133 }
 0x24b   : > { %929 = vst.msk [vmem:[#allocation2 + $0x7a] sm:$0xff] %vm399_vm3, %v847_v34 }
 0x24c   : > { %960 = vst.msk [vmem:[#allocation2 + $0x79] sm:$0xff] %vm951_vm15, %v9906_v30  ;;  %1401 = vrot.lane.b32.xlu1 %v10176_v46, %s8714_s19  ;;  %1153 = vrot.lane.b32.xlu0 %v10203_v59, %s8709_s26 }
 0x24d   : > { %1081 = vst.msk [vmem:[#allocation2 + $0x78] sm:$0xff] %vm1072_vm10, %v999_v13  ;;  %v652_v13 = vadd.f32 %v10235_v29, %v9750_v16 }
 0x24e   : > { %v853_v32 = vpop.permute.xlu1 %852  ;;  %v10233_v47 = vpop.permute.xlu0 %1262 }
 0x24f   : > { %932 = vst.msk [vmem:[#allocation2 + $0x9a] sm:$0xff] %vm399_vm3, %v853_v32  ;;  %v10253_v32 = vmax.f32 %v652_v13, 0.0 }
 0x250   : > { %963 = vst.msk [vmem:[#allocation2 + $0x99] sm:$0xff] %vm951_vm15, %v9944_v56  ;;  %864 = vrot.lane.b32.xlu1 %v10231_v54, %s8712_s17  ;;  %1282 = vrot.lane.b32.xlu0 %v10203_v59, %s8713_s18 }
 0x252   : > { %v1005_v12 = vpop.permute.xlu1 %1004  ;;  %v10246_v34 = vpop.permute.xlu0 %1391 }
 0x253   : > { %1084 = vst.msk [vmem:[#allocation2 + $0x98] sm:$0xff] %vm1072_vm10, %v1005_v12  ;;  %v10261_v12 = vpop.f32.mrf.mxu0 }
 0x254   : > { %1016 = vrot.lane.b32.xlu1 %v10231_v54, %s8710_s13  ;;  %1411 = vrot.lane.b32.xlu0 %v10203_v59, %s8714_s19  ;;  %14862 = vst [vmem:[#allocation69_spill] sm:$0xff] %v10261_v12  ;;  %v650_v13 = vadd.f32 %v9750_v16, %v10261_v12 }
 0x256   : > { %v1128_v27 = vpop.permute.xlu1 %1127  ;;  %v10255_v9 = vpop.permute.xlu0 %1006 }
 0x258   : > { %1139 = vrot.lane.b32.xlu1 %v10231_v54, %s8709_s26  ;;  %1165 = vrot.lane.b32.xlu0 %v10253_v32, %s8709_s26 }
 0x25a   : > { %v1257_v29 = vpop.permute.xlu1 %1256  ;;  %v1130_v28 = vpop.permute.xlu0 %1129 }
 0x25b   : > { %1214 = vst.msk [vmem:[#allocation2 + $0x92] sm:$0xff] %vm1201_vm2, %v1130_v28  ;;  %v10275_v28 = vmax.f32 %v650_v13, 0.0 }
 0x25c   : > { %1268 = vrot.lane.b32.xlu1 %v10231_v54, %s8713_s18  ;;  %1294 = vrot.lane.b32.xlu0 %v10253_v32, %s8713_s18 }
 0x25e   : > { %v1386_v62 = vpop.permute.xlu1 %1385  ;;  %v1259_v35 = vpop.permute.xlu0 %1258 }
 0x25f   : > { %1343 = vst.msk [vmem:[#allocation2 + $0x91] sm:$0xff] %vm1330_vm5, %v1259_v35  ;;  %v645_v35 = vadd.f32 %v10122_v4, %v9750_v16 }
 0x260   : > { %1397 = vrot.lane.b32.xlu1 %v10231_v54, %s8714_s19  ;;  %1423 = vrot.lane.b32.xlu0 %v10253_v32, %s8714_s19 }
 0x262   : > { %v849_v2 = vpop.permute.xlu1 %848  ;;  %v1388_v55 = vpop.permute.xlu0 %1387 }
 0x263   : > { %930 = vst.msk [vmem:[#allocation2 + $0x82] sm:$0xff] %vm399_vm3, %v849_v2  ;;  %v10300_v2 = vmax.f32 %v645_v35, 0.0 }
 0x264   : > { %1472 = vst.msk [vmem:[#allocation2 + $0x90] sm:$0xff] %vm1459_vm6, %v1388_v55  ;;  %874 = vrot.lane.b32.xlu1 %v10075_v21, %s8712_s17  ;;  %886 = vrot.lane.b32.xlu0 %v10275_v28, %s8712_s17 }
 0x265   : > { %961 = vst.msk [vmem:[#allocation2 + $0x81] sm:$0xff] %vm951_vm15, %v9992_v23 }
 0x266   : > { %v1001_v13 = vpop.permute.xlu1 %1000  ;;  %v10287_v12 = vpop.permute.xlu0 %1018 }
 0x267   : > { %1082 = vst.msk [vmem:[#allocation2 + $0x80] sm:$0xff] %vm1072_vm10, %v1001_v13  ;;  %v643_v13 = vadd.f32 %v9750_v16, %v10130_v48 }
 0x268   : > { %1212 = vst.msk [vmem:[#allocation2 + $0x7a] sm:$0xff] %vm1201_vm2, %v10136_v42  ;;  %1213 = vst.msk [vmem:[#allocation2 + $0x82] sm:$0xff] %vm1201_vm2, %v1128_v27  ;;  %870 = vrot.lane.b32.xlu1 %v10120_v24, %s8712_s17  ;;  %1038 = vrot.lane.b32.xlu0 %v10275_v28, %s8710_s13 }
 0x269   : > { %1341 = vst.msk [vmem:[#allocation2 + $0x79] sm:$0xff] %vm1330_vm5, %v10146_v10  ;;  %1342 = vst.msk [vmem:[#allocation2 + $0x81] sm:$0xff] %vm1330_vm5, %v1257_v29 }
 0x26a   : > { %1470 = vst.msk [vmem:[#allocation2 + $0x78] sm:$0xff] %vm1459_vm6, %v10154_v49  ;;  %1471 = vst.msk [vmem:[#allocation2 + $0x80] sm:$0xff] %vm1459_vm6, %v1386_v62  ;;  %v1124_v55 = vpop.permute.xlu1 %1123  ;;  %v10305_v27 = vpop.permute.xlu0 %1141 }
 0x26b   : > { %1211 = vst.msk [vmem:[#allocation2 + $0x6a] sm:$0xff] %vm1201_vm2, %v1124_v55 }
 0x26c   : > { %876 = vrot.lane.b32.xlu1 %v10300_v2, %s8712_s17  ;;  %1161 = vrot.lane.b32.xlu0 %v10275_v28, %s8709_s26 }
 0x26e   : > { %v1253_v10 = vpop.permute.xlu1 %1252  ;;  %v10312_v29 = vpop.permute.xlu0 %1270 }
 0x26f   : > { %1340 = vst.msk [vmem:[#allocation2 + $0x69] sm:$0xff] %vm1330_vm5, %v1253_v10 }
 0x270   : > { %1028 = vrot.lane.b32.xlu1 %v10300_v2, %s8710_s13  ;;  %1290 = vrot.lane.b32.xlu0 %v10275_v28, %s8713_s18 }
 0x272   : > { %v1382_v49 = vpop.permute.xlu1 %1381  ;;  %v10319_v62 = vpop.permute.xlu0 %1399 }
 0x273   : > { %1469 = vst.msk [vmem:[#allocation2 + $0x68] sm:$0xff] %vm1459_vm6, %v1382_v49 }
 0x274   : > { %1151 = vrot.lane.b32.xlu1 %v10300_v2, %s8709_s26  ;;  %1419 = vrot.lane.b32.xlu0 %v10275_v28, %s8714_s19 }
 0x276   : > { %v859_v42 = vpop.permute.xlu1 %858  ;;  %v10326_v35 = vpop.permute.xlu0 %1014 }
 0x277   : > { %935 = vst.msk [vmem:[#allocation2 + $0xc2] sm:$0xff] %vm399_vm3, %v859_v42 }
 0x278   : > { %966 = vst.msk [vmem:[#allocation2 + $0xc1] sm:$0xff] %vm951_vm15, %v9932_v6  ;;  %1280 = vrot.lane.b32.xlu1 %v10300_v2, %s8713_s18  ;;  %1496 = vrot.lane.b32.xlu0 %v9850_v60, %s8715_s20 }
 0x279   : > { %1087 = vst.msk [vmem:[#allocation2 + $0xc0] sm:$0xff] %vm1072_vm10, %v10205_v41  ;;  %v10348_v41 = vmax.f32 %v643_v13, 0.0 }
 0x27a   : > { %v855_v55 = vpop.permute.xlu1 %854  ;;  %v1138_v10 = vpop.permute.xlu0 %1137 }
 0x27b   : > { %933 = vst.msk [vmem:[#allocation2 + $0xaa] sm:$0xff] %vm399_vm3, %v855_v55 }
 0x27c   : > { %964 = vst.msk [vmem:[#allocation2 + $0xa9] sm:$0xff] %vm951_vm15, %v9960_v17  ;;  %1409 = vrot.lane.b32.xlu1 %v10300_v2, %s8714_s19  ;;  %1500 = vrot.lane.b32.xlu0 %v9828_v7, %s8715_s20 }
 0x27d   : > { %1085 = vst.msk [vmem:[#allocation2 + $0xa8] sm:$0xff] %vm1072_vm10, %v10255_v9 }
 0x27e   : > { %v861_v49 = vpop.permute.xlu1 %860  ;;  %v1267_v42 = vpop.permute.xlu0 %1266 }
 0x27f   : > { %936 = vst.msk [vmem:[#allocation2 + $0xca] sm:$0xff] %vm399_vm3, %v861_v49 }
 0x280   : > { %967 = vst.msk [vmem:[#allocation2 + $0xc9] sm:$0xff] %vm951_vm15, %v10053_v26  ;;  %872 = vrot.lane.b32.xlu1 %v10348_v41, %s8712_s17  ;;  %1504 = vrot.lane.b32.xlu0 %v9906_v30, %s8715_s20 }
 0x282   : > { %v1013_v55 = vpop.permute.xlu1 %1012  ;;  %v1396_v4 = vpop.permute.xlu0 %1395 }
 0x283   : > { %1088 = vst.msk [vmem:[#allocation2 + $0xc8] sm:$0xff] %vm1072_vm10, %v1013_v55  ;;  %v649_v55 = vadd.f32 %v10207_v43, %v9750_v16 }
 0x284   : > { %1218 = vst.msk [vmem:[#allocation2 + $0xc2] sm:$0xff] %vm1201_vm2, %v1138_v10  ;;  %1024 = vrot.lane.b32.xlu1 %v10348_v41, %s8710_s13  ;;  %1508 = vrot.lane.b32.xlu0 %v9880_v3, %s8715_s20 }
 0x285   : > { %1347 = vst.msk [vmem:[#allocation2 + $0xc1] sm:$0xff] %vm1330_vm5, %v1267_v42  ;;  %v10394_v57 = vmax.f32 %v649_v55, 0.0 }
 0x286   : > { %1476 = vst.msk [vmem:[#allocation2 + $0xc0] sm:$0xff] %vm1459_vm6, %v1396_v4  ;;  %v1136_v9 = vpop.permute.xlu1 %1135  ;;  %v10365_v13 = vpop.permute.xlu0 %1026 }
 0x288   : > { %1147 = vrot.lane.b32.xlu1 %v10348_v41, %s8709_s26  ;;  %1512 = vrot.lane.b32.xlu0 %v9960_v17, %s8715_s20 }
 0x28a   : > { %v1265_v10 = vpop.permute.xlu1 %1264  ;;  %v10371_v49 = vpop.permute.xlu0 %1149 }
 0x28c   : > { %1276 = vrot.lane.b32.xlu1 %v10348_v41, %s8713_s18  ;;  %1516 = vrot.lane.b32.xlu0 %v9932_v6, %s8715_s20 }
 0x28e   : > { %v1394_v42 = vpop.permute.xlu1 %1393  ;;  %v10377_v4 = vpop.permute.xlu0 %1278 }
 0x290   : > { %1405 = vrot.lane.b32.xlu1 %v10348_v41, %s8714_s19  ;;  %1520 = vrot.lane.b32.xlu0 %v10028_v63, %s8715_s20 }
 0x292   : > { %v857_v48 = vpop.permute.xlu1 %856  ;;  %v10385_v36 = vpop.permute.xlu0 %1407 }
 0x293   : > { %934 = vst.msk [vmem:[#allocation2 + $0xb2] sm:$0xff] %vm399_vm3, %v857_v48 }
 0x294   : > { %965 = vst.msk [vmem:[#allocation2 + $0xb1] sm:$0xff] %vm951_vm15, %v10108_v31  ;;  %878 = vrot.lane.b32.xlu1 %v10203_v59, %s8712_s17  ;;  %1524 = vrot.lane.b32.xlu0 %v10001_v61, %s8715_s20 }
 0x296   : > { %v1009_v44 = vpop.permute.xlu1 %1008  ;;  %v10396_v45 = vpop.permute.xlu0 %1022 }
 0x297   : > { %1086 = vst.msk [vmem:[#allocation2 + $0xb0] sm:$0xff] %vm1072_vm10, %v1009_v44 }
 0x298   : > { %1216 = vst.msk [vmem:[#allocation2 + $0xaa] sm:$0xff] %vm1201_vm2, %v10219_v53  ;;  %1217 = vst.msk [vmem:[#allocation2 + $0xb2] sm:$0xff] %vm1201_vm2, %v1136_v9  ;;  %884 = vrot.lane.b32.xlu1 %v10394_v57, %s8712_s17  ;;  %1528 = vrot.lane.b32.xlu0 %v10120_v24, %s8715_s20 }
 0x299   : > { %1345 = vst.msk [vmem:[#allocation2 + $0xa9] sm:$0xff] %vm1330_vm5, %v10233_v47  ;;  %1346 = vst.msk [vmem:[#allocation2 + $0xb1] sm:$0xff] %vm1330_vm5, %v1265_v10  ;;  %v647_v10 = vadd.f32 %v9750_v16, %v10221_v8 }
 0x29a   : > { %1474 = vst.msk [vmem:[#allocation2 + $0xa8] sm:$0xff] %vm1459_vm6, %v10246_v34  ;;  %1475 = vst.msk [vmem:[#allocation2 + $0xb0] sm:$0xff] %vm1459_vm6, %v1394_v42  ;;  %v1132_v48 = vpop.permute.xlu1 %1131  ;;  %v1146_v44 = vpop.permute.xlu0 %1145 }
 0x29b   : > { %1215 = vst.msk [vmem:[#allocation2 + $0x9a] sm:$0xff] %vm1201_vm2, %v1132_v48  ;;  %v10441_v48 = vmax.f32 %v647_v10, 0.0 }
 0x29c   : > { %1036 = vrot.lane.b32.xlu1 %v10394_v57, %s8710_s13  ;;  %1532 = vrot.lane.b32.xlu0 %v10075_v21, %s8715_s20 }
 0x29e   : > { %v1261_v53 = vpop.permute.xlu1 %1260  ;;  %v1275_v9 = vpop.permute.xlu0 %1274 }
 0x29f   : > { %1344 = vst.msk [vmem:[#allocation2 + $0x99] sm:$0xff] %vm1330_vm5, %v1261_v53 }
 0x2a0   : > { %1159 = vrot.lane.b32.xlu1 %v10394_v57, %s8709_s26  ;;  %1536 = vrot.lane.b32.xlu0 %v10203_v59, %s8715_s20 }
 0x2a2   : > { %v1390_v47 = vpop.permute.xlu1 %1389  ;;  %v1404_v34 = vpop.permute.xlu0 %1403 }
 0x2a3   : > { %1473 = vst.msk [vmem:[#allocation2 + $0x98] sm:$0xff] %vm1459_vm6, %v1390_v47 }
 0x2a4   : > { %1288 = vrot.lane.b32.xlu1 %v10394_v57, %s8713_s18  ;;  %1540 = vrot.lane.b32.xlu0 %v10152_v52, %s8715_s20 }
 0x2a6   : > { %v867_v42 = vpop.permute.xlu1 %866  ;;  %v883_v55 = vpop.permute.xlu0 %882 }
 0x2a7   : > { %939 = vst.msk [vmem:[#allocation2 + $0xf2] sm:$0xff] %vm399_vm3, %v867_v42  ;;  %947 = vst.msk [vmem:[#allocation2 + $0x152] sm:$0xff] %vm399_vm3, %v883_v55 }
 0x2a8   : > { %970 = vst.msk [vmem:[#allocation2 + $0xf1] sm:$0xff] %vm951_vm15, %v10001_v61  ;;  %978 = vst.msk [vmem:[#allocation2 + $0x151] sm:$0xff] %vm951_vm15, %v10152_v52  ;;  %1417 = vrot.lane.b32.xlu1 %v10394_v57, %s8714_s19  ;;  %1544 = vrot.lane.b32.xlu0 %v10275_v28, %s8715_s20 }
 0x2a9   : > { %1091 = vst.msk [vmem:[#allocation2 + $0xf0] sm:$0xff] %vm1072_vm10, %v10287_v12 }
 0x2aa   : > { %v863_v53 = vpop.permute.xlu1 %862  ;;  %v1035_v47 = vpop.permute.xlu0 %1034 }
 0x2ab   : > { %937 = vst.msk [vmem:[#allocation2 + $0xda] sm:$0xff] %vm399_vm3, %v863_v53 }
 0x2ac   : > { %1099 = vst.msk [vmem:[#allocation2 + $0x150] sm:$0xff] %vm1072_vm10, %v1035_v47  ;;  %880 = vrot.lane.b32.xlu1 %v10441_v48, %s8712_s17  ;;  %1548 = vrot.lane.b32.xlu0 %v10253_v32, %s8715_s20  ;;  %v10474_v47 = vpop.f32.mrf.mxu0 }
 0x2ad   : > { %968 = vst.msk [vmem:[#allocation2 + $0xd9] sm:$0xff] %vm951_vm15, %v10028_v63  ;;  %14863 = vst [vmem:[#allocation70_spill] sm:$0xff] %v10474_v47 }
 0x2ae   : > { %1089 = vst.msk [vmem:[#allocation2 + $0xd8] sm:$0xff] %vm1072_vm10, %v10326_v35  ;;  %v869_v12 = vpop.permute.xlu1 %868  ;;  %v10453_v10 = vpop.permute.xlu0 %1157 }
 0x2af   : > { %940 = vst.msk [vmem:[#allocation2 + $0xfa] sm:$0xff] %vm399_vm3, %v869_v12  ;;  %v10498_v38 = vpop.f32.mrf.mxu0 }
 0x2b0   : > { %971 = vst.msk [vmem:[#allocation2 + $0xf9] sm:$0xff] %vm951_vm15, %v10176_v46  ;;  %1032 = vrot.lane.b32.xlu1 %v10441_v48, %s8710_s13  ;;  %1613 = vrot.lane.b32.xlu0 %v9758_v39, %s8716_s21  ;;  %14864 = vst [vmem:[#allocation71_spill] sm:$0xff] %v10498_v38 }
 0x2b2   : > { %v1021_v42 = vpop.permute.xlu1 %1020  ;;  %v10462_v55 = vpop.permute.xlu0 %1286 }
 0x2b3   : > { %1092 = vst.msk [vmem:[#allocation2 + $0xf8] sm:$0xff] %vm1072_vm10, %v1021_v42 }
 0x2b4   : > { %1222 = vst.msk [vmem:[#allocation2 + $0xf2] sm:$0xff] %vm1201_vm2, %v1146_v44  ;;  %1155 = vrot.lane.b32.xlu1 %v10441_v48, %s8709_s26  ;;  %1617 = vrot.lane.b32.xlu0 %v9850_v60, %s8716_s21  ;;  %v653_v44 = vadd.f32 %v10474_v47, %v9750_v16 }
 0x2b5   : > { %1351 = vst.msk [vmem:[#allocation2 + $0xf1] sm:$0xff] %vm1330_vm5, %v1275_v9 }
 0x2b6   : > { %1480 = vst.msk [vmem:[#allocation2 + $0xf0] sm:$0xff] %vm1459_vm6, %v1404_v34  ;;  %v1144_v35 = vpop.permute.xlu1 %1143  ;;  %v10472_v53 = vpop.permute.xlu0 %1415  ;;  %v10488_v9 = vmax.f32 %v653_v44, 0.0  ;;  %v651_v44 = vadd.f32 %v9750_v16, %v10498_v38 }
 0x2b8   : > { %1284 = vrot.lane.b32.xlu1 %v10441_v48, %s8713_s18  ;;  %1621 = vrot.lane.b32.xlu0 %v9828_v7, %s8716_s21  ;;  %v10520_v16 = vmax.f32 %v651_v44, 0.0 }
 0x2ba   : > { %v1273_v12 = vpop.permute.xlu1 %1272  ;;  %v10482_v42 = vpop.permute.xlu0 %1030 }
 0x2bc   : > { %1413 = vrot.lane.b32.xlu1 %v10441_v48, %s8714_s19  ;;  %1625 = vrot.lane.b32.xlu0 %v9906_v30, %s8716_s21 }
 0x2be   : > { %v1402_v34 = vpop.permute.xlu1 %1401  ;;  %v10490_v43 = vpop.permute.xlu0 %1153 }
 0x2c0   : > { %1629 = vrot.lane.b32.xlu0 %v9880_v3, %s8716_s21  ;;  %1167 = vrot.lane.b32.xlu1 %v10488_v9, %s8709_s26 }
 0x2c2   : > { %v865_v47 = vpop.permute.xlu1 %864  ;;  %v10496_v8 = vpop.permute.xlu0 %1282 }
 0x2c3   : > { %938 = vst.msk [vmem:[#allocation2 + $0xe2] sm:$0xff] %vm399_vm3, %v865_v47 }
 0x2c4   : > { %969 = vst.msk [vmem:[#allocation2 + $0xe1] sm:$0xff] %vm951_vm15, %v10231_v54  ;;  %1633 = vrot.lane.b32.xlu0 %v9960_v17, %s8716_s21  ;;  %1296 = vrot.lane.b32.xlu1 %v10488_v9, %s8713_s18 }
 0x2c6   : > { %v1017_v19 = vpop.permute.xlu1 %1016  ;;  %v1412_v58 = vpop.permute.xlu0 %1411 }
 0x2c7   : > { %1090 = vst.msk [vmem:[#allocation2 + $0xe0] sm:$0xff] %vm1072_vm10, %v1017_v19 }
 0x2c8   : > { %1220 = vst.msk [vmem:[#allocation2 + $0xda] sm:$0xff] %vm1201_vm2, %v10305_v27  ;;  %1221 = vst.msk [vmem:[#allocation2 + $0xe2] sm:$0xff] %vm1201_vm2, %v1144_v35  ;;  %1637 = vrot.lane.b32.xlu0 %v9932_v6, %s8716_s21  ;;  %1425 = vrot.lane.b32.xlu1 %v10488_v9, %s8714_s19 }
 0x2c9   : > { %1349 = vst.msk [vmem:[#allocation2 + $0xd9] sm:$0xff] %vm1330_vm5, %v10312_v29  ;;  %1350 = vst.msk [vmem:[#allocation2 + $0xe1] sm:$0xff] %vm1330_vm5, %v1273_v12 }
 0x2ca   : > { %1478 = vst.msk [vmem:[#allocation2 + $0xd8] sm:$0xff] %vm1459_vm6, %v10319_v62  ;;  %1479 = vst.msk [vmem:[#allocation2 + $0xe0] sm:$0xff] %vm1459_vm6, %v1402_v34  ;;  %v1140_v19 = vpop.permute.xlu1 %1139  ;;  %v10525_v27 = vpop.permute.xlu0 %1165 }
 0x2cb   : > { %1219 = vst.msk [vmem:[#allocation2 + $0xca] sm:$0xff] %vm1201_vm2, %v1140_v19 }
 0x2cc   : > { %1641 = vrot.lane.b32.xlu0 %v10028_v63, %s8716_s21  ;;  %888 = vrot.lane.b32.xlu1 %v10520_v16, %s8712_s17 }
 0x2ce   : > { %v1269_v29 = vpop.permute.xlu1 %1268  ;;  %v10532_v35 = vpop.permute.xlu0 %1294 }
 0x2cf   : > { %1348 = vst.msk [vmem:[#allocation2 + $0xc9] sm:$0xff] %vm1330_vm5, %v1269_v29 }
 0x2d0   : > { %1645 = vrot.lane.b32.xlu0 %v10001_v61, %s8716_s21  ;;  %1040 = vrot.lane.b32.xlu1 %v10520_v16, %s8710_s13 }
 0x2d2   : > { %v1398_v62 = vpop.permute.xlu1 %1397  ;;  %v10539_v47 = vpop.permute.xlu0 %1423 }
 0x2d3   : > { %1477 = vst.msk [vmem:[#allocation2 + $0xc8] sm:$0xff] %vm1459_vm6, %v1398_v62 }
 0x2d4   : > { %1649 = vrot.lane.b32.xlu0 %v10120_v24, %s8716_s21  ;;  %1163 = vrot.lane.b32.xlu1 %v10520_v16, %s8709_s26 }
 0x2d6   : > { %v875_v12 = vpop.permute.xlu1 %874  ;;  %v887_v34 = vpop.permute.xlu0 %886 }
 0x2d7   : > { %943 = vst.msk [vmem:[#allocation2 + $0x122] sm:$0xff] %vm399_vm3, %v875_v12  ;;  %949 = vst.msk [vmem:[#allocation2 + $0x16a] sm:$0xff] %vm399_vm3, %v887_v34 }
 0x2d8   : > { %974 = vst.msk [vmem:[#allocation2 + $0x121] sm:$0xff] %vm951_vm15, %v10075_v21  ;;  %980 = vst.msk [vmem:[#allocation2 + $0x169] sm:$0xff] %vm951_vm15, %v10275_v28  ;;  %1653 = vrot.lane.b32.xlu0 %v10075_v21, %s8716_s21  ;;  %1292 = vrot.lane.b32.xlu1 %v10520_v16, %s8713_s18 }
 0x2d9   : > { %1095 = vst.msk [vmem:[#allocation2 + $0x120] sm:$0xff] %vm1072_vm10, %v10365_v13 }
 0x2da   : > { %v871_v44 = vpop.permute.xlu1 %870  ;;  %v1039_v19 = vpop.permute.xlu0 %1038 }
 0x2db   : > { %941 = vst.msk [vmem:[#allocation2 + $0x10a] sm:$0xff] %vm399_vm3, %v871_v44 }
 0x2dc   : > { %1101 = vst.msk [vmem:[#allocation2 + $0x168] sm:$0xff] %vm1072_vm10, %v1039_v19  ;;  %1657 = vrot.lane.b32.xlu0 %v10203_v59, %s8716_s21  ;;  %1421 = vrot.lane.b32.xlu1 %v10520_v16, %s8714_s19 }
 0x2dd   : > { %972 = vst.msk [vmem:[#allocation2 + $0x109] sm:$0xff] %vm951_vm15, %v10120_v24 }
 0x2de   : > { %1093 = vst.msk [vmem:[#allocation2 + $0x108] sm:$0xff] %vm1072_vm10, %v10396_v45  ;;  %v877_v29 = vpop.permute.xlu1 %876  ;;  %v10568_v13 = vpop.permute.xlu0 %1161 }
 0x2df   : > { %944 = vst.msk [vmem:[#allocation2 + $0x12a] sm:$0xff] %vm399_vm3, %v877_v29 }
 0x2e0   : > { %975 = vst.msk [vmem:[#allocation2 + $0x129] sm:$0xff] %vm951_vm15, %v10300_v2  ;;  %1661 = vrot.lane.b32.xlu0 %v10152_v52, %s8716_s21  ;;  %1498 = vrot.lane.b32.xlu1 %v9898_v33, %s8715_s20 }
 0x2e2   : > { %v1029_v62 = vpop.permute.xlu1 %1028  ;;  %v10577_v12 = vpop.permute.xlu0 %1290 }
 0x2e3   : > { %1096 = vst.msk [vmem:[#allocation2 + $0x128] sm:$0xff] %vm1072_vm10, %v1029_v62 }
 0x2e4   : > { %1226 = vst.msk [vmem:[#allocation2 + $0x122] sm:$0xff] %vm1201_vm2, %v10490_v43  ;;  %1665 = vrot.lane.b32.xlu0 %v10275_v28, %s8716_s21  ;;  %1502 = vrot.lane.b32.xlu1 %v9866_v50, %s8715_s20 }
 0x2e5   : > { %1355 = vst.msk [vmem:[#allocation2 + $0x121] sm:$0xff] %vm1330_vm5, %v10496_v8 }
 0x2e6   : > { %1484 = vst.msk [vmem:[#allocation2 + $0x120] sm:$0xff] %vm1459_vm6, %v1412_v58  ;;  %v1152_v45 = vpop.permute.xlu1 %1151  ;;  %v10589_v34 = vpop.permute.xlu0 %1419 }
 0x2e8   : > { %1669 = vrot.lane.b32.xlu0 %v10253_v32, %s8716_s21  ;;  %1506 = vrot.lane.b32.xlu1 %v9992_v23, %s8715_s20 }
 0x2ea   : > { %v1281_v43 = vpop.permute.xlu1 %1280  ;;  %v1497_v44 = vpop.permute.xlu0 %1496 }
 0x2eb   : > { %1585 = vst.msk [vmem:[#allocation2 + $0x1a] sm:$0xff] %vm1582_vm7, %v1497_v44 }
 0x2ec   : > { %1734 = vrot.lane.b32.xlu0 %v9758_v39, %s8717_s22  ;;  %1510 = vrot.lane.b32.xlu1 %v9944_v56, %s8715_s20 }
 0x2ee   : > { %v1410_v8 = vpop.permute.xlu1 %1409  ;;  %v1501_v58 = vpop.permute.xlu0 %1500 }
 0x2ef   : > { %1587 = vst.msk [vmem:[#allocation2 + $0x32] sm:$0xff] %vm1582_vm7, %v1501_v58 }
 0x2f0   : > { %1738 = vrot.lane.b32.xlu0 %v9850_v60, %s8717_s22  ;;  %1514 = vrot.lane.b32.xlu1 %v10108_v31, %s8715_s20 }
 0x2f2   : > { %v873_v19 = vpop.permute.xlu1 %872  ;;  %v1505_v29 = vpop.permute.xlu0 %1504 }
 0x2f3   : > { %942 = vst.msk [vmem:[#allocation2 + $0x112] sm:$0xff] %vm399_vm3, %v873_v19 }
 0x2f4   : > { %1589 = vst.msk [vmem:[#allocation2 + $0x4a] sm:$0xff] %vm1582_vm7, %v1505_v29  ;;  %1742 = vrot.lane.b32.xlu0 %v9828_v7, %s8717_s22  ;;  %1518 = vrot.lane.b32.xlu1 %v10053_v26, %s8715_s20 }
 0x2f5   : > { %973 = vst.msk [vmem:[#allocation2 + $0x111] sm:$0xff] %vm951_vm15, %v10348_v41 }
 0x2f6   : > { %v1025_v39 = vpop.permute.xlu1 %1024  ;;  %v1509_v60 = vpop.permute.xlu0 %1508 }
 0x2f7   : > { %1094 = vst.msk [vmem:[#allocation2 + $0x110] sm:$0xff] %vm1072_vm10, %v1025_v39  ;;  %v701_v39 = vadd.f32 %v9814_v1, %v9952_v20 }
 0x2f8   : > { %1591 = vst.msk [vmem:[#allocation2 + $0x62] sm:$0xff] %vm1582_vm7, %v1509_v60  ;;  %1746 = vrot.lane.b32.xlu0 %v9906_v30, %s8717_s22  ;;  %1522 = vrot.lane.b32.xlu1 %v10231_v54, %s8715_s20 }
 0x2f9   : > { %1224 = vst.msk [vmem:[#allocation2 + $0x10a] sm:$0xff] %vm1201_vm2, %v10371_v49  ;;  %1225 = vst.msk [vmem:[#allocation2 + $0x112] sm:$0xff] %vm1201_vm2, %v1152_v45 }
 0x2fa   : > { %1353 = vst.msk [vmem:[#allocation2 + $0x109] sm:$0xff] %vm1330_vm5, %v10377_v4  ;;  %1354 = vst.msk [vmem:[#allocation2 + $0x111] sm:$0xff] %vm1330_vm5, %v1281_v43  ;;  %v1148_v7 = vpop.permute.xlu1 %1147  ;;  %v1513_v49 = vpop.permute.xlu0 %1512 }
 0x2fb   : > { %1482 = vst.msk [vmem:[#allocation2 + $0x108] sm:$0xff] %vm1459_vm6, %v10385_v36  ;;  %1483 = vst.msk [vmem:[#allocation2 + $0x110] sm:$0xff] %vm1459_vm6, %v1410_v8 }
 0x2fc   : > { %1223 = vst.msk [vmem:[#allocation2 + $0xfa] sm:$0xff] %vm1201_vm2, %v1148_v7  ;;  %1750 = vrot.lane.b32.xlu0 %v9880_v3, %s8717_s22  ;;  %1526 = vrot.lane.b32.xlu1 %v10176_v46, %s8715_s20 }
 0x2fd   : > { %1593 = vst.msk [vmem:[#allocation2 + $0x7a] sm:$0xff] %vm1582_vm7, %v1513_v49 }
 0x2fe   : > { %v1277_v30 = vpop.permute.xlu1 %1276  ;;  %v1517_v4 = vpop.permute.xlu0 %1516 }
 0x2ff   : > { %1352 = vst.msk [vmem:[#allocation2 + $0xf9] sm:$0xff] %vm1330_vm5, %v1277_v30  ;;  %v10747_v30 = vmax.f32 %v701_v39, 0.0 }
 0x300   : > { %1595 = vst.msk [vmem:[#allocation2 + $0x92] sm:$0xff] %vm1582_vm7, %v1517_v4  ;;  %1754 = vrot.lane.b32.xlu0 %v9960_v17, %s8717_s22  ;;  %1530 = vrot.lane.b32.xlu1 %v10348_v41, %s8715_s20  ;;  %v703_v4 = vadd.f32 %v9952_v20, %v9892_v37 }
 0x302   : > { %v1406_v36 = vpop.permute.xlu1 %1405  ;;  %v1521_v62 = vpop.permute.xlu0 %1520 }
 0x303   : > { %1481 = vst.msk [vmem:[#allocation2 + $0xf8] sm:$0xff] %vm1459_vm6, %v1406_v36 }
 0x304   : > { %1597 = vst.msk [vmem:[#allocation2 + $0xaa] sm:$0xff] %vm1582_vm7, %v1521_v62  ;;  %1758 = vrot.lane.b32.xlu0 %v9932_v6, %s8717_s22  ;;  %1534 = vrot.lane.b32.xlu1 %v10300_v2, %s8715_s20 }
 0x306   : > { %v879_v3 = vpop.permute.xlu1 %878  ;;  %v1525_v45 = vpop.permute.xlu0 %1524 }
 0x307   : > { %945 = vst.msk [vmem:[#allocation2 + $0x13a] sm:$0xff] %vm399_vm3, %v879_v3  ;;  %v705_v3 = vadd.f32 %v9868_v0, %v9952_v20 }
 0x308   : > { %1599 = vst.msk [vmem:[#allocation2 + $0xc2] sm:$0xff] %vm1582_vm7, %v1525_v45  ;;  %1762 = vrot.lane.b32.xlu0 %v10028_v63, %s8717_s22  ;;  %1538 = vrot.lane.b32.xlu1 %v10441_v48, %s8715_s20  ;;  %v10758_v45 = vmax.f32 %v703_v4, 0.0 }
 0x309   : > { %976 = vst.msk [vmem:[#allocation2 + $0x139] sm:$0xff] %vm951_vm15, %v10203_v59 }
 0x30a   : > { %1097 = vst.msk [vmem:[#allocation2 + $0x138] sm:$0xff] %vm1072_vm10, %v10482_v42  ;;  %v885_v6 = vpop.permute.xlu1 %884  ;;  %v1529_v17 = vpop.permute.xlu0 %1528 }
 0x30b   : > { %948 = vst.msk [vmem:[#allocation2 + $0x15a] sm:$0xff] %vm399_vm3, %v885_v6 }
 0x30c   : > { %1601 = vst.msk [vmem:[#allocation2 + $0xda] sm:$0xff] %vm1582_vm7, %v1529_v17  ;;  %1766 = vrot.lane.b32.xlu0 %v10001_v61, %s8717_s22  ;;  %1542 = vrot.lane.b32.xlu1 %v10394_v57, %s8715_s20 }
 0x30d   : > { %979 = vst.msk [vmem:[#allocation2 + $0x159] sm:$0xff] %vm951_vm15, %v10394_v57 }
 0x30e   : > { %v1037_v63 = vpop.permute.xlu1 %1036  ;;  %v1533_v43 = vpop.permute.xlu0 %1532 }
 0x30f   : > { %1100 = vst.msk [vmem:[#allocation2 + $0x158] sm:$0xff] %vm1072_vm10, %v1037_v63  ;;  %v10765_v63 = vmax.f32 %v705_v3, 0.0  ;;  %v14866_v3 = vld [vmem:[#allocation60_spill] sm:$0xff] }
 0x310   : > { %1603 = vst.msk [vmem:[#allocation2 + $0xf2] sm:$0xff] %vm1582_vm7, %v1533_v43  ;;  %1770 = vrot.lane.b32.xlu0 %v10120_v24, %s8717_s22  ;;  %1546 = vrot.lane.b32.xlu1 %v10520_v16, %s8715_s20  ;;  %v707_v43 = vadd.f32 %v9952_v20, %v9946_v14 }
 0x311   : > { %1230 = vst.msk [vmem:[#allocation2 + $0x152] sm:$0xff] %vm1201_vm2, %v10568_v13 }
 0x312   : > { %1359 = vst.msk [vmem:[#allocation2 + $0x151] sm:$0xff] %vm1330_vm5, %v10577_v12  ;;  %v1160_v61 = vpop.permute.xlu1 %1159  ;;  %v1537_v42 = vpop.permute.xlu0 %1536 }
 0x313   : > { %1488 = vst.msk [vmem:[#allocation2 + $0x150] sm:$0xff] %vm1459_vm6, %v10589_v34 }
 0x314   : > { %1605 = vst.msk [vmem:[#allocation2 + $0x10a] sm:$0xff] %vm1582_vm7, %v1537_v42  ;;  %1774 = vrot.lane.b32.xlu0 %v10075_v21, %s8717_s22  ;;  %1550 = vrot.lane.b32.xlu1 %v10488_v9, %s8715_s20 }
 0x316   : > { %v1289_v24 = vpop.permute.xlu1 %1288  ;;  %v1541_v13 = vpop.permute.xlu0 %1540 }
 0x318   : > { %1778 = vrot.lane.b32.xlu0 %v10203_v59, %s8717_s22  ;;  %1615 = vrot.lane.b32.xlu1 %v9776_v40, %s8716_s21 }
 0x31a   : > { %v1418_v12 = vpop.permute.xlu1 %1417  ;;  %v1545_v34 = vpop.permute.xlu0 %1544 }
 0x31c   : > { %1782 = vrot.lane.b32.xlu0 %v10152_v52, %s8717_s22  ;;  %1619 = vrot.lane.b32.xlu1 %v9898_v33, %s8716_s21  ;;  %v695_v52 = vadd.f32 %v9952_v20, %v9756_v18 }
 0x31e   : > { %v881_v21 = vpop.permute.xlu1 %880  ;;  %v10689_v44 = vpop.permute.xlu0 %1548  ;;  %v10714_v58 = vmax.f32 %v695_v52, 0.0 }
 0x31f   : > { %946 = vst.msk [vmem:[#allocation2 + $0x142] sm:$0xff] %vm399_vm3, %v881_v21 }
 0x320   : > { %977 = vst.msk [vmem:[#allocation2 + $0x141] sm:$0xff] %vm951_vm15, %v10441_v48  ;;  %1786 = vrot.lane.b32.xlu0 %v10275_v28, %s8717_s22  ;;  %1623 = vrot.lane.b32.xlu1 %v9866_v50, %s8716_s21  ;;  %v697_v28 = vadd.f32 %v9752_v5, %v9952_v20 }
 0x322   : > { %v1033_v59 = vpop.permute.xlu1 %1032  ;;  %v1614_v8 = vpop.permute.xlu0 %1613 }
 0x323   : > { %1098 = vst.msk [vmem:[#allocation2 + $0x140] sm:$0xff] %vm1072_vm10, %v1033_v59  ;;  %v8605_v59 = vld [vmem:[%s14518_s4 + $0x18] sm:$0xff]  }
 0x324   : > { %1704 = vst.msk [vmem:[#allocation2 + $0x1] sm:$0xff] %vm1703_vm8, %v1614_v8  ;;  %1790 = vrot.lane.b32.xlu0 %v10253_v32, %s8717_s22  ;;  %1627 = vrot.lane.b32.xlu1 %v9992_v23, %s8716_s21 }
 0x325   : > { %1228 = vst.msk [vmem:[#allocation2 + $0x13a] sm:$0xff] %vm1201_vm2, %v10453_v10  ;;  %1229 = vst.msk [vmem:[#allocation2 + $0x142] sm:$0xff] %vm1201_vm2, %v1160_v61 }
 0x326   : > { %1358 = vst.msk [vmem:[#allocation2 + $0x141] sm:$0xff] %vm1330_vm5, %v1289_v24  ;;  %1357 = vst.msk [vmem:[#allocation2 + $0x139] sm:$0xff] %vm1330_vm5, %v10462_v55  ;;  %v1156_v10 = vpop.permute.xlu1 %1155  ;;  %v1618_v32 = vpop.permute.xlu0 %1617  ;;  %v10726_v55 = vmax.f32 %v697_v28, 0.0  ;;  %v8604_v24 = vld [vmem:[%s14518_s4 + $0x20] ss:$0 sps:$4 sm:$0xff]   ;;  %v711_v28 = vadd.f32 %v9952_v20, %v10014_v15 }
 0x327   : > { %1486 = vst.msk [vmem:[#allocation2 + $0x138] sm:$0xff] %vm1459_vm6, %v10472_v53  ;;  %1487 = vst.msk [vmem:[#allocation2 + $0x140] sm:$0xff] %vm1459_vm6, %v1418_v12  ;;  %v699_v53 = vadd.f32 %v9952_v20, %v9838_v22  ;;  %v10779_v12 = vmax.f32 %v707_v43, 0.0  ;;  %8449 = vmatprep.subr.msk.bf16.mxu1 %vm448_vm0, %v8604_v24  ;;  %v2036_v52 = vsel %vm448_vm0, %v8604_v24, 0  ;;  %v14867_v24 = vld [vmem:[#allocation65_spill] sm:$0xff] }
 0x328   : > { %1609 = vst.msk [vmem:[#allocation2 + $0x13a] sm:$0xff] %vm1582_vm7, %v1545_v34  ;;  %2467 = vrot.lane.b32.xlu0 %v10714_v58, %s8718_s23  ;;  %1631 = vrot.lane.b32.xlu1 %v9944_v56, %s8716_s21 }
 0x329   : > { %1227 = vst.msk [vmem:[#allocation2 + $0x12a] sm:$0xff] %vm1201_vm2, %v1156_v10  ;;  %v10738_v60 = vmax.f32 %v699_v53, 0.0  ;;  %8293 = vmatpush3.bf16.msra.mxu1 %v2036_v52  ;;  %v8606_v53 = vld [vmem:[%s14518_s4 + $0x10] sm:$0xff]  }
 0x32a   : > { %1706 = vst.msk [vmem:[#allocation2 + $0x19] sm:$0xff] %vm1703_vm8, %v1618_v32  ;;  %v1285_v19 = vpop.permute.xlu1 %1284  ;;  %v1622_v29 = vpop.permute.xlu0 %1621  ;;  %8294 = vmatprep.subr.bf16.mxu1 %v8605_v59 }
 0x32b   : > { %1356 = vst.msk [vmem:[#allocation2 + $0x129] sm:$0xff] %vm1330_vm5, %v1285_v19  ;;  %v10815_v19 = vmax.f32 %v711_v28, 0.0 }
 0x32c   : > { %1708 = vst.msk [vmem:[#allocation2 + $0x31] sm:$0xff] %vm1703_vm8, %v1622_v29  ;;  %2471 = vrot.lane.b32.xlu0 %v10726_v55, %s8718_s23  ;;  %1635 = vrot.lane.b32.xlu1 %v10108_v31, %s8716_s21 }
 0x32d   : > { %8295 = vmatpush3.bf16.msra.mxu1 %v8605_v59 }
 0x32e   : > { %v1414_v7 = vpop.permute.xlu1 %1413  ;;  %v1626_v49 = vpop.permute.xlu0 %1625  ;;  %8296 = vmatprep.subr.bf16.mxu1 %v8606_v53 }
 0x32f   : > { %1485 = vst.msk [vmem:[#allocation2 + $0x128] sm:$0xff] %vm1459_vm6, %v1414_v7 }
 0x330   : > { %1710 = vst.msk [vmem:[#allocation2 + $0x49] sm:$0xff] %vm1703_vm8, %v1626_v49  ;;  %2475 = vrot.lane.b32.xlu0 %v10738_v60, %s8718_s23  ;;  %1639 = vrot.lane.b32.xlu1 %v10053_v26, %s8716_s21  ;;  %v715_v49 = vadd.f32 %v9952_v20, %v10097_v11 }
 0x331   : > { %1607 = vst.msk [vmem:[#allocation2 + $0x122] sm:$0xff] %vm1582_vm7, %v1541_v13  ;;  %v709_v13 = vadd.f32 %v9920_v25, %v9952_v20  ;;  %8297 = vmatpush3.bf16.msra.mxu1 %v8606_v53 }
 0x332   : > { %v1630_v36 = vpop.permute.xlu0 %1629  ;;  %v1168_v62 = vpop.permute.xlu1 %1167 }
 0x333   : > { %1712 = vst.msk [vmem:[#allocation2 + $0x61] sm:$0xff] %vm1703_vm8, %v1630_v36  ;;  %v10794_v8 = vmax.f32 %v709_v13, 0.0  ;;  %v719_v13 = vadd.f32 %v9952_v20, %v14867_v24 }
 0x334   : > { %2479 = vrot.lane.b32.xlu0 %v10747_v30, %s8718_s23  ;;  %1643 = vrot.lane.b32.xlu1 %v10231_v54, %s8716_s21 }
 0x335   : > { %v10954_v59 = vmax.f32 %v719_v13, 0.0 }
 0x336   : > { %v1634_v6 = vpop.permute.xlu0 %1633  ;;  %v1297_v17 = vpop.permute.xlu1 %1296 }
 0x337   : > { %1714 = vst.msk [vmem:[#allocation2 + $0x79] sm:$0xff] %vm1703_vm8, %v1634_v6  ;;  %v717_v6 = vadd.f32 %v14866_v3, %v9952_v20 }
 0x338   : > { %2483 = vrot.lane.b32.xlu0 %v10758_v45, %s8718_s23  ;;  %1647 = vrot.lane.b32.xlu1 %v10176_v46, %s8716_s21 }
 0x33a   : > { %v1638_v61 = vpop.permute.xlu0 %1637  ;;  %v1426_v42 = vpop.permute.xlu1 %1425 }
 0x33b   : > { %1716 = vst.msk [vmem:[#allocation2 + $0x91] sm:$0xff] %vm1703_vm8, %v1638_v61 }
 0x33c   : > { %2487 = vrot.lane.b32.xlu0 %v10765_v63, %s8718_s23  ;;  %1651 = vrot.lane.b32.xlu1 %v10348_v41, %s8716_s21 }
 0x33e   : > { %v1642_v34 = vpop.permute.xlu0 %1641  ;;  %v889_v21 = vpop.permute.xlu1 %888 }
 0x33f   : > { %1718 = vst.msk [vmem:[#allocation2 + $0xa9] sm:$0xff] %vm1703_vm8, %v1642_v34 }
 0x340   : > { %950 = vst.msk [vmem:[#allocation2 + $0x172] sm:$0xff] %vm399_vm3, %v889_v21  ;;  %2491 = vrot.lane.b32.xlu0 %v10779_v12, %s8718_s23  ;;  %1655 = vrot.lane.b32.xlu1 %v10300_v2, %s8716_s21 }
 0x341   : > { %981 = vst.msk [vmem:[#allocation2 + $0x171] sm:$0xff] %vm951_vm15, %v10520_v16  ;;  %vm2665_vm15 = vcmask 64544  }
 0x342   : > { %v1646_v10 = vpop.permute.xlu0 %1645  ;;  %v1041_v32 = vpop.permute.xlu1 %1040 }
 0x343   : > { %1720 = vst.msk [vmem:[#allocation2 + $0xc1] sm:$0xff] %vm1703_vm8, %v1646_v10 }
 0x344   : > { %1102 = vst.msk [vmem:[#allocation2 + $0x170] sm:$0xff] %vm1072_vm10, %v1041_v32  ;;  %2495 = vrot.lane.b32.xlu0 %v10794_v8, %s8718_s23  ;;  %1659 = vrot.lane.b32.xlu1 %v10441_v48, %s8716_s21  ;;  %vm2778_vm10 = vcmask 97344  }
 0x345   : > { %1232 = vst.msk [vmem:[#allocation2 + $0x16a] sm:$0xff] %vm1201_vm2, %v10525_v27  ;;  %1233 = vst.msk [vmem:[#allocation2 + $0x172] sm:$0xff] %vm1201_vm2, %v1168_v62  ;;  %v713_v27 = vadd.f32 %v9983_v51, %v9952_v20  ;;  %v8608_v62 = vld [vmem:[%s14518_s4] sm:$0xff]  }
 0x346   : > { %1361 = vst.msk [vmem:[#allocation2 + $0x169] sm:$0xff] %vm1330_vm5, %v10532_v35  ;;  %1362 = vst.msk [vmem:[#allocation2 + $0x171] sm:$0xff] %vm1330_vm5, %v1297_v17  ;;  %v1650_v29 = vpop.permute.xlu0 %1649  ;;  %v1164_v39 = vpop.permute.xlu1 %1163  ;;  %v8607_v35 = vld [vmem:[%s14518_s4 + $0x8] sm:$0xff]   ;;  %v10932_v17 = vmax.f32 %v715_v49, 0.0 }
 0x347   : > { %1490 = vst.msk [vmem:[#allocation2 + $0x168] sm:$0xff] %vm1459_vm6, %v10539_v47  ;;  %1491 = vst.msk [vmem:[#allocation2 + $0x170] sm:$0xff] %vm1459_vm6, %v1426_v42  ;;  %v14865_v47 = vmov 0.0   ;;  %v10901_v7 = vmax.f32 %v713_v27, 0.0  ;;  %8298 = vmatprep.subr.bf16.mxu1 %v8607_v35  ;;  %v10942_v42 = vmax.f32 %v717_v6, 0.0 }
 0x348   : > { %1722 = vst.msk [vmem:[#allocation2 + $0xd9] sm:$0xff] %vm1703_vm8, %v1650_v29  ;;  %2499 = vrot.lane.b32.xlu0 %v10815_v19, %s8718_s23  ;;  %1663 = vrot.lane.b32.xlu1 %v10394_v57, %s8716_s21 }
 0x349   : > { %1231 = vst.msk [vmem:[#allocation2 + $0x15a] sm:$0xff] %vm1201_vm2, %v1164_v39  ;;  %8299 = vmatpush3.bf16.msra.mxu1 %v8607_v35  ;;  %vm2920_vm2 = vcmask 162944  }
 0x34a   : > { %2407 = vst.msk [vmem:[#allocation3 + $0x152] sm:$0x3] %vm2392_vm9, %v14865_v47  ;;  %2393 = vst.msk [vmem:[#allocation3 + $0x2] sm:$0x3] %vm2392_vm9, %v14865_v47  ;;  %v1654_v4 = vpop.permute.xlu0 %1653  ;;  %v1293_v36 = vpop.permute.xlu1 %1292  ;;  %8300 = vmatprep.subr.bf16.mxu1 %v8608_v62 }
 0x34b   : > { %2434 = vst.msk [vmem:[#allocation3 + $0x158] sm:$0xff] %vm2425_vm11, %v14865_v47  ;;  %2427 = vst.msk [vmem:[#allocation3 + $0x8] sm:$0xff] %vm2425_vm11, %v14865_v47 }
 0x34c   : > { %2394 = vst.msk [vmem:[#allocation3 + $0x1a] sm:$0x3] %vm2392_vm9, %v14865_v47  ;;  %2395 = vst.msk [vmem:[#allocation3 + $0x32] sm:$0x3] %vm2392_vm9, %v14865_v47  ;;  %2503 = vrot.lane.b32.xlu0 %v10901_v7, %s8718_s23  ;;  %1667 = vrot.lane.b32.xlu1 %v10520_v16, %s8716_s21 }
 0x34d   : > { %2396 = vst.msk [vmem:[#allocation3 + $0x4a] sm:$0x3] %vm2392_vm9, %v14865_v47  ;;  %2397 = vst.msk [vmem:[#allocation3 + $0x62] sm:$0x3] %vm2392_vm9, %v14865_v47  ;;  %8301 = vmatpush3.bf16.msra.mxu1 %v8608_v62 }
 0x34e   : > { %2398 = vst.msk [vmem:[#allocation3 + $0x7a] sm:$0x3] %vm2392_vm9, %v14865_v47  ;;  %2399 = vst.msk [vmem:[#allocation3 + $0x92] sm:$0x3] %vm2392_vm9, %v14865_v47  ;;  %v1658_v43 = vpop.permute.xlu0 %1657  ;;  %v1422_v61 = vpop.permute.xlu1 %1421 }
 0x34f   : > { %2400 = vst.msk [vmem:[#allocation3 + $0xaa] sm:$0x3] %vm2392_vm9, %v14865_v47  ;;  %2401 = vst.msk [vmem:[#allocation3 + $0xc2] sm:$0x3] %vm2392_vm9, %v14865_v47 }
 0x350   : > { %2402 = vst.msk [vmem:[#allocation3 + $0xda] sm:$0x3] %vm2392_vm9, %v14865_v47  ;;  %2403 = vst.msk [vmem:[#allocation3 + $0xf2] sm:$0x3] %vm2392_vm9, %v14865_v47  ;;  %2507 = vrot.lane.b32.xlu0 %v10932_v17, %s8718_s23  ;;  %1671 = vrot.lane.b32.xlu1 %v10488_v9, %s8716_s21 }
 0x351   : > { %2404 = vst.msk [vmem:[#allocation3 + $0x10a] sm:$0x3] %vm2392_vm9, %v14865_v47  ;;  %2405 = vst.msk [vmem:[#allocation3 + $0x122] sm:$0x3] %vm2392_vm9, %v14865_v47 }
 0x352   : > { %2406 = vst.msk [vmem:[#allocation3 + $0x13a] sm:$0x3] %vm2392_vm9, %v14865_v47  ;;  %2408 = vst.msk [vmem:[#allocation3 + $0x16a] sm:$0x3] %vm2392_vm9, %v14865_v47  ;;  %v1662_v34 = vpop.permute.xlu0 %1661  ;;  %v1499_v21 = vpop.permute.xlu1 %1498 }
 0x353   : > { %2409 = vst.msk [vmem:[#allocation3 + $0x10] sm:$0x3] %vm2392_vm9, %v14865_v47  ;;  %2410 = vst.msk [vmem:[#allocation3 + $0x28] sm:$0x3] %vm2392_vm9, %v14865_v47 }
 0x354   : > { %2411 = vst.msk [vmem:[#allocation3 + $0x40] sm:$0x3] %vm2392_vm9, %v14865_v47  ;;  %2412 = vst.msk [vmem:[#allocation3 + $0x58] sm:$0x3] %vm2392_vm9, %v14865_v47  ;;  %2511 = vrot.lane.b32.xlu0 %v10942_v42, %s8718_s23  ;;  %1736 = vrot.lane.b32.xlu1 %v9776_v40, %s8717_s22 }
 0x355   : > { %2413 = vst.msk [vmem:[#allocation3 + $0x70] sm:$0x3] %vm2392_vm9, %v14865_v47  ;;  %2414 = vst.msk [vmem:[#allocation3 + $0x88] sm:$0x3] %vm2392_vm9, %v14865_v47 }
 0x356   : > { %2415 = vst.msk [vmem:[#allocation3 + $0xa0] sm:$0x3] %vm2392_vm9, %v14865_v47  ;;  %2416 = vst.msk [vmem:[#allocation3 + $0xb8] sm:$0x3] %vm2392_vm9, %v14865_v47  ;;  %v1666_v28 = vpop.permute.xlu0 %1665  ;;  %v1503_v10 = vpop.permute.xlu1 %1502 }
 0x357   : > { %2417 = vst.msk [vmem:[#allocation3 + $0xd0] sm:$0x3] %vm2392_vm9, %v14865_v47  ;;  %2418 = vst.msk [vmem:[#allocation3 + $0xe8] sm:$0x3] %vm2392_vm9, %v14865_v47 }
 0x358   : > { %2419 = vst.msk [vmem:[#allocation3 + $0x100] sm:$0x3] %vm2392_vm9, %v14865_v47  ;;  %2420 = vst.msk [vmem:[#allocation3 + $0x118] sm:$0x3] %vm2392_vm9, %v14865_v47  ;;  %2515 = vrot.lane.b32.xlu0 %v10954_v59, %s8718_s23  ;;  %1740 = vrot.lane.b32.xlu1 %v9898_v33, %s8717_s22 }
 0x359   : > { %2421 = vst.msk [vmem:[#allocation3 + $0x130] sm:$0x3] %vm2392_vm9, %v14865_v47  ;;  %2422 = vst.msk [vmem:[#allocation3 + $0x148] sm:$0x3] %vm2392_vm9, %v14865_v47 }
 0x35a   : > { %2423 = vst.msk [vmem:[#allocation3 + $0x160] sm:$0x3] %vm2392_vm9, %v14865_v47  ;;  %2424 = vst.msk [vmem:[#allocation3 + $0x178] sm:$0x3] %vm2392_vm9, %v14865_v47  ;;  %v1670_v40 = vpop.permute.xlu0 %1669  ;;  %v1507_v53 = vpop.permute.xlu1 %1506  ;;  %vm3526_vm9 = vcmask 326944  }
 0x35b   : > { %2430 = vst.msk [vmem:[#allocation3 + $0x20] sm:$0xff] %vm2425_vm11, %v14865_v47  ;;  %2437 = vst.msk [vmem:[#allocation3 + $0x170] sm:$0xff] %vm2425_vm11, %v14865_v47 }
 0x35c   : > { %2433 = vst.msk [vmem:[#allocation3 + $0x150] sm:$0xff] %vm2425_vm11, %v14865_v47  ;;  %2426 = vst.msk [vmem:[#allocation3] sm:$0xff] %vm2425_vm11, %v14865_v47  ;;  %1744 = vrot.lane.b32.xlu1 %v9866_v50, %s8717_s22 }
 0x35d   : > { %2428 = vst.msk [vmem:[#allocation3 + $0x10] sm:$0xff] %vm2425_vm11, %v14865_v47  ;;  %2429 = vst.msk [vmem:[#allocation3 + $0x18] sm:$0xff] %vm2425_vm11, %v14865_v47 }
 0x35e   : > { %2431 = vst.msk [vmem:[#allocation3 + $0x28] sm:$0xff] %vm2425_vm11, %v14865_v47  ;;  %2435 = vst.msk [vmem:[#allocation3 + $0x160] sm:$0xff] %vm2425_vm11, %v14865_v47  ;;  %v1735_v27 = vpop.permute.xlu0 %1734  ;;  %v1511_v29 = vpop.permute.xlu1 %1510 }
 0x35f   : > { %2436 = vst.msk [vmem:[#allocation3 + $0x168] sm:$0xff] %vm2425_vm11, %v14865_v47  ;;  %2438 = vst.msk [vmem:[#allocation3 + $0x178] sm:$0xff] %vm2425_vm11, %v14865_v47 }
 0x360   : > { %1724 = vst.msk [vmem:[#allocation2 + $0xf1] sm:$0xff] %vm1703_vm8, %v1654_v4  ;;  %1726 = vst.msk [vmem:[#allocation2 + $0x109] sm:$0xff] %vm1703_vm8, %v1658_v43  ;;  %1748 = vrot.lane.b32.xlu1 %v9992_v23, %s8717_s22 }
 0x361   : > { %1360 = vst.msk [vmem:[#allocation2 + $0x159] sm:$0xff] %vm1330_vm5, %v1293_v36  ;;  %vm3042_vm5 = vcmask 195744  }
 0x362   : > { %1489 = vst.msk [vmem:[#allocation2 + $0x158] sm:$0xff] %vm1459_vm6, %v1422_v61  ;;  %v1739_v33 = vpop.permute.xlu0 %1738  ;;  %v1515_v39 = vpop.permute.xlu1 %1514  ;;  %vm3163_vm6 = vcmask 228544  }
 0x363   : > { %1611 = vst.msk [vmem:[#allocation2 + $0x152] sm:$0xff] %vm1582_vm7, %v10689_v44  ;;  %1586 = vst.msk [vmem:[#allocation2 + $0x22] sm:$0xff] %vm1582_vm7, %v1499_v21  ;;  %v14868_v44 = vld [vmem:[#allocation64_spill] sm:$0xff] }
 0x364   : > { %1728 = vst.msk [vmem:[#allocation2 + $0x121] sm:$0xff] %vm1703_vm8, %v1662_v34  ;;  %v721_v52 = vadd.f32 %v14868_v44, %v9952_v20  ;;  %1730 = vst.msk [vmem:[#allocation2 + $0x139] sm:$0xff] %vm1703_vm8, %v1666_v28  ;;  %1752 = vrot.lane.b32.xlu1 %v9944_v56, %s8717_s22 }
 0x365   : > { %1588 = vst.msk [vmem:[#allocation2 + $0x3a] sm:$0xff] %vm1582_vm7, %v1503_v10  ;;  %1590 = vst.msk [vmem:[#allocation2 + $0x52] sm:$0xff] %vm1582_vm7, %v1507_v53 }
 0x366   : > { %v10962_v32 = vmax.f32 %v721_v52, 0.0  ;;  %1732 = vst.msk [vmem:[#allocation2 + $0x151] sm:$0xff] %vm1703_vm8, %v1670_v40  ;;  %v1743_v50 = vpop.permute.xlu0 %1742  ;;  %v1519_v35 = vpop.permute.xlu1 %1518 }
 0x367   : > { %1825 = vst.msk [vmem:[#allocation2] sm:$0xff] %vm1824_vm12, %v1735_v27  ;;  %1827 = vst.msk [vmem:[#allocation2 + $0x18] sm:$0xff] %vm1824_vm12, %v1739_v33  ;;  %v14872_v33 = vld [vmem:[#allocation46_spill] sm:$0xff] }
 0x368   : > { %2519 = vrot.lane.b32.xlu0 %v10962_v32, %s8718_s23  ;;  %1592 = vst.msk [vmem:[#allocation2 + $0x6a] sm:$0xff] %vm1582_vm7, %v1511_v29  ;;  %1594 = vst.msk [vmem:[#allocation2 + $0x82] sm:$0xff] %vm1582_vm7, %v1515_v39  ;;  %1756 = vrot.lane.b32.xlu1 %v10108_v31, %s8717_s22  ;;  %v702_v39 = vadd.f32 %v14872_v33, %v9952_v20 }
 0x369   : > { %1829 = vst.msk [vmem:[#allocation2 + $0x30] sm:$0xff] %vm1824_vm12, %v1743_v50 }
 0x36a   : > { %1596 = vst.msk [vmem:[#allocation2 + $0x9a] sm:$0xff] %vm1582_vm7, %v1519_v35  ;;  %v1747_v23 = vpop.permute.xlu0 %1746  ;;  %v1523_v47 = vpop.permute.xlu1 %1522 }
 0x36b   : > { %1831 = vst.msk [vmem:[#allocation2 + $0x48] sm:$0xff] %vm1824_vm12, %v1747_v23 }
 0x36c   : > { %2581 = vrot.lane.b32.xlu0 %v10714_v58, %s8719_s10  ;;  %1598 = vst.msk [vmem:[#allocation2 + $0xb2] sm:$0xff] %vm1582_vm7, %v1523_v47  ;;  %1760 = vrot.lane.b32.xlu1 %v10053_v26, %s8717_s22  ;;  %v11074_v47 = vmax.f32 %v702_v39, 0.0 }
 0x36e   : > { %v1751_v56 = vpop.permute.xlu0 %1750  ;;  %v1527_v49 = vpop.permute.xlu1 %1526  ;;  %v1858_v24 = vld [vmem:[#allocation2 + $0x18] sm:$0xff] }
 0x36f   : > { %1833 = vst.msk [vmem:[#allocation2 + $0x60] sm:$0xff] %vm1824_vm12, %v1751_v56  ;;  %v14873_v56 = vld [vmem:[#allocation51_spill] sm:$0xff] }
 0x370   : > { %2585 = vrot.lane.b32.xlu0 %v10726_v55, %s8719_s10  ;;  %1600 = vst.msk [vmem:[#allocation2 + $0xca] sm:$0xff] %vm1582_vm7, %v1527_v49  ;;  %1764 = vrot.lane.b32.xlu1 %v10231_v54, %s8717_s22  ;;  %v704_v49 = vadd.f32 %v9952_v20, %v14873_v56 }
 0x372   : > { %v1755_v31 = vpop.permute.xlu0 %1754  ;;  %v1531_v4 = vpop.permute.xlu1 %1530 }
 0x373   : > { %1835 = vst.msk [vmem:[#allocation2 + $0x78] sm:$0xff] %vm1824_vm12, %v1755_v31 }
 0x374   : > { %2589 = vrot.lane.b32.xlu0 %v10738_v60, %s8719_s10  ;;  %1602 = vst.msk [vmem:[#allocation2 + $0xe2] sm:$0xff] %vm1582_vm7, %v1531_v4  ;;  %1768 = vrot.lane.b32.xlu1 %v10176_v46, %s8717_s22 }
 0x376   : > { %v1759_v26 = vpop.permute.xlu0 %1758  ;;  %v1535_v36 = vpop.permute.xlu1 %1534 }
 0x377   : > { %1837 = vst.msk [vmem:[#allocation2 + $0x90] sm:$0xff] %vm1824_vm12, %v1759_v26  ;;  %v14874_v26 = vld [vmem:[#allocation50_spill] sm:$0xff] }
 0x378   : > { %2593 = vrot.lane.b32.xlu0 %v10747_v30, %s8719_s10  ;;  %1604 = vst.msk [vmem:[#allocation2 + $0xfa] sm:$0xff] %vm1582_vm7, %v1535_v36  ;;  %1772 = vrot.lane.b32.xlu1 %v10348_v41, %s8717_s22  ;;  %v706_v36 = vadd.f32 %v14874_v26, %v9952_v20  ;;  %v724_v26 = vadd.f32 %v9952_v20, %v10498_v38 }
 0x37a   : > { %v1763_v54 = vpop.permute.xlu0 %1762  ;;  %v1539_v62 = vpop.permute.xlu1 %1538  ;;  %v11679_v1 = vmax.f32 %v724_v26, 0.0 }
 0x37b   : > { %1839 = vst.msk [vmem:[#allocation2 + $0xa8] sm:$0xff] %vm1824_vm12, %v1763_v54  ;;  %v11086_v54 = vmax.f32 %v704_v49, 0.0 }
 0x37c   : > { %2597 = vrot.lane.b32.xlu0 %v10758_v45, %s8719_s10  ;;  %1606 = vst.msk [vmem:[#allocation2 + $0x112] sm:$0xff] %vm1582_vm7, %v1539_v62  ;;  %1776 = vrot.lane.b32.xlu1 %v10300_v2, %s8717_s22 }
 0x37e   : > { %v1767_v46 = vpop.permute.xlu0 %1766  ;;  %v1543_v6 = vpop.permute.xlu1 %1542 }
 0x37f   : > { %1841 = vst.msk [vmem:[#allocation2 + $0xc0] sm:$0xff] %vm1824_vm12, %v1767_v46 }
 0x380   : > { %2601 = vrot.lane.b32.xlu0 %v10765_v63, %s8719_s10  ;;  %1608 = vst.msk [vmem:[#allocation2 + $0x12a] sm:$0xff] %vm1582_vm7, %v1543_v6  ;;  %1780 = vrot.lane.b32.xlu1 %v10441_v48, %s8717_s22  ;;  %v14869_v48 = vld [vmem:[#allocation43_spill] sm:$0xff]  ;;  %v11094_v6 = vmax.f32 %v706_v36, 0.0 }
 0x381   : > { %v696_v13 = vadd.f32 %v9952_v20, %v14869_v48 }
 0x382   : > { %v1771_v41 = vpop.permute.xlu0 %1770  ;;  %v1547_v43 = vpop.permute.xlu1 %1546 }
 0x383   : > { %1843 = vst.msk [vmem:[#allocation2 + $0xd8] sm:$0xff] %vm1824_vm12, %v1771_v41  ;;  %v11046_v28 = vmax.f32 %v696_v13, 0.0  ;;  %v14875_v41 = vld [vmem:[#allocation55_spill] sm:$0xff]  ;;  %v14876_v13 = vld [vmem:[#allocation54_spill] sm:$0xff] }
 0x384   : > { %2605 = vrot.lane.b32.xlu0 %v10779_v12, %s8719_s10  ;;  %1610 = vst.msk [vmem:[#allocation2 + $0x142] sm:$0xff] %vm1582_vm7, %v1547_v43  ;;  %1784 = vrot.lane.b32.xlu1 %v10394_v57, %s8717_s22  ;;  %v14870_v57 = vld [vmem:[#allocation19_spill] sm:$0xff]  ;;  %v708_v43 = vadd.f32 %v9952_v20, %v14875_v41 }
 0x385   : > { %v698_v52 = vadd.f32 %v14870_v57, %v9952_v20 }
 0x386   : > { %v1775_v2 = vpop.permute.xlu0 %1774  ;;  %v1551_v61 = vpop.permute.xlu1 %1550 }
 0x387   : > { %1845 = vst.msk [vmem:[#allocation2 + $0xf0] sm:$0xff] %vm1824_vm12, %v1775_v2  ;;  %v11054_v40 = vmax.f32 %v698_v52, 0.0 }
 0x388   : > { %2609 = vrot.lane.b32.xlu0 %v10794_v8, %s8719_s10  ;;  %1612 = vst.msk [vmem:[#allocation2 + $0x15a] sm:$0xff] %vm1582_vm7, %v1551_v61  ;;  %1788 = vrot.lane.b32.xlu1 %v10520_v16, %s8717_s22  ;;  %vm3284_vm7 = vcmask 261344  }
 0x38a   : > { %v1779_v34 = vpop.permute.xlu0 %1778  ;;  %v1616_v21 = vpop.permute.xlu1 %1615 }
 0x38b   : > { %1847 = vst.msk [vmem:[#allocation2 + $0x108] sm:$0xff] %vm1824_vm12, %v1779_v34  ;;  %v710_v34 = vadd.f32 %v14876_v13, %v9952_v20 }
 0x38c   : > { %2613 = vrot.lane.b32.xlu0 %v10815_v19, %s8719_s10  ;;  %1705 = vst.msk [vmem:[#allocation2 + $0x9] sm:$0xff] %vm1703_vm8, %v1616_v21  ;;  %1792 = vrot.lane.b32.xlu1 %v10488_v9, %s8717_s22  ;;  %v14871_v9 = vld [vmem:[#allocation47_spill] sm:$0xff]  ;;  %v11106_v21 = vmax.f32 %v708_v43, 0.0 }
 0x38d   : > { %v700_v53 = vadd.f32 %v9952_v20, %v14871_v9 }
 0x38e   : > { %v1783_v16 = vpop.permute.xlu0 %1782  ;;  %v1620_v10 = vpop.permute.xlu1 %1619 }
 0x38f   : > { %1849 = vst.msk [vmem:[#allocation2 + $0x120] sm:$0xff] %vm1824_vm12, %v1783_v16  ;;  %v11066_v50 = vmax.f32 %v700_v53, 0.0  ;;  %v14877_v53 = vld [vmem:[#allocation59_spill] sm:$0xff] }
 0x390   : > { %2617 = vrot.lane.b32.xlu0 %v10901_v7, %s8719_s10  ;;  %1707 = vst.msk [vmem:[#allocation2 + $0x21] sm:$0xff] %vm1703_vm8, %v1620_v10  ;;  %2469 = vrot.lane.b32.xlu1 %v11046_v28, %s8718_s23  ;;  %v11114_v10 = vmax.f32 %v710_v34, 0.0  ;;  %v14880_v34 = vld [vmem:[#allocation62_spill] sm:$0xff] }
 0x392   : > { %v1787_v27 = vpop.permute.xlu0 %1786  ;;  %v1624_v29 = vpop.permute.xlu1 %1623 }
 0x393   : > { %1851 = vst.msk [vmem:[#allocation2 + $0x138] sm:$0xff] %vm1824_vm12, %v1787_v27  ;;  %v712_v27 = vadd.f32 %v9952_v20, %v14877_v53 }
 0x394   : > { %2621 = vrot.lane.b32.xlu0 %v10932_v17, %s8719_s10  ;;  %1709 = vst.msk [vmem:[#allocation2 + $0x39] sm:$0xff] %vm1703_vm8, %v1624_v29  ;;  %2473 = vrot.lane.b32.xlu1 %v11054_v40, %s8718_s23 }
 0x396   : > { %v1791_v35 = vpop.permute.xlu0 %1790  ;;  %v1628_v23 = vpop.permute.xlu1 %1627 }
 0x397   : > { %1853 = vst.msk [vmem:[#allocation2 + $0x150] sm:$0xff] %vm1824_vm12, %v1791_v35  ;;  %v11127_v35 = vld [vmem:[%s14520_s6] sm:$0xf] }
 0x398   : > { %2625 = vrot.lane.b32.xlu0 %v10942_v42, %s8719_s10  ;;  %1711 = vst.msk [vmem:[#allocation2 + $0x51] sm:$0xff] %vm1703_vm8, %v1628_v23  ;;  %2477 = vrot.lane.b32.xlu1 %v11066_v50, %s8718_s23  ;;  %v14878_v23 = vld [vmem:[#allocation58_spill] sm:$0xff] }
 0x399   : > { %8452 = vmatprep.subr.msk.bf16.mxu1 %vm448_vm0, %v11127_v35  ;;  %v714_v49 = vadd.f32 %v14878_v23, %v9952_v20 }
 0x39a   : > { %v2468_v31 = vpop.permute.xlu0 %2467  ;;  %v1632_v4 = vpop.permute.xlu1 %1631 }
 0x39b   : > { %2553 = vst.msk [vmem:[#allocation3 + $0x34] sm:$0xff] %vm2552_vm13, %v2468_v31  ;;  %v11133_v31 = vmax.f32 %v712_v27, 0.0 }
 0x39c   : > { %2629 = vrot.lane.b32.xlu0 %v10954_v59, %s8719_s10  ;;  %1713 = vst.msk [vmem:[#allocation2 + $0x69] sm:$0xff] %vm1703_vm8, %v1632_v4  ;;  %2481 = vrot.lane.b32.xlu1 %v11074_v47, %s8718_s23 }
 0x39e   : > { %v2472_v62 = vpop.permute.xlu0 %2471  ;;  %v1636_v46 = vpop.permute.xlu1 %1635 }
 0x39f   : > { %2555 = vst.msk [vmem:[#allocation3 + $0x4c] sm:$0xff] %vm2552_vm13, %v2472_v62  ;;  %v11141_v62 = vmax.f32 %v714_v49, 0.0  ;;  %v14881_v49 = vld [vmem:[#allocation67_spill] sm:$0xff] }
 0x3a0   : > { %2633 = vrot.lane.b32.xlu0 %v10962_v32, %s8719_s10  ;;  %1715 = vst.msk [vmem:[#allocation2 + $0x81] sm:$0xff] %vm1703_vm8, %v1636_v46  ;;  %2485 = vrot.lane.b32.xlu1 %v11086_v54, %s8718_s23  ;;  %v14879_v46 = vld [vmem:[#allocation63_spill] sm:$0xff] }
 0x3a1   : > { %v716_v43 = vadd.f32 %v9952_v20, %v14879_v46 }
 0x3a2   : > { %v2476_v2 = vpop.permute.xlu0 %2475  ;;  %v1640_v61 = vpop.permute.xlu1 %1639 }
 0x3a3   : > { %2557 = vst.msk [vmem:[#allocation3 + $0x64] sm:$0xff] %vm2552_vm13, %v2476_v2 }
 0x3a4   : > { %2694 = vrot.lane.b32.xlu0 %v10714_v58, %s8712_s17  ;;  %1717 = vst.msk [vmem:[#allocation2 + $0x99] sm:$0xff] %vm1703_vm8, %v1640_v61  ;;  %2489 = vrot.lane.b32.xlu1 %v11094_v6, %s8718_s23 }
 0x3a6   : > { %v2480_v52 = vpop.permute.xlu0 %2479  ;;  %v1644_v16 = vpop.permute.xlu1 %1643 }
 0x3a7   : > { %2559 = vst.msk [vmem:[#allocation3 + $0x7c] sm:$0xff] %vm2552_vm13, %v2480_v52  ;;  %v718_v52 = vadd.f32 %v14880_v34, %v9952_v20 }
 0x3a8   : > { %2698 = vrot.lane.b32.xlu0 %v10726_v55, %s8712_s17  ;;  %1719 = vst.msk [vmem:[#allocation2 + $0xb1] sm:$0xff] %vm1703_vm8, %v1644_v16  ;;  %2493 = vrot.lane.b32.xlu1 %v11106_v21, %s8718_s23  ;;  %v11153_v16 = vmax.f32 %v716_v43, 0.0 }
 0x3aa   : > { %v2484_v29 = vpop.permute.xlu0 %2483  ;;  %v1648_v39 = vpop.permute.xlu1 %1647 }
 0x3ab   : > { %2561 = vst.msk [vmem:[#allocation3 + $0x94] sm:$0xff] %vm2552_vm13, %v2484_v29 }
 0x3ac   : > { %2702 = vrot.lane.b32.xlu0 %v10738_v60, %s8712_s17  ;;  %1721 = vst.msk [vmem:[#allocation2 + $0xc9] sm:$0xff] %vm1703_vm8, %v1648_v39  ;;  %2497 = vrot.lane.b32.xlu1 %v11114_v10, %s8718_s23  ;;  %v11161_v39 = vmax.f32 %v718_v52, 0.0 }
 0x3ae   : > { %v2488_v4 = vpop.permute.xlu0 %2487  ;;  %v1652_v36 = vpop.permute.xlu1 %1651 }
 0x3af   : > { %2563 = vst.msk [vmem:[#allocation3 + $0xac] sm:$0xff] %vm2552_vm13, %v2488_v4  ;;  %v720_v4 = vadd.f32 %v9952_v20, %v14881_v49 }
 0x3b0   : > { %2706 = vrot.lane.b32.xlu0 %v10747_v30, %s8712_s17  ;;  %1723 = vst.msk [vmem:[#allocation2 + $0xe1] sm:$0xff] %vm1703_vm8, %v1652_v36  ;;  %2501 = vrot.lane.b32.xlu1 %v11133_v31, %s8718_s23 }
 0x3b1   : > { %v11173_v52 = vmax.f32 %v720_v4, 0.0 }
 0x3b2   : > { %v2492_v2 = vpop.permute.xlu0 %2491  ;;  %v1656_v61 = vpop.permute.xlu1 %1655 }
 0x3b3   : > { %2565 = vst.msk [vmem:[#allocation3 + $0xc4] sm:$0xff] %vm2552_vm13, %v2492_v2  ;;  %v14882_v2 = vld [vmem:[#allocation66_spill] sm:$0xff] }
 0x3b4   : > { %2710 = vrot.lane.b32.xlu0 %v10758_v45, %s8712_s17  ;;  %1725 = vst.msk [vmem:[#allocation2 + $0xf9] sm:$0xff] %vm1703_vm8, %v1656_v61  ;;  %2505 = vrot.lane.b32.xlu1 %v11141_v62, %s8718_s23  ;;  %v722_v61 = vadd.f32 %v14882_v2, %v9952_v20 }
 0x3b6   : > { %v2496_v27 = vpop.permute.xlu0 %2495  ;;  %v1660_v29 = vpop.permute.xlu1 %1659 }
 0x3b7   : > { %2567 = vst.msk [vmem:[#allocation3 + $0xdc] sm:$0xff] %vm2552_vm13, %v2496_v27 }
 0x3b8   : > { %2714 = vrot.lane.b32.xlu0 %v10765_v63, %s8712_s17  ;;  %1727 = vst.msk [vmem:[#allocation2 + $0x111] sm:$0xff] %vm1703_vm8, %v1660_v29  ;;  %2509 = vrot.lane.b32.xlu1 %v11153_v16, %s8718_s23 }
 0x3ba   : > { %v2500_v36 = vpop.permute.xlu0 %2499  ;;  %v1664_v43 = vpop.permute.xlu1 %1663 }
 0x3bb   : > { %2569 = vst.msk [vmem:[#allocation3 + $0xf4] sm:$0xff] %vm2552_vm13, %v2500_v36  ;;  %v11181_v36 = vmax.f32 %v722_v61, 0.0 }
 0x3bc   : > { %2718 = vrot.lane.b32.xlu0 %v10779_v12, %s8712_s17  ;;  %1729 = vst.msk [vmem:[#allocation2 + $0x129] sm:$0xff] %vm1703_vm8, %v1664_v43  ;;  %2513 = vrot.lane.b32.xlu1 %v11161_v39, %s8718_s23 }
 0x3be   : > { %v2504_v27 = vpop.permute.xlu0 %2503  ;;  %v1668_v29 = vpop.permute.xlu1 %1667 }
 0x3bf   : > { %2571 = vst.msk [vmem:[#allocation3 + $0x10c] sm:$0xff] %vm2552_vm13, %v2504_v27 }
 0x3c0   : > { %2722 = vrot.lane.b32.xlu0 %v10794_v8, %s8712_s17  ;;  %1731 = vst.msk [vmem:[#allocation2 + $0x141] sm:$0xff] %vm1703_vm8, %v1668_v29  ;;  %2517 = vrot.lane.b32.xlu1 %v11173_v52, %s8718_s23  ;;  %v1857_v29 = vld [vmem:[#allocation2 + $0x10] sm:$0xff] }
 0x3c2   : > { %v2508_v43 = vpop.permute.xlu0 %2507  ;;  %v1672_v44 = vpop.permute.xlu1 %1671 }
 0x3c3   : > { %2573 = vst.msk [vmem:[#allocation3 + $0x124] sm:$0xff] %vm2552_vm13, %v2508_v43 }
 0x3c4   : > { %2726 = vrot.lane.b32.xlu0 %v10815_v19, %s8712_s17  ;;  %1733 = vst.msk [vmem:[#allocation2 + $0x159] sm:$0xff] %vm1703_vm8, %v1672_v44  ;;  %2521 = vrot.lane.b32.xlu1 %v11181_v36, %s8718_s23  ;;  %s8720_s23 = smov 124   ;;  %vm3405_vm8 = vcmask 294144  }
 0x3c6   : > { %v2512_v4 = vpop.permute.xlu0 %2511  ;;  %v1737_v27 = vpop.permute.xlu1 %1736 }
 0x3c7   : > { %2575 = vst.msk [vmem:[#allocation3 + $0x13c] sm:$0xff] %vm2552_vm13, %v2512_v4 }
 0x3c8   : > { %2730 = vrot.lane.b32.xlu0 %v10901_v7, %s8712_s17  ;;  %1826 = vst.msk [vmem:[#allocation2 + $0x8] sm:$0xff] %vm1824_vm12, %v1737_v27  ;;  %2583 = vrot.lane.b32.xlu1 %v11046_v28, %s8719_s10  ;;  %v1855_v27 = vld [vmem:[#allocation2] sm:$0xff] }
 0x3ca   : > { %v2516_v61 = vpop.permute.xlu0 %2515  ;;  %v1741_v44 = vpop.permute.xlu1 %1740 }
 0x3cb   : > { %2577 = vst.msk [vmem:[#allocation3 + $0x154] sm:$0xff] %vm2552_vm13, %v2516_v61  ;;  %v1904_v61 = vpack.c.bf16 %v1858_v24, %v1857_v29 }
 0x3cc   : > { %2734 = vrot.lane.b32.xlu0 %v10932_v17, %s8712_s17  ;;  %1828 = vst.msk [vmem:[#allocation2 + $0x20] sm:$0xff] %vm1824_vm12, %v1741_v44  ;;  %2587 = vrot.lane.b32.xlu1 %v11054_v40, %s8719_s10  ;;  %v11209_v44 = vsel %vm448_vm0, %v11127_v35, 0 }
 0x3ce   : > { %v1745_v4 = vpop.permute.xlu1 %1744 }
 0x3cf   : > { %v1856_v2 = vld [vmem:[#allocation2 + $0x8] sm:$0xff]  ;;  %1830 = vst.msk [vmem:[#allocation2 + $0x38] sm:$0xff] %vm1824_vm12, %v1745_v4 }
 0x3d0   : > { %2738 = vrot.lane.b32.xlu0 %v10942_v42, %s8712_s17  ;;  %v1903_v49 = vpack.c.bf16 %v1856_v2, %v1855_v27  ;;  %2591 = vrot.lane.b32.xlu1 %v11066_v50, %s8719_s10  ;;  %v1860_v27 = vld [vmem:[#allocation2 + $0x28] sm:$0xff] }
 0x3d2   : > { %8302 = vmatprep.mubr.msk.bf16.mxu1 %vm792_vm14, %v1903_v49  ;;  %v1749_v2 = vpop.permute.xlu1 %1748  ;;  %v1861_v49 = vld [vmem:[#allocation2 + $0x30] sm:$0xff] }
 0x3d3   : > { %8303 = vmatmul.mubr.msk.bf16.vlgmr.msra.gmra.mxu1 %vm792_vm14, %v1904_v61  ;;  %v1859_v4 = vld [vmem:[#allocation2 + $0x20] sm:$0xff]  ;;  %1832 = vst.msk [vmem:[#allocation2 + $0x50] sm:$0xff] %vm1824_vm12, %v1749_v2  ;;  %v1864_v2 = vld [vmem:[#allocation2 + $0x48] sm:$0xff] }
 0x3d4   : > { %2742 = vrot.lane.b32.xlu0 %v10954_v59, %s8712_s17  ;;  %v1905_v34 = vpack.c.bf16 %v1860_v27, %v1859_v4  ;;  %8447 = vmatpush3.bf16.msra.mxu1 %v11209_v44  ;;  %v1863_v61 = vld [vmem:[#allocation2 + $0x40] sm:$0xff] }
 0x3d5   : > { %2595 = vrot.lane.b32.xlu1 %v11074_v47, %s8719_s10  ;;  %v1907_v4 = vpack.c.bf16 %v1864_v2, %v1863_v61  ;;  %v1866_v61 = vld [vmem:[#allocation2 + $0x58] sm:$0xff]  ;;  %v1867_v2 = vld [vmem:[#allocation2 + $0x60] sm:$0xff] }
 0x3d6   : > { %8306 = vmatprep.mubr.msk.bf16.mxu1 %vm792_vm14, %v1905_v34  ;;  %v1753_v35 = vpop.permute.xlu1 %1752  ;;  %v1862_v29 = vld [vmem:[#allocation2 + $0x38] sm:$0xff] }
 0x3d7   : > { %1834 = vst.msk [vmem:[#allocation2 + $0x68] sm:$0xff] %vm1824_vm12, %v1753_v35 }
 0x3d8   : > { %2746 = vrot.lane.b32.xlu0 %v10962_v32, %s8712_s17 }
 0x3d9   : > { %2599 = vrot.lane.b32.xlu1 %v11086_v54, %s8719_s10 }
 0x3da   : > { %v2520_v43 = vpop.permute.xlu0 %2519  ;;  %v1757_v34 = vpop.permute.xlu1 %1756 }
 0x3db   : > { %2579 = vst.msk [vmem:[#allocation3 + $0x16c] sm:$0xff] %vm2552_vm13, %v2520_v43 }
 0x3dc   : > { %2807 = vrot.lane.b32.xlu0 %v10714_v58, %s8720_s23  ;;  %1836 = vst.msk [vmem:[#allocation2 + $0x80] sm:$0xff] %vm1824_vm12, %v1757_v34 }
 0x3dd   : > { %2603 = vrot.lane.b32.xlu1 %v11094_v6, %s8719_s10 }
 0x3de   : > { %v2582_v43 = vpop.permute.xlu0 %2581 }
 0x3df   : > { %2666 = vst.msk [vmem:[#allocation3 + $0x33] sm:$0xff] %vm2665_vm15, %v2582_v43  ;;  %v1906_v43 = vpack.c.bf16 %v1862_v29, %v1861_v49  ;;  %v1761_v49 = vpop.permute.xlu1 %1760  ;;  %v1868_v29 = vld [vmem:[#allocation2 + $0x68] sm:$0xff] }
 0x3e0   : > { %2811 = vrot.lane.b32.xlu0 %v10726_v55, %s8720_s23  ;;  %1838 = vst.msk [vmem:[#allocation2 + $0x98] sm:$0xff] %vm1824_vm12, %v1761_v49 }
 0x3e1   : > { %8307 = vmatmul.mubr.msk.bf16.gmra.mxu1 %vm792_vm14, %v1906_v43  ;;  %2607 = vrot.lane.b32.xlu1 %v11106_v21, %s8719_s10 }
 0x3e2   : > { %v2586_v24 = vpop.permute.xlu0 %2585  ;;  %8310 = vmatprep.mubr.msk.bf16.mxu1 %vm792_vm14, %v1907_v4  ;;  %v1909_v4 = vpack.c.bf16 %v1868_v29, %v1867_v2  ;;  %v1872_v2 = vld [vmem:[#allocation2 + $0x88] sm:$0xff] }
 0x3e3   : > { %2668 = vst.msk [vmem:[#allocation3 + $0x4b] sm:$0xff] %vm2665_vm15, %v2586_v24  ;;  %v1865_v24 = vld [vmem:[#allocation2 + $0x50] sm:$0xff]  ;;  %v1765_v34 = vpop.permute.xlu1 %1764  ;;  %v1871_v29 = vld [vmem:[#allocation2 + $0x80] sm:$0xff] }
 0x3e4   : > { %2815 = vrot.lane.b32.xlu0 %v10738_v60, %s8720_s23  ;;  %v1908_v43 = vpack.c.bf16 %v1866_v61, %v1865_v24  ;;  %1840 = vst.msk [vmem:[#allocation2 + $0xb0] sm:$0xff] %vm1824_vm12, %v1765_v34  ;;  %v1870_v61 = vld [vmem:[#allocation2 + $0x78] sm:$0xff] }
 0x3e5   : > { %2611 = vrot.lane.b32.xlu1 %v11114_v10, %s8719_s10 }
 0x3e6   : > { %v2590_v27 = vpop.permute.xlu0 %2589 }
 0x3e7   : > { %2670 = vst.msk [vmem:[#allocation3 + $0x63] sm:$0xff] %vm2665_vm15, %v2590_v27  ;;  %v1769_v49 = vpop.permute.xlu1 %1768 }
 0x3e8   : > { %2819 = vrot.lane.b32.xlu0 %v10747_v30, %s8720_s23  ;;  %1842 = vst.msk [vmem:[#allocation2 + $0xc8] sm:$0xff] %vm1824_vm12, %v1769_v49 }
 0x3e9   : > { %8311 = vmatmul.mubr.msk.bf16.gmra.mxu1 %vm792_vm14, %v1908_v43  ;;  %2615 = vrot.lane.b32.xlu1 %v11133_v31, %s8719_s10 }
 0x3ea   : > { %v2594_v35 = vpop.permute.xlu0 %2593  ;;  %8314 = vmatprep.mubr.msk.bf16.mxu1 %vm792_vm14, %v1909_v4  ;;  %v1911_v4 = vpack.c.bf16 %v1872_v2, %v1871_v29  ;;  %v1875_v29 = vld [vmem:[#allocation2 + $0xa0] sm:$0xff]  ;;  %v1876_v2 = vld [vmem:[#allocation2 + $0xa8] sm:$0xff] }
 0x3eb   : > { %2672 = vst.msk [vmem:[#allocation3 + $0x7b] sm:$0xff] %vm2665_vm15, %v2594_v35  ;;  %v1869_v35 = vld [vmem:[#allocation2 + $0x70] sm:$0xff]  ;;  %v1773_v34 = vpop.permute.xlu1 %1772 }
 0x3ec   : > { %2823 = vrot.lane.b32.xlu0 %v10758_v45, %s8720_s23  ;;  %v1910_v43 = vpack.c.bf16 %v1870_v61, %v1869_v35  ;;  %1844 = vst.msk [vmem:[#allocation2 + $0xe0] sm:$0xff] %vm1824_vm12, %v1773_v34  ;;  %v1873_v61 = vld [vmem:[#allocation2 + $0x90] sm:$0xff] }
 0x3ed   : > { %2619 = vrot.lane.b32.xlu1 %v11141_v62, %s8719_s10 }
 0x3ee   : > { %v2598_v27 = vpop.permute.xlu0 %2597 }
 0x3ef   : > { %2674 = vst.msk [vmem:[#allocation3 + $0x93] sm:$0xff] %vm2665_vm15, %v2598_v27  ;;  %v1777_v49 = vpop.permute.xlu1 %1776 }
 0x3f0   : > { %2827 = vrot.lane.b32.xlu0 %v10765_v63, %s8720_s23  ;;  %1846 = vst.msk [vmem:[#allocation2 + $0xf8] sm:$0xff] %vm1824_vm12, %v1777_v49 }
 0x3f1   : > { %8315 = vmatmul.mubr.msk.bf16.gmra.mxu1 %vm792_vm14, %v1910_v43  ;;  %2623 = vrot.lane.b32.xlu1 %v11153_v16, %s8719_s10 }
 0x3f2   : > { %v2602_v24 = vpop.permute.xlu0 %2601  ;;  %8318 = vmatprep.mubr.msk.bf16.mxu1 %vm792_vm14, %v1911_v4  ;;  %v1913_v4 = vpack.c.bf16 %v1876_v2, %v1875_v29  ;;  %v1880_v29 = vld [vmem:[#allocation2 + $0xc8] sm:$0xff]  ;;  %v1879_v2 = vld [vmem:[#allocation2 + $0xc0] sm:$0xff] }
 0x3f3   : > { %2676 = vst.msk [vmem:[#allocation3 + $0xab] sm:$0xff] %vm2665_vm15, %v2602_v24  ;;  %v1874_v24 = vld [vmem:[#allocation2 + $0x98] sm:$0xff]  ;;  %v1781_v34 = vpop.permute.xlu1 %1780 }
 0x3f4   : > { %2831 = vrot.lane.b32.xlu0 %v10779_v12, %s8720_s23  ;;  %v1912_v43 = vpack.c.bf16 %v1874_v24, %v1873_v61  ;;  %1848 = vst.msk [vmem:[#allocation2 + $0x110] sm:$0xff] %vm1824_vm12, %v1781_v34  ;;  %v1878_v61 = vld [vmem:[#allocation2 + $0xb8] sm:$0xff] }
 0x3f5   : > { %2627 = vrot.lane.b32.xlu1 %v11161_v39, %s8719_s10 }
 0x3f6   : > { %v2606_v27 = vpop.permute.xlu0 %2605 }
 0x3f7   : > { %2678 = vst.msk [vmem:[#allocation3 + $0xc3] sm:$0xff] %vm2665_vm15, %v2606_v27  ;;  %v1785_v49 = vpop.permute.xlu1 %1784 }
 0x3f8   : > { %2835 = vrot.lane.b32.xlu0 %v10794_v8, %s8720_s23  ;;  %1850 = vst.msk [vmem:[#allocation2 + $0x128] sm:$0xff] %vm1824_vm12, %v1785_v49 }
 0x3f9   : > { %8319 = vmatmul.mubr.msk.bf16.gmra.mxu1 %vm792_vm14, %v1912_v43  ;;  %2631 = vrot.lane.b32.xlu1 %v11173_v52, %s8719_s10 }
 0x3fa   : > { %v2610_v35 = vpop.permute.xlu0 %2609  ;;  %8322 = vmatprep.mubr.msk.bf16.mxu1 %vm792_vm14, %v1913_v4  ;;  %v1915_v4 = vpack.c.bf16 %v1880_v29, %v1879_v2  ;;  %v1883_v29 = vld [vmem:[#allocation2 + $0xe0] sm:$0xff]  ;;  %v1884_v2 = vld [vmem:[#allocation2 + $0xe8] sm:$0xff] }
 0x3fb   : > { %2680 = vst.msk [vmem:[#allocation3 + $0xdb] sm:$0xff] %vm2665_vm15, %v2610_v35  ;;  %v1877_v35 = vld [vmem:[#allocation2 + $0xb0] sm:$0xff]  ;;  %v1789_v34 = vpop.permute.xlu1 %1788 }
 0x3fc   : > { %2839 = vrot.lane.b32.xlu0 %v10815_v19, %s8720_s23  ;;  %v1914_v43 = vpack.c.bf16 %v1878_v61, %v1877_v35  ;;  %1852 = vst.msk [vmem:[#allocation2 + $0x140] sm:$0xff] %vm1824_vm12, %v1789_v34  ;;  %v1882_v61 = vld [vmem:[#allocation2 + $0xd8] sm:$0xff] }
 0x3fd   : > { %2635 = vrot.lane.b32.xlu1 %v11181_v36, %s8719_s10  ;;  %s8723_s10 = smov 20  }
 0x3fe   : > { %v2614_v27 = vpop.permute.xlu0 %2613 }
 0x3ff   : > { %2682 = vst.msk [vmem:[#allocation3 + $0xf3] sm:$0xff] %vm2665_vm15, %v2614_v27  ;;  %v1793_v49 = vpop.permute.xlu1 %1792 }
 0x400   : > { %2843 = vrot.lane.b32.xlu0 %v10901_v7, %s8720_s23  ;;  %1854 = vst.msk [vmem:[#allocation2 + $0x158] sm:$0xff] %vm1824_vm12, %v1793_v49  ;;  %vm3655_vm12 = vcmask 359744  }
 0x401   : > { %8323 = vmatmul.mubr.msk.bf16.gmra.mxu1 %vm792_vm14, %v1914_v43  ;;  %2696 = vrot.lane.b32.xlu1 %v11046_v28, %s8712_s17 }
 0x402   : > { %v2618_v24 = vpop.permute.xlu0 %2617  ;;  %8326 = vmatprep.mubr.msk.bf16.mxu1 %vm792_vm14, %v1915_v4  ;;  %v1917_v4 = vpack.c.bf16 %v1884_v2, %v1883_v29  ;;  %v1887_v29 = vld [vmem:[#allocation2 + $0x100] sm:$0xff]  ;;  %v1888_v2 = vld [vmem:[#allocation2 + $0x108] sm:$0xff] }
 0x403   : > { %2684 = vst.msk [vmem:[#allocation3 + $0x10b] sm:$0xff] %vm2665_vm15, %v2618_v24  ;;  %v1881_v24 = vld [vmem:[#allocation2 + $0xd0] sm:$0xff]  ;;  %v2470_v34 = vpop.permute.xlu1 %2469 }
 0x404   : > { %2847 = vrot.lane.b32.xlu0 %v10932_v17, %s8720_s23  ;;  %v1916_v43 = vpack.c.bf16 %v1882_v61, %v1881_v24  ;;  %2554 = vst.msk [vmem:[#allocation3 + $0x3c] sm:$0xff] %vm2552_vm13, %v2470_v34  ;;  %v1885_v61 = vld [vmem:[#allocation2 + $0xf0] sm:$0xff] }
 0x405   : > { %2700 = vrot.lane.b32.xlu1 %v11054_v40, %s8712_s17 }
 0x406   : > { %v2622_v27 = vpop.permute.xlu0 %2621 }
 0x407   : > { %2686 = vst.msk [vmem:[#allocation3 + $0x123] sm:$0xff] %vm2665_vm15, %v2622_v27  ;;  %v2474_v49 = vpop.permute.xlu1 %2473 }
 0x408   : > { %2851 = vrot.lane.b32.xlu0 %v10942_v42, %s8720_s23  ;;  %2556 = vst.msk [vmem:[#allocation3 + $0x54] sm:$0xff] %vm2552_vm13, %v2474_v49 }
 0x409   : > { %8327 = vmatmul.mubr.msk.bf16.gmra.mxu1 %vm792_vm14, %v1916_v43  ;;  %2704 = vrot.lane.b32.xlu1 %v11066_v50, %s8712_s17 }
 0x40a   : > { %v2626_v35 = vpop.permute.xlu0 %2625  ;;  %8330 = vmatprep.mubr.msk.bf16.mxu1 %vm792_vm14, %v1917_v4  ;;  %v1919_v4 = vpack.c.bf16 %v1888_v2, %v1887_v29  ;;  %v1892_v29 = vld [vmem:[#allocation2 + $0x128] sm:$0xff]  ;;  %v1891_v2 = vld [vmem:[#allocation2 + $0x120] sm:$0xff] }
 0x40b   : > { %2688 = vst.msk [vmem:[#allocation3 + $0x13b] sm:$0xff] %vm2665_vm15, %v2626_v35  ;;  %v1886_v35 = vld [vmem:[#allocation2 + $0xf8] sm:$0xff]  ;;  %v2478_v34 = vpop.permute.xlu1 %2477 }
 0x40c   : > { %2855 = vrot.lane.b32.xlu0 %v10954_v59, %s8720_s23  ;;  %v1918_v43 = vpack.c.bf16 %v1886_v35, %v1885_v61  ;;  %2558 = vst.msk [vmem:[#allocation3 + $0x6c] sm:$0xff] %vm2552_vm13, %v2478_v34  ;;  %v1890_v61 = vld [vmem:[#allocation2 + $0x118] sm:$0xff] }
 0x40d   : > { %2708 = vrot.lane.b32.xlu1 %v11074_v47, %s8712_s17 }
 0x40e   : > { %v2630_v27 = vpop.permute.xlu0 %2629 }
 0x40f   : > { %2690 = vst.msk [vmem:[#allocation3 + $0x153] sm:$0xff] %vm2665_vm15, %v2630_v27  ;;  %v2482_v49 = vpop.permute.xlu1 %2481 }
 0x410   : > { %2859 = vrot.lane.b32.xlu0 %v10962_v32, %s8720_s23  ;;  %2560 = vst.msk [vmem:[#allocation3 + $0x84] sm:$0xff] %vm2552_vm13, %v2482_v49 }
 0x411   : > { %8331 = vmatmul.mubr.msk.bf16.gmra.mxu1 %vm792_vm14, %v1918_v43  ;;  %2712 = vrot.lane.b32.xlu1 %v11086_v54, %s8712_s17 }
 0x412   : > { %v2634_v24 = vpop.permute.xlu0 %2633  ;;  %8334 = vmatprep.mubr.msk.bf16.mxu1 %vm792_vm14, %v1919_v4  ;;  %v1921_v4 = vpack.c.bf16 %v1892_v29, %v1891_v2  ;;  %v1895_v29 = vld [vmem:[#allocation2 + $0x140] sm:$0xff]  ;;  %v1896_v2 = vld [vmem:[#allocation2 + $0x148] sm:$0xff] }
 0x413   : > { %2692 = vst.msk [vmem:[#allocation3 + $0x16b] sm:$0xff] %vm2665_vm15, %v2634_v24  ;;  %v1889_v24 = vld [vmem:[#allocation2 + $0x110] sm:$0xff]  ;;  %v2486_v34 = vpop.permute.xlu1 %2485 }
 0x414   : > { %2951 = vrot.lane.b32.xlu0 %v10714_v58, %s14639_s25  ;;  %v1920_v43 = vpack.c.bf16 %v1890_v61, %v1889_v24  ;;  %2562 = vst.msk [vmem:[#allocation3 + $0x9c] sm:$0xff] %vm2552_vm13, %v2486_v34  ;;  %v1894_v61 = vld [vmem:[#allocation2 + $0x138] sm:$0xff] }
 0x415   : > { %2716 = vrot.lane.b32.xlu1 %v11094_v6, %s8712_s17 }
 0x416   : > { %v2695_v27 = vpop.permute.xlu0 %2694 }
 0x417   : > { %2779 = vst.msk [vmem:[#allocation3 + $0x32] sm:$0xff] %vm2778_vm10, %v2695_v27  ;;  %v2490_v49 = vpop.permute.xlu1 %2489 }
 0x418   : > { %2955 = vrot.lane.b32.xlu0 %v10726_v55, %s14639_s25  ;;  %2564 = vst.msk [vmem:[#allocation3 + $0xb4] sm:$0xff] %vm2552_vm13, %v2490_v49 }
 0x419   : > { %8335 = vmatmul.mubr.msk.bf16.gmra.mxu1 %vm792_vm14, %v1920_v43  ;;  %2720 = vrot.lane.b32.xlu1 %v11106_v21, %s8712_s17 }
 0x41a   : > { %v2699_v35 = vpop.permute.xlu0 %2698  ;;  %8338 = vmatprep.mubr.msk.bf16.mxu1 %vm792_vm14, %v1921_v4  ;;  %v1923_v4 = vpack.c.bf16 %v1896_v2, %v1895_v29  ;;  %v1899_v29 = vld [vmem:[#allocation2 + $0x160] sm:$0xff]  ;;  %v1900_v2 = vld [vmem:[#allocation2 + $0x168] sm:$0xff] }
 0x41b   : > { %2781 = vst.msk [vmem:[#allocation3 + $0x4a] sm:$0xff] %vm2778_vm10, %v2699_v35  ;;  %v1893_v35 = vld [vmem:[#allocation2 + $0x130] sm:$0xff]  ;;  %v2494_v34 = vpop.permute.xlu1 %2493 }
 0x41c   : > { %2959 = vrot.lane.b32.xlu0 %v10738_v60, %s14639_s25  ;;  %v1922_v43 = vpack.c.bf16 %v1894_v61, %v1893_v35  ;;  %2566 = vst.msk [vmem:[#allocation3 + $0xcc] sm:$0xff] %vm2552_vm13, %v2494_v34  ;;  %v1897_v61 = vld [vmem:[#allocation2 + $0x150] sm:$0xff] }
 0x41d   : > { %2724 = vrot.lane.b32.xlu1 %v11114_v10, %s8712_s17 }
 0x41e   : > { %v2703_v27 = vpop.permute.xlu0 %2702 }
 0x41f   : > { %2783 = vst.msk [vmem:[#allocation3 + $0x62] sm:$0xff] %vm2778_vm10, %v2703_v27  ;;  %v2498_v49 = vpop.permute.xlu1 %2497 }
 0x420   : > { %2963 = vrot.lane.b32.xlu0 %v10747_v30, %s14639_s25  ;;  %2568 = vst.msk [vmem:[#allocation3 + $0xe4] sm:$0xff] %vm2552_vm13, %v2498_v49 }
 0x421   : > { %8339 = vmatmul.mubr.msk.bf16.gmra.mxu1 %vm792_vm14, %v1922_v43  ;;  %2728 = vrot.lane.b32.xlu1 %v11133_v31, %s8712_s17 }
 0x422   : > { %v2707_v24 = vpop.permute.xlu0 %2706  ;;  %8342 = vmatprep.mubr.msk.bf16.mxu1 %vm792_vm14, %v1923_v4  ;;  %v1925_v4 = vpack.c.bf16 %v1900_v2, %v1899_v29 }
 0x423   : > { %2785 = vst.msk [vmem:[#allocation3 + $0x7a] sm:$0xff] %vm2778_vm10, %v2707_v24  ;;  %v1898_v24 = vld [vmem:[#allocation2 + $0x158] sm:$0xff]  ;;  %v2502_v34 = vpop.permute.xlu1 %2501 }
 0x424   : > { %2967 = vrot.lane.b32.xlu0 %v10758_v45, %s14639_s25  ;;  %v1924_v43 = vpack.c.bf16 %v1898_v24, %v1897_v61  ;;  %2570 = vst.msk [vmem:[#allocation3 + $0xfc] sm:$0xff] %vm2552_vm13, %v2502_v34  ;;  %v1902_v24 = vld [vmem:[#allocation2 + $0x178] sm:$0xff] }
 0x425   : > { %2732 = vrot.lane.b32.xlu1 %v11141_v62, %s8712_s17 }
 0x426   : > { %v2711_v27 = vpop.permute.xlu0 %2710 }
 0x427   : > { %2787 = vst.msk [vmem:[#allocation3 + $0x92] sm:$0xff] %vm2778_vm10, %v2711_v27  ;;  %v2506_v29 = vpop.permute.xlu1 %2505 }
 0x428   : > { %2971 = vrot.lane.b32.xlu0 %v10765_v63, %s14639_s25  ;;  %2572 = vst.msk [vmem:[#allocation3 + $0x114] sm:$0xff] %vm2552_vm13, %v2506_v29  ;;  %v14886_v29 = vld [vmem:[#allocation23_spill] sm:$0xff] }
 0x429   : > { %8343 = vmatmul.mubr.msk.bf16.gmra.mxu1 %vm792_vm14, %v1924_v43  ;;  %2736 = vrot.lane.b32.xlu1 %v11153_v16, %s8712_s17 }
 0x42a   : > { %v2715_v35 = vpop.permute.xlu0 %2714  ;;  %8346 = vmatprep.mubr.msk.bf16.mxu1 %vm792_vm14, %v1925_v4  ;;  %v14883_v4 = vld [vmem:[#allocation21_spill] sm:$0xff] }
 0x42b   : > { %2789 = vst.msk [vmem:[#allocation3 + $0xaa] sm:$0xff] %vm2778_vm10, %v2715_v35  ;;  %v1901_v35 = vld [vmem:[#allocation2 + $0x170] sm:$0xff]  ;;  %v2510_v2 = vpop.permute.xlu1 %2509 }
 0x42c   : > { %2975 = vrot.lane.b32.xlu0 %v10779_v12, %s14639_s25  ;;  %v1926_v61 = vpack.c.bf16 %v1902_v24, %v1901_v35  ;;  %2574 = vst.msk [vmem:[#allocation3 + $0x12c] sm:$0xff] %vm2552_vm13, %v2510_v2 }
 0x42d   : > { %2740 = vrot.lane.b32.xlu1 %v11161_v39, %s8712_s17 }
 0x42e   : > { %v2719_v27 = vpop.permute.xlu0 %2718 }
 0x42f   : > { %2791 = vst.msk [vmem:[#allocation3 + $0xc2] sm:$0xff] %vm2778_vm10, %v2719_v27  ;;  %v14884_v27 = vld [vmem:[#allocation20_spill] sm:$0xff]  ;;  %v2514_v24 = vpop.permute.xlu1 %2513 }
 0x430   : > { %2979 = vrot.lane.b32.xlu0 %v10794_v8, %s14639_s25  ;;  %v14885_v34 = vpack.c.bf16 %v14883_v4, %v14884_v27  ;;  %2576 = vst.msk [vmem:[#allocation3 + $0x144] sm:$0xff] %vm2552_vm13, %v2514_v24  ;;  %v14889_v4 = vld [vmem:[#allocation26_spill] sm:$0xff]  ;;  %v14890_v27 = vld [vmem:[#allocation25_spill] sm:$0xff] }
 0x431   : > { %8347 = vmatmul.mubr.msk.bf16.gmra.mxu1 %vm792_vm14, %v1926_v61  ;;  %2744 = vrot.lane.b32.xlu1 %v11173_v52, %s8712_s17  ;;  %v14887_v61 = vld [vmem:[#allocation22_spill] sm:$0xff]  ;;  %vm2891_vm14 = vcmask 130144  }
 0x432   : > { %v2723_v49 = vpop.permute.xlu0 %2722  ;;  %8418 = vmatprep.mubr.msk.bf16.mxu1 %vm399_vm3, %v14885_v34  ;;  %v14891_v34 = vpack.c.bf16 %v14889_v4, %v14890_v27 }
 0x433   : > { %2793 = vst.msk [vmem:[#allocation3 + $0xda] sm:$0xff] %vm2778_vm10, %v2723_v49  ;;  %v2518_v2 = vpop.permute.xlu1 %2517 }
 0x434   : > { %2983 = vrot.lane.b32.xlu0 %v10815_v19, %s14639_s25  ;;  %2578 = vst.msk [vmem:[#allocation3 + $0x15c] sm:$0xff] %vm2552_vm13, %v2518_v2  ;;  %v14894_v2 = vld [vmem:[#allocation27_spill] sm:$0xff] }
 0x435   : > { %2748 = vrot.lane.b32.xlu1 %v11181_v36, %s8712_s17  ;;  %s8722_s17 = smov 12  }
 0x436   : > { %v2727_v43 = vpop.permute.xlu0 %2726 }
 0x437   : > { %2795 = vst.msk [vmem:[#allocation3 + $0xf2] sm:$0xff] %vm2778_vm10, %v2727_v43  ;;  %v14888_v43 = vpack.c.bf16 %v14886_v29, %v14887_v61  ;;  %v2522_v24 = vpop.permute.xlu1 %2521 }
 0x438   : > { %2987 = vrot.lane.b32.xlu0 %v10901_v7, %s14639_s25  ;;  %2580 = vst.msk [vmem:[#allocation3 + $0x174] sm:$0xff] %vm2552_vm13, %v2522_v24  ;;  %vm3784_vm13 = vcmask 392544  }
 0x439   : > { %8419 = vmatmul.mubr.msk.bf16.vlgmr.msra.gmra.mxu1 %vm399_vm3, %v14888_v43  ;;  %2809 = vrot.lane.b32.xlu1 %v11046_v28, %s8720_s23  ;;  %v14893_v43 = vld [vmem:[#allocation28_spill] sm:$0xff] }
 0x43a   : > { %v2731_v35 = vpop.permute.xlu0 %2730  ;;  %8422 = vmatprep.mubr.msk.bf16.mxu1 %vm399_vm3, %v14891_v34  ;;  %v14895_v4 = vpack.c.bf16 %v14893_v43, %v14894_v2  ;;  %v14896_v34 = vld [vmem:[#allocation30_spill] sm:$0xff] }
 0x43b   : > { %2797 = vst.msk [vmem:[#allocation3 + $0x10a] sm:$0xff] %vm2778_vm10, %v2731_v35  ;;  %v2584_v27 = vpop.permute.xlu1 %2583 }
 0x43c   : > { %2991 = vrot.lane.b32.xlu0 %v10932_v17, %s14639_s25  ;;  %2667 = vst.msk [vmem:[#allocation3 + $0x3b] sm:$0xff] %vm2665_vm15, %v2584_v27  ;;  %v14900_v27 = vld [vmem:[#allocation32_spill] sm:$0xff] }
 0x43d   : > { %2813 = vrot.lane.b32.xlu1 %v11054_v40, %s8720_s23 }
 0x43e   : > { %v2735_v49 = vpop.permute.xlu0 %2734 }
 0x43f   : > { %2799 = vst.msk [vmem:[#allocation3 + $0x122] sm:$0xff] %vm2778_vm10, %v2735_v49  ;;  %v14892_v49 = vld [vmem:[#allocation69_spill] sm:$0xff]  ;;  %v2588_v2 = vpop.permute.xlu1 %2587 }
 0x440   : > { %2995 = vrot.lane.b32.xlu0 %v10942_v42, %s14639_s25  ;;  %v723_v29 = vadd.f32 %v9952_v20, %v14892_v49  ;;  %2669 = vst.msk [vmem:[#allocation3 + $0x53] sm:$0xff] %vm2665_vm15, %v2588_v2 }
 0x441   : > { %8423 = vmatmul.mubr.msk.bf16.gmra.mxu1 %vm399_vm3, %v14895_v4  ;;  %2817 = vrot.lane.b32.xlu1 %v11066_v50, %s8720_s23  ;;  %v14899_v4 = vld [vmem:[#allocation31_spill] sm:$0xff] }
 0x442   : > { %v2739_v35 = vpop.permute.xlu0 %2738  ;;  %v11420_v49 = vmax.f32 %v723_v29, 0.0 }
 0x443   : > { %2801 = vst.msk [vmem:[#allocation3 + $0x13a] sm:$0xff] %vm2778_vm10, %v2739_v35  ;;  %v14897_v35 = vld [vmem:[#allocation29_spill] sm:$0xff]  ;;  %v2592_v29 = vpop.permute.xlu1 %2591 }
 0x444   : > { %2999 = vrot.lane.b32.xlu0 %v10954_v59, %s14639_s25  ;;  %v14898_v24 = vpack.c.bf16 %v14896_v34, %v14897_v35  ;;  %v14901_v34 = vpack.c.bf16 %v14899_v4, %v14900_v27  ;;  %2671 = vst.msk [vmem:[#allocation3 + $0x6b] sm:$0xff] %vm2665_vm15, %v2592_v29  ;;  %v14902_v35 = vld [vmem:[#allocation33_spill] sm:$0xff]  ;;  %v14905_v27 = vld [vmem:[#allocation36_spill] sm:$0xff] }
 0x445   : > { %2821 = vrot.lane.b32.xlu1 %v11074_v47, %s8720_s23 }
 0x446   : > { %v2743_v61 = vpop.permute.xlu0 %2742  ;;  %8426 = vmatprep.mubr.msk.bf16.mxu1 %vm399_vm3, %v14898_v24  ;;  %v14903_v24 = vld [vmem:[#allocation34_spill] sm:$0xff] }
 0x447   : > { %2803 = vst.msk [vmem:[#allocation3 + $0x152] sm:$0xff] %vm2778_vm10, %v2743_v61  ;;  %v2596_v4 = vpop.permute.xlu1 %2595 }
 0x448   : > { %3003 = vrot.lane.b32.xlu0 %v10962_v32, %s14639_s25  ;;  %2673 = vst.msk [vmem:[#allocation3 + $0x83] sm:$0xff] %vm2665_vm15, %v2596_v4 }
 0x449   : > { %8427 = vmatmul.mubr.msk.bf16.gmra.mxu1 %vm399_vm3, %v14901_v34  ;;  %2825 = vrot.lane.b32.xlu1 %v11086_v54, %s8720_s23  ;;  %v14906_v34 = vld [vmem:[#allocation35_spill] sm:$0xff] }
 0x44a   : > { %v2747_v43 = vpop.permute.xlu0 %2746  ;;  %v14907_v29 = vpack.c.bf16 %v14905_v27, %v14906_v34  ;;  %v14911_v34 = vld [vmem:[#allocation40_spill] sm:$0xff] }
 0x44b   : > { %2805 = vst.msk [vmem:[#allocation3 + $0x16a] sm:$0xff] %vm2778_vm10, %v2747_v43  ;;  %v14904_v43 = vpack.c.bf16 %v14902_v35, %v14903_v24  ;;  %v2600_v35 = vpop.permute.xlu1 %2599  ;;  %v14908_v24 = vld [vmem:[#allocation38_spill] sm:$0xff] }
 0x44c   : > { %3007 = vrot.lane.b32.xlu0 %v11420_v49, %s14639_s25  ;;  %2675 = vst.msk [vmem:[#allocation3 + $0x9b] sm:$0xff] %vm2665_vm15, %v2600_v35 }
 0x44d   : > { %8430 = vmatprep.mubr.msk.bf16.mxu1 %vm399_vm3, %v14904_v43  ;;  %v14909_v43 = vld [vmem:[#allocation37_spill] sm:$0xff]  ;;  %2829 = vrot.lane.b32.xlu1 %v11094_v6, %s8720_s23 }
 0x44e   : > { %v2808_v61 = vpop.permute.xlu0 %2807 }
 0x44f   : > { %2892 = vst.msk [vmem:[#allocation3 + $0x31] sm:$0xff] %vm2891_vm14, %v2808_v61  ;;  %v2604_v27 = vpop.permute.xlu1 %2603 }
 0x450   : > { %2921 = vst.msk [vmem:[#allocation3 + $0x30] sm:$0xff] %vm2920_vm2, %v10714_v58  ;;  %3073 = vrot.lane.b32.xlu0 %v10714_v58, %s8710_s13 }
 0x451   : > { %8431 = vmatmul.mubr.msk.bf16.gmra.mxu1 %vm399_vm3, %v14907_v29  ;;  %2677 = vst.msk [vmem:[#allocation3 + $0xb3] sm:$0xff] %vm2665_vm15, %v2604_v27  ;;  %2833 = vrot.lane.b32.xlu1 %v11106_v21, %s8720_s23  ;;  %v14912_v29 = vld [vmem:[#allocation39_spill] sm:$0xff] }
 0x452   : > { %v2812_v2 = vpop.permute.xlu0 %2811  ;;  %v14913_v35 = vpack.c.bf16 %v14911_v34, %v14912_v29  ;;  %v14917_v29 = vld [vmem:[#allocation42_spill] sm:$0xff] }
 0x453   : > { %2894 = vst.msk [vmem:[#allocation3 + $0x49] sm:$0xff] %vm2891_vm14, %v2812_v2  ;;  %v14910_v2 = vpack.c.bf16 %v14908_v24, %v14909_v43  ;;  %v2608_v24 = vpop.permute.xlu1 %2607  ;;  %v14914_v43 = vld [vmem:[#allocation41_spill] sm:$0xff] }
 0x454   : > { %2923 = vst.msk [vmem:[#allocation3 + $0x48] sm:$0xff] %vm2920_vm2, %v10726_v55  ;;  %3077 = vrot.lane.b32.xlu0 %v10726_v55, %s8710_s13 }
 0x455   : > { %8434 = vmatprep.mubr.msk.bf16.mxu1 %vm399_vm3, %v14910_v2  ;;  %2679 = vst.msk [vmem:[#allocation3 + $0xcb] sm:$0xff] %vm2665_vm15, %v2608_v24  ;;  %v14915_v2 = vld [vmem:[#allocation24_spill] sm:$0xff]  ;;  %2837 = vrot.lane.b32.xlu1 %v11114_v10, %s8720_s23 }
 0x456   : > { %v2816_v61 = vpop.permute.xlu0 %2815 }
 0x457   : > { %2896 = vst.msk [vmem:[#allocation3 + $0x61] sm:$0xff] %vm2891_vm14, %v2816_v61  ;;  %v2612_v34 = vpop.permute.xlu1 %2611 }
 0x458   : > { %2925 = vst.msk [vmem:[#allocation3 + $0x60] sm:$0xff] %vm2920_vm2, %v10738_v60  ;;  %3081 = vrot.lane.b32.xlu0 %v10738_v60, %s8710_s13 }
 0x459   : > { %8435 = vmatmul.mubr.msk.bf16.gmra.mxu1 %vm399_vm3, %v14913_v35  ;;  %2681 = vst.msk [vmem:[#allocation3 + $0xe3] sm:$0xff] %vm2665_vm15, %v2612_v34  ;;  %2841 = vrot.lane.b32.xlu1 %v11133_v31, %s8720_s23  ;;  %v14918_v35 = vld [vmem:[#allocation10_spill] sm:$0xff] }
 0x45a   : > { %v2820_v4 = vpop.permute.xlu0 %2819  ;;  %v14919_v24 = vpack.c.bf16 %v14917_v29, %v14918_v35  ;;  %v14923_v35 = vld [vmem:[#allocation11_spill] sm:$0xff] }
 0x45b   : > { %2898 = vst.msk [vmem:[#allocation3 + $0x79] sm:$0xff] %vm2891_vm14, %v2820_v4  ;;  %v14916_v4 = vpack.c.bf16 %v14914_v43, %v14915_v2  ;;  %v2616_v43 = vpop.permute.xlu1 %2615  ;;  %v14920_v2 = vld [vmem:[#allocation15_spill] sm:$0xff] }
 0x45c   : > { %2927 = vst.msk [vmem:[#allocation3 + $0x78] sm:$0xff] %vm2920_vm2, %v10747_v30  ;;  %3085 = vrot.lane.b32.xlu0 %v10747_v30, %s8710_s13 }
 0x45d   : > { %8438 = vmatprep.mubr.msk.bf16.mxu1 %vm399_vm3, %v14916_v4  ;;  %2683 = vst.msk [vmem:[#allocation3 + $0xfb] sm:$0xff] %vm2665_vm15, %v2616_v43  ;;  %v14921_v4 = vld [vmem:[#allocation12_spill] sm:$0xff]  ;;  %2845 = vrot.lane.b32.xlu1 %v11141_v62, %s8720_s23 }
 0x45e   : > { %v2824_v61 = vpop.permute.xlu0 %2823 }
 0x45f   : > { %2900 = vst.msk [vmem:[#allocation3 + $0x91] sm:$0xff] %vm2891_vm14, %v2824_v61  ;;  %v2620_v29 = vpop.permute.xlu1 %2619 }
 0x460   : > { %2929 = vst.msk [vmem:[#allocation3 + $0x90] sm:$0xff] %vm2920_vm2, %v10758_v45  ;;  %3089 = vrot.lane.b32.xlu0 %v10758_v45, %s8710_s13 }
 0x461   : > { %8439 = vmatmul.mubr.msk.bf16.gmra.mxu1 %vm399_vm3, %v14919_v24  ;;  %2685 = vst.msk [vmem:[#allocation3 + $0x113] sm:$0xff] %vm2665_vm15, %v2620_v29  ;;  %2849 = vrot.lane.b32.xlu1 %v11153_v16, %s8720_s23 }
 0x462   : > { %v2828_v27 = vpop.permute.xlu0 %2827 }
 0x463   : > { %2902 = vst.msk [vmem:[#allocation3 + $0xa9] sm:$0xff] %vm2891_vm14, %v2828_v27  ;;  %v14922_v27 = vpack.c.bf16 %v14920_v2, %v14921_v4  ;;  %v2624_v24 = vpop.permute.xlu1 %2623 }
 0x464   : > { %2931 = vst.msk [vmem:[#allocation3 + $0xa8] sm:$0xff] %vm2920_vm2, %v10765_v63  ;;  %3093 = vrot.lane.b32.xlu0 %v10765_v63, %s8710_s13 }
 0x465   : > { %8442 = vmatprep.mubr.msk.bf16.mxu1 %vm399_vm3, %v14922_v27  ;;  %2687 = vst.msk [vmem:[#allocation3 + $0x12b] sm:$0xff] %vm2665_vm15, %v2624_v24  ;;  %2853 = vrot.lane.b32.xlu1 %v11161_v39, %s8720_s23 }
 0x466   : > { %v2832_v61 = vpop.permute.xlu0 %2831 }
 0x467   : > { %2904 = vst.msk [vmem:[#allocation3 + $0xc1] sm:$0xff] %vm2891_vm14, %v2832_v61  ;;  %v2628_v2 = vpop.permute.xlu1 %2627 }
 0x468   : > { %2933 = vst.msk [vmem:[#allocation3 + $0xc0] sm:$0xff] %vm2920_vm2, %v10779_v12  ;;  %3097 = vrot.lane.b32.xlu0 %v10779_v12, %s8710_s13 }
 0x469   : > { %8443 = vmatmul.mubr.msk.bf16.gmra.mxu1 %vm399_vm3, %v14923_v35  ;;  %2689 = vst.msk [vmem:[#allocation3 + $0x143] sm:$0xff] %vm2665_vm15, %v2628_v2  ;;  %2857 = vrot.lane.b32.xlu1 %v11173_v52, %s8720_s23 }
 0x46a   : > { %v2836_v34 = vpop.permute.xlu0 %2835 }
 0x46b   : > { %2906 = vst.msk [vmem:[#allocation3 + $0xd9] sm:$0xff] %vm2891_vm14, %v2836_v34  ;;  %v2632_v27 = vpop.permute.xlu1 %2631 }
 0x46c   : > { %2935 = vst.msk [vmem:[#allocation3 + $0xd8] sm:$0xff] %vm2920_vm2, %v10794_v8  ;;  %3101 = vrot.lane.b32.xlu0 %v10794_v8, %s8710_s13 }
 0x46d   : > { %2691 = vst.msk [vmem:[#allocation3 + $0x15b] sm:$0xff] %vm2665_vm15, %v2632_v27  ;;  %2861 = vrot.lane.b32.xlu1 %v11181_v36, %s8720_s23  ;;  %s14640_s23 = smov 64  }
 0x46e   : > { %v2840_v61 = vpop.permute.xlu0 %2839 }
 0x46f   : > { %2908 = vst.msk [vmem:[#allocation3 + $0xf1] sm:$0xff] %vm2891_vm14, %v2840_v61  ;;  %v2636_v29 = vpop.permute.xlu1 %2635 }
 0x470   : > { %2937 = vst.msk [vmem:[#allocation3 + $0xf0] sm:$0xff] %vm2920_vm2, %v10815_v19  ;;  %3105 = vrot.lane.b32.xlu0 %v10815_v19, %s8710_s13 }
 0x471   : > { %2693 = vst.msk [vmem:[#allocation3 + $0x173] sm:$0xff] %vm2665_vm15, %v2636_v29  ;;  %2953 = vrot.lane.b32.xlu1 %v11046_v28, %s14639_s25  ;;  %vm3913_vm15 = vcmask 425344  }
 0x472   : > { %v2844_v43 = vpop.permute.xlu0 %2843 }
 0x473   : > { %2910 = vst.msk [vmem:[#allocation3 + $0x109] sm:$0xff] %vm2891_vm14, %v2844_v43  ;;  %v2697_v35 = vpop.permute.xlu1 %2696 }
 0x474   : > { %2939 = vst.msk [vmem:[#allocation3 + $0x108] sm:$0xff] %vm2920_vm2, %v10901_v7  ;;  %3109 = vrot.lane.b32.xlu0 %v10901_v7, %s8710_s13 }
 0x475   : > { %2780 = vst.msk [vmem:[#allocation3 + $0x3a] sm:$0xff] %vm2778_vm10, %v2697_v35  ;;  %2957 = vrot.lane.b32.xlu1 %v11054_v40, %s14639_s25 }
 0x476   : > { %v2848_v4 = vpop.permute.xlu0 %2847 }
 0x477   : > { %2912 = vst.msk [vmem:[#allocation3 + $0x121] sm:$0xff] %vm2891_vm14, %v2848_v4  ;;  %v2701_v43 = vpop.permute.xlu1 %2700 }
 0x478   : > { %2941 = vst.msk [vmem:[#allocation3 + $0x120] sm:$0xff] %vm2920_vm2, %v10932_v17  ;;  %3113 = vrot.lane.b32.xlu0 %v10932_v17, %s8710_s13 }
 0x479   : > { %2782 = vst.msk [vmem:[#allocation3 + $0x52] sm:$0xff] %vm2778_vm10, %v2701_v43  ;;  %2961 = vrot.lane.b32.xlu1 %v11066_v50, %s14639_s25 }
 0x47a   : > { %v2852_v34 = vpop.permute.xlu0 %2851 }
 0x47b   : > { %2914 = vst.msk [vmem:[#allocation3 + $0x139] sm:$0xff] %vm2891_vm14, %v2852_v34  ;;  %v2705_v4 = vpop.permute.xlu1 %2704 }
 0x47c   : > { %2943 = vst.msk [vmem:[#allocation3 + $0x138] sm:$0xff] %vm2920_vm2, %v10942_v42  ;;  %3117 = vrot.lane.b32.xlu0 %v10942_v42, %s8710_s13 }
 0x47d   : > { %2784 = vst.msk [vmem:[#allocation3 + $0x6a] sm:$0xff] %vm2778_vm10, %v2705_v4  ;;  %2965 = vrot.lane.b32.xlu1 %v11074_v47, %s14639_s25 }
 0x47e   : > { %v2856_v61 = vpop.permute.xlu0 %2855 }
 0x47f   : > { %2916 = vst.msk [vmem:[#allocation3 + $0x151] sm:$0xff] %vm2891_vm14, %v2856_v61  ;;  %v2709_v34 = vpop.permute.xlu1 %2708 }
 0x480   : > { %2945 = vst.msk [vmem:[#allocation3 + $0x150] sm:$0xff] %vm2920_vm2, %v10954_v59  ;;  %3121 = vrot.lane.b32.xlu0 %v10954_v59, %s8710_s13 }
 0x481   : > { %2786 = vst.msk [vmem:[#allocation3 + $0x82] sm:$0xff] %vm2778_vm10, %v2709_v34  ;;  %2969 = vrot.lane.b32.xlu1 %v11086_v54, %s14639_s25 }
 0x482   : > { %v2860_v24 = vpop.permute.xlu0 %2859 }
 0x483   : > { %2918 = vst.msk [vmem:[#allocation3 + $0x169] sm:$0xff] %vm2891_vm14, %v2860_v24  ;;  %v2713_v61 = vpop.permute.xlu1 %2712 }
 0x484   : > { %2947 = vst.msk [vmem:[#allocation3 + $0x168] sm:$0xff] %vm2920_vm2, %v10962_v32  ;;  %3125 = vrot.lane.b32.xlu0 %v10962_v32, %s8710_s13 }
 0x485   : > { %2788 = vst.msk [vmem:[#allocation3 + $0x9a] sm:$0xff] %vm2778_vm10, %v2713_v61  ;;  %2973 = vrot.lane.b32.xlu1 %v11094_v6, %s14639_s25 }
 0x486   : > { %v2952_v2 = vpop.permute.xlu0 %2951 }
 0x487   : > { %3043 = vst.msk [vmem:[#allocation3 + $0x1c] sm:$0xff] %vm3042_vm5, %v2952_v2  ;;  %v2717_v24 = vpop.permute.xlu1 %2716 }
 0x488   : > { %3129 = vrot.lane.b32.xlu0 %v11420_v49, %s8710_s13  ;;  %2790 = vst.msk [vmem:[#allocation3 + $0xb2] sm:$0xff] %vm2778_vm10, %v2717_v24 }
 0x489   : > { %2977 = vrot.lane.b32.xlu1 %v11106_v21, %s14639_s25 }
 0x48a   : > { %v11580_v27 = vpop.permute.xlu0 %2955 }
 0x48b   : > { %v2721_v2 = vpop.permute.xlu1 %2720 }
 0x48c   : > { %3194 = vrot.lane.b32.xlu0 %v10714_v58, %s8722_s17  ;;  %2792 = vst.msk [vmem:[#allocation3 + $0xca] sm:$0xff] %vm2778_vm10, %v2721_v2 }
 0x48d   : > { %2981 = vrot.lane.b32.xlu1 %v11114_v10, %s14639_s25 }
 0x48e   : > { %v11587_v29 = vpop.permute.xlu0 %2959 }
 0x48f   : > { %v2725_v34 = vpop.permute.xlu1 %2724 }
 0x490   : > { %3198 = vrot.lane.b32.xlu0 %v10726_v55, %s8722_s17  ;;  %2794 = vst.msk [vmem:[#allocation3 + $0xe2] sm:$0xff] %vm2778_vm10, %v2725_v34 }
 0x491   : > { %2985 = vrot.lane.b32.xlu1 %v11133_v31, %s14639_s25 }
 0x492   : > { %v11594_v35 = vpop.permute.xlu0 %2963 }
 0x493   : > { %v8304_v24 = vpop.f32.mrf.mxu1  ;;  %v2729_v2 = vpop.permute.xlu1 %2728 }
 0x494   : > { %3202 = vrot.lane.b32.xlu0 %v10738_v60, %s8722_s17  ;;  %2796 = vst.msk [vmem:[#allocation3 + $0xfa] sm:$0xff] %vm2778_vm10, %v2729_v2  ;;  %v2315_v2 = vrot.slane %v8304_v24, 1 }
 0x495   : > { %v11620_v3 = vpop.f32.mrf.mxu1  ;;  %2989 = vrot.lane.b32.xlu1 %v11141_v62, %s14639_s25 }
 0x496   : > { %v11601_v43 = vpop.permute.xlu0 %2967 }
 0x497   : > { %v11626_v46 = vpop.f32.mrf.mxu1  ;;  %v2733_v11 = vpop.permute.xlu1 %2732 }
 0x498   : > { %3206 = vrot.lane.b32.xlu0 %v10747_v30, %s8722_s17  ;;  %2798 = vst.msk [vmem:[#allocation3 + $0x112] sm:$0xff] %vm2778_vm10, %v2733_v11 }
 0x499   : > { %v11631_v23 = vpop.f32.mrf.mxu1  ;;  %2993 = vrot.lane.b32.xlu1 %v11153_v16, %s14639_s25 }
 0x49a   : > { %v11608_v4 = vpop.permute.xlu0 %2971  ;;  %v14611_v51 = vrot.slane %v11631_v23, 1 }
 0x49b   : > { %v2737_v13 = vpop.permute.xlu1 %2736 }
 0x49c   : > { %3210 = vrot.lane.b32.xlu0 %v10758_v45, %s8722_s17  ;;  %v11643_v11 = vsel %vm2311_vm4, %v14611_v51, %v2315_v2  ;;  %2800 = vst.msk [vmem:[#allocation3 + $0x12a] sm:$0xff] %vm2778_vm10, %v2737_v13 }
 0x49d   : > { %14924 = vst [vmem:[#allocation21_spill] sm:$0xff] %v11643_v11  ;;  %2997 = vrot.lane.b32.xlu1 %v11161_v39, %s14639_s25 }
 0x49e   : > { %v11615_v61 = vpop.permute.xlu0 %2975 }
 0x49f   : > { %v2741_v14 = vpop.permute.xlu1 %2740 }
 0x4a0   : > { %3214 = vrot.lane.b32.xlu0 %v10765_v63, %s8722_s17  ;;  %2802 = vst.msk [vmem:[#allocation3 + $0x142] sm:$0xff] %vm2778_vm10, %v2741_v14 }
 0x4a1   : > { %v11638_v15 = vpop.f32.mrf.mxu1  ;;  %3001 = vrot.lane.b32.xlu1 %v11173_v52, %s14639_s25 }
 0x4a2   : > { %v11624_v34 = vpop.permute.xlu0 %2979 }
 0x4a3   : > { %v11648_v25 = vpop.f32.mrf.mxu1  ;;  %v2745_v37 = vpop.permute.xlu1 %2744 }
 0x4a4   : > { %3218 = vrot.lane.b32.xlu0 %v10779_v12, %s8722_s17  ;;  %v14617_v13 = vrot.slane %v11648_v25, 1  ;;  %2804 = vst.msk [vmem:[#allocation3 + $0x15a] sm:$0xff] %vm2778_vm10, %v2745_v37 }
 0x4a5   : > { %v11654_v41 = vpop.f32.mrf.mxu1  ;;  %3005 = vrot.lane.b32.xlu1 %v11181_v36, %s14639_s25 }
 0x4a6   : > { %v11636_v53 = vpop.permute.xlu0 %2983 }
 0x4a7   : > { %v2091_v2 = vpop.f32.mrf.mxu1  ;;  %v2749_v57 = vpop.permute.xlu1 %2748 }
 0x4a8   : > { %3222 = vrot.lane.b32.xlu0 %v10794_v8, %s8722_s17  ;;  %v2320_v51 = vrot.slane %v2091_v2, 1  ;;  %v14620_v2 = vrot.slane %v11654_v41, 1  ;;  %2806 = vst.msk [vmem:[#allocation3 + $0x172] sm:$0xff] %vm2778_vm10, %v2749_v57  ;;  %vm4042_vm10 = vcmask 458144  }
 0x4a9   : > { %v11666_v56 = vpop.f32.mrf.mxu1  ;;  %3009 = vrot.lane.b32.xlu1 %v11679_v1, %s14639_s25  ;;  %s8734_s25 = smov [#allocation4]  }
 0x4aa   : > { %v11652_v24 = vpop.permute.xlu0 %2987  ;;  %v11671_v14 = vsel %vm2311_vm4, %v14617_v13, %v2320_v51  ;;  %v14619_v51 = vrot.slane %v11666_v56, 1 }
 0x4ab   : > { %14925 = vst [vmem:[#allocation20_spill] sm:$0xff] %v11671_v14  ;;  %v2104_v33 = vpop.f32.mrf.mxu1 }
 0x4ac   : > { %3226 = vrot.lane.b32.xlu0 %v10815_v19, %s8722_s17  ;;  %v2325_v38 = vrot.slane %v2104_v33, 1 }
 0x4ad   : > { %v8313_v22 = vpop.f32.mrf.mxu1  ;;  %3075 = vrot.lane.b32.xlu1 %v11046_v28, %s8710_s13 }
 0x4ae   : > { %v11664_v0 = vpop.permute.xlu0 %2991  ;;  %v2330_v13 = vrot.slane %v8313_v22, 1  ;;  %v11687_v37 = vsel %vm2311_vm4, %v14620_v2, %v2325_v38  ;;  %v2810_v38 = vpop.permute.xlu1 %2809 }
 0x4af   : > { %14926 = vst [vmem:[#allocation23_spill] sm:$0xff] %v11687_v37  ;;  %v11692_v33 = vpop.f32.mrf.mxu1  ;;  %2893 = vst.msk [vmem:[#allocation3 + $0x39] sm:$0xff] %vm2891_vm14, %v2810_v38 }
 0x4b0   : > { %3230 = vrot.lane.b32.xlu0 %v10901_v7, %s8722_s17  ;;  %v11699_v22 = vsel %vm2311_vm4, %v14619_v51, %v2330_v13  ;;  %2922 = vst.msk [vmem:[#allocation3 + $0x38] sm:$0xff] %vm2920_vm2, %v11046_v28 }
 0x4b1   : > { %14927 = vst [vmem:[#allocation22_spill] sm:$0xff] %v11699_v22  ;;  %v8316_v5 = vpop.f32.mrf.mxu1  ;;  %3045 = vst.msk [vmem:[#allocation3 + $0x34] sm:$0xff] %vm3042_vm5, %v11580_v27  ;;  %3079 = vrot.lane.b32.xlu1 %v11054_v40, %s8710_s13 }
 0x4b2   : > { %v11681_v9 = vpop.permute.xlu0 %2995  ;;  %v2814_v2 = vpop.permute.xlu1 %2813  ;;  %v2335_v48 = vrot.slane %v8316_v5, 1 }
 0x4b3   : > { %v11706_v57 = vpop.f32.mrf.mxu1  ;;  %2895 = vst.msk [vmem:[#allocation3 + $0x51] sm:$0xff] %vm2891_vm14, %v2814_v2 }
 0x4b4   : > { %3234 = vrot.lane.b32.xlu0 %v10932_v17, %s8722_s17  ;;  %2924 = vst.msk [vmem:[#allocation3 + $0x50] sm:$0xff] %vm2920_vm2, %v11054_v40 }
 0x4b5   : > { %v11716_v51 = vpop.f32.mrf.mxu1  ;;  %3047 = vst.msk [vmem:[#allocation3 + $0x4c] sm:$0xff] %vm3042_vm5, %v11587_v29  ;;  %3083 = vrot.lane.b32.xlu1 %v11066_v50, %s8710_s13 }
 0x4b6   : > { %v11701_v26 = vpop.permute.xlu0 %2999  ;;  %v2818_v22 = vpop.permute.xlu1 %2817 }
 0x4b7   : > { %v11721_v38 = vpop.f32.mrf.mxu1  ;;  %2897 = vst.msk [vmem:[#allocation3 + $0x69] sm:$0xff] %vm2891_vm14, %v2818_v22 }
 0x4b8   : > { %3238 = vrot.lane.b32.xlu0 %v10942_v42, %s8722_s17  ;;  %v14622_v27 = vrot.slane %v11721_v38, 1  ;;  %2926 = vst.msk [vmem:[#allocation3 + $0x68] sm:$0xff] %vm2920_vm2, %v11066_v50 }
 0x4b9   : > { %v11732_v2 = vpop.f32.mrf.mxu1  ;;  %3049 = vst.msk [vmem:[#allocation3 + $0x64] sm:$0xff] %vm3042_vm5, %v11594_v35  ;;  %3087 = vrot.lane.b32.xlu1 %v11074_v47, %s8710_s13 }
 0x4ba   : > { %v11714_v13 = vpop.permute.xlu0 %3003  ;;  %14928 = vst [vmem:[#allocation26_spill] sm:$0xff] %v11732_v2  ;;  %v11737_v37 = vsel %vm2311_vm4, %v14622_v27, %v2335_v48  ;;  %v2822_v22 = vpop.permute.xlu1 %2821 }
 0x4bb   : > { %14929 = vst [vmem:[#allocation25_spill] sm:$0xff] %v11737_v37  ;;  %v11742_v5 = vpop.f32.mrf.mxu1  ;;  %2899 = vst.msk [vmem:[#allocation3 + $0x81] sm:$0xff] %vm2891_vm14, %v2822_v22 }
 0x4bc   : > { %3242 = vrot.lane.b32.xlu0 %v10954_v59, %s8722_s17  ;;  %14930 = vst [vmem:[#allocation28_spill] sm:$0xff] %v11742_v5  ;;  %v14623_v37 = vrot.slane %v11742_v5, 1  ;;  %2928 = vst.msk [vmem:[#allocation3 + $0x80] sm:$0xff] %vm2920_vm2, %v11074_v47 }
 0x4bd   : > { %v11750_v48 = vpop.f32.mrf.mxu1  ;;  %3051 = vst.msk [vmem:[#allocation3 + $0x7c] sm:$0xff] %vm3042_vm5, %v11601_v43  ;;  %3091 = vrot.lane.b32.xlu1 %v11086_v54, %s8710_s13 }
 0x4be   : > { %v11730_v18 = vpop.permute.xlu0 %3007  ;;  %v2826_v22 = vpop.permute.xlu1 %2825  ;;  %v14626_v43 = vrot.slane %v11750_v48, 1 }
 0x4bf   : > { %v2139_v27 = vpop.f32.mrf.mxu1  ;;  %2901 = vst.msk [vmem:[#allocation3 + $0x99] sm:$0xff] %vm2891_vm14, %v2826_v22 }
 0x4c0   : > { %3246 = vrot.lane.b32.xlu0 %v10962_v32, %s8722_s17  ;;  %v2340_v35 = vrot.slane %v2139_v27, 1  ;;  %2930 = vst.msk [vmem:[#allocation3 + $0x98] sm:$0xff] %vm2920_vm2, %v11086_v54 }
 0x4c1   : > { %v11763_v14 = vpop.f32.mrf.mxu1  ;;  %3053 = vst.msk [vmem:[#allocation3 + $0x94] sm:$0xff] %vm3042_vm5, %v11608_v4  ;;  %3095 = vrot.lane.b32.xlu1 %v11094_v6, %s8710_s13 }
 0x4c2   : > { %v3074_v29 = vpop.permute.xlu0 %3073  ;;  %v11769_v11 = vsel %vm2311_vm4, %v14623_v37, %v2340_v35  ;;  %v14625_v22 = vrot.slane %v11763_v14, 1  ;;  %v2830_v2 = vpop.permute.xlu1 %2829 }
 0x4c3   : > { %3164 = vst.msk [vmem:[#allocation3 + $0x1b] sm:$0xff] %vm3163_vm6, %v3074_v29  ;;  %14931 = vst [vmem:[#allocation27_spill] sm:$0xff] %v11769_v11  ;;  %v2152_v27 = vpop.f32.mrf.mxu1 }
 0x4c4   : > { %3250 = vrot.lane.b32.xlu0 %v11420_v49, %s8722_s17  ;;  %2903 = vst.msk [vmem:[#allocation3 + $0xb1] sm:$0xff] %vm2891_vm14, %v2830_v2 }
 0x4c5   : > { %v8325_v37 = vpop.f32.mrf.mxu1  ;;  %2932 = vst.msk [vmem:[#allocation3 + $0xb0] sm:$0xff] %vm2920_vm2, %v11094_v6  ;;  %3099 = vrot.lane.b32.xlu1 %v11106_v21, %s8710_s13 }
 0x4c6   : > { %v3078_v29 = vpop.permute.xlu0 %3077  ;;  %v2350_v11 = vrot.slane %v8325_v37, 1  ;;  %3055 = vst.msk [vmem:[#allocation3 + $0xac] sm:$0xff] %vm3042_vm5, %v11615_v61 }
 0x4c7   : > { %3166 = vst.msk [vmem:[#allocation3 + $0x33] sm:$0xff] %vm3163_vm6, %v3078_v29  ;;  %v2345_v29 = vrot.slane %v2152_v27, 1  ;;  %v11791_v27 = vpop.f32.mrf.mxu1 }
 0x4c8   : > { %3315 = vrot.lane.b32.xlu0 %v10714_v58, %s8709_s26  ;;  %v11800_v4 = vsel %vm2311_vm4, %v14625_v22, %v2350_v11 }
 0x4c9   : > { %v11786_v5 = vsel %vm2311_vm4, %v14626_v43, %v2345_v29  ;;  %14933 = vst [vmem:[#allocation29_spill] sm:$0xff] %v11800_v4  ;;  %v8328_v2 = vpop.f32.mrf.mxu1  ;;  %v2834_v29 = vpop.permute.xlu1 %2833  ;;  %3103 = vrot.lane.b32.xlu1 %v11114_v10, %s8710_s13 }
 0x4ca   : > { %v3082_v35 = vpop.permute.xlu0 %3081  ;;  %14932 = vst [vmem:[#allocation30_spill] sm:$0xff] %v11786_v5  ;;  %2905 = vst.msk [vmem:[#allocation3 + $0xc9] sm:$0xff] %vm2891_vm14, %v2834_v29  ;;  %v2355_v22 = vrot.slane %v8328_v2, 1 }
 0x4cb   : > { %3168 = vst.msk [vmem:[#allocation3 + $0x4b] sm:$0xff] %vm3163_vm6, %v3082_v35  ;;  %v11808_v35 = vpop.f32.mrf.mxu1 }
 0x4cc   : > { %3319 = vrot.lane.b32.xlu0 %v10726_v55, %s8709_s26  ;;  %14934 = vst [vmem:[#allocation31_spill] sm:$0xff] %v11808_v35  ;;  %2934 = vst.msk [vmem:[#allocation3 + $0xc8] sm:$0xff] %vm2920_vm2, %v11106_v21 }
 0x4cd   : > { %3057 = vst.msk [vmem:[#allocation3 + $0xc4] sm:$0xff] %vm3042_vm5, %v11624_v34  ;;  %v11816_v11 = vpop.f32.mrf.mxu1  ;;  %3107 = vrot.lane.b32.xlu1 %v11133_v31, %s8710_s13 }
 0x4ce   : > { %v3086_v37 = vpop.permute.xlu0 %3085  ;;  %14935 = vst [vmem:[#allocation32_spill] sm:$0xff] %v11816_v11 }
 0x4cf   : > { %3170 = vst.msk [vmem:[#allocation3 + $0x63] sm:$0xff] %vm3163_vm6, %v3086_v37  ;;  %v2838_v37 = vpop.permute.xlu1 %2837  ;;  %v11822_v29 = vpop.f32.mrf.mxu1 }
 0x4d0   : > { %3323 = vrot.lane.b32.xlu0 %v10738_v60, %s8709_s26  ;;  %2907 = vst.msk [vmem:[#allocation3 + $0xe1] sm:$0xff] %vm2891_vm14, %v2838_v37  ;;  %14936 = vst [vmem:[#allocation33_spill] sm:$0xff] %v11822_v29  ;;  %v14627_v34 = vrot.slane %v11822_v29, 1 }
 0x4d1   : > { %2936 = vst.msk [vmem:[#allocation3 + $0xe0] sm:$0xff] %vm2920_vm2, %v11114_v10  ;;  %v11831_v43 = vpop.f32.mrf.mxu1  ;;  %3111 = vrot.lane.b32.xlu1 %v11141_v62, %s8710_s13 }
 0x4d2   : > { %v3090_v61 = vpop.permute.xlu0 %3089  ;;  %3059 = vst.msk [vmem:[#allocation3 + $0xdc] sm:$0xff] %vm3042_vm5, %v11636_v53  ;;  %14937 = vst [vmem:[#allocation34_spill] sm:$0xff] %v11831_v43  ;;  %v11837_v4 = vsel %vm2311_vm4, %v14627_v34, %v2355_v22 }
 0x4d3   : > { %3172 = vst.msk [vmem:[#allocation3 + $0x7b] sm:$0xff] %vm3163_vm6, %v3090_v61  ;;  %v2842_v37 = vpop.permute.xlu1 %2841  ;;  %14938 = vst [vmem:[#allocation36_spill] sm:$0xff] %v11837_v4  ;;  %v11842_v2 = vpop.f32.mrf.mxu1 }
 0x4d4   : > { %3327 = vrot.lane.b32.xlu0 %v10747_v30, %s8709_s26  ;;  %2909 = vst.msk [vmem:[#allocation3 + $0xf9] sm:$0xff] %vm2891_vm14, %v2842_v37  ;;  %14939 = vst [vmem:[#allocation35_spill] sm:$0xff] %v11842_v2  ;;  %v14628_v34 = vrot.slane %v11842_v2, 1 }
 0x4d5   : > { %2938 = vst.msk [vmem:[#allocation3 + $0xf8] sm:$0xff] %vm2920_vm2, %v11133_v31  ;;  %3115 = vrot.lane.b32.xlu1 %v11153_v16, %s8710_s13 }
 0x4d6   : > { %v3094_v61 = vpop.permute.xlu0 %3093  ;;  %3061 = vst.msk [vmem:[#allocation3 + $0xf4] sm:$0xff] %vm3042_vm5, %v11652_v24 }
 0x4d7   : > { %3174 = vst.msk [vmem:[#allocation3 + $0x93] sm:$0xff] %vm3163_vm6, %v3094_v61  ;;  %v11850_v61 = vpop.f32.mrf.mxu1  ;;  %v2846_v22 = vpop.permute.xlu1 %2845 }
 0x4d8   : > { %3331 = vrot.lane.b32.xlu0 %v10758_v45, %s8709_s26  ;;  %14940 = vst [vmem:[#allocation38_spill] sm:$0xff] %v11850_v61  ;;  %2911 = vst.msk [vmem:[#allocation3 + $0x111] sm:$0xff] %vm2891_vm14, %v2846_v22 }
 0x4d9   : > { %v2187_v37 = vpop.f32.mrf.mxu1  ;;  %2940 = vst.msk [vmem:[#allocation3 + $0x110] sm:$0xff] %vm2920_vm2, %v11141_v62  ;;  %3119 = vrot.lane.b32.xlu1 %v11161_v39, %s8710_s13 }
 0x4da   : > { %v3098_v53 = vpop.permute.xlu0 %3097  ;;  %v2360_v24 = vrot.slane %v2187_v37, 1  ;;  %3063 = vst.msk [vmem:[#allocation3 + $0x10c] sm:$0xff] %vm3042_vm5, %v11664_v0  ;;  %v14631_v0 = vrot.slane %v11850_v61, 1  ;;  %v14957_v61 = vld [vmem:[#allocation70_spill] sm:$0xff] }
 0x4db   : > { %3176 = vst.msk [vmem:[#allocation3 + $0xab] sm:$0xff] %vm3163_vm6, %v3098_v53  ;;  %v11863_v4 = vpop.f32.mrf.mxu1  ;;  %v2850_v22 = vpop.permute.xlu1 %2849 }
 0x4dc   : > { %3335 = vrot.lane.b32.xlu0 %v10765_v63, %s8709_s26  ;;  %14941 = vst [vmem:[#allocation37_spill] sm:$0xff] %v11863_v4  ;;  %v11869_v5 = vsel %vm2311_vm4, %v14628_v34, %v2360_v24  ;;  %2913 = vst.msk [vmem:[#allocation3 + $0x129] sm:$0xff] %vm2891_vm14, %v2850_v22  ;;  %v14630_v22 = vrot.slane %v11863_v4, 1 }
 0x4dd   : > { %14942 = vst [vmem:[#allocation40_spill] sm:$0xff] %v11869_v5  ;;  %v2200_v37 = vpop.f32.mrf.mxu1  ;;  %2942 = vst.msk [vmem:[#allocation3 + $0x128] sm:$0xff] %vm2920_vm2, %v11153_v16  ;;  %3123 = vrot.lane.b32.xlu1 %v11173_v52, %s8710_s13 }
 0x4de   : > { %v3102_v53 = vpop.permute.xlu0 %3101  ;;  %3065 = vst.msk [vmem:[#allocation3 + $0x124] sm:$0xff] %vm3042_vm5, %v11681_v9 }
 0x4df   : > { %3178 = vst.msk [vmem:[#allocation3 + $0xc3] sm:$0xff] %vm3163_vm6, %v3102_v53  ;;  %v2365_v53 = vrot.slane %v2200_v37, 1  ;;  %v8337_v34 = vpop.f32.mrf.mxu1  ;;  %v2854_v43 = vpop.permute.xlu1 %2853 }
 0x4e0   : > { %3339 = vrot.lane.b32.xlu0 %v10779_v12, %s8709_s26  ;;  %v2370_v5 = vrot.slane %v8337_v34, 1  ;;  %2915 = vst.msk [vmem:[#allocation3 + $0x141] sm:$0xff] %vm2891_vm14, %v2854_v43 }
 0x4e1   : > { %v11886_v2 = vsel %vm2311_vm4, %v14631_v0, %v2365_v53  ;;  %v11891_v37 = vpop.f32.mrf.mxu1  ;;  %2944 = vst.msk [vmem:[#allocation3 + $0x140] sm:$0xff] %vm2920_vm2, %v11161_v39  ;;  %3127 = vrot.lane.b32.xlu1 %v11181_v36, %s8710_s13 }
 0x4e2   : > { %v3106_v24 = vpop.permute.xlu0 %3105  ;;  %14943 = vst [vmem:[#allocation39_spill] sm:$0xff] %v11886_v2  ;;  %14944 = vst [vmem:[#allocation41_spill] sm:$0xff] %v11891_v37  ;;  %v11900_v9 = vsel %vm2311_vm4, %v14630_v22, %v2370_v5 }
 0x4e3   : > { %3180 = vst.msk [vmem:[#allocation3 + $0xdb] sm:$0xff] %vm3163_vm6, %v3106_v24  ;;  %14945 = vst [vmem:[#allocation24_spill] sm:$0xff] %v11900_v9  ;;  %v8340_v34 = vpop.f32.mrf.mxu1  ;;  %v2858_v53 = vpop.permute.xlu1 %2857 }
 0x4e4   : > { %3343 = vrot.lane.b32.xlu0 %v10794_v8, %s8709_s26  ;;  %3067 = vst.msk [vmem:[#allocation3 + $0x13c] sm:$0xff] %vm3042_vm5, %v11701_v26  ;;  %v2375_v22 = vrot.slane %v8340_v34, 1 }
 0x4e5   : > { %2917 = vst.msk [vmem:[#allocation3 + $0x159] sm:$0xff] %vm2891_vm14, %v2858_v53  ;;  %v11908_v24 = vpop.f32.mrf.mxu1  ;;  %3131 = vrot.lane.b32.xlu1 %v11679_v1, %s8710_s13 }
 0x4e6   : > { %v3110_v43 = vpop.permute.xlu0 %3109  ;;  %14946 = vst [vmem:[#allocation42_spill] sm:$0xff] %v11908_v24  ;;  %2946 = vst.msk [vmem:[#allocation3 + $0x158] sm:$0xff] %vm2920_vm2, %v11173_v52 }
 0x4e7   : > { %3182 = vst.msk [vmem:[#allocation3 + $0xf3] sm:$0xff] %vm3163_vm6, %v3110_v43  ;;  %v11916_v5 = vpop.f32.mrf.mxu1  ;;  %v2862_v43 = vpop.permute.xlu1 %2861 }
 0x4e8   : > { %3347 = vrot.lane.b32.xlu0 %v10815_v19, %s8709_s26  ;;  %3069 = vst.msk [vmem:[#allocation3 + $0x154] sm:$0xff] %vm3042_vm5, %v11714_v13  ;;  %14947 = vst [vmem:[#allocation10_spill] sm:$0xff] %v11916_v5 }
 0x4e9   : > { %2919 = vst.msk [vmem:[#allocation3 + $0x171] sm:$0xff] %vm2891_vm14, %v2862_v43  ;;  %v11922_v53 = vpop.f32.mrf.mxu1  ;;  %3196 = vrot.lane.b32.xlu1 %v11046_v28, %s8722_s17  ;;  %vm4171_vm14 = vcmask 490944  }
 0x4ea   : > { %v3114_v26 = vpop.permute.xlu0 %3113  ;;  %14948 = vst [vmem:[#allocation15_spill] sm:$0xff] %v11922_v53  ;;  %2948 = vst.msk [vmem:[#allocation3 + $0x170] sm:$0xff] %vm2920_vm2, %v11181_v36  ;;  %v14633_v13 = vrot.slane %v11922_v53, 1  ;;  %vm4294_vm2 = vcmask 523744  }
 0x4eb   : > { %3184 = vst.msk [vmem:[#allocation3 + $0x10b] sm:$0xff] %vm3163_vm6, %v3114_v26  ;;  %v8344_v0 = vpop.f32.mrf.mxu1  ;;  %v2954_v43 = vpop.permute.xlu1 %2953 }
 0x4ec   : > { %3351 = vrot.lane.b32.xlu0 %v10901_v7, %s8709_s26  ;;  %3071 = vst.msk [vmem:[#allocation3 + $0x16c] sm:$0xff] %vm3042_vm5, %v11730_v18  ;;  %v11935_v9 = vsel %vm2311_vm4, %v14633_v13, %v2375_v22  ;;  %3044 = vst.msk [vmem:[#allocation3 + $0x24] sm:$0xff] %vm3042_vm5, %v2954_v43  ;;  %v2382_v5 = vrot.slane %v8344_v0, 1 }
 0x4ed   : > { %14949 = vst [vmem:[#allocation12_spill] sm:$0xff] %v11935_v9  ;;  %v11940_v34 = vpop.f32.mrf.mxu1  ;;  %3200 = vrot.lane.b32.xlu1 %v11054_v40, %s8722_s17 }
 0x4ee   : > { %v3118_v26 = vpop.permute.xlu0 %3117  ;;  %14950 = vst [vmem:[#allocation11_spill] sm:$0xff] %v11940_v34  ;;  %v14636_v43 = vrot.slane %v11940_v34, 1 }
 0x4ef   : > { %3186 = vst.msk [vmem:[#allocation3 + $0x123] sm:$0xff] %vm3163_vm6, %v3118_v26  ;;  %v8345_v2 = vpop.f32.mrf.mxu1  ;;  %v2958_v53 = vpop.permute.xlu1 %2957 }
 0x4f0   : > { %3355 = vrot.lane.b32.xlu0 %v10932_v17, %s8709_s26  ;;  %v2383_v26 = vrot.slane %v8345_v2, 1  ;;  %3046 = vst.msk [vmem:[#allocation3 + $0x3c] sm:$0xff] %vm3042_vm5, %v2958_v53 }
 0x4f1   : > { %v2235_v22 = vpop.f32.mrf.mxu1  ;;  %3204 = vrot.lane.b32.xlu1 %v11066_v50, %s8722_s17 }
 0x4f2   : > { %v3122_v18 = vpop.permute.xlu0 %3121  ;;  %v2380_v13 = vrot.slane %v2235_v22, 1  ;;  %v11952_v9 = vsel %vm2311_vm4, %v2382_v5, %v2383_v26 }
 0x4f3   : > { %3188 = vst.msk [vmem:[#allocation3 + $0x13b] sm:$0xff] %vm3163_vm6, %v3122_v18  ;;  %14951 = vst [vmem:[#allocation72_spill] sm:$0xff] %v11952_v9  ;;  %v8348_v24 = vpop.f32.mrf.mxu1  ;;  %v2962_v2 = vpop.permute.xlu1 %2961 }
 0x4f4   : > { %3359 = vrot.lane.b32.xlu0 %v10942_v42, %s8709_s26  ;;  %v11958_v53 = vsel %vm2311_vm4, %v14636_v43, %v2380_v13  ;;  %3048 = vst.msk [vmem:[#allocation3 + $0x54] sm:$0xff] %vm3042_vm5, %v2962_v2  ;;  %v2388_v4 = vrot.slane %v8348_v24, 1 }
 0x4f5   : > { %14952 = vst [vmem:[#allocation73_spill] sm:$0xff] %v11958_v53  ;;  %v2248_v18 = vpop.f32.mrf.mxu1  ;;  %3208 = vrot.lane.b32.xlu1 %v11074_v47, %s8722_s17 }
 0x4f6   : > { %v3126_v0 = vpop.permute.xlu0 %3125  ;;  %v2385_v5 = vrot.slane %v2248_v18, 1 }
 0x4f7   : > { %3190 = vst.msk [vmem:[#allocation3 + $0x153] sm:$0xff] %vm3163_vm6, %v3126_v0  ;;  %v8349_v9 = vpop.f32.mrf.mxu1  ;;  %v2966_v34 = vpop.permute.xlu1 %2965 }
 0x4f8   : > { %3363 = vrot.lane.b32.xlu0 %v10954_v59, %s8709_s26  ;;  %v2390_v0 = vrot.slane %v8349_v9, 1  ;;  %v11967_v13 = vsel %vm2311_vm4, %v2383_v26, %v2385_v5  ;;  %3050 = vst.msk [vmem:[#allocation3 + $0x6c] sm:$0xff] %vm3042_vm5, %v2966_v34 }
 0x4f9   : > { %14953 = vst [vmem:[#allocation74_spill] sm:$0xff] %v11967_v13  ;;  %v2251_v2 = vpop.f32.mrf.mxu1  ;;  %3212 = vrot.lane.b32.xlu1 %v11086_v54, %s8722_s17 }
 0x4fa   : > { %v3130_v22 = vpop.permute.xlu0 %3129  ;;  %v2387_v18 = vrot.slane %v2251_v2, 1  ;;  %v11975_v24 = vsel %vm2311_vm4, %v2388_v4, %v2390_v0 }
 0x4fb   : > { %3192 = vst.msk [vmem:[#allocation3 + $0x16b] sm:$0xff] %vm3163_vm6, %v3130_v22  ;;  %14954 = vst [vmem:[#allocation75_spill] sm:$0xff] %v11975_v24  ;;  %v2970_v9 = vpop.permute.xlu1 %2969 }
 0x4fc   : > { %3367 = vrot.lane.b32.xlu0 %v10962_v32, %s8709_s26  ;;  %v11979_v26 = vsel %vm2311_vm4, %v2387_v18, %v2388_v4  ;;  %3052 = vst.msk [vmem:[#allocation3 + $0x84] sm:$0xff] %vm3042_vm5, %v2970_v9 }
 0x4fd   : > { %14955 = vst [vmem:[#allocation76_spill] sm:$0xff] %v11979_v26  ;;  %3216 = vrot.lane.b32.xlu1 %v11094_v6, %s8722_s17 }
 0x4fe   : > { %v3195_v22 = vpop.permute.xlu0 %3194 }
 0x4ff   : > { %3285 = vst.msk [vmem:[#allocation3 + $0x1a] sm:$0xff] %vm3284_vm7, %v3195_v22  ;;  %v2974_v5 = vpop.permute.xlu1 %2973 }
 0x500   : > { %3371 = vrot.lane.b32.xlu0 %v11420_v49, %s8709_s26  ;;  %3054 = vst.msk [vmem:[#allocation3 + $0x9c] sm:$0xff] %vm3042_vm5, %v2974_v5 }
 0x501   : > { %3220 = vrot.lane.b32.xlu1 %v11106_v21, %s8722_s17 }
 0x502   : > { %v3199_v34 = vpop.permute.xlu0 %3198 }
 0x503   : > { %3287 = vst.msk [vmem:[#allocation3 + $0x32] sm:$0xff] %vm3284_vm7, %v3199_v34  ;;  %v2978_v0 = vpop.permute.xlu1 %2977 }
 0x504   : > { %3436 = vrot.lane.b32.xlu0 %v10714_v58, %s8723_s10  ;;  %3056 = vst.msk [vmem:[#allocation3 + $0xb4] sm:$0xff] %vm3042_vm5, %v2978_v0 }
 0x505   : > { %3224 = vrot.lane.b32.xlu1 %v11114_v10, %s8722_s17 }
 0x506   : > { %v3203_v4 = vpop.permute.xlu0 %3202 }
 0x507   : > { %3289 = vst.msk [vmem:[#allocation3 + $0x4a] sm:$0xff] %vm3284_vm7, %v3203_v4  ;;  %v2982_v18 = vpop.permute.xlu1 %2981 }
 0x508   : > { %3440 = vrot.lane.b32.xlu0 %v10726_v55, %s8723_s10  ;;  %3058 = vst.msk [vmem:[#allocation3 + $0xcc] sm:$0xff] %vm3042_vm5, %v2982_v18 }
 0x509   : > { %3228 = vrot.lane.b32.xlu1 %v11133_v31, %s8722_s17 }
 0x50a   : > { %v3207_v2 = vpop.permute.xlu0 %3206 }
 0x50b   : > { %3291 = vst.msk [vmem:[#allocation3 + $0x62] sm:$0xff] %vm3284_vm7, %v3207_v2  ;;  %v2986_v9 = vpop.permute.xlu1 %2985 }
 0x50c   : > { %3444 = vrot.lane.b32.xlu0 %v10738_v60, %s8723_s10  ;;  %3060 = vst.msk [vmem:[#allocation3 + $0xe4] sm:$0xff] %vm3042_vm5, %v2986_v9 }
 0x50d   : > { %3232 = vrot.lane.b32.xlu1 %v11141_v62, %s8722_s17 }
 0x50e   : > { %v3211_v22 = vpop.permute.xlu0 %3210 }
 0x50f   : > { %3293 = vst.msk [vmem:[#allocation3 + $0x7a] sm:$0xff] %vm3284_vm7, %v3211_v22  ;;  %v2990_v5 = vpop.permute.xlu1 %2989 }
 0x510   : > { %3448 = vrot.lane.b32.xlu0 %v10747_v30, %s8723_s10  ;;  %3062 = vst.msk [vmem:[#allocation3 + $0xfc] sm:$0xff] %vm3042_vm5, %v2990_v5 }
 0x511   : > { %3236 = vrot.lane.b32.xlu1 %v11153_v16, %s8722_s17 }
 0x512   : > { %v3215_v34 = vpop.permute.xlu0 %3214 }
 0x513   : > { %3295 = vst.msk [vmem:[#allocation3 + $0x92] sm:$0xff] %vm3284_vm7, %v3215_v34  ;;  %v2994_v0 = vpop.permute.xlu1 %2993 }
 0x514   : > { %3452 = vrot.lane.b32.xlu0 %v10758_v45, %s8723_s10  ;;  %3064 = vst.msk [vmem:[#allocation3 + $0x114] sm:$0xff] %vm3042_vm5, %v2994_v0 }
 0x515   : > { %3240 = vrot.lane.b32.xlu1 %v11161_v39, %s8722_s17 }
 0x516   : > { %v3219_v4 = vpop.permute.xlu0 %3218 }
 0x517   : > { %3297 = vst.msk [vmem:[#allocation3 + $0xaa] sm:$0xff] %vm3284_vm7, %v3219_v4  ;;  %v2998_v18 = vpop.permute.xlu1 %2997 }
 0x518   : > { %3456 = vrot.lane.b32.xlu0 %v10765_v63, %s8723_s10  ;;  %3066 = vst.msk [vmem:[#allocation3 + $0x12c] sm:$0xff] %vm3042_vm5, %v2998_v18 }
 0x519   : > { %3244 = vrot.lane.b32.xlu1 %v11173_v52, %s8722_s17 }
 0x51a   : > { %v3223_v2 = vpop.permute.xlu0 %3222 }
 0x51b   : > { %3299 = vst.msk [vmem:[#allocation3 + $0xc2] sm:$0xff] %vm3284_vm7, %v3223_v2  ;;  %v3002_v9 = vpop.permute.xlu1 %3001 }
 0x51c   : > { %3460 = vrot.lane.b32.xlu0 %v10779_v12, %s8723_s10  ;;  %3068 = vst.msk [vmem:[#allocation3 + $0x144] sm:$0xff] %vm3042_vm5, %v3002_v9 }
 0x51d   : > { %3248 = vrot.lane.b32.xlu1 %v11181_v36, %s8722_s17 }
 0x51e   : > { %v3227_v22 = vpop.permute.xlu0 %3226 }
 0x51f   : > { %3301 = vst.msk [vmem:[#allocation3 + $0xda] sm:$0xff] %vm3284_vm7, %v3227_v22  ;;  %v3006_v5 = vpop.permute.xlu1 %3005 }
 0x520   : > { %3464 = vrot.lane.b32.xlu0 %v10794_v8, %s8723_s10  ;;  %3070 = vst.msk [vmem:[#allocation3 + $0x15c] sm:$0xff] %vm3042_vm5, %v3006_v5 }
 0x521   : > { %3252 = vrot.lane.b32.xlu1 %v11679_v1, %s8722_s17  ;;  %s8730_s17 = smov 68  }
 0x522   : > { %v3231_v34 = vpop.permute.xlu0 %3230 }
 0x523   : > { %3303 = vst.msk [vmem:[#allocation3 + $0xf2] sm:$0xff] %vm3284_vm7, %v3231_v34  ;;  %v3010_v0 = vpop.permute.xlu1 %3009 }
 0x524   : > { %3468 = vrot.lane.b32.xlu0 %v10815_v19, %s8723_s10  ;;  %3072 = vst.msk [vmem:[#allocation3 + $0x174] sm:$0xff] %vm3042_vm5, %v3010_v0  ;;  %vm4415_vm5 = vcmask 556544  }
 0x525   : > { %3317 = vrot.lane.b32.xlu1 %v11046_v28, %s8709_s26 }
 0x526   : > { %v3235_v4 = vpop.permute.xlu0 %3234 }
 0x527   : > { %3305 = vst.msk [vmem:[#allocation3 + $0x10a] sm:$0xff] %vm3284_vm7, %v3235_v4  ;;  %v3076_v18 = vpop.permute.xlu1 %3075 }
 0x528   : > { %3472 = vrot.lane.b32.xlu0 %v10901_v7, %s8723_s10  ;;  %3165 = vst.msk [vmem:[#allocation3 + $0x23] sm:$0xff] %vm3163_vm6, %v3076_v18 }
 0x529   : > { %3321 = vrot.lane.b32.xlu1 %v11054_v40, %s8709_s26 }
 0x52a   : > { %v3239_v2 = vpop.permute.xlu0 %3238 }
 0x52b   : > { %3307 = vst.msk [vmem:[#allocation3 + $0x122] sm:$0xff] %vm3284_vm7, %v3239_v2  ;;  %v3080_v9 = vpop.permute.xlu1 %3079 }
 0x52c   : > { %3476 = vrot.lane.b32.xlu0 %v10932_v17, %s8723_s10  ;;  %3167 = vst.msk [vmem:[#allocation3 + $0x3b] sm:$0xff] %vm3163_vm6, %v3080_v9 }
 0x52d   : > { %3325 = vrot.lane.b32.xlu1 %v11066_v50, %s8709_s26 }
 0x52e   : > { %v3243_v22 = vpop.permute.xlu0 %3242 }
 0x52f   : > { %3309 = vst.msk [vmem:[#allocation3 + $0x13a] sm:$0xff] %vm3284_vm7, %v3243_v22  ;;  %v3084_v5 = vpop.permute.xlu1 %3083 }
 0x530   : > { %3480 = vrot.lane.b32.xlu0 %v10942_v42, %s8723_s10  ;;  %3169 = vst.msk [vmem:[#allocation3 + $0x53] sm:$0xff] %vm3163_vm6, %v3084_v5 }
 0x531   : > { %3329 = vrot.lane.b32.xlu1 %v11074_v47, %s8709_s26 }
 0x532   : > { %v3247_v34 = vpop.permute.xlu0 %3246 }
 0x533   : > { %3311 = vst.msk [vmem:[#allocation3 + $0x152] sm:$0xff] %vm3284_vm7, %v3247_v34  ;;  %v3088_v0 = vpop.permute.xlu1 %3087 }
 0x534   : > { %3484 = vrot.lane.b32.xlu0 %v10954_v59, %s8723_s10  ;;  %3171 = vst.msk [vmem:[#allocation3 + $0x6b] sm:$0xff] %vm3163_vm6, %v3088_v0 }
 0x535   : > { %3333 = vrot.lane.b32.xlu1 %v11086_v54, %s8709_s26 }
 0x536   : > { %v3251_v4 = vpop.permute.xlu0 %3250 }
 0x537   : > { %3313 = vst.msk [vmem:[#allocation3 + $0x16a] sm:$0xff] %vm3284_vm7, %v3251_v4  ;;  %v3092_v18 = vpop.permute.xlu1 %3091 }
 0x538   : > { %3488 = vrot.lane.b32.xlu0 %v10962_v32, %s8723_s10  ;;  %3173 = vst.msk [vmem:[#allocation3 + $0x83] sm:$0xff] %vm3163_vm6, %v3092_v18 }
 0x539   : > { %3337 = vrot.lane.b32.xlu1 %v11094_v6, %s8709_s26 }
 0x53a   : > { %v3316_v2 = vpop.permute.xlu0 %3315 }
 0x53b   : > { %3406 = vst.msk [vmem:[#allocation3 + $0x19] sm:$0xff] %vm3405_vm8, %v3316_v2  ;;  %v3096_v9 = vpop.permute.xlu1 %3095 }
 0x53c   : > { %3492 = vrot.lane.b32.xlu0 %v11420_v49, %s8723_s10  ;;  %3175 = vst.msk [vmem:[#allocation3 + $0x9b] sm:$0xff] %vm3163_vm6, %v3096_v9 }
 0x53d   : > { %3341 = vrot.lane.b32.xlu1 %v11106_v21, %s8709_s26 }
 0x53e   : > { %v3320_v22 = vpop.permute.xlu0 %3319 }
 0x53f   : > { %3408 = vst.msk [vmem:[#allocation3 + $0x31] sm:$0xff] %vm3405_vm8, %v3320_v22  ;;  %v3100_v5 = vpop.permute.xlu1 %3099 }
 0x540   : > { %3559 = vrot.lane.b32.xlu0 %v10714_v58, %s8713_s18  ;;  %3177 = vst.msk [vmem:[#allocation3 + $0xb3] sm:$0xff] %vm3163_vm6, %v3100_v5 }
 0x541   : > { %3345 = vrot.lane.b32.xlu1 %v11114_v10, %s8709_s26 }
 0x542   : > { %v3324_v34 = vpop.permute.xlu0 %3323 }
 0x543   : > { %3410 = vst.msk [vmem:[#allocation3 + $0x49] sm:$0xff] %vm3405_vm8, %v3324_v34  ;;  %v3104_v0 = vpop.permute.xlu1 %3103 }
 0x544   : > { %3563 = vrot.lane.b32.xlu0 %v10726_v55, %s8713_s18  ;;  %3179 = vst.msk [vmem:[#allocation3 + $0xcb] sm:$0xff] %vm3163_vm6, %v3104_v0 }
 0x545   : > { %3349 = vrot.lane.b32.xlu1 %v11133_v31, %s8709_s26 }
 0x546   : > { %v3328_v4 = vpop.permute.xlu0 %3327 }
 0x547   : > { %3412 = vst.msk [vmem:[#allocation3 + $0x61] sm:$0xff] %vm3405_vm8, %v3328_v4  ;;  %v3108_v18 = vpop.permute.xlu1 %3107 }
 0x548   : > { %3567 = vrot.lane.b32.xlu0 %v10738_v60, %s8713_s18  ;;  %3181 = vst.msk [vmem:[#allocation3 + $0xe3] sm:$0xff] %vm3163_vm6, %v3108_v18 }
 0x549   : > { %3353 = vrot.lane.b32.xlu1 %v11141_v62, %s8709_s26 }
 0x54a   : > { %v3332_v2 = vpop.permute.xlu0 %3331 }
 0x54b   : > { %3414 = vst.msk [vmem:[#allocation3 + $0x79] sm:$0xff] %vm3405_vm8, %v3332_v2  ;;  %v3112_v9 = vpop.permute.xlu1 %3111 }
 0x54c   : > { %3571 = vrot.lane.b32.xlu0 %v10747_v30, %s8713_s18  ;;  %3183 = vst.msk [vmem:[#allocation3 + $0xfb] sm:$0xff] %vm3163_vm6, %v3112_v9 }
 0x54d   : > { %3357 = vrot.lane.b32.xlu1 %v11153_v16, %s8709_s26 }
 0x54e   : > { %v3336_v22 = vpop.permute.xlu0 %3335 }
 0x54f   : > { %3416 = vst.msk [vmem:[#allocation3 + $0x91] sm:$0xff] %vm3405_vm8, %v3336_v22  ;;  %v3116_v5 = vpop.permute.xlu1 %3115 }
 0x550   : > { %3575 = vrot.lane.b32.xlu0 %v10758_v45, %s8713_s18  ;;  %3185 = vst.msk [vmem:[#allocation3 + $0x113] sm:$0xff] %vm3163_vm6, %v3116_v5 }
 0x551   : > { %3361 = vrot.lane.b32.xlu1 %v11161_v39, %s8709_s26 }
 0x552   : > { %v3340_v34 = vpop.permute.xlu0 %3339 }
 0x553   : > { %3418 = vst.msk [vmem:[#allocation3 + $0xa9] sm:$0xff] %vm3405_vm8, %v3340_v34  ;;  %v3120_v0 = vpop.permute.xlu1 %3119 }
 0x554   : > { %3579 = vrot.lane.b32.xlu0 %v10765_v63, %s8713_s18  ;;  %3187 = vst.msk [vmem:[#allocation3 + $0x12b] sm:$0xff] %vm3163_vm6, %v3120_v0 }
 0x555   : > { %3365 = vrot.lane.b32.xlu1 %v11173_v52, %s8709_s26 }
 0x556   : > { %v3344_v4 = vpop.permute.xlu0 %3343 }
 0x557   : > { %3420 = vst.msk [vmem:[#allocation3 + $0xc1] sm:$0xff] %vm3405_vm8, %v3344_v4  ;;  %v3124_v18 = vpop.permute.xlu1 %3123 }
 0x558   : > { %3583 = vrot.lane.b32.xlu0 %v10779_v12, %s8713_s18  ;;  %3189 = vst.msk [vmem:[#allocation3 + $0x143] sm:$0xff] %vm3163_vm6, %v3124_v18 }
 0x559   : > { %3369 = vrot.lane.b32.xlu1 %v11181_v36, %s8709_s26 }
 0x55a   : > { %v3348_v2 = vpop.permute.xlu0 %3347 }
 0x55b   : > { %3422 = vst.msk [vmem:[#allocation3 + $0xd9] sm:$0xff] %vm3405_vm8, %v3348_v2  ;;  %v3128_v9 = vpop.permute.xlu1 %3127 }
 0x55c   : > { %3587 = vrot.lane.b32.xlu0 %v10794_v8, %s8713_s18  ;;  %3191 = vst.msk [vmem:[#allocation3 + $0x15b] sm:$0xff] %vm3163_vm6, %v3128_v9 }
 0x55d   : > { %3373 = vrot.lane.b32.xlu1 %v11679_v1, %s8709_s26  ;;  %s8724_s26 = smov 28  }
 0x55e   : > { %v3352_v22 = vpop.permute.xlu0 %3351 }
 0x55f   : > { %3424 = vst.msk [vmem:[#allocation3 + $0xf1] sm:$0xff] %vm3405_vm8, %v3352_v22  ;;  %v3132_v5 = vpop.permute.xlu1 %3131 }
 0x560   : > { %3591 = vrot.lane.b32.xlu0 %v10815_v19, %s8713_s18  ;;  %3193 = vst.msk [vmem:[#allocation3 + $0x173] sm:$0xff] %vm3163_vm6, %v3132_v5  ;;  %vm4536_vm6 = vcmask 589344  }
 0x561   : > { %3438 = vrot.lane.b32.xlu1 %v11046_v28, %s8723_s10 }
 0x562   : > { %v3356_v34 = vpop.permute.xlu0 %3355 }
 0x563   : > { %3426 = vst.msk [vmem:[#allocation3 + $0x109] sm:$0xff] %vm3405_vm8, %v3356_v34  ;;  %v3197_v0 = vpop.permute.xlu1 %3196 }
 0x564   : > { %3595 = vrot.lane.b32.xlu0 %v10901_v7, %s8713_s18  ;;  %3286 = vst.msk [vmem:[#allocation3 + $0x22] sm:$0xff] %vm3284_vm7, %v3197_v0 }
 0x565   : > { %3442 = vrot.lane.b32.xlu1 %v11054_v40, %s8723_s10 }
 0x566   : > { %v3360_v4 = vpop.permute.xlu0 %3359 }
 0x567   : > { %3428 = vst.msk [vmem:[#allocation3 + $0x121] sm:$0xff] %vm3405_vm8, %v3360_v4  ;;  %v3201_v18 = vpop.permute.xlu1 %3200  ;;  %v14956_v4 = vld [vmem:[#allocation68_spill] sm:$0xff] }
 0x568   : > { %3599 = vrot.lane.b32.xlu0 %v10932_v17, %s8713_s18  ;;  %3288 = vst.msk [vmem:[#allocation3 + $0x3a] sm:$0xff] %vm3284_vm7, %v3201_v18  ;;  %v725_v0 = vadd.f32 %v14956_v4, %v9952_v20 }
 0x569   : > { %3446 = vrot.lane.b32.xlu1 %v11066_v50, %s8723_s10 }
 0x56a   : > { %v3364_v2 = vpop.permute.xlu0 %3363 }
 0x56b   : > { %3430 = vst.msk [vmem:[#allocation3 + $0x139] sm:$0xff] %vm3405_vm8, %v3364_v2  ;;  %v3205_v9 = vpop.permute.xlu1 %3204 }
 0x56c   : > { %3603 = vrot.lane.b32.xlu0 %v10942_v42, %s8713_s18  ;;  %3290 = vst.msk [vmem:[#allocation3 + $0x52] sm:$0xff] %vm3284_vm7, %v3205_v9 }
 0x56d   : > { %3450 = vrot.lane.b32.xlu1 %v11074_v47, %s8723_s10 }
 0x56e   : > { %v3368_v22 = vpop.permute.xlu0 %3367 }
 0x56f   : > { %3432 = vst.msk [vmem:[#allocation3 + $0x151] sm:$0xff] %vm3405_vm8, %v3368_v22  ;;  %v3209_v5 = vpop.permute.xlu1 %3208  ;;  %v12168_v22 = vmax.f32 %v725_v0, 0.0 }
 0x570   : > { %3607 = vrot.lane.b32.xlu0 %v10954_v59, %s8713_s18  ;;  %3292 = vst.msk [vmem:[#allocation3 + $0x6a] sm:$0xff] %vm3284_vm7, %v3209_v5 }
 0x571   : > { %3454 = vrot.lane.b32.xlu1 %v11086_v54, %s8723_s10 }
 0x572   : > { %v3372_v34 = vpop.permute.xlu0 %3371 }
 0x573   : > { %3434 = vst.msk [vmem:[#allocation3 + $0x169] sm:$0xff] %vm3405_vm8, %v3372_v34  ;;  %v3213_v18 = vpop.permute.xlu1 %3212 }
 0x574   : > { %3611 = vrot.lane.b32.xlu0 %v10962_v32, %s8713_s18  ;;  %3294 = vst.msk [vmem:[#allocation3 + $0x82] sm:$0xff] %vm3284_vm7, %v3213_v18 }
 0x575   : > { %3458 = vrot.lane.b32.xlu1 %v11094_v6, %s8723_s10 }
 0x576   : > { %v3437_v2 = vpop.permute.xlu0 %3436 }
 0x577   : > { %3527 = vst.msk [vmem:[#allocation3 + $0x18] sm:$0xff] %vm3526_vm9, %v3437_v2  ;;  %v3217_v34 = vpop.permute.xlu1 %3216 }
 0x578   : > { %3615 = vrot.lane.b32.xlu0 %v11420_v49, %s8713_s18  ;;  %3296 = vst.msk [vmem:[#allocation3 + $0x9a] sm:$0xff] %vm3284_vm7, %v3217_v34 }
 0x579   : > { %3462 = vrot.lane.b32.xlu1 %v11106_v21, %s8723_s10 }
 0x57a   : > { %v3441_v9 = vpop.permute.xlu0 %3440 }
 0x57b   : > { %3529 = vst.msk [vmem:[#allocation3 + $0x30] sm:$0xff] %vm3526_vm9, %v3441_v9  ;;  %v3221_v2 = vpop.permute.xlu1 %3220 }
 0x57c   : > { %3619 = vrot.lane.b32.xlu0 %v12168_v22, %s8713_s18  ;;  %3298 = vst.msk [vmem:[#allocation3 + $0xb2] sm:$0xff] %vm3284_vm7, %v3221_v2 }
 0x57d   : > { %3466 = vrot.lane.b32.xlu1 %v11114_v10, %s8723_s10 }
 0x57e   : > { %v3445_v5 = vpop.permute.xlu0 %3444 }
 0x57f   : > { %3531 = vst.msk [vmem:[#allocation3 + $0x48] sm:$0xff] %vm3526_vm9, %v3445_v5  ;;  %v3225_v18 = vpop.permute.xlu1 %3224 }
 0x580   : > { %3688 = vrot.lane.b32.xlu0 %v10714_v58, %s8724_s26  ;;  %3300 = vst.msk [vmem:[#allocation3 + $0xca] sm:$0xff] %vm3284_vm7, %v3225_v18 }
 0x581   : > { %3470 = vrot.lane.b32.xlu1 %v11133_v31, %s8723_s10 }
 0x582   : > { %v3449_v0 = vpop.permute.xlu0 %3448 }
 0x583   : > { %3533 = vst.msk [vmem:[#allocation3 + $0x60] sm:$0xff] %vm3526_vm9, %v3449_v0  ;;  %v3229_v34 = vpop.permute.xlu1 %3228 }
 0x584   : > { %3692 = vrot.lane.b32.xlu0 %v10726_v55, %s8724_s26  ;;  %3302 = vst.msk [vmem:[#allocation3 + $0xe2] sm:$0xff] %vm3284_vm7, %v3229_v34 }
 0x585   : > { %3474 = vrot.lane.b32.xlu1 %v11141_v62, %s8723_s10 }
 0x586   : > { %v3453_v9 = vpop.permute.xlu0 %3452 }
 0x587   : > { %3535 = vst.msk [vmem:[#allocation3 + $0x78] sm:$0xff] %vm3526_vm9, %v3453_v9  ;;  %v3233_v2 = vpop.permute.xlu1 %3232 }
 0x588   : > { %3696 = vrot.lane.b32.xlu0 %v10738_v60, %s8724_s26  ;;  %3304 = vst.msk [vmem:[#allocation3 + $0xfa] sm:$0xff] %vm3284_vm7, %v3233_v2 }
 0x589   : > { %3478 = vrot.lane.b32.xlu1 %v11153_v16, %s8723_s10 }
 0x58a   : > { %v3457_v5 = vpop.permute.xlu0 %3456 }
 0x58b   : > { %3537 = vst.msk [vmem:[#allocation3 + $0x90] sm:$0xff] %vm3526_vm9, %v3457_v5  ;;  %v3237_v18 = vpop.permute.xlu1 %3236 }
 0x58c   : > { %3700 = vrot.lane.b32.xlu0 %v10747_v30, %s8724_s26  ;;  %3306 = vst.msk [vmem:[#allocation3 + $0x112] sm:$0xff] %vm3284_vm7, %v3237_v18 }
 0x58d   : > { %3482 = vrot.lane.b32.xlu1 %v11161_v39, %s8723_s10 }
 0x58e   : > { %v3461_v0 = vpop.permute.xlu0 %3460 }
 0x58f   : > { %3539 = vst.msk [vmem:[#allocation3 + $0xa8] sm:$0xff] %vm3526_vm9, %v3461_v0  ;;  %v3241_v34 = vpop.permute.xlu1 %3240 }
 0x590   : > { %3704 = vrot.lane.b32.xlu0 %v10758_v45, %s8724_s26  ;;  %3308 = vst.msk [vmem:[#allocation3 + $0x12a] sm:$0xff] %vm3284_vm7, %v3241_v34 }
 0x591   : > { %3486 = vrot.lane.b32.xlu1 %v11173_v52, %s8723_s10 }
 0x592   : > { %v3465_v9 = vpop.permute.xlu0 %3464 }
 0x593   : > { %3541 = vst.msk [vmem:[#allocation3 + $0xc0] sm:$0xff] %vm3526_vm9, %v3465_v9  ;;  %v3245_v2 = vpop.permute.xlu1 %3244 }
 0x594   : > { %3708 = vrot.lane.b32.xlu0 %v10765_v63, %s8724_s26  ;;  %3310 = vst.msk [vmem:[#allocation3 + $0x142] sm:$0xff] %vm3284_vm7, %v3245_v2 }
 0x595   : > { %3490 = vrot.lane.b32.xlu1 %v11181_v36, %s8723_s10 }
 0x596   : > { %v3469_v5 = vpop.permute.xlu0 %3468 }
 0x597   : > { %3543 = vst.msk [vmem:[#allocation3 + $0xd8] sm:$0xff] %vm3526_vm9, %v3469_v5  ;;  %v3249_v18 = vpop.permute.xlu1 %3248 }
 0x598   : > { %3712 = vrot.lane.b32.xlu0 %v10779_v12, %s8724_s26  ;;  %3312 = vst.msk [vmem:[#allocation3 + $0x15a] sm:$0xff] %vm3284_vm7, %v3249_v18 }
 0x599   : > { %3494 = vrot.lane.b32.xlu1 %v11679_v1, %s8723_s10  ;;  %s8731_s10 = smov 72  }
 0x59a   : > { %v3473_v0 = vpop.permute.xlu0 %3472 }
 0x59b   : > { %3545 = vst.msk [vmem:[#allocation3 + $0xf0] sm:$0xff] %vm3526_vm9, %v3473_v0  ;;  %v3253_v34 = vpop.permute.xlu1 %3252 }
 0x59c   : > { %3716 = vrot.lane.b32.xlu0 %v10794_v8, %s8724_s26  ;;  %3314 = vst.msk [vmem:[#allocation3 + $0x172] sm:$0xff] %vm3284_vm7, %v3253_v34  ;;  %vm4657_vm7 = vcmask 622144  }
 0x59d   : > { %3561 = vrot.lane.b32.xlu1 %v11046_v28, %s8713_s18 }
 0x59e   : > { %v3477_v9 = vpop.permute.xlu0 %3476 }
 0x59f   : > { %3547 = vst.msk [vmem:[#allocation3 + $0x108] sm:$0xff] %vm3526_vm9, %v3477_v9  ;;  %v3318_v2 = vpop.permute.xlu1 %3317 }
 0x5a0   : > { %3720 = vrot.lane.b32.xlu0 %v10815_v19, %s8724_s26  ;;  %3407 = vst.msk [vmem:[#allocation3 + $0x21] sm:$0xff] %vm3405_vm8, %v3318_v2 }
 0x5a1   : > { %3565 = vrot.lane.b32.xlu1 %v11054_v40, %s8713_s18 }
 0x5a2   : > { %v3481_v5 = vpop.permute.xlu0 %3480 }
 0x5a3   : > { %3549 = vst.msk [vmem:[#allocation3 + $0x120] sm:$0xff] %vm3526_vm9, %v3481_v5  ;;  %v3322_v18 = vpop.permute.xlu1 %3321 }
 0x5a4   : > { %3724 = vrot.lane.b32.xlu0 %v10901_v7, %s8724_s26  ;;  %3409 = vst.msk [vmem:[#allocation3 + $0x39] sm:$0xff] %vm3405_vm8, %v3322_v18 }
 0x5a5   : > { %3569 = vrot.lane.b32.xlu1 %v11066_v50, %s8713_s18 }
 0x5a6   : > { %v3485_v0 = vpop.permute.xlu0 %3484 }
 0x5a7   : > { %3551 = vst.msk [vmem:[#allocation3 + $0x138] sm:$0xff] %vm3526_vm9, %v3485_v0  ;;  %v3326_v34 = vpop.permute.xlu1 %3325 }
 0x5a8   : > { %3728 = vrot.lane.b32.xlu0 %v10932_v17, %s8724_s26  ;;  %3411 = vst.msk [vmem:[#allocation3 + $0x51] sm:$0xff] %vm3405_vm8, %v3326_v34 }
 0x5a9   : > { %3573 = vrot.lane.b32.xlu1 %v11074_v47, %s8713_s18 }
 0x5aa   : > { %v3489_v9 = vpop.permute.xlu0 %3488 }
 0x5ab   : > { %3553 = vst.msk [vmem:[#allocation3 + $0x150] sm:$0xff] %vm3526_vm9, %v3489_v9  ;;  %v3330_v2 = vpop.permute.xlu1 %3329 }
 0x5ac   : > { %3732 = vrot.lane.b32.xlu0 %v10942_v42, %s8724_s26  ;;  %3413 = vst.msk [vmem:[#allocation3 + $0x69] sm:$0xff] %vm3405_vm8, %v3330_v2 }
 0x5ad   : > { %3577 = vrot.lane.b32.xlu1 %v11086_v54, %s8713_s18 }
 0x5ae   : > { %v3493_v5 = vpop.permute.xlu0 %3492 }
 0x5af   : > { %3555 = vst.msk [vmem:[#allocation3 + $0x168] sm:$0xff] %vm3526_vm9, %v3493_v5  ;;  %v3334_v18 = vpop.permute.xlu1 %3333 }
 0x5b0   : > { %3736 = vrot.lane.b32.xlu0 %v10954_v59, %s8724_s26  ;;  %3415 = vst.msk [vmem:[#allocation3 + $0x81] sm:$0xff] %vm3405_vm8, %v3334_v18 }
 0x5b1   : > { %3581 = vrot.lane.b32.xlu1 %v11094_v6, %s8713_s18 }
 0x5b2   : > { %v3560_v0 = vpop.permute.xlu0 %3559 }
 0x5b3   : > { %3656 = vst.msk [vmem:[#allocation3 + $0x4] sm:$0xff] %vm3655_vm12, %v3560_v0  ;;  %v3338_v34 = vpop.permute.xlu1 %3337 }
 0x5b4   : > { %3740 = vrot.lane.b32.xlu0 %v10962_v32, %s8724_s26  ;;  %3417 = vst.msk [vmem:[#allocation3 + $0x99] sm:$0xff] %vm3405_vm8, %v3338_v34 }
 0x5b5   : > { %3585 = vrot.lane.b32.xlu1 %v11106_v21, %s8713_s18 }
 0x5b6   : > { %v3564_v9 = vpop.permute.xlu0 %3563 }
 0x5b7   : > { %v3342_v2 = vpop.permute.xlu1 %3341 }
 0x5b8   : > { %3744 = vrot.lane.b32.xlu0 %v11420_v49, %s8724_s26  ;;  %3419 = vst.msk [vmem:[#allocation3 + $0xb1] sm:$0xff] %vm3405_vm8, %v3342_v2 }
 0x5b9   : > { %3589 = vrot.lane.b32.xlu1 %v11114_v10, %s8713_s18 }
 0x5ba   : > { %v3568_v5 = vpop.permute.xlu0 %3567 }
 0x5bb   : > { %v3346_v18 = vpop.permute.xlu1 %3345 }
 0x5bc   : > { %3748 = vrot.lane.b32.xlu0 %v12168_v22, %s8724_s26  ;;  %3421 = vst.msk [vmem:[#allocation3 + $0xc9] sm:$0xff] %vm3405_vm8, %v3346_v18 }
 0x5bd   : > { %3593 = vrot.lane.b32.xlu1 %v11133_v31, %s8713_s18 }
 0x5be   : > { %v3572_v0 = vpop.permute.xlu0 %3571 }
 0x5bf   : > { %v3350_v43 = vpop.permute.xlu1 %3349 }
 0x5c0   : > { %3817 = vrot.lane.b32.xlu0 %v10714_v58, %s8714_s19  ;;  %3423 = vst.msk [vmem:[#allocation3 + $0xe1] sm:$0xff] %vm3405_vm8, %v3350_v43 }
 0x5c1   : > { %3597 = vrot.lane.b32.xlu1 %v11141_v62, %s8713_s18 }
 0x5c2   : > { %v3576_v34 = vpop.permute.xlu0 %3575 }
 0x5c3   : > { %v3354_v4 = vpop.permute.xlu1 %3353 }
 0x5c4   : > { %3821 = vrot.lane.b32.xlu0 %v10726_v55, %s8714_s19  ;;  %3425 = vst.msk [vmem:[#allocation3 + $0xf9] sm:$0xff] %vm3405_vm8, %v3354_v4 }
 0x5c5   : > { %3601 = vrot.lane.b32.xlu1 %v11153_v16, %s8713_s18 }
 0x5c6   : > { %v3580_v2 = vpop.permute.xlu0 %3579 }
 0x5c7   : > { %v3358_v24 = vpop.permute.xlu1 %3357 }
 0x5c8   : > { %3825 = vrot.lane.b32.xlu0 %v10738_v60, %s8714_s19  ;;  %3427 = vst.msk [vmem:[#allocation3 + $0x111] sm:$0xff] %vm3405_vm8, %v3358_v24 }
 0x5c9   : > { %3605 = vrot.lane.b32.xlu1 %v11161_v39, %s8713_s18 }
 0x5ca   : > { %v12285_v18 = vpop.permute.xlu0 %3583 }
 0x5cb   : > { %v3362_v4 = vpop.permute.xlu1 %3361 }
 0x5cc   : > { %3829 = vrot.lane.b32.xlu0 %v10747_v30, %s8714_s19  ;;  %3429 = vst.msk [vmem:[#allocation3 + $0x129] sm:$0xff] %vm3405_vm8, %v3362_v4 }
 0x5cd   : > { %3609 = vrot.lane.b32.xlu1 %v11173_v52, %s8713_s18 }
 0x5ce   : > { %v12292_v43 = vpop.permute.xlu0 %3587 }
 0x5cf   : > { %v3366_v24 = vpop.permute.xlu1 %3365 }
 0x5d0   : > { %3833 = vrot.lane.b32.xlu0 %v10758_v45, %s8714_s19  ;;  %3431 = vst.msk [vmem:[#allocation3 + $0x141] sm:$0xff] %vm3405_vm8, %v3366_v24 }
 0x5d1   : > { %3613 = vrot.lane.b32.xlu1 %v11181_v36, %s8713_s18 }
 0x5d2   : > { %v12299_v26 = vpop.permute.xlu0 %3591 }
 0x5d3   : > { %v3370_v4 = vpop.permute.xlu1 %3369 }
 0x5d4   : > { %3837 = vrot.lane.b32.xlu0 %v10765_v63, %s8714_s19  ;;  %3433 = vst.msk [vmem:[#allocation3 + $0x159] sm:$0xff] %vm3405_vm8, %v3370_v4  ;;  %v726_v4 = vadd.f32 %v14957_v61, %v9952_v20 }
 0x5d5   : > { %3617 = vrot.lane.b32.xlu1 %v11679_v1, %s8713_s18 }
 0x5d6   : > { %v12306_v13 = vpop.permute.xlu0 %3595 }
 0x5d7   : > { %v3374_v24 = vpop.permute.xlu1 %3373 }
 0x5d8   : > { %3841 = vrot.lane.b32.xlu0 %v10779_v12, %s8714_s19  ;;  %3435 = vst.msk [vmem:[#allocation3 + $0x171] sm:$0xff] %vm3405_vm8, %v3374_v24  ;;  %v12330_v24 = vmax.f32 %v726_v4, 0.0  ;;  %vm4778_vm8 = vcmask 654944  }
 0x5da   : > { %v12313_v53 = vpop.permute.xlu0 %3599  ;;  %3621 = vrot.lane.b32.xlu1 %v12330_v24, %s8713_s18 }
 0x5db   : > { %v3439_v11 = vpop.permute.xlu1 %3438 }
 0x5dc   : > { %3845 = vrot.lane.b32.xlu0 %v10794_v8, %s8714_s19  ;;  %3528 = vst.msk [vmem:[#allocation3 + $0x20] sm:$0xff] %vm3526_vm9, %v3439_v11 }
 0x5dd   : > { %3658 = vst.msk [vmem:[#allocation3 + $0x1c] sm:$0xff] %vm3655_vm12, %v3564_v9 }
 0x5de   : > { %v12322_v37 = vpop.permute.xlu0 %3603  ;;  %3690 = vrot.lane.b32.xlu1 %v11046_v28, %s8724_s26 }
 0x5df   : > { %v3443_v35 = vpop.permute.xlu1 %3442 }
 0x5e0   : > { %3849 = vrot.lane.b32.xlu0 %v10815_v19, %s8714_s19  ;;  %3530 = vst.msk [vmem:[#allocation3 + $0x38] sm:$0xff] %vm3526_vm9, %v3443_v35 }
 0x5e1   : > { %3660 = vst.msk [vmem:[#allocation3 + $0x34] sm:$0xff] %vm3655_vm12, %v3568_v5 }
 0x5e2   : > { %v12332_v29 = vpop.permute.xlu0 %3607  ;;  %3694 = vrot.lane.b32.xlu1 %v11054_v40, %s8724_s26 }
 0x5e3   : > { %v3447_v11 = vpop.permute.xlu1 %3446 }
 0x5e4   : > { %3853 = vrot.lane.b32.xlu0 %v10901_v7, %s8714_s19  ;;  %3532 = vst.msk [vmem:[#allocation3 + $0x50] sm:$0xff] %vm3526_vm9, %v3447_v11 }
 0x5e5   : > { %3662 = vst.msk [vmem:[#allocation3 + $0x4c] sm:$0xff] %vm3655_vm12, %v3572_v0 }
 0x5e6   : > { %v12340_v20 = vpop.permute.xlu0 %3611  ;;  %3698 = vrot.lane.b32.xlu1 %v11066_v50, %s8724_s26 }
 0x5e7   : > { %v3451_v9 = vpop.permute.xlu1 %3450 }
 0x5e8   : > { %3857 = vrot.lane.b32.xlu0 %v10932_v17, %s8714_s19  ;;  %3534 = vst.msk [vmem:[#allocation3 + $0x68] sm:$0xff] %vm3526_vm9, %v3451_v9 }
 0x5e9   : > { %3664 = vst.msk [vmem:[#allocation3 + $0x64] sm:$0xff] %vm3655_vm12, %v3576_v34 }
 0x5ea   : > { %v12348_v35 = vpop.permute.xlu0 %3615  ;;  %3702 = vrot.lane.b32.xlu1 %v11074_v47, %s8724_s26 }
 0x5eb   : > { %v3455_v4 = vpop.permute.xlu1 %3454 }
 0x5ec   : > { %3861 = vrot.lane.b32.xlu0 %v10942_v42, %s8714_s19  ;;  %3536 = vst.msk [vmem:[#allocation3 + $0x80] sm:$0xff] %vm3526_vm9, %v3455_v4 }
 0x5ed   : > { %3666 = vst.msk [vmem:[#allocation3 + $0x7c] sm:$0xff] %vm3655_vm12, %v3580_v2 }
 0x5ee   : > { %v12356_v5 = vpop.permute.xlu0 %3619  ;;  %3706 = vrot.lane.b32.xlu1 %v11086_v54, %s8724_s26 }
 0x5ef   : > { %v3459_v11 = vpop.permute.xlu1 %3458 }
 0x5f0   : > { %3865 = vrot.lane.b32.xlu0 %v10954_v59, %s8714_s19  ;;  %3538 = vst.msk [vmem:[#allocation3 + $0x98] sm:$0xff] %vm3526_vm9, %v3459_v11 }
 0x5f1   : > { %3668 = vst.msk [vmem:[#allocation3 + $0x94] sm:$0xff] %vm3655_vm12, %v12285_v18 }
 0x5f2   : > { %v3689_v0 = vpop.permute.xlu0 %3688  ;;  %3710 = vrot.lane.b32.xlu1 %v11094_v6, %s8724_s26 }
 0x5f3   : > { %3785 = vst.msk [vmem:[#allocation3 + $0x3] sm:$0xff] %vm3784_vm13, %v3689_v0  ;;  %v3463_v9 = vpop.permute.xlu1 %3462 }
 0x5f4   : > { %3869 = vrot.lane.b32.xlu0 %v10962_v32, %s8714_s19  ;;  %3540 = vst.msk [vmem:[#allocation3 + $0xb0] sm:$0xff] %vm3526_vm9, %v3463_v9 }
 0x5f5   : > { %3670 = vst.msk [vmem:[#allocation3 + $0xac] sm:$0xff] %vm3655_vm12, %v12292_v43 }
 0x5f6   : > { %v3693_v34 = vpop.permute.xlu0 %3692  ;;  %3714 = vrot.lane.b32.xlu1 %v11106_v21, %s8724_s26 }
 0x5f7   : > { %3787 = vst.msk [vmem:[#allocation3 + $0x1b] sm:$0xff] %vm3784_vm13, %v3693_v34  ;;  %v3467_v4 = vpop.permute.xlu1 %3466 }
 0x5f8   : > { %3873 = vrot.lane.b32.xlu0 %v11420_v49, %s8714_s19  ;;  %3542 = vst.msk [vmem:[#allocation3 + $0xc8] sm:$0xff] %vm3526_vm9, %v3467_v4 }
 0x5f9   : > { %3672 = vst.msk [vmem:[#allocation3 + $0xc4] sm:$0xff] %vm3655_vm12, %v12299_v26 }
 0x5fa   : > { %v3697_v2 = vpop.permute.xlu0 %3696  ;;  %3718 = vrot.lane.b32.xlu1 %v11114_v10, %s8724_s26 }
 0x5fb   : > { %3789 = vst.msk [vmem:[#allocation3 + $0x33] sm:$0xff] %vm3784_vm13, %v3697_v2  ;;  %v3471_v0 = vpop.permute.xlu1 %3470 }
 0x5fc   : > { %3877 = vrot.lane.b32.xlu0 %v12168_v22, %s8714_s19  ;;  %3544 = vst.msk [vmem:[#allocation3 + $0xe0] sm:$0xff] %vm3526_vm9, %v3471_v0 }
 0x5fd   : > { %3674 = vst.msk [vmem:[#allocation3 + $0xdc] sm:$0xff] %vm3655_vm12, %v12306_v13 }
 0x5fe   : > { %v3701_v18 = vpop.permute.xlu0 %3700  ;;  %3722 = vrot.lane.b32.xlu1 %v11133_v31, %s8724_s26 }
 0x5ff   : > { %3791 = vst.msk [vmem:[#allocation3 + $0x4b] sm:$0xff] %vm3784_vm13, %v3701_v18  ;;  %v3475_v26 = vpop.permute.xlu1 %3474 }
 0x600   : > { %3946 = vrot.lane.b32.xlu0 %v10714_v58, %s8725_s12  ;;  %3546 = vst.msk [vmem:[#allocation3 + $0xf8] sm:$0xff] %vm3526_vm9, %v3475_v26 }
 0x601   : > { %3676 = vst.msk [vmem:[#allocation3 + $0xf4] sm:$0xff] %vm3655_vm12, %v12313_v53 }
 0x602   : > { %v3705_v43 = vpop.permute.xlu0 %3704  ;;  %3726 = vrot.lane.b32.xlu1 %v11141_v62, %s8724_s26 }
 0x603   : > { %3793 = vst.msk [vmem:[#allocation3 + $0x63] sm:$0xff] %vm3784_vm13, %v3705_v43  ;;  %v3479_v34 = vpop.permute.xlu1 %3478 }
 0x604   : > { %3950 = vrot.lane.b32.xlu0 %v10726_v55, %s8725_s12  ;;  %3548 = vst.msk [vmem:[#allocation3 + $0x110] sm:$0xff] %vm3526_vm9, %v3479_v34 }
 0x605   : > { %3678 = vst.msk [vmem:[#allocation3 + $0x10c] sm:$0xff] %vm3655_vm12, %v12322_v37 }
 0x606   : > { %v3709_v11 = vpop.permute.xlu0 %3708  ;;  %3730 = vrot.lane.b32.xlu1 %v11153_v16, %s8724_s26 }
 0x607   : > { %3795 = vst.msk [vmem:[#allocation3 + $0x7b] sm:$0xff] %vm3784_vm13, %v3709_v11  ;;  %v3483_v9 = vpop.permute.xlu1 %3482 }
 0x608   : > { %3954 = vrot.lane.b32.xlu0 %v10738_v60, %s8725_s12  ;;  %3550 = vst.msk [vmem:[#allocation3 + $0x128] sm:$0xff] %vm3526_vm9, %v3483_v9 }
 0x609   : > { %3680 = vst.msk [vmem:[#allocation3 + $0x124] sm:$0xff] %vm3655_vm12, %v12332_v29 }
 0x60a   : > { %v3713_v13 = vpop.permute.xlu0 %3712  ;;  %3734 = vrot.lane.b32.xlu1 %v11161_v39, %s8724_s26 }
 0x60b   : > { %3797 = vst.msk [vmem:[#allocation3 + $0x93] sm:$0xff] %vm3784_vm13, %v3713_v13  ;;  %v3487_v2 = vpop.permute.xlu1 %3486 }
 0x60c   : > { %3958 = vrot.lane.b32.xlu0 %v10747_v30, %s8725_s12  ;;  %3552 = vst.msk [vmem:[#allocation3 + $0x140] sm:$0xff] %vm3526_vm9, %v3487_v2 }
 0x60d   : > { %3682 = vst.msk [vmem:[#allocation3 + $0x13c] sm:$0xff] %vm3655_vm12, %v12340_v20 }
 0x60e   : > { %v3717_v53 = vpop.permute.xlu0 %3716  ;;  %3738 = vrot.lane.b32.xlu1 %v11173_v52, %s8724_s26 }
 0x60f   : > { %3799 = vst.msk [vmem:[#allocation3 + $0xab] sm:$0xff] %vm3784_vm13, %v3717_v53  ;;  %v3491_v4 = vpop.permute.xlu1 %3490 }
 0x610   : > { %3962 = vrot.lane.b32.xlu0 %v10758_v45, %s8725_s12  ;;  %3554 = vst.msk [vmem:[#allocation3 + $0x158] sm:$0xff] %vm3526_vm9, %v3491_v4 }
 0x611   : > { %3684 = vst.msk [vmem:[#allocation3 + $0x154] sm:$0xff] %vm3655_vm12, %v12348_v35 }
 0x612   : > { %v3721_v37 = vpop.permute.xlu0 %3720  ;;  %3742 = vrot.lane.b32.xlu1 %v11181_v36, %s8724_s26 }
 0x613   : > { %3801 = vst.msk [vmem:[#allocation3 + $0xc3] sm:$0xff] %vm3784_vm13, %v3721_v37  ;;  %v3495_v18 = vpop.permute.xlu1 %3494 }
 0x614   : > { %3966 = vrot.lane.b32.xlu0 %v10765_v63, %s8725_s12  ;;  %3556 = vst.msk [vmem:[#allocation3 + $0x170] sm:$0xff] %vm3526_vm9, %v3495_v18  ;;  %vm5570_vm9 = vcmask 1041408  }
 0x615   : > { %3686 = vst.msk [vmem:[#allocation3 + $0x16c] sm:$0xff] %vm3655_vm12, %v12356_v5 }
 0x616   : > { %v3725_v29 = vpop.permute.xlu0 %3724  ;;  %3746 = vrot.lane.b32.xlu1 %v11679_v1, %s8724_s26 }
 0x617   : > { %3803 = vst.msk [vmem:[#allocation3 + $0xdb] sm:$0xff] %vm3784_vm13, %v3725_v29  ;;  %v3562_v0 = vpop.permute.xlu1 %3561 }
 0x618   : > { %3970 = vrot.lane.b32.xlu0 %v10779_v12, %s8725_s12  ;;  %3657 = vst.msk [vmem:[#allocation3 + $0xc] sm:$0xff] %vm3655_vm12, %v3562_v0 }
 0x61a   : > { %v3729_v20 = vpop.permute.xlu0 %3728  ;;  %3750 = vrot.lane.b32.xlu1 %v12330_v24, %s8724_s26  ;;  %s8732_s26 = smov 76  }
 0x61b   : > { %3805 = vst.msk [vmem:[#allocation3 + $0xf3] sm:$0xff] %vm3784_vm13, %v3729_v20  ;;  %v3566_v43 = vpop.permute.xlu1 %3565 }
 0x61c   : > { %3974 = vrot.lane.b32.xlu0 %v10794_v8, %s8725_s12  ;;  %3659 = vst.msk [vmem:[#allocation3 + $0x24] sm:$0xff] %vm3655_vm12, %v3566_v43 }
 0x61e   : > { %v3733_v35 = vpop.permute.xlu0 %3732  ;;  %3819 = vrot.lane.b32.xlu1 %v11046_v28, %s8714_s19 }
 0x61f   : > { %3807 = vst.msk [vmem:[#allocation3 + $0x10b] sm:$0xff] %vm3784_vm13, %v3733_v35  ;;  %v3570_v26 = vpop.permute.xlu1 %3569 }
 0x620   : > { %3978 = vrot.lane.b32.xlu0 %v10815_v19, %s8725_s12  ;;  %3661 = vst.msk [vmem:[#allocation3 + $0x3c] sm:$0xff] %vm3655_vm12, %v3570_v26 }
 0x622   : > { %v3737_v5 = vpop.permute.xlu0 %3736  ;;  %3823 = vrot.lane.b32.xlu1 %v11054_v40, %s8714_s19 }
 0x623   : > { %3809 = vst.msk [vmem:[#allocation3 + $0x123] sm:$0xff] %vm3784_vm13, %v3737_v5  ;;  %v3574_v34 = vpop.permute.xlu1 %3573 }
 0x624   : > { %3982 = vrot.lane.b32.xlu0 %v10901_v7, %s8725_s12  ;;  %3663 = vst.msk [vmem:[#allocation3 + $0x54] sm:$0xff] %vm3655_vm12, %v3574_v34 }
 0x626   : > { %v3741_v11 = vpop.permute.xlu0 %3740  ;;  %3827 = vrot.lane.b32.xlu1 %v11066_v50, %s8714_s19 }
 0x627   : > { %3811 = vst.msk [vmem:[#allocation3 + $0x13b] sm:$0xff] %vm3784_vm13, %v3741_v11  ;;  %v3578_v9 = vpop.permute.xlu1 %3577 }
 0x628   : > { %3986 = vrot.lane.b32.xlu0 %v10932_v17, %s8725_s12  ;;  %3665 = vst.msk [vmem:[#allocation3 + $0x6c] sm:$0xff] %vm3655_vm12, %v3578_v9 }
 0x62a   : > { %v3745_v13 = vpop.permute.xlu0 %3744  ;;  %3831 = vrot.lane.b32.xlu1 %v11074_v47, %s8714_s19 }
 0x62b   : > { %3813 = vst.msk [vmem:[#allocation3 + $0x153] sm:$0xff] %vm3784_vm13, %v3745_v13  ;;  %v3582_v2 = vpop.permute.xlu1 %3581 }
 0x62c   : > { %3990 = vrot.lane.b32.xlu0 %v10942_v42, %s8725_s12  ;;  %3667 = vst.msk [vmem:[#allocation3 + $0x84] sm:$0xff] %vm3655_vm12, %v3582_v2 }
 0x62e   : > { %v3749_v53 = vpop.permute.xlu0 %3748  ;;  %3835 = vrot.lane.b32.xlu1 %v11086_v54, %s8714_s19 }
 0x62f   : > { %3815 = vst.msk [vmem:[#allocation3 + $0x16b] sm:$0xff] %vm3784_vm13, %v3749_v53  ;;  %v3586_v4 = vpop.permute.xlu1 %3585 }
 0x630   : > { %3994 = vrot.lane.b32.xlu0 %v10954_v59, %s8725_s12  ;;  %3669 = vst.msk [vmem:[#allocation3 + $0x9c] sm:$0xff] %vm3655_vm12, %v3586_v4 }
 0x632   : > { %v3818_v37 = vpop.permute.xlu0 %3817  ;;  %3839 = vrot.lane.b32.xlu1 %v11094_v6, %s8714_s19 }
 0x633   : > { %3914 = vst.msk [vmem:[#allocation3 + $0x2] sm:$0xff] %vm3913_vm15, %v3818_v37  ;;  %v3590_v18 = vpop.permute.xlu1 %3589 }
 0x634   : > { %3998 = vrot.lane.b32.xlu0 %v10962_v32, %s8725_s12  ;;  %3671 = vst.msk [vmem:[#allocation3 + $0xb4] sm:$0xff] %vm3655_vm12, %v3590_v18 }
 0x636   : > { %v3822_v29 = vpop.permute.xlu0 %3821  ;;  %3843 = vrot.lane.b32.xlu1 %v11106_v21, %s8714_s19 }
 0x637   : > { %3916 = vst.msk [vmem:[#allocation3 + $0x1a] sm:$0xff] %vm3913_vm15, %v3822_v29  ;;  %v3594_v0 = vpop.permute.xlu1 %3593 }
 0x638   : > { %4002 = vrot.lane.b32.xlu0 %v11420_v49, %s8725_s12  ;;  %3673 = vst.msk [vmem:[#allocation3 + $0xcc] sm:$0xff] %vm3655_vm12, %v3594_v0 }
 0x63a   : > { %v3826_v20 = vpop.permute.xlu0 %3825  ;;  %3847 = vrot.lane.b32.xlu1 %v11114_v10, %s8714_s19 }
 0x63b   : > { %3918 = vst.msk [vmem:[#allocation3 + $0x32] sm:$0xff] %vm3913_vm15, %v3826_v20  ;;  %v3598_v43 = vpop.permute.xlu1 %3597 }
 0x63c   : > { %4006 = vrot.lane.b32.xlu0 %v12168_v22, %s8725_s12  ;;  %3675 = vst.msk [vmem:[#allocation3 + $0xe4] sm:$0xff] %vm3655_vm12, %v3598_v43 }
 0x63e   : > { %v3830_v35 = vpop.permute.xlu0 %3829  ;;  %3851 = vrot.lane.b32.xlu1 %v11133_v31, %s8714_s19 }
 0x63f   : > { %3920 = vst.msk [vmem:[#allocation3 + $0x4a] sm:$0xff] %vm3913_vm15, %v3830_v35  ;;  %v3602_v26 = vpop.permute.xlu1 %3601 }
 0x640   : > { %4075 = vrot.lane.b32.xlu0 %v10714_v58, %s8715_s20  ;;  %3677 = vst.msk [vmem:[#allocation3 + $0xfc] sm:$0xff] %vm3655_vm12, %v3602_v26 }
 0x642   : > { %v3834_v5 = vpop.permute.xlu0 %3833  ;;  %3855 = vrot.lane.b32.xlu1 %v11141_v62, %s8714_s19 }
 0x643   : > { %3922 = vst.msk [vmem:[#allocation3 + $0x62] sm:$0xff] %vm3913_vm15, %v3834_v5  ;;  %v3606_v34 = vpop.permute.xlu1 %3605 }
 0x644   : > { %4079 = vrot.lane.b32.xlu0 %v10726_v55, %s8715_s20  ;;  %3679 = vst.msk [vmem:[#allocation3 + $0x114] sm:$0xff] %vm3655_vm12, %v3606_v34 }
 0x646   : > { %v3838_v11 = vpop.permute.xlu0 %3837  ;;  %3859 = vrot.lane.b32.xlu1 %v11153_v16, %s8714_s19 }
 0x647   : > { %3924 = vst.msk [vmem:[#allocation3 + $0x7a] sm:$0xff] %vm3913_vm15, %v3838_v11  ;;  %v3610_v13 = vpop.permute.xlu1 %3609 }
 0x648   : > { %4083 = vrot.lane.b32.xlu0 %v10738_v60, %s8715_s20  ;;  %3681 = vst.msk [vmem:[#allocation3 + $0x12c] sm:$0xff] %vm3655_vm12, %v3610_v13 }
 0x64a   : > { %v3842_v58 = vpop.permute.xlu0 %3841  ;;  %3863 = vrot.lane.b32.xlu1 %v11161_v39, %s8714_s19 }
 0x64b   : > { %3926 = vst.msk [vmem:[#allocation3 + $0x92] sm:$0xff] %vm3913_vm15, %v3842_v58  ;;  %v3614_v53 = vpop.permute.xlu1 %3613 }
 0x64c   : > { %4087 = vrot.lane.b32.xlu0 %v10747_v30, %s8715_s20  ;;  %3683 = vst.msk [vmem:[#allocation3 + $0x144] sm:$0xff] %vm3655_vm12, %v3614_v53 }
 0x64e   : > { %v3846_v9 = vpop.permute.xlu0 %3845  ;;  %3867 = vrot.lane.b32.xlu1 %v11173_v52, %s8714_s19 }
 0x64f   : > { %3928 = vst.msk [vmem:[#allocation3 + $0xaa] sm:$0xff] %vm3913_vm15, %v3846_v9  ;;  %v3618_v37 = vpop.permute.xlu1 %3617 }
 0x650   : > { %4091 = vrot.lane.b32.xlu0 %v10758_v45, %s8715_s20  ;;  %3685 = vst.msk [vmem:[#allocation3 + $0x15c] sm:$0xff] %vm3655_vm12, %v3618_v37 }
 0x652   : > { %v3850_v2 = vpop.permute.xlu0 %3849  ;;  %3871 = vrot.lane.b32.xlu1 %v11181_v36, %s8714_s19 }
 0x653   : > { %3930 = vst.msk [vmem:[#allocation3 + $0xc2] sm:$0xff] %vm3913_vm15, %v3850_v2  ;;  %v3622_v29 = vpop.permute.xlu1 %3621 }
 0x654   : > { %4095 = vrot.lane.b32.xlu0 %v10765_v63, %s8715_s20  ;;  %3687 = vst.msk [vmem:[#allocation3 + $0x174] sm:$0xff] %vm3655_vm12, %v3622_v29  ;;  %vm5006_vm12 = vcmask 720544  }
 0x656   : > { %v3854_v4 = vpop.permute.xlu0 %3853  ;;  %3875 = vrot.lane.b32.xlu1 %v11679_v1, %s8714_s19 }
 0x657   : > { %3932 = vst.msk [vmem:[#allocation3 + $0xda] sm:$0xff] %vm3913_vm15, %v3854_v4  ;;  %v3691_v20 = vpop.permute.xlu1 %3690 }
 0x658   : > { %4099 = vrot.lane.b32.xlu0 %v10779_v12, %s8715_s20  ;;  %3786 = vst.msk [vmem:[#allocation3 + $0xb] sm:$0xff] %vm3784_vm13, %v3691_v20 }
 0x65a   : > { %v3858_v18 = vpop.permute.xlu0 %3857  ;;  %3879 = vrot.lane.b32.xlu1 %v12330_v24, %s8714_s19 }
 0x65b   : > { %3934 = vst.msk [vmem:[#allocation3 + $0xf2] sm:$0xff] %vm3913_vm15, %v3858_v18  ;;  %v3695_v35 = vpop.permute.xlu1 %3694 }
 0x65c   : > { %4103 = vrot.lane.b32.xlu0 %v10794_v8, %s8715_s20  ;;  %3788 = vst.msk [vmem:[#allocation3 + $0x23] sm:$0xff] %vm3784_vm13, %v3695_v35 }
 0x65e   : > { %v3862_v0 = vpop.permute.xlu0 %3861  ;;  %3948 = vrot.lane.b32.xlu1 %v11046_v28, %s8725_s12 }
 0x65f   : > { %3936 = vst.msk [vmem:[#allocation3 + $0x10a] sm:$0xff] %vm3913_vm15, %v3862_v0  ;;  %v3699_v5 = vpop.permute.xlu1 %3698 }
 0x660   : > { %4107 = vrot.lane.b32.xlu0 %v10815_v19, %s8715_s20  ;;  %3790 = vst.msk [vmem:[#allocation3 + $0x3b] sm:$0xff] %vm3784_vm13, %v3699_v5 }
 0x662   : > { %v3866_v43 = vpop.permute.xlu0 %3865  ;;  %3952 = vrot.lane.b32.xlu1 %v11054_v40, %s8725_s12 }
 0x663   : > { %3938 = vst.msk [vmem:[#allocation3 + $0x122] sm:$0xff] %vm3913_vm15, %v3866_v43  ;;  %v3703_v11 = vpop.permute.xlu1 %3702 }
 0x664   : > { %4111 = vrot.lane.b32.xlu0 %v10901_v7, %s8715_s20  ;;  %3792 = vst.msk [vmem:[#allocation3 + $0x53] sm:$0xff] %vm3784_vm13, %v3703_v11 }
 0x666   : > { %v3870_v26 = vpop.permute.xlu0 %3869  ;;  %3956 = vrot.lane.b32.xlu1 %v11066_v50, %s8725_s12 }
 0x667   : > { %3940 = vst.msk [vmem:[#allocation3 + $0x13a] sm:$0xff] %vm3913_vm15, %v3870_v26  ;;  %v3707_v58 = vpop.permute.xlu1 %3706 }
 0x668   : > { %4115 = vrot.lane.b32.xlu0 %v10932_v17, %s8715_s20  ;;  %3794 = vst.msk [vmem:[#allocation3 + $0x6b] sm:$0xff] %vm3784_vm13, %v3707_v58 }
 0x66a   : > { %v3874_v34 = vpop.permute.xlu0 %3873  ;;  %3960 = vrot.lane.b32.xlu1 %v11074_v47, %s8725_s12 }
 0x66b   : > { %3942 = vst.msk [vmem:[#allocation3 + $0x152] sm:$0xff] %vm3913_vm15, %v3874_v34  ;;  %v3711_v9 = vpop.permute.xlu1 %3710 }
 0x66c   : > { %4119 = vrot.lane.b32.xlu0 %v10942_v42, %s8715_s20  ;;  %3796 = vst.msk [vmem:[#allocation3 + $0x83] sm:$0xff] %vm3784_vm13, %v3711_v9 }
 0x66e   : > { %v3878_v13 = vpop.permute.xlu0 %3877  ;;  %3964 = vrot.lane.b32.xlu1 %v11086_v54, %s8725_s12 }
 0x66f   : > { %3944 = vst.msk [vmem:[#allocation3 + $0x16a] sm:$0xff] %vm3913_vm15, %v3878_v13  ;;  %v3715_v2 = vpop.permute.xlu1 %3714 }
 0x670   : > { %4123 = vrot.lane.b32.xlu0 %v10954_v59, %s8715_s20  ;;  %3798 = vst.msk [vmem:[#allocation3 + $0x9b] sm:$0xff] %vm3784_vm13, %v3715_v2 }
 0x672   : > { %v3947_v53 = vpop.permute.xlu0 %3946  ;;  %3968 = vrot.lane.b32.xlu1 %v11094_v6, %s8725_s12 }
 0x673   : > { %4043 = vst.msk [vmem:[#allocation3 + $0x1] sm:$0xff] %vm4042_vm10, %v3947_v53  ;;  %v3719_v4 = vpop.permute.xlu1 %3718 }
 0x674   : > { %4127 = vrot.lane.b32.xlu0 %v10962_v32, %s8715_s20  ;;  %3800 = vst.msk [vmem:[#allocation3 + $0xb3] sm:$0xff] %vm3784_vm13, %v3719_v4 }
 0x676   : > { %v3951_v37 = vpop.permute.xlu0 %3950  ;;  %3972 = vrot.lane.b32.xlu1 %v11106_v21, %s8725_s12 }
 0x677   : > { %4045 = vst.msk [vmem:[#allocation3 + $0x19] sm:$0xff] %vm4042_vm10, %v3951_v37  ;;  %v3723_v18 = vpop.permute.xlu1 %3722 }
 0x678   : > { %4131 = vrot.lane.b32.xlu0 %v11420_v49, %s8715_s20  ;;  %3802 = vst.msk [vmem:[#allocation3 + $0xcb] sm:$0xff] %vm3784_vm13, %v3723_v18 }
 0x67a   : > { %v3955_v29 = vpop.permute.xlu0 %3954  ;;  %3976 = vrot.lane.b32.xlu1 %v11114_v10, %s8725_s12 }
 0x67b   : > { %4047 = vst.msk [vmem:[#allocation3 + $0x31] sm:$0xff] %vm4042_vm10, %v3955_v29  ;;  %v3727_v0 = vpop.permute.xlu1 %3726 }
 0x67c   : > { %4135 = vrot.lane.b32.xlu0 %v12168_v22, %s8715_s20  ;;  %3804 = vst.msk [vmem:[#allocation3 + $0xe3] sm:$0xff] %vm3784_vm13, %v3727_v0 }
 0x67e   : > { %v3959_v20 = vpop.permute.xlu0 %3958  ;;  %3980 = vrot.lane.b32.xlu1 %v11133_v31, %s8725_s12 }
 0x67f   : > { %4049 = vst.msk [vmem:[#allocation3 + $0x49] sm:$0xff] %vm4042_vm10, %v3959_v20  ;;  %v3731_v43 = vpop.permute.xlu1 %3730 }
 0x680   : > { %4204 = vrot.lane.b32.xlu0 %v10726_v55, %s8726_s24  ;;  %3806 = vst.msk [vmem:[#allocation3 + $0xfb] sm:$0xff] %vm3784_vm13, %v3731_v43 }
 0x682   : > { %v3963_v35 = vpop.permute.xlu0 %3962  ;;  %3984 = vrot.lane.b32.xlu1 %v11141_v62, %s8725_s12 }
 0x683   : > { %4051 = vst.msk [vmem:[#allocation3 + $0x61] sm:$0xff] %vm4042_vm10, %v3963_v35  ;;  %v3735_v26 = vpop.permute.xlu1 %3734 }
 0x684   : > { %4208 = vrot.lane.b32.xlu0 %v10738_v60, %s8726_s24  ;;  %3808 = vst.msk [vmem:[#allocation3 + $0x113] sm:$0xff] %vm3784_vm13, %v3735_v26 }
 0x686   : > { %v3967_v5 = vpop.permute.xlu0 %3966  ;;  %3988 = vrot.lane.b32.xlu1 %v11153_v16, %s8725_s12 }
 0x687   : > { %4053 = vst.msk [vmem:[#allocation3 + $0x79] sm:$0xff] %vm4042_vm10, %v3967_v5  ;;  %v3739_v34 = vpop.permute.xlu1 %3738 }
 0x688   : > { %4212 = vrot.lane.b32.xlu0 %v10747_v30, %s8726_s24  ;;  %3810 = vst.msk [vmem:[#allocation3 + $0x12b] sm:$0xff] %vm3784_vm13, %v3739_v34 }
 0x68a   : > { %v3971_v11 = vpop.permute.xlu0 %3970  ;;  %3992 = vrot.lane.b32.xlu1 %v11161_v39, %s8725_s12 }
 0x68b   : > { %4055 = vst.msk [vmem:[#allocation3 + $0x91] sm:$0xff] %vm4042_vm10, %v3971_v11  ;;  %v3743_v13 = vpop.permute.xlu1 %3742 }
 0x68c   : > { %4216 = vrot.lane.b32.xlu0 %v10758_v45, %s8726_s24  ;;  %3812 = vst.msk [vmem:[#allocation3 + $0x143] sm:$0xff] %vm3784_vm13, %v3743_v13 }
 0x68e   : > { %v3975_v58 = vpop.permute.xlu0 %3974  ;;  %3996 = vrot.lane.b32.xlu1 %v11173_v52, %s8725_s12 }
 0x68f   : > { %4057 = vst.msk [vmem:[#allocation3 + $0xa9] sm:$0xff] %vm4042_vm10, %v3975_v58  ;;  %v3747_v53 = vpop.permute.xlu1 %3746 }
 0x690   : > { %4220 = vrot.lane.b32.xlu0 %v10765_v63, %s8726_s24  ;;  %3814 = vst.msk [vmem:[#allocation3 + $0x15b] sm:$0xff] %vm3784_vm13, %v3747_v53 }
 0x692   : > { %v3979_v9 = vpop.permute.xlu0 %3978  ;;  %4000 = vrot.lane.b32.xlu1 %v11181_v36, %s8725_s12 }
 0x693   : > { %4059 = vst.msk [vmem:[#allocation3 + $0xc1] sm:$0xff] %vm4042_vm10, %v3979_v9  ;;  %v3751_v37 = vpop.permute.xlu1 %3750 }
 0x694   : > { %4224 = vrot.lane.b32.xlu0 %v10779_v12, %s8726_s24  ;;  %3816 = vst.msk [vmem:[#allocation3 + $0x173] sm:$0xff] %vm3784_vm13, %v3751_v37  ;;  %vm5119_vm13 = vcmask 753344  }
 0x696   : > { %v3983_v2 = vpop.permute.xlu0 %3982  ;;  %4004 = vrot.lane.b32.xlu1 %v11679_v1, %s8725_s12 }
 0x697   : > { %4061 = vst.msk [vmem:[#allocation3 + $0xd9] sm:$0xff] %vm4042_vm10, %v3983_v2  ;;  %v3820_v29 = vpop.permute.xlu1 %3819 }
 0x698   : > { %4228 = vrot.lane.b32.xlu0 %v10794_v8, %s8726_s24  ;;  %3915 = vst.msk [vmem:[#allocation3 + $0xa] sm:$0xff] %vm3913_vm15, %v3820_v29 }
 0x69a   : > { %v3987_v4 = vpop.permute.xlu0 %3986  ;;  %4008 = vrot.lane.b32.xlu1 %v12330_v24, %s8725_s12  ;;  %s8733_s12 = smov 80  }
 0x69b   : > { %4063 = vst.msk [vmem:[#allocation3 + $0xf1] sm:$0xff] %vm4042_vm10, %v3987_v4  ;;  %v3824_v20 = vpop.permute.xlu1 %3823 }
 0x69c   : > { %4232 = vrot.lane.b32.xlu0 %v10815_v19, %s8726_s24  ;;  %3917 = vst.msk [vmem:[#allocation3 + $0x22] sm:$0xff] %vm3913_vm15, %v3824_v20 }
 0x69e   : > { %v3991_v18 = vpop.permute.xlu0 %3990  ;;  %4077 = vrot.lane.b32.xlu1 %v11046_v28, %s8715_s20 }
 0x69f   : > { %4065 = vst.msk [vmem:[#allocation3 + $0x109] sm:$0xff] %vm4042_vm10, %v3991_v18  ;;  %v3828_v35 = vpop.permute.xlu1 %3827 }
 0x6a0   : > { %4236 = vrot.lane.b32.xlu0 %v10901_v7, %s8726_s24  ;;  %3919 = vst.msk [vmem:[#allocation3 + $0x3a] sm:$0xff] %vm3913_vm15, %v3828_v35 }
 0x6a2   : > { %v3995_v0 = vpop.permute.xlu0 %3994  ;;  %4081 = vrot.lane.b32.xlu1 %v11054_v40, %s8715_s20 }
 0x6a3   : > { %4067 = vst.msk [vmem:[#allocation3 + $0x121] sm:$0xff] %vm4042_vm10, %v3995_v0  ;;  %v3832_v5 = vpop.permute.xlu1 %3831 }
 0x6a4   : > { %4240 = vrot.lane.b32.xlu0 %v10932_v17, %s8726_s24  ;;  %3921 = vst.msk [vmem:[#allocation3 + $0x52] sm:$0xff] %vm3913_vm15, %v3832_v5 }
 0x6a6   : > { %v3999_v43 = vpop.permute.xlu0 %3998  ;;  %4085 = vrot.lane.b32.xlu1 %v11066_v50, %s8715_s20 }
 0x6a7   : > { %4069 = vst.msk [vmem:[#allocation3 + $0x139] sm:$0xff] %vm4042_vm10, %v3999_v43  ;;  %v3836_v11 = vpop.permute.xlu1 %3835 }
 0x6a8   : > { %4244 = vrot.lane.b32.xlu0 %v10942_v42, %s8726_s24  ;;  %3923 = vst.msk [vmem:[#allocation3 + $0x6a] sm:$0xff] %vm3913_vm15, %v3836_v11 }
 0x6aa   : > { %v4003_v26 = vpop.permute.xlu0 %4002  ;;  %4089 = vrot.lane.b32.xlu1 %v11074_v47, %s8715_s20 }
 0x6ab   : > { %4071 = vst.msk [vmem:[#allocation3 + $0x151] sm:$0xff] %vm4042_vm10, %v4003_v26  ;;  %v3840_v58 = vpop.permute.xlu1 %3839 }
 0x6ac   : > { %4248 = vrot.lane.b32.xlu0 %v10954_v59, %s8726_s24  ;;  %3925 = vst.msk [vmem:[#allocation3 + $0x82] sm:$0xff] %vm3913_vm15, %v3840_v58 }
 0x6ae   : > { %v4007_v34 = vpop.permute.xlu0 %4006  ;;  %4093 = vrot.lane.b32.xlu1 %v11086_v54, %s8715_s20 }
 0x6af   : > { %4073 = vst.msk [vmem:[#allocation3 + $0x169] sm:$0xff] %vm4042_vm10, %v4007_v34  ;;  %v3844_v13 = vpop.permute.xlu1 %3843 }
 0x6b0   : > { %4252 = vrot.lane.b32.xlu0 %v10962_v32, %s8726_s24  ;;  %3927 = vst.msk [vmem:[#allocation3 + $0x9a] sm:$0xff] %vm3913_vm15, %v3844_v13 }
 0x6b2   : > { %v4076_v28 = vpop.permute.xlu0 %4075  ;;  %4097 = vrot.lane.b32.xlu1 %v11094_v6, %s8715_s20 }
 0x6b3   : > { %4172 = vst.msk [vmem:[#allocation3] sm:$0xff] %vm4171_vm14, %v4076_v28  ;;  %v3848_v53 = vpop.permute.xlu1 %3847 }
 0x6b4   : > { %4256 = vrot.lane.b32.xlu0 %v11420_v49, %s8726_s24  ;;  %3929 = vst.msk [vmem:[#allocation3 + $0xb2] sm:$0xff] %vm3913_vm15, %v3848_v53 }
 0x6b6   : > { %v4080_v9 = vpop.permute.xlu0 %4079  ;;  %4101 = vrot.lane.b32.xlu1 %v11106_v21, %s8715_s20 }
 0x6b7   : > { %4174 = vst.msk [vmem:[#allocation3 + $0x18] sm:$0xff] %vm4171_vm14, %v4080_v9  ;;  %v3852_v37 = vpop.permute.xlu1 %3851 }
 0x6b8   : > { %4260 = vrot.lane.b32.xlu0 %v12168_v22, %s8726_s24  ;;  %3931 = vst.msk [vmem:[#allocation3 + $0xca] sm:$0xff] %vm3913_vm15, %v3852_v37 }
 0x6ba   : > { %v4084_v2 = vpop.permute.xlu0 %4083  ;;  %4105 = vrot.lane.b32.xlu1 %v11114_v10, %s8715_s20 }
 0x6bb   : > { %4176 = vst.msk [vmem:[#allocation3 + $0x30] sm:$0xff] %vm4171_vm14, %v4084_v2  ;;  %v3856_v29 = vpop.permute.xlu1 %3855 }
 0x6bc   : > { %4325 = vrot.lane.b32.xlu0 %v10726_v55, %s8716_s21  ;;  %3933 = vst.msk [vmem:[#allocation3 + $0xe2] sm:$0xff] %vm3913_vm15, %v3856_v29 }
 0x6be   : > { %v4088_v4 = vpop.permute.xlu0 %4087  ;;  %4109 = vrot.lane.b32.xlu1 %v11133_v31, %s8715_s20 }
 0x6bf   : > { %4178 = vst.msk [vmem:[#allocation3 + $0x48] sm:$0xff] %vm4171_vm14, %v4088_v4  ;;  %v3860_v20 = vpop.permute.xlu1 %3859 }
 0x6c0   : > { %4329 = vrot.lane.b32.xlu0 %v10738_v60, %s8716_s21  ;;  %3935 = vst.msk [vmem:[#allocation3 + $0xfa] sm:$0xff] %vm3913_vm15, %v3860_v20 }
 0x6c2   : > { %v4092_v18 = vpop.permute.xlu0 %4091  ;;  %4113 = vrot.lane.b32.xlu1 %v11141_v62, %s8715_s20 }
 0x6c3   : > { %4180 = vst.msk [vmem:[#allocation3 + $0x60] sm:$0xff] %vm4171_vm14, %v4092_v18  ;;  %v3864_v35 = vpop.permute.xlu1 %3863 }
 0x6c4   : > { %4333 = vrot.lane.b32.xlu0 %v10747_v30, %s8716_s21  ;;  %3937 = vst.msk [vmem:[#allocation3 + $0x112] sm:$0xff] %vm3913_vm15, %v3864_v35 }
 0x6c6   : > { %v4096_v0 = vpop.permute.xlu0 %4095  ;;  %4117 = vrot.lane.b32.xlu1 %v11153_v16, %s8715_s20 }
 0x6c7   : > { %4182 = vst.msk [vmem:[#allocation3 + $0x78] sm:$0xff] %vm4171_vm14, %v4096_v0  ;;  %v3868_v5 = vpop.permute.xlu1 %3867 }
 0x6c8   : > { %4337 = vrot.lane.b32.xlu0 %v10758_v45, %s8716_s21  ;;  %3939 = vst.msk [vmem:[#allocation3 + $0x12a] sm:$0xff] %vm3913_vm15, %v3868_v5 }
 0x6ca   : > { %v4100_v43 = vpop.permute.xlu0 %4099  ;;  %4121 = vrot.lane.b32.xlu1 %v11161_v39, %s8715_s20 }
 0x6cb   : > { %4184 = vst.msk [vmem:[#allocation3 + $0x90] sm:$0xff] %vm4171_vm14, %v4100_v43  ;;  %v3872_v11 = vpop.permute.xlu1 %3871 }
 0x6cc   : > { %4341 = vrot.lane.b32.xlu0 %v10765_v63, %s8716_s21  ;;  %3941 = vst.msk [vmem:[#allocation3 + $0x142] sm:$0xff] %vm3913_vm15, %v3872_v11 }
 0x6ce   : > { %v4104_v26 = vpop.permute.xlu0 %4103  ;;  %4125 = vrot.lane.b32.xlu1 %v11173_v52, %s8715_s20 }
 0x6cf   : > { %4186 = vst.msk [vmem:[#allocation3 + $0xa8] sm:$0xff] %vm4171_vm14, %v4104_v26  ;;  %v3876_v58 = vpop.permute.xlu1 %3875 }
 0x6d0   : > { %4345 = vrot.lane.b32.xlu0 %v10779_v12, %s8716_s21  ;;  %3943 = vst.msk [vmem:[#allocation3 + $0x15a] sm:$0xff] %vm3913_vm15, %v3876_v58 }
 0x6d2   : > { %v4108_v34 = vpop.permute.xlu0 %4107  ;;  %4129 = vrot.lane.b32.xlu1 %v11181_v36, %s8715_s20 }
 0x6d3   : > { %4188 = vst.msk [vmem:[#allocation3 + $0xc0] sm:$0xff] %vm4171_vm14, %v4108_v34  ;;  %v3880_v13 = vpop.permute.xlu1 %3879 }
 0x6d4   : > { %4349 = vrot.lane.b32.xlu0 %v10794_v8, %s8716_s21  ;;  %3945 = vst.msk [vmem:[#allocation3 + $0x172] sm:$0xff] %vm3913_vm15, %v3880_v13  ;;  %vm5232_vm15 = vcmask 786144  }
 0x6d6   : > { %v4112_v28 = vpop.permute.xlu0 %4111  ;;  %4133 = vrot.lane.b32.xlu1 %v11679_v1, %s8715_s20 }
 0x6d7   : > { %4190 = vst.msk [vmem:[#allocation3 + $0xd8] sm:$0xff] %vm4171_vm14, %v4112_v28  ;;  %v3949_v53 = vpop.permute.xlu1 %3948 }
 0x6d8   : > { %4353 = vrot.lane.b32.xlu0 %v10815_v19, %s8716_s21  ;;  %4044 = vst.msk [vmem:[#allocation3 + $0x9] sm:$0xff] %vm4042_vm10, %v3949_v53 }
 0x6da   : > { %v4116_v9 = vpop.permute.xlu0 %4115  ;;  %4137 = vrot.lane.b32.xlu1 %v12330_v24, %s8715_s20  ;;  %s8727_s20 = smov 52  }
 0x6db   : > { %4192 = vst.msk [vmem:[#allocation3 + $0xf0] sm:$0xff] %vm4171_vm14, %v4116_v9  ;;  %v3953_v37 = vpop.permute.xlu1 %3952 }
 0x6dc   : > { %4357 = vrot.lane.b32.xlu0 %v10901_v7, %s8716_s21  ;;  %4046 = vst.msk [vmem:[#allocation3 + $0x21] sm:$0xff] %vm4042_vm10, %v3953_v37 }
 0x6de   : > { %v4120_v2 = vpop.permute.xlu0 %4119  ;;  %4206 = vrot.lane.b32.xlu1 %v11054_v40, %s8726_s24 }
 0x6df   : > { %4194 = vst.msk [vmem:[#allocation3 + $0x108] sm:$0xff] %vm4171_vm14, %v4120_v2  ;;  %v3957_v29 = vpop.permute.xlu1 %3956 }
 0x6e0   : > { %4361 = vrot.lane.b32.xlu0 %v10932_v17, %s8716_s21  ;;  %4048 = vst.msk [vmem:[#allocation3 + $0x39] sm:$0xff] %vm4042_vm10, %v3957_v29 }
 0x6e2   : > { %v4124_v4 = vpop.permute.xlu0 %4123  ;;  %4210 = vrot.lane.b32.xlu1 %v11066_v50, %s8726_s24 }
 0x6e3   : > { %4196 = vst.msk [vmem:[#allocation3 + $0x120] sm:$0xff] %vm4171_vm14, %v4124_v4  ;;  %v3961_v20 = vpop.permute.xlu1 %3960 }
 0x6e4   : > { %4365 = vrot.lane.b32.xlu0 %v10942_v42, %s8716_s21  ;;  %4050 = vst.msk [vmem:[#allocation3 + $0x51] sm:$0xff] %vm4042_vm10, %v3961_v20 }
 0x6e6   : > { %v4128_v18 = vpop.permute.xlu0 %4127  ;;  %4214 = vrot.lane.b32.xlu1 %v11074_v47, %s8726_s24 }
 0x6e7   : > { %4198 = vst.msk [vmem:[#allocation3 + $0x138] sm:$0xff] %vm4171_vm14, %v4128_v18  ;;  %v3965_v35 = vpop.permute.xlu1 %3964 }
 0x6e8   : > { %4369 = vrot.lane.b32.xlu0 %v10954_v59, %s8716_s21  ;;  %4052 = vst.msk [vmem:[#allocation3 + $0x69] sm:$0xff] %vm4042_vm10, %v3965_v35 }
 0x6ea   : > { %v4132_v0 = vpop.permute.xlu0 %4131  ;;  %4218 = vrot.lane.b32.xlu1 %v11086_v54, %s8726_s24 }
 0x6eb   : > { %4200 = vst.msk [vmem:[#allocation3 + $0x150] sm:$0xff] %vm4171_vm14, %v4132_v0  ;;  %v3969_v5 = vpop.permute.xlu1 %3968 }
 0x6ec   : > { %4373 = vrot.lane.b32.xlu0 %v10962_v32, %s8716_s21  ;;  %4054 = vst.msk [vmem:[#allocation3 + $0x81] sm:$0xff] %vm4042_vm10, %v3969_v5 }
 0x6ee   : > { %v4136_v43 = vpop.permute.xlu0 %4135  ;;  %4222 = vrot.lane.b32.xlu1 %v11094_v6, %s8726_s24 }
 0x6ef   : > { %4202 = vst.msk [vmem:[#allocation3 + $0x168] sm:$0xff] %vm4171_vm14, %v4136_v43  ;;  %v3973_v11 = vpop.permute.xlu1 %3972 }
 0x6f0   : > { %4377 = vrot.lane.b32.xlu0 %v11420_v49, %s8716_s21  ;;  %4056 = vst.msk [vmem:[#allocation3 + $0x99] sm:$0xff] %vm4042_vm10, %v3973_v11 }
 0x6f2   : > { %v4205_v26 = vpop.permute.xlu0 %4204  ;;  %4226 = vrot.lane.b32.xlu1 %v11106_v21, %s8726_s24 }
 0x6f3   : > { %v3977_v58 = vpop.permute.xlu1 %3976 }
 0x6f4   : > { %4381 = vrot.lane.b32.xlu0 %v12168_v22, %s8716_s21  ;;  %4058 = vst.msk [vmem:[#allocation3 + $0xb1] sm:$0xff] %vm4042_vm10, %v3977_v58 }
 0x6f6   : > { %v4209_v34 = vpop.permute.xlu0 %4208  ;;  %4230 = vrot.lane.b32.xlu1 %v11114_v10, %s8726_s24 }
 0x6f7   : > { %v3981_v13 = vpop.permute.xlu1 %3980 }
 0x6f8   : > { %4446 = vrot.lane.b32.xlu0 %v10726_v55, %s8727_s20  ;;  %4060 = vst.msk [vmem:[#allocation3 + $0xc9] sm:$0xff] %vm4042_vm10, %v3981_v13 }
 0x6fa   : > { %v4213_v28 = vpop.permute.xlu0 %4212  ;;  %4234 = vrot.lane.b32.xlu1 %v11133_v31, %s8726_s24 }
 0x6fb   : > { %v3985_v53 = vpop.permute.xlu1 %3984 }
 0x6fc   : > { %4450 = vrot.lane.b32.xlu0 %v10738_v60, %s8727_s20  ;;  %4062 = vst.msk [vmem:[#allocation3 + $0xe1] sm:$0xff] %vm4042_vm10, %v3985_v53 }
 0x6fe   : > { %v4217_v9 = vpop.permute.xlu0 %4216  ;;  %4238 = vrot.lane.b32.xlu1 %v11141_v62, %s8726_s24 }
 0x6ff   : > { %v3989_v37 = vpop.permute.xlu1 %3988 }
 0x700   : > { %4454 = vrot.lane.b32.xlu0 %v10747_v30, %s8727_s20  ;;  %4064 = vst.msk [vmem:[#allocation3 + $0xf9] sm:$0xff] %vm4042_vm10, %v3989_v37 }
 0x702   : > { %v4221_v2 = vpop.permute.xlu0 %4220  ;;  %4242 = vrot.lane.b32.xlu1 %v11153_v16, %s8726_s24 }
 0x703   : > { %v3993_v29 = vpop.permute.xlu1 %3992 }
 0x704   : > { %4458 = vrot.lane.b32.xlu0 %v10758_v45, %s8727_s20  ;;  %4066 = vst.msk [vmem:[#allocation3 + $0x111] sm:$0xff] %vm4042_vm10, %v3993_v29 }
 0x706   : > { %v12793_v4 = vpop.permute.xlu0 %4224  ;;  %4246 = vrot.lane.b32.xlu1 %v11161_v39, %s8726_s24 }
 0x707   : > { %v3997_v20 = vpop.permute.xlu1 %3996 }
 0x708   : > { %4462 = vrot.lane.b32.xlu0 %v10765_v63, %s8727_s20  ;;  %4068 = vst.msk [vmem:[#allocation3 + $0x129] sm:$0xff] %vm4042_vm10, %v3997_v20 }
 0x70a   : > { %v12800_v18 = vpop.permute.xlu0 %4228  ;;  %4250 = vrot.lane.b32.xlu1 %v11173_v52, %s8726_s24 }
 0x70b   : > { %v4001_v35 = vpop.permute.xlu1 %4000 }
 0x70c   : > { %4466 = vrot.lane.b32.xlu0 %v10779_v12, %s8727_s20  ;;  %4070 = vst.msk [vmem:[#allocation3 + $0x141] sm:$0xff] %vm4042_vm10, %v4001_v35 }
 0x70e   : > { %v12807_v0 = vpop.permute.xlu0 %4232  ;;  %4254 = vrot.lane.b32.xlu1 %v11181_v36, %s8726_s24 }
 0x70f   : > { %v4005_v5 = vpop.permute.xlu1 %4004 }
 0x710   : > { %4470 = vrot.lane.b32.xlu0 %v10794_v8, %s8727_s20  ;;  %4072 = vst.msk [vmem:[#allocation3 + $0x159] sm:$0xff] %vm4042_vm10, %v4005_v5 }
 0x712   : > { %v12814_v43 = vpop.permute.xlu0 %4236  ;;  %4258 = vrot.lane.b32.xlu1 %v11679_v1, %s8726_s24 }
 0x713   : > { %v4009_v58 = vpop.permute.xlu1 %4008 }
 0x714   : > { %4474 = vrot.lane.b32.xlu0 %v10815_v19, %s8727_s20  ;;  %4074 = vst.msk [vmem:[#allocation3 + $0x171] sm:$0xff] %vm4042_vm10, %v4009_v58  ;;  %vm5345_vm10 = vcmask 818944  }
 0x716   : > { %v12821_v11 = vpop.permute.xlu0 %4240  ;;  %4262 = vrot.lane.b32.xlu1 %v12330_v24, %s8726_s24 }
 0x717   : > { %v4078_v53 = vpop.permute.xlu1 %4077 }
 0x718   : > { %4478 = vrot.lane.b32.xlu0 %v10901_v7, %s8727_s20  ;;  %4173 = vst.msk [vmem:[#allocation3 + $0x8] sm:$0xff] %vm4171_vm14, %v4078_v53 }
 0x719   : > { %4295 = vst.msk [vmem:[#allocation3 + $0x4] sm:$0xff] %vm4294_vm2, %v4205_v26 }
 0x71a   : > { %v12828_v13 = vpop.permute.xlu0 %4244  ;;  %4327 = vrot.lane.b32.xlu1 %v11054_v40, %s8716_s21 }
 0x71b   : > { %v4082_v29 = vpop.permute.xlu1 %4081 }
 0x71c   : > { %4482 = vrot.lane.b32.xlu0 %v10932_v17, %s8727_s20  ;;  %4175 = vst.msk [vmem:[#allocation3 + $0x20] sm:$0xff] %vm4171_vm14, %v4082_v29 }
 0x71d   : > { %4297 = vst.msk [vmem:[#allocation3 + $0x1c] sm:$0xff] %vm4294_vm2, %v4209_v34 }
 0x71e   : > { %v12836_v37 = vpop.permute.xlu0 %4248  ;;  %4331 = vrot.lane.b32.xlu1 %v11066_v50, %s8716_s21 }
 0x71f   : > { %v4086_v35 = vpop.permute.xlu1 %4085 }
 0x720   : > { %4486 = vrot.lane.b32.xlu0 %v10942_v42, %s8727_s20  ;;  %4177 = vst.msk [vmem:[#allocation3 + $0x38] sm:$0xff] %vm4171_vm14, %v4086_v35 }
 0x721   : > { %4299 = vst.msk [vmem:[#allocation3 + $0x34] sm:$0xff] %vm4294_vm2, %v4213_v28 }
 0x722   : > { %v12844_v20 = vpop.permute.xlu0 %4252  ;;  %4335 = vrot.lane.b32.xlu1 %v11074_v47, %s8716_s21 }
 0x723   : > { %v4090_v5 = vpop.permute.xlu1 %4089 }
 0x724   : > { %4490 = vrot.lane.b32.xlu0 %v10954_v59, %s8727_s20  ;;  %4179 = vst.msk [vmem:[#allocation3 + $0x50] sm:$0xff] %vm4171_vm14, %v4090_v5 }
 0x725   : > { %4301 = vst.msk [vmem:[#allocation3 + $0x4c] sm:$0xff] %vm4294_vm2, %v4217_v9 }
 0x726   : > { %v12852_v26 = vpop.permute.xlu0 %4256  ;;  %4339 = vrot.lane.b32.xlu1 %v11086_v54, %s8716_s21 }
 0x727   : > { %v4094_v58 = vpop.permute.xlu1 %4093 }
 0x728   : > { %4494 = vrot.lane.b32.xlu0 %v10962_v32, %s8727_s20  ;;  %4181 = vst.msk [vmem:[#allocation3 + $0x68] sm:$0xff] %vm4171_vm14, %v4094_v58 }
 0x729   : > { %4303 = vst.msk [vmem:[#allocation3 + $0x64] sm:$0xff] %vm4294_vm2, %v4221_v2 }
 0x72a   : > { %v12860_v34 = vpop.permute.xlu0 %4260  ;;  %4343 = vrot.lane.b32.xlu1 %v11094_v6, %s8716_s21 }
 0x72b   : > { %v4098_v53 = vpop.permute.xlu1 %4097 }
 0x72c   : > { %4498 = vrot.lane.b32.xlu0 %v11420_v49, %s8727_s20  ;;  %4183 = vst.msk [vmem:[#allocation3 + $0x80] sm:$0xff] %vm4171_vm14, %v4098_v53 }
 0x72d   : > { %4305 = vst.msk [vmem:[#allocation3 + $0x7c] sm:$0xff] %vm4294_vm2, %v12793_v4 }
 0x72e   : > { %v4326_v28 = vpop.permute.xlu0 %4325  ;;  %4347 = vrot.lane.b32.xlu1 %v11106_v21, %s8716_s21 }
 0x72f   : > { %4416 = vst.msk [vmem:[#allocation3 + $0x3] sm:$0xff] %vm4415_vm5, %v4326_v28  ;;  %v4102_v29 = vpop.permute.xlu1 %4101 }
 0x730   : > { %4502 = vrot.lane.b32.xlu0 %v12168_v22, %s8727_s20  ;;  %4185 = vst.msk [vmem:[#allocation3 + $0x98] sm:$0xff] %vm4171_vm14, %v4102_v29 }
 0x731   : > { %4307 = vst.msk [vmem:[#allocation3 + $0x94] sm:$0xff] %vm4294_vm2, %v12800_v18 }
 0x732   : > { %v4330_v9 = vpop.permute.xlu0 %4329  ;;  %4351 = vrot.lane.b32.xlu1 %v11114_v10, %s8716_s21 }
 0x733   : > { %4418 = vst.msk [vmem:[#allocation3 + $0x1b] sm:$0xff] %vm4415_vm5, %v4330_v9  ;;  %v4106_v35 = vpop.permute.xlu1 %4105 }
 0x734   : > { %4567 = vrot.lane.b32.xlu0 %v10726_v55, %s8717_s22  ;;  %4187 = vst.msk [vmem:[#allocation3 + $0xb0] sm:$0xff] %vm4171_vm14, %v4106_v35 }
 0x735   : > { %4309 = vst.msk [vmem:[#allocation3 + $0xac] sm:$0xff] %vm4294_vm2, %v12807_v0 }
 0x736   : > { %v4334_v2 = vpop.permute.xlu0 %4333  ;;  %4355 = vrot.lane.b32.xlu1 %v11133_v31, %s8716_s21 }
 0x737   : > { %4420 = vst.msk [vmem:[#allocation3 + $0x33] sm:$0xff] %vm4415_vm5, %v4334_v2  ;;  %v4110_v5 = vpop.permute.xlu1 %4109 }
 0x738   : > { %4571 = vrot.lane.b32.xlu0 %v10738_v60, %s8717_s22  ;;  %4189 = vst.msk [vmem:[#allocation3 + $0xc8] sm:$0xff] %vm4171_vm14, %v4110_v5 }
 0x739   : > { %4311 = vst.msk [vmem:[#allocation3 + $0xc4] sm:$0xff] %vm4294_vm2, %v12814_v43 }
 0x73a   : > { %v4338_v4 = vpop.permute.xlu0 %4337  ;;  %4359 = vrot.lane.b32.xlu1 %v11141_v62, %s8716_s21 }
 0x73b   : > { %4422 = vst.msk [vmem:[#allocation3 + $0x4b] sm:$0xff] %vm4415_vm5, %v4338_v4  ;;  %v4114_v58 = vpop.permute.xlu1 %4113 }
 0x73c   : > { %4575 = vrot.lane.b32.xlu0 %v10747_v30, %s8717_s22  ;;  %4191 = vst.msk [vmem:[#allocation3 + $0xe0] sm:$0xff] %vm4171_vm14, %v4114_v58 }
 0x73d   : > { %4313 = vst.msk [vmem:[#allocation3 + $0xdc] sm:$0xff] %vm4294_vm2, %v12821_v11 }
 0x73e   : > { %v4342_v18 = vpop.permute.xlu0 %4341  ;;  %4363 = vrot.lane.b32.xlu1 %v11153_v16, %s8716_s21 }
 0x73f   : > { %4424 = vst.msk [vmem:[#allocation3 + $0x63] sm:$0xff] %vm4415_vm5, %v4342_v18  ;;  %v4118_v28 = vpop.permute.xlu1 %4117 }
 0x740   : > { %4579 = vrot.lane.b32.xlu0 %v10758_v45, %s8717_s22  ;;  %4193 = vst.msk [vmem:[#allocation3 + $0xf8] sm:$0xff] %vm4171_vm14, %v4118_v28 }
 0x741   : > { %4315 = vst.msk [vmem:[#allocation3 + $0xf4] sm:$0xff] %vm4294_vm2, %v12828_v13 }
 0x742   : > { %v4346_v0 = vpop.permute.xlu0 %4345  ;;  %4367 = vrot.lane.b32.xlu1 %v11161_v39, %s8716_s21 }
 0x743   : > { %4426 = vst.msk [vmem:[#allocation3 + $0x7b] sm:$0xff] %vm4415_vm5, %v4346_v0  ;;  %v4122_v53 = vpop.permute.xlu1 %4121 }
 0x744   : > { %4583 = vrot.lane.b32.xlu0 %v10765_v63, %s8717_s22  ;;  %4195 = vst.msk [vmem:[#allocation3 + $0x110] sm:$0xff] %vm4171_vm14, %v4122_v53 }
 0x745   : > { %4317 = vst.msk [vmem:[#allocation3 + $0x10c] sm:$0xff] %vm4294_vm2, %v12836_v37 }
 0x746   : > { %v4350_v43 = vpop.permute.xlu0 %4349  ;;  %4371 = vrot.lane.b32.xlu1 %v11173_v52, %s8716_s21 }
 0x747   : > { %4428 = vst.msk [vmem:[#allocation3 + $0x93] sm:$0xff] %vm4415_vm5, %v4350_v43  ;;  %v4126_v9 = vpop.permute.xlu1 %4125 }
 0x748   : > { %4587 = vrot.lane.b32.xlu0 %v10779_v12, %s8717_s22  ;;  %4197 = vst.msk [vmem:[#allocation3 + $0x128] sm:$0xff] %vm4171_vm14, %v4126_v9 }
 0x749   : > { %4319 = vst.msk [vmem:[#allocation3 + $0x124] sm:$0xff] %vm4294_vm2, %v12844_v20 }
 0x74a   : > { %v4354_v11 = vpop.permute.xlu0 %4353  ;;  %4375 = vrot.lane.b32.xlu1 %v11181_v36, %s8716_s21 }
 0x74b   : > { %4430 = vst.msk [vmem:[#allocation3 + $0xab] sm:$0xff] %vm4415_vm5, %v4354_v11  ;;  %v4130_v29 = vpop.permute.xlu1 %4129 }
 0x74c   : > { %4591 = vrot.lane.b32.xlu0 %v10794_v8, %s8717_s22  ;;  %4199 = vst.msk [vmem:[#allocation3 + $0x140] sm:$0xff] %vm4171_vm14, %v4130_v29 }
 0x74d   : > { %4321 = vst.msk [vmem:[#allocation3 + $0x13c] sm:$0xff] %vm4294_vm2, %v12852_v26 }
 0x74e   : > { %v4358_v13 = vpop.permute.xlu0 %4357  ;;  %4379 = vrot.lane.b32.xlu1 %v11679_v1, %s8716_s21 }
 0x74f   : > { %4432 = vst.msk [vmem:[#allocation3 + $0xc3] sm:$0xff] %vm4415_vm5, %v4358_v13  ;;  %v4134_v2 = vpop.permute.xlu1 %4133 }
 0x750   : > { %4595 = vrot.lane.b32.xlu0 %v10815_v19, %s8717_s22  ;;  %4201 = vst.msk [vmem:[#allocation3 + $0x158] sm:$0xff] %vm4171_vm14, %v4134_v2 }
 0x751   : > { %4323 = vst.msk [vmem:[#allocation3 + $0x154] sm:$0xff] %vm4294_vm2, %v12860_v34 }
 0x752   : > { %v4362_v37 = vpop.permute.xlu0 %4361  ;;  %4383 = vrot.lane.b32.xlu1 %v12330_v24, %s8716_s21  ;;  %s8728_s21 = smov 60  }
 0x753   : > { %4434 = vst.msk [vmem:[#allocation3 + $0xdb] sm:$0xff] %vm4415_vm5, %v4362_v37  ;;  %v4138_v35 = vpop.permute.xlu1 %4137 }
 0x754   : > { %4599 = vrot.lane.b32.xlu0 %v10901_v7, %s8717_s22  ;;  %4203 = vst.msk [vmem:[#allocation3 + $0x170] sm:$0xff] %vm4171_vm14, %v4138_v35  ;;  %vm7401_vm14 = vcmask 195584  }
 0x756   : > { %v4366_v20 = vpop.permute.xlu0 %4365  ;;  %4448 = vrot.lane.b32.xlu1 %v11054_v40, %s8727_s20 }
 0x757   : > { %4436 = vst.msk [vmem:[#allocation3 + $0xf3] sm:$0xff] %vm4415_vm5, %v4366_v20  ;;  %v4207_v4 = vpop.permute.xlu1 %4206 }
 0x758   : > { %4603 = vrot.lane.b32.xlu0 %v10932_v17, %s8717_s22  ;;  %4296 = vst.msk [vmem:[#allocation3 + $0xc] sm:$0xff] %vm4294_vm2, %v4207_v4 }
 0x75a   : > { %v4370_v26 = vpop.permute.xlu0 %4369  ;;  %4452 = vrot.lane.b32.xlu1 %v11066_v50, %s8727_s20 }
 0x75b   : > { %4438 = vst.msk [vmem:[#allocation3 + $0x10b] sm:$0xff] %vm4415_vm5, %v4370_v26  ;;  %v4211_v5 = vpop.permute.xlu1 %4210 }
 0x75c   : > { %4607 = vrot.lane.b32.xlu0 %v10942_v42, %s8717_s22  ;;  %4298 = vst.msk [vmem:[#allocation3 + $0x24] sm:$0xff] %vm4294_vm2, %v4211_v5 }
 0x75e   : > { %v4374_v34 = vpop.permute.xlu0 %4373  ;;  %4456 = vrot.lane.b32.xlu1 %v11074_v47, %s8727_s20 }
 0x75f   : > { %4440 = vst.msk [vmem:[#allocation3 + $0x123] sm:$0xff] %vm4415_vm5, %v4374_v34  ;;  %v4215_v58 = vpop.permute.xlu1 %4214 }
 0x760   : > { %4611 = vrot.lane.b32.xlu0 %v10954_v59, %s8717_s22  ;;  %4300 = vst.msk [vmem:[#allocation3 + $0x3c] sm:$0xff] %vm4294_vm2, %v4215_v58 }
 0x762   : > { %v4378_v18 = vpop.permute.xlu0 %4377  ;;  %4460 = vrot.lane.b32.xlu1 %v11086_v54, %s8727_s20 }
 0x763   : > { %4442 = vst.msk [vmem:[#allocation3 + $0x13b] sm:$0xff] %vm4415_vm5, %v4378_v18  ;;  %v4219_v28 = vpop.permute.xlu1 %4218 }
 0x764   : > { %4615 = vrot.lane.b32.xlu0 %v10962_v32, %s8717_s22  ;;  %4302 = vst.msk [vmem:[#allocation3 + $0x54] sm:$0xff] %vm4294_vm2, %v4219_v28 }
 0x766   : > { %v4382_v0 = vpop.permute.xlu0 %4381  ;;  %4464 = vrot.lane.b32.xlu1 %v11094_v6, %s8727_s20 }
 0x767   : > { %4444 = vst.msk [vmem:[#allocation3 + $0x153] sm:$0xff] %vm4415_vm5, %v4382_v0  ;;  %v4223_v53 = vpop.permute.xlu1 %4222 }
 0x768   : > { %4619 = vrot.lane.b32.xlu0 %v11420_v49, %s8717_s22  ;;  %4304 = vst.msk [vmem:[#allocation3 + $0x6c] sm:$0xff] %vm4294_vm2, %v4223_v53 }
 0x76a   : > { %v4447_v43 = vpop.permute.xlu0 %4446  ;;  %4468 = vrot.lane.b32.xlu1 %v11106_v21, %s8727_s20 }
 0x76b   : > { %4537 = vst.msk [vmem:[#allocation3 + $0x2] sm:$0xff] %vm4536_vm6, %v4447_v43  ;;  %v4227_v9 = vpop.permute.xlu1 %4226 }
 0x76c   : > { %4623 = vrot.lane.b32.xlu0 %v12168_v22, %s8717_s22  ;;  %4306 = vst.msk [vmem:[#allocation3 + $0x84] sm:$0xff] %vm4294_vm2, %v4227_v9 }
 0x76e   : > { %v4451_v11 = vpop.permute.xlu0 %4450  ;;  %4472 = vrot.lane.b32.xlu1 %v11114_v10, %s8727_s20 }
 0x76f   : > { %4539 = vst.msk [vmem:[#allocation3 + $0x1a] sm:$0xff] %vm4536_vm6, %v4451_v11  ;;  %v4231_v29 = vpop.permute.xlu1 %4230 }
 0x770   : > { %4688 = vrot.lane.b32.xlu0 %v10726_v55, %s8728_s21  ;;  %4308 = vst.msk [vmem:[#allocation3 + $0x9c] sm:$0xff] %vm4294_vm2, %v4231_v29 }
 0x772   : > { %v4455_v13 = vpop.permute.xlu0 %4454  ;;  %4476 = vrot.lane.b32.xlu1 %v11133_v31, %s8727_s20 }
 0x773   : > { %4541 = vst.msk [vmem:[#allocation3 + $0x32] sm:$0xff] %vm4536_vm6, %v4455_v13  ;;  %v4235_v2 = vpop.permute.xlu1 %4234 }
 0x774   : > { %4692 = vrot.lane.b32.xlu0 %v10738_v60, %s8728_s21  ;;  %4310 = vst.msk [vmem:[#allocation3 + $0xb4] sm:$0xff] %vm4294_vm2, %v4235_v2 }
 0x776   : > { %v4459_v37 = vpop.permute.xlu0 %4458  ;;  %4480 = vrot.lane.b32.xlu1 %v11141_v62, %s8727_s20 }
 0x777   : > { %4543 = vst.msk [vmem:[#allocation3 + $0x4a] sm:$0xff] %vm4536_vm6, %v4459_v37  ;;  %v4239_v20 = vpop.permute.xlu1 %4238 }
 0x778   : > { %4696 = vrot.lane.b32.xlu0 %v10747_v30, %s8728_s21  ;;  %4312 = vst.msk [vmem:[#allocation3 + $0xcc] sm:$0xff] %vm4294_vm2, %v4239_v20 }
 0x77a   : > { %v4463_v55 = vpop.permute.xlu0 %4462  ;;  %4484 = vrot.lane.b32.xlu1 %v11153_v16, %s8727_s20 }
 0x77b   : > { %4545 = vst.msk [vmem:[#allocation3 + $0x62] sm:$0xff] %vm4536_vm6, %v4463_v55  ;;  %v4243_v26 = vpop.permute.xlu1 %4242 }
 0x77c   : > { %4700 = vrot.lane.b32.xlu0 %v10758_v45, %s8728_s21  ;;  %4314 = vst.msk [vmem:[#allocation3 + $0xe4] sm:$0xff] %vm4294_vm2, %v4243_v26 }
 0x77e   : > { %v4467_v35 = vpop.permute.xlu0 %4466  ;;  %4488 = vrot.lane.b32.xlu1 %v11161_v39, %s8727_s20 }
 0x77f   : > { %4547 = vst.msk [vmem:[#allocation3 + $0x7a] sm:$0xff] %vm4536_vm6, %v4467_v35  ;;  %v4247_v34 = vpop.permute.xlu1 %4246 }
 0x780   : > { %4704 = vrot.lane.b32.xlu0 %v10765_v63, %s8728_s21  ;;  %4316 = vst.msk [vmem:[#allocation3 + $0xfc] sm:$0xff] %vm4294_vm2, %v4247_v34 }
 0x782   : > { %v4471_v4 = vpop.permute.xlu0 %4470  ;;  %4492 = vrot.lane.b32.xlu1 %v11173_v52, %s8727_s20 }
 0x783   : > { %4549 = vst.msk [vmem:[#allocation3 + $0x92] sm:$0xff] %vm4536_vm6, %v4471_v4  ;;  %v4251_v18 = vpop.permute.xlu1 %4250 }
 0x784   : > { %4708 = vrot.lane.b32.xlu0 %v10779_v12, %s8728_s21  ;;  %4318 = vst.msk [vmem:[#allocation3 + $0x114] sm:$0xff] %vm4294_vm2, %v4251_v18 }
 0x786   : > { %v4475_v5 = vpop.permute.xlu0 %4474  ;;  %4496 = vrot.lane.b32.xlu1 %v11181_v36, %s8727_s20 }
 0x787   : > { %4551 = vst.msk [vmem:[#allocation3 + $0xaa] sm:$0xff] %vm4536_vm6, %v4475_v5  ;;  %v4255_v0 = vpop.permute.xlu1 %4254 }
 0x788   : > { %4712 = vrot.lane.b32.xlu0 %v10794_v8, %s8728_s21  ;;  %4320 = vst.msk [vmem:[#allocation3 + $0x12c] sm:$0xff] %vm4294_vm2, %v4255_v0 }
 0x78a   : > { %v4479_v58 = vpop.permute.xlu0 %4478  ;;  %4500 = vrot.lane.b32.xlu1 %v11679_v1, %s8727_s20 }
 0x78b   : > { %4553 = vst.msk [vmem:[#allocation3 + $0xc2] sm:$0xff] %vm4536_vm6, %v4479_v58  ;;  %v4259_v43 = vpop.permute.xlu1 %4258 }
 0x78c   : > { %4811 = vrot.lane.b32.xlu0 %v11066_v50, %s14640_s23  ;;  %4322 = vst.msk [vmem:[#allocation3 + $0x144] sm:$0xff] %vm4294_vm2, %v4259_v43 }
 0x78e   : > { %v4483_v28 = vpop.permute.xlu0 %4482  ;;  %4504 = vrot.lane.b32.xlu1 %v12330_v24, %s8727_s20  ;;  %s8621_s20 = sshll.u32 %s8734_s25, 4  ;;  %s8622_s20 = int_to_ptr.vmem [resolvable:$false] %s8621_s20 }
 0x78f   : > { %4555 = vst.msk [vmem:[#allocation3 + $0xda] sm:$0xff] %vm4536_vm6, %v4483_v28  ;;  %v4263_v11 = vpop.permute.xlu1 %4262 }
 0x790   : > { %4922 = vrot.lane.b32.xlu0 %v10738_v60, %s8730_s17  ;;  %4324 = vst.msk [vmem:[#allocation3 + $0x15c] sm:$0xff] %vm4294_vm2, %v4263_v11  ;;  %vm7467_vm2 = vcmask 326656  }
 0x792   : > { %v4487_v53 = vpop.permute.xlu0 %4486  ;;  %4569 = vrot.lane.b32.xlu1 %v11054_v40, %s8717_s22 }
 0x793   : > { %4557 = vst.msk [vmem:[#allocation3 + $0xf2] sm:$0xff] %vm4536_vm6, %v4487_v53  ;;  %v4328_v13 = vpop.permute.xlu1 %4327 }
 0x794   : > { %4926 = vrot.lane.b32.xlu0 %v10747_v30, %s8730_s17  ;;  %4417 = vst.msk [vmem:[#allocation3 + $0xb] sm:$0xff] %vm4415_vm5, %v4328_v13 }
 0x796   : > { %v4491_v9 = vpop.permute.xlu0 %4490  ;;  %4573 = vrot.lane.b32.xlu1 %v11066_v50, %s8717_s22 }
 0x797   : > { %4559 = vst.msk [vmem:[#allocation3 + $0x10a] sm:$0xff] %vm4536_vm6, %v4491_v9  ;;  %v4332_v37 = vpop.permute.xlu1 %4331 }
 0x798   : > { %5037 = vrot.lane.b32.xlu0 %v11066_v50, %s8731_s10  ;;  %4419 = vst.msk [vmem:[#allocation3 + $0x23] sm:$0xff] %vm4415_vm5, %v4332_v37 }
 0x79a   : > { %v4495_v29 = vpop.permute.xlu0 %4494  ;;  %4577 = vrot.lane.b32.xlu1 %v11074_v47, %s8717_s22 }
 0x79b   : > { %4561 = vst.msk [vmem:[#allocation3 + $0x122] sm:$0xff] %vm4536_vm6, %v4495_v29  ;;  %v4336_v55 = vpop.permute.xlu1 %4335 }
 0x79c   : > { %5148 = vrot.lane.b32.xlu0 %v10738_v60, %s8732_s26  ;;  %4421 = vst.msk [vmem:[#allocation3 + $0x3b] sm:$0xff] %vm4415_vm5, %v4336_v55 }
 0x79e   : > { %v4499_v2 = vpop.permute.xlu0 %4498  ;;  %4581 = vrot.lane.b32.xlu1 %v11086_v54, %s8717_s22 }
 0x79f   : > { %4563 = vst.msk [vmem:[#allocation3 + $0x13a] sm:$0xff] %vm4536_vm6, %v4499_v2  ;;  %v4340_v35 = vpop.permute.xlu1 %4339 }
 0x7a0   : > { %5152 = vrot.lane.b32.xlu0 %v10747_v30, %s8732_s26  ;;  %4423 = vst.msk [vmem:[#allocation3 + $0x53] sm:$0xff] %vm4415_vm5, %v4340_v35 }
 0x7a2   : > { %v4503_v20 = vpop.permute.xlu0 %4502  ;;  %4585 = vrot.lane.b32.xlu1 %v11094_v6, %s8717_s22 }
 0x7a3   : > { %4565 = vst.msk [vmem:[#allocation3 + $0x152] sm:$0xff] %vm4536_vm6, %v4503_v20  ;;  %v4344_v4 = vpop.permute.xlu1 %4343 }
 0x7a4   : > { %5263 = vrot.lane.b32.xlu0 %v11066_v50, %s8733_s12  ;;  %4425 = vst.msk [vmem:[#allocation3 + $0x6b] sm:$0xff] %vm4415_vm5, %v4344_v4 }
 0x7a6   : > { %v4568_v26 = vpop.permute.xlu0 %4567  ;;  %4589 = vrot.lane.b32.xlu1 %v11106_v21, %s8717_s22 }
 0x7a7   : > { %4658 = vst.msk [vmem:[#allocation3 + $0x1] sm:$0xff] %vm4657_vm7, %v4568_v26  ;;  %v4348_v5 = vpop.permute.xlu1 %4347 }
 0x7a8   : > { %4815 = vrot.lane.b32.xlu0 %v11074_v47, %s14640_s23  ;;  %4427 = vst.msk [vmem:[#allocation3 + $0x83] sm:$0xff] %vm4415_vm5, %v4348_v5 }
 0x7aa   : > { %v4572_v34 = vpop.permute.xlu0 %4571  ;;  %4593 = vrot.lane.b32.xlu1 %v11114_v10, %s8717_s22 }
 0x7ab   : > { %4660 = vst.msk [vmem:[#allocation3 + $0x19] sm:$0xff] %vm4657_vm7, %v4572_v34  ;;  %v4352_v58 = vpop.permute.xlu1 %4351 }
 0x7ac   : > { %4819 = vrot.lane.b32.xlu0 %v11086_v54, %s14640_s23  ;;  %4429 = vst.msk [vmem:[#allocation3 + $0x9b] sm:$0xff] %vm4415_vm5, %v4352_v58 }
 0x7ae   : > { %v4576_v18 = vpop.permute.xlu0 %4575  ;;  %4597 = vrot.lane.b32.xlu1 %v11133_v31, %s8717_s22 }
 0x7af   : > { %4662 = vst.msk [vmem:[#allocation3 + $0x31] sm:$0xff] %vm4657_vm7, %v4576_v18  ;;  %v4356_v28 = vpop.permute.xlu1 %4355 }
 0x7b0   : > { %4930 = vrot.lane.b32.xlu0 %v10758_v45, %s8730_s17  ;;  %4431 = vst.msk [vmem:[#allocation3 + $0xb3] sm:$0xff] %vm4415_vm5, %v4356_v28 }
 0x7b2   : > { %v4580_v0 = vpop.permute.xlu0 %4579  ;;  %4601 = vrot.lane.b32.xlu1 %v11141_v62, %s8717_s22 }
 0x7b3   : > { %4664 = vst.msk [vmem:[#allocation3 + $0x49] sm:$0xff] %vm4657_vm7, %v4580_v0  ;;  %v4360_v53 = vpop.permute.xlu1 %4359 }
 0x7b4   : > { %5041 = vrot.lane.b32.xlu0 %v11074_v47, %s8731_s10  ;;  %4433 = vst.msk [vmem:[#allocation3 + $0xcb] sm:$0xff] %vm4415_vm5, %v4360_v53 }
 0x7b6   : > { %v4584_v43 = vpop.permute.xlu0 %4583  ;;  %4605 = vrot.lane.b32.xlu1 %v11153_v16, %s8717_s22 }
 0x7b7   : > { %4666 = vst.msk [vmem:[#allocation3 + $0x61] sm:$0xff] %vm4657_vm7, %v4584_v43  ;;  %v4364_v9 = vpop.permute.xlu1 %4363 }
 0x7b8   : > { %5045 = vrot.lane.b32.xlu0 %v11086_v54, %s8731_s10  ;;  %4435 = vst.msk [vmem:[#allocation3 + $0xe3] sm:$0xff] %vm4415_vm5, %v4364_v9 }
 0x7ba   : > { %v4588_v11 = vpop.permute.xlu0 %4587  ;;  %4609 = vrot.lane.b32.xlu1 %v11161_v39, %s8717_s22 }
 0x7bb   : > { %4668 = vst.msk [vmem:[#allocation3 + $0x79] sm:$0xff] %vm4657_vm7, %v4588_v11  ;;  %v4368_v29 = vpop.permute.xlu1 %4367 }
 0x7bc   : > { %5156 = vrot.lane.b32.xlu0 %v10758_v45, %s8732_s26  ;;  %4437 = vst.msk [vmem:[#allocation3 + $0xfb] sm:$0xff] %vm4415_vm5, %v4368_v29 }
 0x7be   : > { %v4592_v13 = vpop.permute.xlu0 %4591  ;;  %4613 = vrot.lane.b32.xlu1 %v11173_v52, %s8717_s22 }
 0x7bf   : > { %4670 = vst.msk [vmem:[#allocation3 + $0x91] sm:$0xff] %vm4657_vm7, %v4592_v13  ;;  %v4372_v2 = vpop.permute.xlu1 %4371 }
 0x7c0   : > { %5267 = vrot.lane.b32.xlu0 %v11074_v47, %s8733_s12  ;;  %4439 = vst.msk [vmem:[#allocation3 + $0x113] sm:$0xff] %vm4415_vm5, %v4372_v2 }
 0x7c2   : > { %v4596_v37 = vpop.permute.xlu0 %4595  ;;  %4617 = vrot.lane.b32.xlu1 %v11181_v36, %s8717_s22 }
 0x7c3   : > { %4672 = vst.msk [vmem:[#allocation3 + $0xa9] sm:$0xff] %vm4657_vm7, %v4596_v37  ;;  %v4376_v20 = vpop.permute.xlu1 %4375 }
 0x7c4   : > { %5271 = vrot.lane.b32.xlu0 %v11086_v54, %s8733_s12  ;;  %4441 = vst.msk [vmem:[#allocation3 + $0x12b] sm:$0xff] %vm4415_vm5, %v4376_v20 }
 0x7c6   : > { %v4600_v55 = vpop.permute.xlu0 %4599  ;;  %4621 = vrot.lane.b32.xlu1 %v11679_v1, %s8717_s22 }
 0x7c7   : > { %4674 = vst.msk [vmem:[#allocation3 + $0xc1] sm:$0xff] %vm4657_vm7, %v4600_v55  ;;  %v4380_v26 = vpop.permute.xlu1 %4379  ;;  %v8609_v55 = vld [vmem:[%s14519_s5 + $0x30] ss:$0 sps:$4 sm:$0x33]  }
 0x7c8   : > { %4823 = vrot.lane.b32.xlu0 %v11094_v6, %s14640_s23  ;;  %4443 = vst.msk [vmem:[#allocation3 + $0x143] sm:$0xff] %vm4415_vm5, %v4380_v26  ;;  %8450 = vmatprep.subr.msk.bf16.mxu0 %vm5570_vm9, %v8609_v55  ;;  %v8610_v26 = vld [vmem:[%s14519_s5 + $0x28] sm:$0xff]  }
 0x7ca   : > { %v4604_v35 = vpop.permute.xlu0 %4603  ;;  %4625 = vrot.lane.b32.xlu1 %v12330_v24, %s8717_s22 }
 0x7cb   : > { %4676 = vst.msk [vmem:[#allocation3 + $0xd9] sm:$0xff] %vm4657_vm7, %v4604_v35  ;;  %v4384_v34 = vpop.permute.xlu1 %4383 }
 0x7cc   : > { %4936 = vrot.lane.b32.xlu0 %v11094_v6, %s8730_s17  ;;  %4445 = vst.msk [vmem:[#allocation3 + $0x15b] sm:$0xff] %vm4415_vm5, %v4384_v34 }
 0x7ce   : > { %v4608_v4 = vpop.permute.xlu0 %4607  ;;  %4690 = vrot.lane.b32.xlu1 %v11054_v40, %s8728_s21 }
 0x7cf   : > { %4678 = vst.msk [vmem:[#allocation3 + $0xf1] sm:$0xff] %vm4657_vm7, %v4608_v4  ;;  %v4449_v18 = vpop.permute.xlu1 %4448 }
 0x7d0   : > { %5049 = vrot.lane.b32.xlu0 %v11094_v6, %s8731_s10  ;;  %4538 = vst.msk [vmem:[#allocation3 + $0xa] sm:$0xff] %vm4536_vm6, %v4449_v18 }
 0x7d2   : > { %v4612_v5 = vpop.permute.xlu0 %4611  ;;  %4694 = vrot.lane.b32.xlu1 %v11066_v50, %s8728_s21 }
 0x7d3   : > { %4680 = vst.msk [vmem:[#allocation3 + $0x109] sm:$0xff] %vm4657_vm7, %v4612_v5  ;;  %v4453_v0 = vpop.permute.xlu1 %4452  ;;  %v8611_v5 = vld [vmem:[%s14519_s5 + $0x20] sm:$0xff]  }
 0x7d4   : > { %5162 = vrot.lane.b32.xlu0 %v11094_v6, %s8732_s26  ;;  %4540 = vst.msk [vmem:[#allocation3 + $0x22] sm:$0xff] %vm4536_vm6, %v4453_v0  ;;  %v8612_v0 = vld [vmem:[%s14519_s5 + $0x18] sm:$0xff]  }
 0x7d6   : > { %v4616_v58 = vpop.permute.xlu0 %4615  ;;  %4698 = vrot.lane.b32.xlu1 %v11074_v47, %s8728_s21 }
 0x7d7   : > { %4682 = vst.msk [vmem:[#allocation3 + $0x121] sm:$0xff] %vm4657_vm7, %v4616_v58  ;;  %v4457_v43 = vpop.permute.xlu1 %4456 }
 0x7d8   : > { %5275 = vrot.lane.b32.xlu0 %v11094_v6, %s8733_s12  ;;  %4542 = vst.msk [vmem:[#allocation3 + $0x3a] sm:$0xff] %vm4536_vm6, %v4457_v43 }
 0x7da   : > { %v4620_v28 = vpop.permute.xlu0 %4619  ;;  %4702 = vrot.lane.b32.xlu1 %v11086_v54, %s8728_s21 }
 0x7db   : > { %4684 = vst.msk [vmem:[#allocation3 + $0x139] sm:$0xff] %vm4657_vm7, %v4620_v28  ;;  %v4461_v11 = vpop.permute.xlu1 %4460 }
 0x7dc   : > { %4827 = vrot.lane.b32.xlu0 %v11106_v21, %s14640_s23  ;;  %4544 = vst.msk [vmem:[#allocation3 + $0x52] sm:$0xff] %vm4536_vm6, %v4461_v11 }
 0x7de   : > { %v4624_v53 = vpop.permute.xlu0 %4623  ;;  %4706 = vrot.lane.b32.xlu1 %v11094_v6, %s8728_s21  ;;  %v5572_v6 = vsel %vm5570_vm9, %v8609_v55, 0 }
 0x7df   : > { %4686 = vst.msk [vmem:[#allocation3 + $0x151] sm:$0xff] %vm4657_vm7, %v4624_v53  ;;  %v4465_v9 = vpop.permute.xlu1 %4464  ;;  %8351 = vmatpush3.bf16.msra.mxu0 %v5572_v6  ;;  %v8613_v53 = vld [vmem:[%s14519_s5 + $0x10] sm:$0xff]  }
 0x7e0   : > { %4938 = vrot.lane.b32.xlu0 %v10779_v12, %s8730_s17  ;;  %4546 = vst.msk [vmem:[#allocation3 + $0x6a] sm:$0xff] %vm4536_vm6, %v4465_v9  ;;  %8352 = vmatprep.subr.bf16.mxu0 %v8610_v26  ;;  %v8614_v9 = vld [vmem:[%s14519_s5 + $0x8] sm:$0xff]  }
 0x7e2   : > { %v4689_v40 = vpop.permute.xlu0 %4688  ;;  %4710 = vrot.lane.b32.xlu1 %v11106_v21, %s8728_s21 }
 0x7e3   : > { %4779 = vst.msk [vmem:[#allocation3] sm:$0xff] %vm4778_vm8, %v4689_v40  ;;  %v4469_v29 = vpop.permute.xlu1 %4468  ;;  %8353 = vmatpush3.bf16.msra.mxu0 %v8610_v26 }
 0x7e4   : > { %4942 = vrot.lane.b32.xlu0 %v10794_v8, %s8730_s17  ;;  %4548 = vst.msk [vmem:[#allocation3 + $0x82] sm:$0xff] %vm4536_vm6, %v4469_v29  ;;  %8354 = vmatprep.subr.bf16.mxu0 %v8611_v5 }
 0x7e6   : > { %v4693_v13 = vpop.permute.xlu0 %4692  ;;  %4809 = vrot.lane.b32.xlu1 %v10738_v60, %s14640_s23 }
 0x7e7   : > { %4781 = vst.msk [vmem:[#allocation3 + $0x18] sm:$0xff] %vm4778_vm8, %v4693_v13  ;;  %v4473_v2 = vpop.permute.xlu1 %4472  ;;  %8355 = vmatpush3.bf16.msra.mxu0 %v8611_v5 }
 0x7e8   : > { %5053 = vrot.lane.b32.xlu0 %v11106_v21, %s8731_s10  ;;  %4550 = vst.msk [vmem:[#allocation3 + $0x9a] sm:$0xff] %vm4536_vm6, %v4473_v2  ;;  %8356 = vmatprep.subr.bf16.mxu0 %v8612_v0 }
 0x7ea   : > { %v4697_v37 = vpop.permute.xlu0 %4696  ;;  %4813 = vrot.lane.b32.xlu1 %v10747_v30, %s14640_s23 }
 0x7eb   : > { %4783 = vst.msk [vmem:[#allocation3 + $0x30] sm:$0xff] %vm4778_vm8, %v4697_v37  ;;  %v4477_v35 = vpop.permute.xlu1 %4476  ;;  %8357 = vmatpush3.bf16.msra.mxu0 %v8612_v0  ;;  %v8615_v37 = vld [vmem:[%s14519_s5] sm:$0xff]  }
 0x7ec   : > { %5164 = vrot.lane.b32.xlu0 %v10779_v12, %s8732_s26  ;;  %4552 = vst.msk [vmem:[#allocation3 + $0xb2] sm:$0xff] %vm4536_vm6, %v4477_v35  ;;  %8358 = vmatprep.subr.bf16.mxu0 %v8613_v53 }
 0x7ee   : > { %v4701_v20 = vpop.permute.xlu0 %4700  ;;  %4924 = vrot.lane.b32.xlu1 %v11066_v50, %s8730_s17 }
 0x7ef   : > { %4785 = vst.msk [vmem:[#allocation3 + $0x48] sm:$0xff] %vm4778_vm8, %v4701_v20  ;;  %v4481_v34 = vpop.permute.xlu1 %4480  ;;  %8359 = vmatpush3.bf16.msra.mxu0 %v8613_v53 }
 0x7f0   : > { %5168 = vrot.lane.b32.xlu0 %v10794_v8, %s8732_s26  ;;  %4554 = vst.msk [vmem:[#allocation3 + $0xca] sm:$0xff] %vm4536_vm6, %v4481_v34  ;;  %8360 = vmatprep.subr.bf16.mxu0 %v8614_v9 }
 0x7f2   : > { %v4705_v4 = vpop.permute.xlu0 %4704  ;;  %5035 = vrot.lane.b32.xlu1 %v10738_v60, %s8731_s10 }
 0x7f3   : > { %4787 = vst.msk [vmem:[#allocation3 + $0x60] sm:$0xff] %vm4778_vm8, %v4705_v4  ;;  %v4485_v58 = vpop.permute.xlu1 %4484  ;;  %8361 = vmatpush3.bf16.msra.mxu0 %v8614_v9 }
 0x7f4   : > { %5279 = vrot.lane.b32.xlu0 %v11106_v21, %s8733_s12  ;;  %4556 = vst.msk [vmem:[#allocation3 + $0xe2] sm:$0xff] %vm4536_vm6, %v4485_v58  ;;  %8362 = vmatprep.subr.bf16.mxu0 %v8615_v37 }
 0x7f6   : > { %v4709_v18 = vpop.permute.xlu0 %4708  ;;  %5039 = vrot.lane.b32.xlu1 %v10747_v30, %s8731_s10 }
 0x7f7   : > { %4789 = vst.msk [vmem:[#allocation3 + $0x78] sm:$0xff] %vm4778_vm8, %v4709_v18  ;;  %v4489_v43 = vpop.permute.xlu1 %4488  ;;  %8363 = vmatpush3.bf16.msra.mxu0 %v8615_v37 }
 0x7f8   : > { %4714 = vrot.lane.b32.xlu0 %v11114_v10, %s8728_s21  ;;  %4558 = vst.msk [vmem:[#allocation3 + $0xfa] sm:$0xff] %vm4536_vm6, %v4489_v43 }
 0x7fa   : > { %v4713_v28 = vpop.permute.xlu0 %4712  ;;  %5150 = vrot.lane.b32.xlu1 %v11066_v50, %s8732_s26  ;;  %v8616_v50 = vld [vmem:[%s14520_s6] sm:$0xf] }
 0x7fb   : > { %4791 = vst.msk [vmem:[#allocation3 + $0x90] sm:$0xff] %vm4778_vm8, %v4713_v28  ;;  %v4493_v40 = vpop.permute.xlu1 %4492  ;;  %8451 = vmatprep.subr.msk.bf16.mxu0 %vm448_vm0, %v8616_v50  ;;  %vm4893_vm0 = vcmask 687744  }
 0x7fc   : > { %4833 = vrot.lane.b32.xlu0 %v10815_v19, %s14640_s23  ;;  %4560 = vst.msk [vmem:[#allocation3 + $0x112] sm:$0xff] %vm4536_vm6, %v4493_v40 }
 0x7fe   : > { %v13215_v11 = vpop.permute.xlu0 %4811  ;;  %5261 = vrot.lane.b32.xlu1 %v10738_v60, %s8733_s12 }
 0x7ff   : > { %v4497_v29 = vpop.permute.xlu1 %4496 }
 0x800   : > { %4944 = vrot.lane.b32.xlu0 %v11114_v10, %s8730_s17  ;;  %4562 = vst.msk [vmem:[#allocation3 + $0x12a] sm:$0xff] %vm4536_vm6, %v4497_v29 }
 0x802   : > { %v13225_v13 = vpop.permute.xlu0 %4922  ;;  %5265 = vrot.lane.b32.xlu1 %v10747_v30, %s8733_s12 }
 0x803   : > { %v4501_v55 = vpop.permute.xlu1 %4500 }
 0x804   : > { %4948 = vrot.lane.b32.xlu0 %v11133_v31, %s8730_s17  ;;  %4564 = vst.msk [vmem:[#allocation3 + $0x142] sm:$0xff] %vm4536_vm6, %v4501_v55 }
 0x806   : > { %v13235_v2 = vpop.permute.xlu0 %4926  ;;  %4817 = vrot.lane.b32.xlu1 %v10758_v45, %s14640_s23 }
 0x807   : > { %v4505_v6 = vpop.permute.xlu1 %4504 }
 0x808   : > { %5059 = vrot.lane.b32.xlu0 %v10815_v19, %s8731_s10  ;;  %4566 = vst.msk [vmem:[#allocation3 + $0x15a] sm:$0xff] %vm4536_vm6, %v4505_v6 }
 0x80a   : > { %v13242_v20 = vpop.permute.xlu0 %5037  ;;  %4928 = vrot.lane.b32.xlu1 %v11074_v47, %s8730_s17 }
 0x80b   : > { %v4570_v60 = vpop.permute.xlu1 %4569 }
 0x80c   : > { %5170 = vrot.lane.b32.xlu0 %v11114_v10, %s8732_s26  ;;  %4659 = vst.msk [vmem:[#allocation3 + $0x9] sm:$0xff] %vm4657_vm7, %v4570_v60 }
 0x80e   : > { %v13253_v35 = vpop.permute.xlu0 %5148  ;;  %4932 = vrot.lane.b32.xlu1 %v11086_v54, %s8730_s17 }
 0x80f   : > { %v4574_v4 = vpop.permute.xlu1 %4573 }
 0x810   : > { %5174 = vrot.lane.b32.xlu0 %v11133_v31, %s8732_s26  ;;  %4661 = vst.msk [vmem:[#allocation3 + $0x21] sm:$0xff] %vm4657_vm7, %v4574_v4 }
 0x812   : > { %v13260_v26 = vpop.permute.xlu0 %5152  ;;  %5043 = vrot.lane.b32.xlu1 %v10758_v45, %s8731_s10 }
 0x813   : > { %v4578_v34 = vpop.permute.xlu1 %4577 }
 0x814   : > { %5285 = vrot.lane.b32.xlu0 %v10815_v19, %s8733_s12  ;;  %4663 = vst.msk [vmem:[#allocation3 + $0x39] sm:$0xff] %vm4657_vm7, %v4578_v34 }
 0x816   : > { %v13267_v30 = vpop.permute.xlu0 %5263  ;;  %5154 = vrot.lane.b32.xlu1 %v11074_v47, %s8732_s26 }
 0x817   : > { %v4582_v18 = vpop.permute.xlu1 %4581 }
 0x818   : > { %4716 = vrot.lane.b32.xlu0 %v10815_v19, %s8728_s21  ;;  %4665 = vst.msk [vmem:[#allocation3 + $0x51] sm:$0xff] %vm4657_vm7, %v4582_v18 }
 0x81a   : > { %v13274_v5 = vpop.permute.xlu0 %4815  ;;  %5158 = vrot.lane.b32.xlu1 %v11086_v54, %s8732_s26 }
 0x81b   : > { %v4586_v0 = vpop.permute.xlu1 %4585 }
 0x81c   : > { %4837 = vrot.lane.b32.xlu0 %v10901_v7, %s14640_s23  ;;  %4667 = vst.msk [vmem:[#allocation3 + $0x69] sm:$0xff] %vm4657_vm7, %v4586_v0 }
 0x81e   : > { %v13281_v58 = vpop.permute.xlu0 %4819  ;;  %5269 = vrot.lane.b32.xlu1 %v10758_v45, %s8733_s12 }
 0x81f   : > { %v4590_v43 = vpop.permute.xlu1 %4589 }
 0x820   : > { %4950 = vrot.lane.b32.xlu0 %v10901_v7, %s8730_s17  ;;  %4669 = vst.msk [vmem:[#allocation3 + $0x81] sm:$0xff] %vm4657_vm7, %v4590_v43 }
 0x822   : > { %v13288_v28 = vpop.permute.xlu0 %4930  ;;  %4821 = vrot.lane.b32.xlu1 %v10765_v63, %s14640_s23 }
 0x823   : > { %v4594_v40 = vpop.permute.xlu1 %4593 }
 0x824   : > { %5063 = vrot.lane.b32.xlu0 %v10901_v7, %s8731_s10  ;;  %4671 = vst.msk [vmem:[#allocation3 + $0x99] sm:$0xff] %vm4657_vm7, %v4594_v40 }
 0x826   : > { %v13295_v53 = vpop.permute.xlu0 %5041  ;;  %4934 = vrot.lane.b32.xlu1 %v10765_v63, %s8730_s17 }
 0x827   : > { %v4598_v9 = vpop.permute.xlu1 %4597 }
 0x828   : > { %5176 = vrot.lane.b32.xlu0 %v10901_v7, %s8732_s26  ;;  %4673 = vst.msk [vmem:[#allocation3 + $0xb1] sm:$0xff] %vm4657_vm7, %v4598_v9 }
 0x82a   : > { %v13302_v47 = vpop.permute.xlu0 %5045  ;;  %5047 = vrot.lane.b32.xlu1 %v10765_v63, %s8731_s10 }
 0x82b   : > { %v4602_v29 = vpop.permute.xlu1 %4601 }
 0x82c   : > { %5289 = vrot.lane.b32.xlu0 %v10901_v7, %s8733_s12  ;;  %4675 = vst.msk [vmem:[#allocation3 + $0xc9] sm:$0xff] %vm4657_vm7, %v4602_v29 }
 0x82e   : > { %v13309_v54 = vpop.permute.xlu0 %5156  ;;  %5160 = vrot.lane.b32.xlu1 %v10765_v63, %s8732_s26 }
 0x82f   : > { %v4606_v37 = vpop.permute.xlu1 %4605 }
 0x830   : > { %4720 = vrot.lane.b32.xlu0 %v10901_v7, %s8728_s21  ;;  %4677 = vst.msk [vmem:[#allocation3 + $0xe1] sm:$0xff] %vm4657_vm7, %v4606_v37 }
 0x832   : > { %v13316_v45 = vpop.permute.xlu0 %5267  ;;  %5273 = vrot.lane.b32.xlu1 %v10765_v63, %s8733_s12 }
 0x833   : > { %v4610_v50 = vpop.permute.xlu1 %4609 }
 0x834   : > { %4724 = vrot.lane.b32.xlu0 %v10932_v17, %s8728_s21  ;;  %4679 = vst.msk [vmem:[#allocation3 + $0xf9] sm:$0xff] %vm4657_vm7, %v4610_v50 }
 0x836   : > { %v13323_v55 = vpop.permute.xlu0 %5271  ;;  %4825 = vrot.lane.b32.xlu1 %v10779_v12, %s14640_s23 }
 0x837   : > { %v4614_v6 = vpop.permute.xlu1 %4613 }
 0x838   : > { %4841 = vrot.lane.b32.xlu0 %v10932_v17, %s14640_s23  ;;  %4681 = vst.msk [vmem:[#allocation3 + $0x111] sm:$0xff] %vm4657_vm7, %v4614_v6 }
 0x83a   : > { %v4824_v7 = vpop.permute.xlu0 %4823  ;;  %4829 = vrot.lane.b32.xlu1 %v10794_v8, %s14640_s23 }
 0x83b   : > { %v4618_v4 = vpop.permute.xlu1 %4617 }
 0x83c   : > { %4845 = vrot.lane.b32.xlu0 %v10942_v42, %s14640_s23  ;;  %4683 = vst.msk [vmem:[#allocation3 + $0x129] sm:$0xff] %vm4657_vm7, %v4618_v4 }
 0x83e   : > { %v13335_v60 = vpop.permute.xlu0 %4936  ;;  %4940 = vrot.lane.b32.xlu1 %v11106_v21, %s8730_s17 }
 0x83f   : > { %v4622_v18 = vpop.permute.xlu1 %4621 }
 0x840   : > { %4956 = vrot.lane.b32.xlu0 %v11153_v16, %s8730_s17  ;;  %4685 = vst.msk [vmem:[#allocation3 + $0x141] sm:$0xff] %vm4657_vm7, %v4622_v18 }
 0x842   : > { %v13342_v34 = vpop.permute.xlu0 %5049  ;;  %5051 = vrot.lane.b32.xlu1 %v10779_v12, %s8731_s10 }
 0x843   : > { %v4626_v0 = vpop.permute.xlu1 %4625 }
 0x844   : > { %5067 = vrot.lane.b32.xlu0 %v10932_v17, %s8731_s10  ;;  %4687 = vst.msk [vmem:[#allocation3 + $0x159] sm:$0xff] %vm4657_vm7, %v4626_v0 }
 0x846   : > { %v13349_v63 = vpop.permute.xlu0 %5162  ;;  %5055 = vrot.lane.b32.xlu1 %v10794_v8, %s8731_s10 }
 0x847   : > { %v4691_v40 = vpop.permute.xlu1 %4690 }
 0x848   : > { %5071 = vrot.lane.b32.xlu0 %v10942_v42, %s8731_s10  ;;  %4780 = vst.msk [vmem:[#allocation3 + $0x8] sm:$0xff] %vm4778_vm8, %v4691_v40 }
 0x849   : > { %4895 = vst.msk [vmem:[#allocation3 + $0xc] sm:$0xff] %vm4893_vm0, %v13215_v11 }
 0x84a   : > { %v13356_v43 = vpop.permute.xlu0 %5275  ;;  %5166 = vrot.lane.b32.xlu1 %v11106_v21, %s8732_s26 }
 0x84b   : > { %v4695_v29 = vpop.permute.xlu1 %4694 }
 0x84c   : > { %5182 = vrot.lane.b32.xlu0 %v11153_v16, %s8732_s26  ;;  %4782 = vst.msk [vmem:[#allocation3 + $0x20] sm:$0xff] %vm4778_vm8, %v4695_v29 }
 0x84d   : > { %4897 = vst.msk [vmem:[#allocation3 + $0x24] sm:$0xff] %vm4893_vm0, %v13274_v5 }
 0x84e   : > { %v4828_v9 = vpop.permute.xlu0 %4827  ;;  %5277 = vrot.lane.b32.xlu1 %v10779_v12, %s8733_s12 }
 0x84f   : > { %v4699_v50 = vpop.permute.xlu1 %4698 }
 0x850   : > { %5293 = vrot.lane.b32.xlu0 %v10932_v17, %s8733_s12  ;;  %4784 = vst.msk [vmem:[#allocation3 + $0x38] sm:$0xff] %vm4778_vm8, %v4699_v50 }
 0x851   : > { %4899 = vst.msk [vmem:[#allocation3 + $0x3c] sm:$0xff] %vm4893_vm0, %v13281_v58 }
 0x852   : > { %v13372_v37 = vpop.permute.xlu0 %4938  ;;  %5281 = vrot.lane.b32.xlu1 %v10794_v8, %s8733_s12 }
 0x853   : > { %v4703_v6 = vpop.permute.xlu1 %4702 }
 0x854   : > { %5297 = vrot.lane.b32.xlu0 %v10942_v42, %s8733_s12  ;;  %4786 = vst.msk [vmem:[#allocation3 + $0x50] sm:$0xff] %vm4778_vm8, %v4703_v6 }
 0x855   : > { %4901 = vst.msk [vmem:[#allocation3 + $0x54] sm:$0xff] %vm4893_vm0, %v4824_v7 }
 0x856   : > { %v13381_v11 = vpop.permute.xlu0 %4942  ;;  %4831 = vrot.lane.b32.xlu1 %v11114_v10, %s14640_s23 }
 0x857   : > { %v4707_v4 = vpop.permute.xlu1 %4706 }
 0x858   : > { %4730 = vrot.lane.b32.xlu0 %v11161_v39, %s8728_s21  ;;  %4788 = vst.msk [vmem:[#allocation3 + $0x68] sm:$0xff] %vm4778_vm8, %v4707_v4 }
 0x859   : > { %4903 = vst.msk [vmem:[#allocation3 + $0x6c] sm:$0xff] %vm4893_vm0, %v4828_v9 }
 0x85a   : > { %v13389_v5 = vpop.permute.xlu0 %5053  ;;  %4835 = vrot.lane.b32.xlu1 %v11133_v31, %s14640_s23 }
 0x85b   : > { %v4711_v58 = vpop.permute.xlu1 %4710 }
 0x85c   : > { %4849 = vrot.lane.b32.xlu0 %v10954_v59, %s14640_s23  ;;  %4790 = vst.msk [vmem:[#allocation3 + $0x80] sm:$0xff] %vm4778_vm8, %v4711_v58 }
 0x85e   : > { %v13397_v21 = vpop.permute.xlu0 %5164  ;;  %4946 = vrot.lane.b32.xlu1 %v10815_v19, %s8730_s17 }
 0x85f   : > { %v4810_v7 = vpop.permute.xlu1 %4809 }
 0x860   : > { %4960 = vrot.lane.b32.xlu0 %v11161_v39, %s8730_s17  ;;  %4894 = vst.msk [vmem:[#allocation3 + $0x4] sm:$0xff] %vm4893_vm0, %v4810_v7 }
 0x861   : > { %5007 = vst.msk [vmem:[#allocation3 + $0x3] sm:$0xff] %vm5006_vm12, %v13225_v13 }
 0x862   : > { %v13404_v12 = vpop.permute.xlu0 %5168  ;;  %5057 = vrot.lane.b32.xlu1 %v11114_v10, %s8731_s10 }
 0x863   : > { %v4814_v18 = vpop.permute.xlu1 %4813 }
 0x864   : > { %4964 = vrot.lane.b32.xlu0 %v11173_v52, %s8730_s17  ;;  %4896 = vst.msk [vmem:[#allocation3 + $0x1c] sm:$0xff] %vm4893_vm0, %v4814_v18 }
 0x865   : > { %5009 = vst.msk [vmem:[#allocation3 + $0x1b] sm:$0xff] %vm5006_vm12, %v13235_v2 }
 0x866   : > { %v13413_v8 = vpop.permute.xlu0 %5279  ;;  %5061 = vrot.lane.b32.xlu1 %v11133_v31, %s8731_s10 }
 0x867   : > { %v4925_v40 = vpop.permute.xlu1 %4924 }
 0x868   : > { %5075 = vrot.lane.b32.xlu0 %v10954_v59, %s8731_s10  ;;  %5008 = vst.msk [vmem:[#allocation3 + $0xb] sm:$0xff] %vm5006_vm12, %v4925_v40 }
 0x869   : > { %5121 = vst.msk [vmem:[#allocation3 + $0xa] sm:$0xff] %vm5119_vm13, %v13242_v20 }
 0x86a   : > { %v4715_v0 = vpop.permute.xlu0 %4714  ;;  %5172 = vrot.lane.b32.xlu1 %v10815_v19, %s8732_s26 }
 0x86b   : > { %4792 = vst.msk [vmem:[#allocation3 + $0x98] sm:$0xff] %vm4778_vm8, %v4715_v0  ;;  %v5036_v2 = vpop.permute.xlu1 %5035 }
 0x86c   : > { %5186 = vrot.lane.b32.xlu0 %v11161_v39, %s8732_s26  ;;  %5120 = vst.msk [vmem:[#allocation3 + $0x2] sm:$0xff] %vm5119_vm13, %v5036_v2 }
 0x86d   : > { %5233 = vst.msk [vmem:[#allocation3 + $0x1] sm:$0xff] %vm5232_vm15, %v13253_v35 }
 0x86e   : > { %v4834_v13 = vpop.permute.xlu0 %4833  ;;  %5283 = vrot.lane.b32.xlu1 %v11114_v10, %s8733_s12 }
 0x86f   : > { %4906 = vst.msk [vmem:[#allocation3 + $0x94] sm:$0xff] %vm4893_vm0, %v4834_v13  ;;  %v5040_v29 = vpop.permute.xlu1 %5039 }
 0x870   : > { %5190 = vrot.lane.b32.xlu0 %v11173_v52, %s8732_s26  ;;  %5122 = vst.msk [vmem:[#allocation3 + $0x1a] sm:$0xff] %vm5119_vm13, %v5040_v29 }
 0x871   : > { %5235 = vst.msk [vmem:[#allocation3 + $0x19] sm:$0xff] %vm5232_vm15, %v13260_v26 }
 0x872   : > { %v13438_v9 = vpop.permute.xlu0 %4944  ;;  %5287 = vrot.lane.b32.xlu1 %v11133_v31, %s8733_s12 }
 0x873   : > { %v5151_v50 = vpop.permute.xlu1 %5150 }
 0x874   : > { %5301 = vrot.lane.b32.xlu0 %v10954_v59, %s8733_s12  ;;  %5234 = vst.msk [vmem:[#allocation3 + $0x9] sm:$0xff] %vm5232_vm15, %v5151_v50 }
 0x875   : > { %5347 = vst.msk [vmem:[#allocation3 + $0x8] sm:$0xff] %vm5345_vm10, %v13267_v30 }
 0x876   : > { %v13447_v20 = vpop.permute.xlu0 %4948  ;;  %4718 = vrot.lane.b32.xlu1 %v11133_v31, %s8728_s21 }
 0x877   : > { %v5262_v19 = vpop.permute.xlu1 %5261 }
 0x878   : > { %4732 = vrot.lane.b32.xlu0 %v10954_v59, %s8728_s21  ;;  %5346 = vst.msk [vmem:[#allocation3] sm:$0xff] %vm5345_vm10, %v5262_v19 }
 0x87a   : > { %v13456_v35 = vpop.permute.xlu0 %5059  ;;  %4839 = vrot.lane.b32.xlu1 %v11141_v62, %s14640_s23 }
 0x87b   : > { %v5266_v6 = vpop.permute.xlu1 %5265  ;;  %v5376_v0 = vld [vmem:[#allocation3 + $0x10] sm:$0xff] }
 0x87c   : > { %4853 = vrot.lane.b32.xlu0 %v10962_v32, %s14640_s23  ;;  %5348 = vst.msk [vmem:[#allocation3 + $0x18] sm:$0xff] %vm5345_vm10, %v5266_v6  ;;  %v5375_v58 = vld [vmem:[#allocation3 + $0x8] sm:$0xff] }
 0x87e   : > { %v13463_v26 = vpop.permute.xlu0 %5170  ;;  %4952 = vrot.lane.b32.xlu1 %v11141_v62, %s8730_s17 }
 0x87f   : > { %v4818_v30 = vpop.permute.xlu1 %4817  ;;  %v5374_v4 = vld [vmem:[#allocation3] sm:$0xff] }
 0x880   : > { %4966 = vrot.lane.b32.xlu0 %v10962_v32, %s8730_s17  ;;  %4898 = vst.msk [vmem:[#allocation3 + $0x34] sm:$0xff] %vm4893_vm0, %v4818_v30  ;;  %v5422_v7 = vpack.c.bf16 %v5375_v58, %v5374_v4 }
 0x881   : > { %5011 = vst.msk [vmem:[#allocation3 + $0x33] sm:$0xff] %vm5006_vm12, %v13288_v28 }
 0x882   : > { %v13470_v10 = vpop.permute.xlu0 %5174  ;;  %8364 = vmatprep.mubr.msk.bf16.mxu0 %vm2425_vm11, %v5422_v7  ;;  %5065 = vrot.lane.b32.xlu1 %v11141_v62, %s8731_s10 }
 0x883   : > { %v4929_v18 = vpop.permute.xlu1 %4928  ;;  %v5377_v40 = vld [vmem:[#allocation3 + $0x18] sm:$0xff] }
 0x884   : > { %5079 = vrot.lane.b32.xlu0 %v10962_v32, %s8731_s10  ;;  %5010 = vst.msk [vmem:[#allocation3 + $0x23] sm:$0xff] %vm5006_vm12, %v4929_v18  ;;  %v5423_v13 = vpack.c.bf16 %v5377_v40, %v5376_v0 }
 0x885   : > { %5123 = vst.msk [vmem:[#allocation3 + $0x22] sm:$0xff] %vm5119_vm13, %v13295_v53 }
 0x886   : > { %v13480_v31 = vpop.permute.xlu0 %5285  ;;  %8365 = vmatmul.mubr.msk.bf16.vlgmr.msra.gmra.mxu0 %vm2425_vm11, %v5423_v13  ;;  %5178 = vrot.lane.b32.xlu1 %v11141_v62, %s8732_s26 }
 0x887   : > { %v4933_v2 = vpop.permute.xlu1 %4932  ;;  %8413 = vmatpush3.bf16.msra.mxu0 %v11209_v44 }
 0x888   : > { %5192 = vrot.lane.b32.xlu0 %v10962_v32, %s8732_s26  ;;  %5012 = vst.msk [vmem:[#allocation3 + $0x3b] sm:$0xff] %vm5006_vm12, %v4933_v2 }
 0x889   : > { %5125 = vst.msk [vmem:[#allocation3 + $0x3a] sm:$0xff] %vm5119_vm13, %v13302_v47 }
 0x88a   : > { %v4717_v28 = vpop.permute.xlu0 %4716  ;;  %5291 = vrot.lane.b32.xlu1 %v11141_v62, %s8733_s12 }
 0x88b   : > { %4793 = vst.msk [vmem:[#allocation3 + $0xa8] sm:$0xff] %vm4778_vm8, %v4717_v28  ;;  %v5044_v29 = vpop.permute.xlu1 %5043 }
 0x88c   : > { %5305 = vrot.lane.b32.xlu0 %v10962_v32, %s8733_s12  ;;  %5124 = vst.msk [vmem:[#allocation3 + $0x32] sm:$0xff] %vm5119_vm13, %v5044_v29 }
 0x88d   : > { %5237 = vst.msk [vmem:[#allocation3 + $0x31] sm:$0xff] %vm5232_vm15, %v13309_v54 }
 0x88e   : > { %v13499_v53 = vpop.permute.xlu0 %4837  ;;  %4722 = vrot.lane.b32.xlu1 %v11141_v62, %s8728_s21 }
 0x88f   : > { %v5155_v50 = vpop.permute.xlu1 %5154 }
 0x890   : > { %4736 = vrot.lane.b32.xlu0 %v10962_v32, %s8728_s21  ;;  %5236 = vst.msk [vmem:[#allocation3 + $0x21] sm:$0xff] %vm5232_vm15, %v5155_v50 }
 0x891   : > { %5349 = vst.msk [vmem:[#allocation3 + $0x20] sm:$0xff] %vm5345_vm10, %v13316_v45 }
 0x892   : > { %v13508_v44 = vpop.permute.xlu0 %4950  ;;  %4726 = vrot.lane.b32.xlu1 %v11153_v16, %s8728_s21 }
 0x893   : > { %v5159_v47 = vpop.permute.xlu1 %5158 }
 0x894   : > { %4740 = vrot.lane.b32.xlu0 %v11420_v49, %s8728_s21  ;;  %5238 = vst.msk [vmem:[#allocation3 + $0x39] sm:$0xff] %vm5232_vm15, %v5159_v47 }
 0x895   : > { %5351 = vst.msk [vmem:[#allocation3 + $0x38] sm:$0xff] %vm5345_vm10, %v13323_v55 }
 0x896   : > { %v13517_v32 = vpop.permute.xlu0 %5063  ;;  %4843 = vrot.lane.b32.xlu1 %v11153_v16, %s14640_s23 }
 0x897   : > { %v5270_v19 = vpop.permute.xlu1 %5269  ;;  %v5379_v6 = vld [vmem:[#allocation3 + $0x28] sm:$0xff] }
 0x898   : > { %4857 = vrot.lane.b32.xlu0 %v11420_v49, %s14640_s23  ;;  %5350 = vst.msk [vmem:[#allocation3 + $0x30] sm:$0xff] %vm5345_vm10, %v5270_v19  ;;  %v5378_v45 = vld [vmem:[#allocation3 + $0x20] sm:$0xff] }
 0x899   : > { %v5424_v30 = vpack.c.bf16 %v5379_v6, %v5378_v45 }
 0x89a   : > { %v13526_v54 = vpop.permute.xlu0 %5176  ;;  %4954 = vrot.lane.b32.xlu1 %v10932_v17, %s8730_s17 }
 0x89b   : > { %8368 = vmatprep.mubr.msk.bf16.mxu0 %vm2425_vm11, %v5424_v30  ;;  %v4822_v62 = vpop.permute.xlu1 %4821  ;;  %v5382_v19 = vld [vmem:[#allocation3 + $0x40] sm:$0xff] }
 0x89c   : > { %4861 = vrot.lane.b32.xlu0 %v12168_v22, %s14640_s23  ;;  %4900 = vst.msk [vmem:[#allocation3 + $0x4c] sm:$0xff] %vm4893_vm0, %v4822_v62  ;;  %v5381_v18 = vld [vmem:[#allocation3 + $0x38] sm:$0xff] }
 0x89d   : > { %5014 = vst.msk [vmem:[#allocation3 + $0x53] sm:$0xff] %vm5006_vm12, %v13335_v60 }
 0x89e   : > { %v13533_v4 = vpop.permute.xlu0 %5289  ;;  %4958 = vrot.lane.b32.xlu1 %v10942_v42, %s8730_s17 }
 0x89f   : > { %v4935_v58 = vpop.permute.xlu1 %4934  ;;  %v5380_v7 = vld [vmem:[#allocation3 + $0x30] sm:$0xff] }
 0x8a0   : > { %4972 = vrot.lane.b32.xlu0 %v11679_v1, %s8730_s17  ;;  %5013 = vst.msk [vmem:[#allocation3 + $0x4b] sm:$0xff] %vm5006_vm12, %v4935_v58  ;;  %v5425_v0 = vpack.c.bf16 %v5381_v18, %v5380_v7  ;;  %v2317_v18 = vrot.slane %v11626_v46, 1 }
 0x8a1   : > { %5127 = vst.msk [vmem:[#allocation3 + $0x52] sm:$0xff] %vm5119_vm13, %v13342_v34 }
 0x8a2   : > { %v4721_v55 = vpop.permute.xlu0 %4720  ;;  %8369 = vmatmul.mubr.msk.bf16.gmra.mxu0 %vm2425_vm11, %v5425_v0  ;;  %5069 = vrot.lane.b32.xlu1 %v11153_v16, %s8731_s10  ;;  %v14959_v0 = vrot.slane %v11648_v25, 1 }
 0x8a3   : > { %4795 = vst.msk [vmem:[#allocation3 + $0xc0] sm:$0xff] %vm4778_vm8, %v4721_v55  ;;  %v5048_v40 = vpop.permute.xlu1 %5047  ;;  %v2312_v55 = vrot.slane %v11620_v3, 1 }
 0x8a4   : > { %5083 = vrot.lane.b32.xlu0 %v11420_v49, %s8731_s10  ;;  %5126 = vst.msk [vmem:[#allocation3 + $0x4a] sm:$0xff] %vm5119_vm13, %v5048_v40  ;;  %v14960_v40 = vrot.slane %v11654_v41, 1  ;;  %v2332_v41 = vrot.slane %v11706_v57, 1 }
 0x8a5   : > { %5240 = vst.msk [vmem:[#allocation3 + $0x51] sm:$0xff] %vm5232_vm15, %v13349_v63 }
 0x8a6   : > { %v4725_v60 = vpop.permute.xlu0 %4724  ;;  %5180 = vrot.lane.b32.xlu1 %v10932_v17, %s8732_s26 }
 0x8a7   : > { %4797 = vst.msk [vmem:[#allocation3 + $0xd8] sm:$0xff] %vm4778_vm8, %v4725_v60  ;;  %v5161_v34 = vpop.permute.xlu1 %5160  ;;  %v2322_v60 = vrot.slane %v11638_v15, 1 }
 0x8a8   : > { %5087 = vrot.lane.b32.xlu0 %v12168_v22, %s8731_s10  ;;  %5239 = vst.msk [vmem:[#allocation3 + $0x49] sm:$0xff] %vm5232_vm15, %v5161_v34 }
 0x8a9   : > { %5353 = vst.msk [vmem:[#allocation3 + $0x50] sm:$0xff] %vm5345_vm10, %v13356_v43  ;;  %v2324_v34 = vsel %vm2311_vm4, %v2322_v60, %v14960_v40 }
 0x8aa   : > { %v13560_v13 = vpop.permute.xlu0 %4841  ;;  %5184 = vrot.lane.b32.xlu1 %v10942_v42, %s8732_s26 }
 0x8ab   : > { %v5274_v2 = vpop.permute.xlu1 %5273 }
 0x8ac   : > { %5198 = vrot.lane.b32.xlu0 %v11679_v1, %s8732_s26  ;;  %5352 = vst.msk [vmem:[#allocation3 + $0x48] sm:$0xff] %vm5345_vm10, %v5274_v2  ;;  %v5385_v45 = vld [vmem:[#allocation3 + $0x58] sm:$0xff]  ;;  %v14961_v2 = vrot.slane %v11666_v56, 1 }
 0x8ae   : > { %v13569_v28 = vpop.permute.xlu0 %4845  ;;  %5295 = vrot.lane.b32.xlu1 %v11153_v16, %s8733_s12 }
 0x8af   : > { %v4826_v29 = vpop.permute.xlu1 %4825 }
 0x8b0   : > { %5309 = vrot.lane.b32.xlu0 %v11420_v49, %s8733_s12  ;;  %4902 = vst.msk [vmem:[#allocation3 + $0x64] sm:$0xff] %vm4893_vm0, %v4826_v29  ;;  %v5384_v50 = vld [vmem:[#allocation3 + $0x50] sm:$0xff] }
 0x8b1   : > { %5015 = vst.msk [vmem:[#allocation3 + $0x63] sm:$0xff] %vm5006_vm12, %v13372_v37  ;;  %v5427_v37 = vpack.c.bf16 %v5385_v45, %v5384_v50  ;;  %v2337_v45 = vrot.slane %v11716_v51, 1  ;;  %v14965_v51 = vld [vmem:[#allocation26_spill] sm:$0xff] }
 0x8b2   : > { %v13576_v63 = vpop.permute.xlu0 %4956  ;;  %4728 = vrot.lane.b32.xlu1 %v10942_v42, %s8728_s21 }
 0x8b3   : > { %v4830_v47 = vpop.permute.xlu1 %4829  ;;  %v5383_v17 = vld [vmem:[#allocation3 + $0x48] sm:$0xff] }
 0x8b4   : > { %5313 = vrot.lane.b32.xlu0 %v12168_v22, %s8733_s12  ;;  %4904 = vst.msk [vmem:[#allocation3 + $0x7c] sm:$0xff] %vm4893_vm0, %v4830_v47  ;;  %v5426_v6 = vpack.c.bf16 %v5383_v17, %v5382_v19  ;;  %v14962_v47 = vrot.slane %v11721_v38, 1 }
 0x8b5   : > { %5017 = vst.msk [vmem:[#allocation3 + $0x7b] sm:$0xff] %vm5006_vm12, %v13381_v11 }
 0x8b6   : > { %v13585_v43 = vpop.permute.xlu0 %5067  ;;  %8372 = vmatprep.mubr.msk.bf16.mxu0 %vm2425_vm11, %v5426_v6  ;;  %4847 = vrot.lane.b32.xlu1 %v11161_v39, %s14640_s23  ;;  %v2334_v19 = vsel %vm2311_vm4, %v2332_v41, %v14962_v47  ;;  %v14974_v41 = vld [vmem:[#allocation34_spill] sm:$0xff]  ;;  %v14975_v47 = vld [vmem:[#allocation41_spill] sm:$0xff] }
 0x8b7   : > { %8373 = vmatmul.mubr.msk.bf16.gmra.mxu0 %vm2425_vm11, %v5427_v37  ;;  %v4941_v62 = vpop.permute.xlu1 %4940  ;;  %v14963_v37 = vld [vmem:[#allocation28_spill] sm:$0xff] }
 0x8b8   : > { %4976 = vrot.lane.b32.xlu0 %v12330_v24, %s8730_s17  ;;  %5016 = vst.msk [vmem:[#allocation3 + $0x6b] sm:$0xff] %vm5006_vm12, %v4941_v62  ;;  %v14964_v62 = vrot.slane %v14963_v37, 1  ;;  %v14978_v37 = vld [vmem:[#allocation37_spill] sm:$0xff] }
 0x8b9   : > { %5129 = vst.msk [vmem:[#allocation3 + $0x6a] sm:$0xff] %vm5119_vm13, %v13389_v5  ;;  %v14958_v5 = vrot.slane %v11631_v23, 1  ;;  %v2319_v23 = vsel %vm2311_vm4, %v2317_v18, %v14959_v0 }
 0x8ba   : > { %v13595_v30 = vpop.permute.xlu0 %5071  ;;  %4851 = vrot.lane.b32.xlu1 %v11173_v52, %s14640_s23 }
 0x8bb   : > { %v5052_v11 = vpop.permute.xlu1 %5051  ;;  %v2314_v7 = vsel %vm2311_vm4, %v2312_v55, %v14958_v5 }
 0x8bc   : > { %5202 = vrot.lane.b32.xlu0 %v12330_v24, %s8732_s26  ;;  %5128 = vst.msk [vmem:[#allocation3 + $0x62] sm:$0xff] %vm5119_vm13, %v5052_v11  ;;  %v2339_v11 = vsel %vm2311_vm4, %v2337_v45, %v14964_v62  ;;  %v14979_v62 = vrot.slane %v14978_v37, 1 }
 0x8bd   : > { %5241 = vst.msk [vmem:[#allocation3 + $0x61] sm:$0xff] %vm5232_vm15, %v13397_v21 }
 0x8be   : > { %v13605_v16 = vpop.permute.xlu0 %5182  ;;  %4962 = vrot.lane.b32.xlu1 %v10954_v59, %s8730_s17 }
 0x8bf   : > { %v5056_v58 = vpop.permute.xlu1 %5055 }
 0x8c0   : > { %4744 = vrot.lane.b32.xlu0 %v12168_v22, %s8728_s21  ;;  %5130 = vst.msk [vmem:[#allocation3 + $0x7a] sm:$0xff] %vm5119_vm13, %v5056_v58 }
 0x8c1   : > { %5243 = vst.msk [vmem:[#allocation3 + $0x79] sm:$0xff] %vm5232_vm15, %v13404_v12  ;;  %v2327_v12 = vrot.slane %v11692_v33, 1 }
 0x8c2   : > { %v13615_v42 = vpop.permute.xlu0 %5293  ;;  %5073 = vrot.lane.b32.xlu1 %v11161_v39, %s8731_s10 }
 0x8c3   : > { %v5167_v21 = vpop.permute.xlu1 %5166  ;;  %v2329_v33 = vsel %vm2311_vm4, %v2327_v12, %v14961_v2  ;;  %v14969_v12 = vld [vmem:[#allocation33_spill] sm:$0xff] }
 0x8c4   : > { %7049 = vrot.lane.b32.xlu0 %v2314_v7, %s8710_s13  ;;  %5242 = vst.msk [vmem:[#allocation3 + $0x69] sm:$0xff] %vm5232_vm15, %v5167_v21  ;;  %v2347_v7 = vrot.slane %v11791_v27, 1  ;;  %v14966_v21 = vrot.slane %v11750_v48, 1  ;;  %v14967_v27 = vrot.slane %v11763_v14, 1  ;;  %v14968_v48 = vld [vmem:[#allocation31_spill] sm:$0xff] }
 0x8c5   : > { %5355 = vst.msk [vmem:[#allocation3 + $0x68] sm:$0xff] %vm5345_vm10, %v13413_v8  ;;  %v2352_v60 = vrot.slane %v14968_v48, 1 }
 0x8c6   : > { %v13627_v3 = vpop.permute.xlu0 %5297  ;;  %5077 = vrot.lane.b32.xlu1 %v11173_v52, %s8731_s10 }
 0x8c7   : > { %v5278_v25 = vpop.permute.xlu1 %5277 }
 0x8c8   : > { %7053 = vrot.lane.b32.xlu0 %v2319_v23, %s8710_s13  ;;  %5354 = vst.msk [vmem:[#allocation3 + $0x60] sm:$0xff] %vm5345_vm10, %v5278_v25  ;;  %v2349_v23 = vsel %vm2311_vm4, %v2347_v7, %v14967_v27  ;;  %v14970_v25 = vrot.slane %v14969_v12, 1  ;;  %v14983_v27 = vld [vmem:[#allocation10_spill] sm:$0xff] }
 0x8ca   : > { %v4731_v46 = vpop.permute.xlu0 %4730  ;;  %5188 = vrot.lane.b32.xlu1 %v10954_v59, %s8732_s26  ;;  %v2354_v14 = vsel %vm2311_vm4, %v2352_v60, %v14970_v25 }
 0x8cb   : > { %4800 = vst.msk [vmem:[#allocation3 + $0xf8] sm:$0xff] %vm4778_vm8, %v4731_v46  ;;  %v5282_v8 = vpop.permute.xlu1 %5281  ;;  %v5388_v55 = vld [vmem:[#allocation3 + $0x70] sm:$0xff] }
 0x8cc   : > { %7057 = vrot.lane.b32.xlu0 %v2324_v34, %s8710_s13  ;;  %5356 = vst.msk [vmem:[#allocation3 + $0x78] sm:$0xff] %vm5345_vm10, %v5282_v8  ;;  %v5387_v56 = vld [vmem:[#allocation3 + $0x68] sm:$0xff] }
 0x8cd   : > { %v14972_v8 = vld [vmem:[#allocation35_spill] sm:$0xff] }
 0x8ce   : > { %v13648_v15 = vpop.permute.xlu0 %4849  ;;  %5299 = vrot.lane.b32.xlu1 %v11161_v39, %s8733_s12  ;;  %v14973_v2 = vrot.slane %v14972_v8, 1 }
 0x8cf   : > { %v4832_v50 = vpop.permute.xlu1 %4831  ;;  %v5386_v17 = vld [vmem:[#allocation3 + $0x60] sm:$0xff] }
 0x8d0   : > { %7061 = vrot.lane.b32.xlu0 %v2329_v33, %s8710_s13  ;;  %4905 = vst.msk [vmem:[#allocation3 + $0x84] sm:$0xff] %vm4893_vm0, %v4832_v50  ;;  %v5428_v6 = vpack.c.bf16 %v5387_v56, %v5386_v17  ;;  %v2362_v50 = vrot.slane %v14974_v41, 1  ;;  %v14976_v56 = vld [vmem:[#allocation38_spill] sm:$0xff] }
 0x8d1   : > { %5018 = vst.msk [vmem:[#allocation3 + $0x83] sm:$0xff] %vm5006_vm12, %v13438_v9  ;;  %v2342_v9 = vrot.slane %v14965_v51, 1 }
 0x8d2   : > { %v13658_v29 = vpop.permute.xlu0 %4960  ;;  %8376 = vmatprep.mubr.msk.bf16.mxu0 %vm2425_vm11, %v5428_v6  ;;  %5303 = vrot.lane.b32.xlu1 %v11173_v52, %s8733_s12  ;;  %v14977_v6 = vrot.slane %v14976_v56, 1 }
 0x8d3   : > { %v4836_v38 = vpop.permute.xlu1 %4835  ;;  %v5389_v58 = vld [vmem:[#allocation3 + $0x78] sm:$0xff]  ;;  %v2344_v0 = vsel %vm2311_vm4, %v2342_v9, %v14966_v21  ;;  %v14981_v9 = vld [vmem:[#allocation15_spill] sm:$0xff] }
 0x8d4   : > { %7065 = vrot.lane.b32.xlu0 %v2334_v19, %s8710_s13  ;;  %4907 = vst.msk [vmem:[#allocation3 + $0x9c] sm:$0xff] %vm4893_vm0, %v4836_v38  ;;  %v5429_v59 = vpack.c.bf16 %v5389_v58, %v5388_v55  ;;  %v2367_v19 = vrot.slane %v14975_v47, 1  ;;  %v2364_v45 = vsel %vm2311_vm4, %v2362_v50, %v14977_v6  ;;  %v14980_v55 = vld [vmem:[#allocation42_spill] sm:$0xff]  ;;  %v14982_v7 = vrot.slane %v14981_v9, 1 }
 0x8d5   : > { %5020 = vst.msk [vmem:[#allocation3 + $0x9b] sm:$0xff] %vm5006_vm12, %v13447_v20  ;;  %v2372_v58 = vrot.slane %v14980_v55, 1  ;;  %v14986_v55 = vld [vmem:[#allocation21_spill] sm:$0xff] }
 0x8d6   : > { %v13671_v57 = vpop.permute.xlu0 %4964  ;;  %8377 = vmatmul.mubr.msk.bf16.gmra.mxu0 %vm2425_vm11, %v5429_v59  ;;  %4734 = vrot.lane.b32.xlu1 %v11173_v52, %s8728_s21  ;;  %v14971_v52 = vld [vmem:[#allocation32_spill] sm:$0xff] }
 0x8d7   : > { %v4947_v18 = vpop.permute.xlu1 %4946  ;;  %v2357_v40 = vrot.slane %v14971_v52, 1 }
 0x8d8   : > { %7069 = vrot.lane.b32.xlu0 %v2339_v11, %s8710_s13  ;;  %5019 = vst.msk [vmem:[#allocation3 + $0x93] sm:$0xff] %vm5006_vm12, %v4947_v18  ;;  %v2369_v11 = vsel %vm2311_vm4, %v2367_v19, %v14979_v62  ;;  %v2374_v18 = vsel %vm2311_vm4, %v2372_v58, %v14982_v7 }
 0x8d9   : > { %5132 = vst.msk [vmem:[#allocation3 + $0x92] sm:$0xff] %vm5119_vm13, %v13456_v35  ;;  %v2359_v33 = vsel %vm2311_vm4, %v2357_v40, %v14973_v2 }
 0x8da   : > { %v13684_v5 = vpop.permute.xlu0 %5075  ;;  %4855 = vrot.lane.b32.xlu1 %v11181_v36, %s14640_s23 }
 0x8db   : > { %v5058_v20 = vpop.permute.xlu1 %5057 }
 0x8dc   : > { %7073 = vrot.lane.b32.xlu0 %v2344_v0, %s8710_s13  ;;  %5131 = vst.msk [vmem:[#allocation3 + $0x82] sm:$0xff] %vm5119_vm13, %v5058_v20 }
 0x8dd   : > { %5244 = vst.msk [vmem:[#allocation3 + $0x81] sm:$0xff] %vm5232_vm15, %v13463_v26 }
 0x8de   : > { %v13696_v39 = vpop.permute.xlu0 %5186  ;;  %4968 = vrot.lane.b32.xlu1 %v11181_v36, %s8730_s17 }
 0x8df   : > { %v5062_v46 = vpop.permute.xlu1 %5061 }
 0x8e0   : > { %7077 = vrot.lane.b32.xlu0 %v2349_v23, %s8710_s13  ;;  %5133 = vst.msk [vmem:[#allocation3 + $0x9a] sm:$0xff] %vm5119_vm13, %v5062_v46  ;;  %v2377_v23 = vrot.slane %v14983_v27, 1  ;;  %v14984_v46 = vld [vmem:[#allocation11_spill] sm:$0xff] }
 0x8e1   : > { %5246 = vst.msk [vmem:[#allocation3 + $0x99] sm:$0xff] %vm5232_vm15, %v13470_v10  ;;  %v14985_v12 = vrot.slane %v14984_v46, 1  ;;  %v14990_v46 = vld [vmem:[#allocation25_spill] sm:$0xff] }
 0x8e2   : > { %v13708_v35 = vpop.permute.xlu0 %5190  ;;  %5081 = vrot.lane.b32.xlu1 %v11181_v36, %s8731_s10 }
 0x8e3   : > { %v5173_v34 = vpop.permute.xlu1 %5172  ;;  %v2379_v25 = vsel %vm2311_vm4, %v2377_v23, %v14985_v12  ;;  %v14989_v23 = vld [vmem:[#allocation22_spill] sm:$0xff]  ;;  %v14991_v12 = vld [vmem:[#allocation27_spill] sm:$0xff]  ;;  %vm5847_vm4 = vcmask 1045504  }
 0x8e4   : > { %7081 = vrot.lane.b32.xlu0 %v2354_v14, %s8710_s13  ;;  %5245 = vst.msk [vmem:[#allocation3 + $0x91] sm:$0xff] %vm5232_vm15, %v5173_v34  ;;  %v5391_v0 = vld [vmem:[#allocation3 + $0x88] sm:$0xff] }
 0x8e5   : > { %5358 = vst.msk [vmem:[#allocation3 + $0x90] sm:$0xff] %vm5345_vm10, %v13480_v31 }
 0x8e6   : > { %v13720_v26 = vpop.permute.xlu0 %5301  ;;  %5194 = vrot.lane.b32.xlu1 %v11181_v36, %s8732_s26 }
 0x8e7   : > { %v5284_v17 = vpop.permute.xlu1 %5283 }
 0x8e8   : > { %7085 = vrot.lane.b32.xlu0 %v2359_v33, %s8710_s13  ;;  %5357 = vst.msk [vmem:[#allocation3 + $0x80] sm:$0xff] %vm5345_vm10, %v5284_v17 }
 0x8ea   : > { %v4733_v10 = vpop.permute.xlu0 %4732  ;;  %5307 = vrot.lane.b32.xlu1 %v11181_v36, %s8733_s12 }
 0x8eb   : > { %4801 = vst.msk [vmem:[#allocation3 + $0x108] sm:$0xff] %vm4778_vm8, %v4733_v10  ;;  %v5288_v31 = vpop.permute.xlu1 %5287 }
 0x8ec   : > { %7089 = vrot.lane.b32.xlu0 %v2364_v45, %s8710_s13  ;;  %5359 = vst.msk [vmem:[#allocation3 + $0x98] sm:$0xff] %vm5345_vm10, %v5288_v31  ;;  %v5392_v14 = vld [vmem:[#allocation3 + $0x90] sm:$0xff] }
 0x8ee   : > { %v13741_v38 = vpop.permute.xlu0 %4853  ;;  %4738 = vrot.lane.b32.xlu1 %v11181_v36, %s8728_s21  ;;  %v5394_v36 = vld [vmem:[#allocation3 + $0xa0] sm:$0xff] }
 0x8ef   : > { %v4719_v51 = vpop.permute.xlu1 %4718  ;;  %v5390_v21 = vld [vmem:[#allocation3 + $0x80] sm:$0xff] }
 0x8f0   : > { %7093 = vrot.lane.b32.xlu0 %v2369_v11, %s8710_s13  ;;  %4794 = vst.msk [vmem:[#allocation3 + $0xb0] sm:$0xff] %vm4778_vm8, %v4719_v51  ;;  %v5430_v20 = vpack.c.bf16 %v5391_v0, %v5390_v21  ;;  %v14987_v51 = vld [vmem:[#allocation20_spill] sm:$0xff]  ;;  %v14988_v21 = vld [vmem:[#allocation23_spill] sm:$0xff] }
 0x8f1   : > { %4908 = vst.msk [vmem:[#allocation3 + $0xac] sm:$0xff] %vm4893_vm0, %v13499_v53 }
 0x8f2   : > { %v13751_v59 = vpop.permute.xlu0 %4966  ;;  %5021 = vst.msk [vmem:[#allocation3 + $0xab] sm:$0xff] %vm5006_vm12, %v13508_v44  ;;  %8380 = vmatprep.mubr.msk.bf16.mxu0 %vm2425_vm11, %v5430_v20  ;;  %4742 = vrot.lane.b32.xlu1 %v11679_v1, %s8728_s21 }
 0x8f3   : > { %5134 = vst.msk [vmem:[#allocation3 + $0xaa] sm:$0xff] %vm5119_vm13, %v13517_v32  ;;  %v4840_v60 = vpop.permute.xlu1 %4839  ;;  %v5393_v52 = vld [vmem:[#allocation3 + $0x98] sm:$0xff] }
 0x8f4   : > { %7097 = vrot.lane.b32.xlu0 %v2374_v18, %s8710_s13  ;;  %5247 = vst.msk [vmem:[#allocation3 + $0xa9] sm:$0xff] %vm5232_vm15, %v13526_v54  ;;  %v5431_v53 = vpack.c.bf16 %v5393_v52, %v5392_v14 }
 0x8f5   : > { %4909 = vst.msk [vmem:[#allocation3 + $0xb4] sm:$0xff] %vm4893_vm0, %v4840_v60 }
 0x8f6   : > { %v13766_v48 = vpop.permute.xlu0 %5079  ;;  %5360 = vst.msk [vmem:[#allocation3 + $0xa8] sm:$0xff] %vm5345_vm10, %v13533_v4  ;;  %8381 = vmatmul.mubr.msk.bf16.gmra.mxu0 %vm2425_vm11, %v5431_v53  ;;  %4859 = vrot.lane.b32.xlu1 %v11679_v1, %s14640_s23 }
 0x8f7   : > { %v4953_v32 = vpop.permute.xlu1 %4952 }
 0x8f8   : > { %7101 = vrot.lane.b32.xlu0 %v2379_v25, %s8710_s13  ;;  %5022 = vst.msk [vmem:[#allocation3 + $0xb3] sm:$0xff] %vm5006_vm12, %v4953_v32  ;;  %v14994_v32 = vld [vmem:[#allocation36_spill] sm:$0xff] }
 0x8fa   : > { %v13782_v44 = vpop.permute.xlu0 %5192  ;;  %4970 = vrot.lane.b32.xlu1 %v11420_v49, %s8730_s17 }
 0x8fb   : > { %v5066_v40 = vpop.permute.xlu1 %5065 }
 0x8fc   : > { %5135 = vst.msk [vmem:[#allocation3 + $0xb2] sm:$0xff] %vm5119_vm13, %v5066_v40 }
 0x8fd   : > { %v5395_v4 = vld [vmem:[#allocation3 + $0xa8] sm:$0xff] }
 0x8fe   : > { %v13787_v54 = vpop.permute.xlu0 %5305  ;;  %v5432_v34 = vpack.c.bf16 %v5395_v4, %v5394_v36  ;;  %4974 = vrot.lane.b32.xlu1 %v12168_v22, %s8730_s17  ;;  %v14995_v4 = vld [vmem:[#allocation40_spill] sm:$0xff] }
 0x8ff   : > { %v5179_v2 = vpop.permute.xlu1 %5178 }
 0x900   : > { %8384 = vmatprep.mubr.msk.bf16.mxu0 %vm2425_vm11, %v5432_v34  ;;  %5248 = vst.msk [vmem:[#allocation3 + $0xb1] sm:$0xff] %vm5232_vm15, %v5179_v2 }
 0x902   : > { %v4737_v8 = vpop.permute.xlu0 %4736  ;;  %5085 = vrot.lane.b32.xlu1 %v11679_v1, %s8731_s10 }
 0x903   : > { %4803 = vst.msk [vmem:[#allocation3 + $0x120] sm:$0xff] %vm4778_vm8, %v4737_v8  ;;  %v5292_v41 = vpop.permute.xlu1 %5291 }
 0x904   : > { %5361 = vst.msk [vmem:[#allocation3 + $0xb0] sm:$0xff] %vm5345_vm10, %v5292_v41 }
 0x906   : > { %v4741_v33 = vpop.permute.xlu0 %4740  ;;  %5196 = vrot.lane.b32.xlu1 %v11420_v49, %s8732_s26 }
 0x907   : > { %4805 = vst.msk [vmem:[#allocation3 + $0x138] sm:$0xff] %vm4778_vm8, %v4741_v33  ;;  %v4723_v10 = vpop.permute.xlu1 %4722  ;;  %v5397_v56 = vld [vmem:[#allocation3 + $0xb8] sm:$0xff] }
 0x908   : > { %4796 = vst.msk [vmem:[#allocation3 + $0xc8] sm:$0xff] %vm4778_vm8, %v4723_v10  ;;  %v14996_v10 = vld [vmem:[#allocation39_spill] sm:$0xff] }
 0x909   : > { %4910 = vst.msk [vmem:[#allocation3 + $0xc4] sm:$0xff] %vm4893_vm0, %v13560_v13 }
 0x90a   : > { %v13801_v50 = vpop.permute.xlu0 %4857  ;;  %5200 = vrot.lane.b32.xlu1 %v12168_v22, %s8732_s26 }
 0x90b   : > { %v4727_v19 = vpop.permute.xlu1 %4726  ;;  %v5396_v17 = vld [vmem:[#allocation3 + $0xb0] sm:$0xff] }
 0x90c   : > { %4798 = vst.msk [vmem:[#allocation3 + $0xe0] sm:$0xff] %vm4778_vm8, %v4727_v19  ;;  %v5433_v6 = vpack.c.bf16 %v5397_v56, %v5396_v17 }
 0x90d   : > { %4912 = vst.msk [vmem:[#allocation3 + $0xdc] sm:$0xff] %vm4893_vm0, %v13569_v28 }
 0x90e   : > { %v13808_v47 = vpop.permute.xlu0 %4861  ;;  %8385 = vmatmul.mubr.msk.bf16.gmra.mxu0 %vm2425_vm11, %v5433_v6  ;;  %5311 = vrot.lane.b32.xlu1 %v11679_v1, %s8733_s12 }
 0x90f   : > { %v4844_v31 = vpop.permute.xlu1 %4843 }
 0x910   : > { %4911 = vst.msk [vmem:[#allocation3 + $0xcc] sm:$0xff] %vm4893_vm0, %v4844_v31  ;;  %v14997_v31 = vld [vmem:[#allocation24_spill] sm:$0xff] }
 0x911   : > { %5024 = vst.msk [vmem:[#allocation3 + $0xcb] sm:$0xff] %vm5006_vm12, %v13576_v63 }
 0x912   : > { %v13816_v45 = vpop.permute.xlu0 %4972  ;;  %4863 = vrot.lane.b32.xlu1 %v12330_v24, %s14640_s23 }
 0x913   : > { %v4955_v49 = vpop.permute.xlu1 %4954 }
 0x914   : > { %5023 = vst.msk [vmem:[#allocation3 + $0xc3] sm:$0xff] %vm5006_vm12, %v4955_v49 }
 0x915   : > { %5136 = vst.msk [vmem:[#allocation3 + $0xc2] sm:$0xff] %vm5119_vm13, %v13585_v43 }
 0x916   : > { %v13823_v13 = vpop.permute.xlu0 %5083  ;;  %5089 = vrot.lane.b32.xlu1 %v12330_v24, %s8731_s10 }
 0x917   : > { %v4959_v37 = vpop.permute.xlu1 %4958 }
 0x918   : > { %5025 = vst.msk [vmem:[#allocation3 + $0xdb] sm:$0xff] %vm5006_vm12, %v4959_v37 }
 0x919   : > { %5138 = vst.msk [vmem:[#allocation3 + $0xda] sm:$0xff] %vm5119_vm13, %v13595_v30 }
 0x91a   : > { %v13830_v28 = vpop.permute.xlu0 %5087  ;;  %5315 = vrot.lane.b32.xlu1 %v12330_v24, %s8733_s12 }
 0x91b   : > { %v5070_v63 = vpop.permute.xlu1 %5069 }
 0x91c   : > { %5137 = vst.msk [vmem:[#allocation3 + $0xca] sm:$0xff] %vm5119_vm13, %v5070_v63 }
 0x91d   : > { %5250 = vst.msk [vmem:[#allocation3 + $0xc9] sm:$0xff] %vm5232_vm15, %v13605_v16 }
 0x91e   : > { %v13837_v22 = vpop.permute.xlu0 %5198  ;;  %4746 = vrot.lane.b32.xlu1 %v12330_v24, %s8728_s21  ;;  %s14219_s21 = sand.u32 1, %s8699_s28  }
 0x91f   : > { %v5181_v43 = vpop.permute.xlu1 %5180  ;;  %s7898_s17 = sshll.u32 %s14219_s21, 7  ;;  %s7769_s22 = scalar_lea.sflag [#allocation5], %s14219_s21 }
 0x920   : > { %5249 = vst.msk [vmem:[#allocation3 + $0xc1] sm:$0xff] %vm5232_vm15, %v5181_v43  ;;  %s14241_s10 = scalar_lea.vmem [#allocation4], %s7898_s17  ;;  %s8623_s17 = scalar_lea.vmem %s8622_s20, 4096 }
 0x921   : > { %5362 = vst.msk [vmem:[#allocation3 + $0xc0] sm:$0xff] %vm5345_vm10, %v13615_v42 }
 0x922   : > { %v13844_v1 = vpop.permute.xlu0 %5309  ;;  %7051 = vrot.lane.b32.xlu1 %v14986_v55, %s8710_s13 }
 0x923   : > { %v5185_v62 = vpop.permute.xlu1 %5184 }
 0x924   : > { %5251 = vst.msk [vmem:[#allocation3 + $0xd9] sm:$0xff] %vm5232_vm15, %v5185_v62  ;;  %v5400_v20 = vld [vmem:[#allocation3 + $0xd0] sm:$0xff] }
 0x925   : > { %5364 = vst.msk [vmem:[#allocation3 + $0xd8] sm:$0xff] %vm5345_vm10, %v13627_v3 }
 0x926   : > { %v13851_v30 = vpop.permute.xlu0 %5313  ;;  %7055 = vrot.lane.b32.xlu1 %v14987_v51, %s8710_s13 }
 0x927   : > { %v5296_v11 = vpop.permute.xlu1 %5295 }
 0x928   : > { %5363 = vst.msk [vmem:[#allocation3 + $0xc8] sm:$0xff] %vm5345_vm10, %v5296_v11  ;;  %v5398_v7 = vld [vmem:[#allocation3 + $0xc0] sm:$0xff] }
 0x92a   : > { %v13858_v16 = vpop.permute.xlu0 %4976  ;;  %7059 = vrot.lane.b32.xlu1 %v14988_v21, %s8710_s13 }
 0x92b   : > { %v4729_v58 = vpop.permute.xlu1 %4728 }
 0x92c   : > { %4799 = vst.msk [vmem:[#allocation3 + $0xf0] sm:$0xff] %vm4778_vm8, %v4729_v58  ;;  %v5401_v3 = vld [vmem:[#allocation3 + $0xd8] sm:$0xff] }
 0x92d   : > { %4914 = vst.msk [vmem:[#allocation3 + $0xf4] sm:$0xff] %vm4893_vm0, %v13648_v15  ;;  %v5435_v27 = vpack.c.bf16 %v5401_v3, %v5400_v20 }
 0x92e   : > { %v13863_v42 = vpop.permute.xlu0 %5202  ;;  %7063 = vrot.lane.b32.xlu1 %v14989_v23, %s8710_s13 }
 0x92f   : > { %v4848_v9 = vpop.permute.xlu1 %4847  ;;  %v5399_v18 = vld [vmem:[#allocation3 + $0xc8] sm:$0xff] }
 0x930   : > { %4913 = vst.msk [vmem:[#allocation3 + $0xe4] sm:$0xff] %vm4893_vm0, %v4848_v9  ;;  %v5434_v0 = vpack.c.bf16 %v5399_v18, %v5398_v7 }
 0x931   : > { %5026 = vst.msk [vmem:[#allocation3 + $0xe3] sm:$0xff] %vm5006_vm12, %v13658_v29 }
 0x932   : > { %v4745_v24 = vpop.permute.xlu0 %4744  ;;  %8388 = vmatprep.mubr.msk.bf16.mxu0 %vm2425_vm11, %v5434_v0  ;;  %7067 = vrot.lane.b32.xlu1 %v14990_v46, %s8710_s13 }
 0x933   : > { %4807 = vst.msk [vmem:[#allocation3 + $0x150] sm:$0xff] %vm4778_vm8, %v4745_v24  ;;  %8389 = vmatmul.mubr.msk.bf16.gmra.mxu0 %vm2425_vm11, %v5435_v27  ;;  %v4852_v15 = vpop.permute.xlu1 %4851 }
 0x934   : > { %4915 = vst.msk [vmem:[#allocation3 + $0xfc] sm:$0xff] %vm4893_vm0, %v4852_v15 }
 0x935   : > { %5028 = vst.msk [vmem:[#allocation3 + $0xfb] sm:$0xff] %vm5006_vm12, %v13671_v57  ;;  %v14992_v57 = vld [vmem:[#allocation30_spill] sm:$0xff] }
 0x936   : > { %7071 = vrot.lane.b32.xlu1 %v14991_v12, %s8710_s13 }
 0x937   : > { %v4963_v60 = vpop.permute.xlu1 %4962 }
 0x938   : > { %5027 = vst.msk [vmem:[#allocation3 + $0xf3] sm:$0xff] %vm5006_vm12, %v4963_v60 }
 0x939   : > { %5140 = vst.msk [vmem:[#allocation3 + $0xf2] sm:$0xff] %vm5119_vm13, %v13684_v5  ;;  %v14993_v5 = vld [vmem:[#allocation29_spill] sm:$0xff] }
 0x93a   : > { %7075 = vrot.lane.b32.xlu1 %v14992_v57, %s8710_s13 }
 0x93b   : > { %v5074_v29 = vpop.permute.xlu1 %5073 }
 0x93c   : > { %5139 = vst.msk [vmem:[#allocation3 + $0xe2] sm:$0xff] %vm5119_vm13, %v5074_v29 }
 0x93d   : > { %5252 = vst.msk [vmem:[#allocation3 + $0xe1] sm:$0xff] %vm5232_vm15, %v13696_v39 }
 0x93e   : > { %7079 = vrot.lane.b32.xlu1 %v14993_v5, %s8710_s13 }
 0x93f   : > { %v5078_v25 = vpop.permute.xlu1 %5077 }
 0x940   : > { %5141 = vst.msk [vmem:[#allocation3 + $0xfa] sm:$0xff] %vm5119_vm13, %v5078_v25 }
 0x941   : > { %5254 = vst.msk [vmem:[#allocation3 + $0xf9] sm:$0xff] %vm5232_vm15, %v13708_v35 }
 0x942   : > { %7083 = vrot.lane.b32.xlu1 %v14994_v32, %s8710_s13 }
 0x943   : > { %v5189_v14 = vpop.permute.xlu1 %5188 }
 0x944   : > { %5253 = vst.msk [vmem:[#allocation3 + $0xf1] sm:$0xff] %vm5232_vm15, %v5189_v14  ;;  %v5403_v41 = vld [vmem:[#allocation3 + $0xe8] sm:$0xff] }
 0x945   : > { %5366 = vst.msk [vmem:[#allocation3 + $0xf0] sm:$0xff] %vm5345_vm10, %v13720_v26 }
 0x946   : > { %v8366_v52 = vpop.f32.mrf.mxu0  ;;  %7087 = vrot.lane.b32.xlu1 %v14995_v4, %s8710_s13 }
 0x947   : > { %v5300_v39 = vpop.permute.xlu1 %5299  ;;  %v5851_v34 = vrot.slane %v8366_v52, 2 }
 0x948   : > { %5365 = vst.msk [vmem:[#allocation3 + $0xe0] sm:$0xff] %vm5345_vm10, %v5300_v39  ;;  %v5608_v53 = vpop.f32.mrf.mxu0  ;;  %v5406_v63 = vld [vmem:[#allocation3 + $0x100] sm:$0xff] }
 0x949   : > { %v5848_v49 = vrot.slane %v5608_v53, 2 }
 0x94a   : > { %v8367_v40 = vpop.f32.mrf.mxu0  ;;  %7091 = vrot.lane.b32.xlu1 %v14996_v10, %s8710_s13 }
 0x94b   : > { %v5304_v36 = vpop.permute.xlu1 %5303  ;;  %v5853_v51 = vrot.slane %v8367_v40, 2 }
 0x94c   : > { %5367 = vst.msk [vmem:[#allocation3 + $0xf8] sm:$0xff] %vm5345_vm10, %v5304_v36  ;;  %v5611_v35 = vpop.f32.mrf.mxu0  ;;  %v5404_v56 = vld [vmem:[#allocation3 + $0xf0] sm:$0xff] }
 0x94d   : > { %v5849_v8 = vrot.slane %v5611_v35, 2 }
 0x94e   : > { %7095 = vrot.lane.b32.xlu1 %v14997_v31, %s8710_s13 }
 0x94f   : > { %v4735_v26 = vpop.permute.xlu1 %4734  ;;  %v5852_v2 = vsel %vm5847_vm4, %v5849_v8, %v5851_v34  ;;  %v5402_v33 = vld [vmem:[#allocation3 + $0xe0] sm:$0xff] }
 0x950   : > { %4802 = vst.msk [vmem:[#allocation3 + $0x110] sm:$0xff] %vm4778_vm8, %v4735_v26  ;;  %7147 = vrot.lane.b32.xlu0 %v5852_v2, %s8713_s18  ;;  %v5436_v19 = vpack.c.bf16 %v5403_v41, %v5402_v33 }
 0x951   : > { %4916 = vst.msk [vmem:[#allocation3 + $0x10c] sm:$0xff] %vm4893_vm0, %v13741_v38 }
 0x952   : > { %5029 = vst.msk [vmem:[#allocation3 + $0x10b] sm:$0xff] %vm5006_vm12, %v13751_v59  ;;  %8392 = vmatprep.mubr.msk.bf16.mxu0 %vm2425_vm11, %v5436_v19 }
 0x953   : > { %5142 = vst.msk [vmem:[#allocation3 + $0x10a] sm:$0xff] %vm5119_vm13, %v13766_v48  ;;  %v4856_v17 = vpop.permute.xlu1 %4855  ;;  %v5405_v6 = vld [vmem:[#allocation3 + $0xf8] sm:$0xff] }
 0x954   : > { %5255 = vst.msk [vmem:[#allocation3 + $0x109] sm:$0xff] %vm5232_vm15, %v13782_v44  ;;  %v5437_v38 = vpack.c.bf16 %v5405_v6, %v5404_v56  ;;  %v14998_v48 = vld [vmem:[#allocation12_spill] sm:$0xff]  ;;  %v5850_v44 = vsel %vm5847_vm4, %v5848_v49, %v5849_v8  ;;  %v5418_v49 = vld [vmem:[#allocation3 + $0x160] sm:$0xff] }
 0x955   : > { %4917 = vst.msk [vmem:[#allocation3 + $0x114] sm:$0xff] %vm4893_vm0, %v4856_v17  ;;  %7099 = vrot.lane.b32.xlu1 %v14998_v48, %s8710_s13 }
 0x956   : > { %5368 = vst.msk [vmem:[#allocation3 + $0x108] sm:$0xff] %vm5345_vm10, %v13787_v54  ;;  %8393 = vmatmul.mubr.msk.bf16.gmra.mxu0 %vm2425_vm11, %v5437_v38 }
 0x957   : > { %v4969_v59 = vpop.permute.xlu1 %4968 }
 0x958   : > { %5030 = vst.msk [vmem:[#allocation3 + $0x113] sm:$0xff] %vm5006_vm12, %v4969_v59 }
 0x959   : > { %7145 = vrot.lane.b32.xlu1 %v5850_v44, %s8713_s18 }
 0x95b   : > { %v5082_v37 = vpop.permute.xlu1 %5081 }
 0x95c   : > { %5143 = vst.msk [vmem:[#allocation3 + $0x112] sm:$0xff] %vm5119_vm13, %v5082_v37  ;;  %v5416_v37 = vld [vmem:[#allocation3 + $0x150] sm:$0xff] }
 0x95d   : > { %v5407_v43 = vld [vmem:[#allocation3 + $0x108] sm:$0xff] }
 0x95e   : > { %v5438_v62 = vpack.c.bf16 %v5407_v43, %v5406_v63 }
 0x95f   : > { %v5195_v54 = vpop.permute.xlu1 %5194 }
 0x960   : > { %8396 = vmatprep.mubr.msk.bf16.mxu0 %vm2425_vm11, %v5438_v62  ;;  %5256 = vst.msk [vmem:[#allocation3 + $0x111] sm:$0xff] %vm5232_vm15, %v5195_v54  ;;  %v5419_v54 = vld [vmem:[#allocation3 + $0x168] sm:$0xff] }
 0x962   : > { %v8370_v11 = vpop.f32.mrf.mxu0 }
 0x963   : > { %v5308_v55 = vpop.permute.xlu1 %5307  ;;  %v5858_v9 = vrot.slane %v8370_v11, 2  ;;  %v5444_v11 = vpack.c.bf16 %v5419_v54, %v5418_v49 }
 0x964   : > { %5369 = vst.msk [vmem:[#allocation3 + $0x110] sm:$0xff] %vm5345_vm10, %v5308_v55  ;;  %v5624_v58 = vpop.f32.mrf.mxu0  ;;  %v5420_v55 = vld [vmem:[#allocation3 + $0x170] sm:$0xff] }
 0x965   : > { %v5854_v24 = vrot.slane %v5624_v58, 2  ;;  %v5421_v58 = vld [vmem:[#allocation3 + $0x178] sm:$0xff] }
 0x966   : > { %v8371_v3 = vpop.f32.mrf.mxu0 }
 0x967   : > { %v5859_v7 = vrot.slane %v8371_v3, 2  ;;  %v4739_v18 = vpop.permute.xlu1 %4738  ;;  %v13939_v21 = vsel %vm5847_vm4, %v5853_v51, %v5854_v24  ;;  %v5409_v60 = vld [vmem:[#allocation3 + $0x118] sm:$0xff]  ;;  %v5445_v51 = vpack.c.bf16 %v5421_v58, %v5420_v55 }
 0x968   : > { %4804 = vst.msk [vmem:[#allocation3 + $0x128] sm:$0xff] %vm4778_vm8, %v4739_v18  ;;  %v5627_v0 = vpop.f32.mrf.mxu0  ;;  %v15000_v3 = vld [vmem:[#allocation13_spill] sm:$0xff] }
 0x969   : > { %4918 = vst.msk [vmem:[#allocation3 + $0x124] sm:$0xff] %vm4893_vm0, %v13801_v50  ;;  %v5856_v20 = vrot.slane %v5627_v0, 2  ;;  %v13945_v27 = vsel %vm5847_vm4, %v5858_v9, %v5859_v7 }
 0x96b   : > { %v4743_v15 = vpop.permute.xlu1 %4742  ;;  %v5408_v23 = vld [vmem:[#allocation3 + $0x110] sm:$0xff]  ;;  %v13948_v46 = vsel %vm5847_vm4, %v5854_v24, %v5856_v20  ;;  %v14999_v24 = vld [vmem:[#allocation14_spill] sm:$0xff] }
 0x96c   : > { %4806 = vst.msk [vmem:[#allocation3 + $0x140] sm:$0xff] %vm4778_vm8, %v4743_v15  ;;  %v5439_v29 = vpack.c.bf16 %v5409_v60, %v5408_v23  ;;  %v15001_v9 = vpack.c.bf16 %v14999_v24, %v15000_v3 }
 0x96d   : > { %4920 = vst.msk [vmem:[#allocation3 + $0x13c] sm:$0xff] %vm4893_vm0, %v13808_v47 }
 0x96e   : > { %8397 = vmatmul.mubr.msk.bf16.gmra.mxu0 %vm2425_vm11, %v5439_v29 }
 0x96f   : > { %v4860_v12 = vpop.permute.xlu1 %4859 }
 0x970   : > { %4919 = vst.msk [vmem:[#allocation3 + $0x12c] sm:$0xff] %vm4893_vm0, %v4860_v12 }
 0x971   : > { %5032 = vst.msk [vmem:[#allocation3 + $0x12b] sm:$0xff] %vm5006_vm12, %v13816_v45 }
 0x973   : > { %v4971_v50 = vpop.permute.xlu1 %4970 }
 0x974   : > { %5031 = vst.msk [vmem:[#allocation3 + $0x123] sm:$0xff] %vm5006_vm12, %v4971_v50 }
 0x975   : > { %5144 = vst.msk [vmem:[#allocation3 + $0x122] sm:$0xff] %vm5119_vm13, %v13823_v13 }
 0x977   : > { %v8374_v25 = vpop.f32.mrf.mxu0  ;;  %v4975_v57 = vpop.permute.xlu1 %4974 }
 0x978   : > { %5033 = vst.msk [vmem:[#allocation3 + $0x13b] sm:$0xff] %vm5006_vm12, %v4975_v57  ;;  %v5864_v39 = vrot.slane %v8374_v25, 2 }
 0x979   : > { %5146 = vst.msk [vmem:[#allocation3 + $0x13a] sm:$0xff] %vm5119_vm13, %v13830_v28  ;;  %v5640_v47 = vpop.f32.mrf.mxu0 }
 0x97a   : > { %v5861_v14 = vrot.slane %v5640_v47, 2 }
 0x97b   : > { %v8375_v5 = vpop.f32.mrf.mxu0  ;;  %v5086_v52 = vpop.permute.xlu1 %5085 }
 0x97c   : > { %v5866_v53 = vrot.slane %v8375_v5, 2  ;;  %5145 = vst.msk [vmem:[#allocation3 + $0x12a] sm:$0xff] %vm5119_vm13, %v5086_v52  ;;  %v13965_v45 = vsel %vm5847_vm4, %v5859_v7, %v5861_v14  ;;  %v15002_v7 = vld [vmem:[#allocation16_spill] sm:$0xff] }
 0x97d   : > { %5258 = vst.msk [vmem:[#allocation3 + $0x129] sm:$0xff] %vm5232_vm15, %v13837_v22  ;;  %v5643_v13 = vpop.f32.mrf.mxu0 }
 0x97e   : > { %v5863_v32 = vrot.slane %v5643_v13, 2  ;;  %v13970_v40 = vsel %vm5847_vm4, %v5864_v39, %v5866_v53 }
 0x97f   : > { %v5197_v28 = vpop.permute.xlu1 %5196 }
 0x980   : > { %5257 = vst.msk [vmem:[#allocation3 + $0x121] sm:$0xff] %vm5232_vm15, %v5197_v28  ;;  %v13974_v36 = vsel %vm5847_vm4, %v5863_v32, %v5864_v39 }
 0x981   : > { %5370 = vst.msk [vmem:[#allocation3 + $0x120] sm:$0xff] %vm5345_vm10, %v13844_v1 }
 0x983   : > { %v5201_v35 = vpop.permute.xlu1 %5200 }
 0x984   : > { %5259 = vst.msk [vmem:[#allocation3 + $0x139] sm:$0xff] %vm5232_vm15, %v5201_v35  ;;  %v5412_v33 = vld [vmem:[#allocation3 + $0x130] sm:$0xff] }
 0x985   : > { %5372 = vst.msk [vmem:[#allocation3 + $0x138] sm:$0xff] %vm5345_vm10, %v13851_v30 }
 0x987   : > { %v5312_v22 = vpop.permute.xlu1 %5311 }
 0x988   : > { %5371 = vst.msk [vmem:[#allocation3 + $0x128] sm:$0xff] %vm5345_vm10, %v5312_v22  ;;  %v5410_v26 = vld [vmem:[#allocation3 + $0x120] sm:$0xff] }
 0x98b   : > { %v4864_v4 = vpop.permute.xlu1 %4863 }
 0x98c   : > { %4921 = vst.msk [vmem:[#allocation3 + $0x144] sm:$0xff] %vm4893_vm0, %v4864_v4  ;;  %v5413_v34 = vld [vmem:[#allocation3 + $0x138] sm:$0xff] }
 0x98d   : > { %5034 = vst.msk [vmem:[#allocation3 + $0x143] sm:$0xff] %vm5006_vm12, %v13858_v16  ;;  %v5441_v30 = vpack.c.bf16 %v5413_v34, %v5412_v33 }
 0x98f   : > { %v5090_v8 = vpop.permute.xlu1 %5089  ;;  %v5411_v2 = vld [vmem:[#allocation3 + $0x128] sm:$0xff] }
 0x990   : > { %5147 = vst.msk [vmem:[#allocation3 + $0x142] sm:$0xff] %vm5119_vm13, %v5090_v8  ;;  %v5440_v1 = vpack.c.bf16 %v5411_v2, %v5410_v26 }
 0x991   : > { %5260 = vst.msk [vmem:[#allocation3 + $0x141] sm:$0xff] %vm5232_vm15, %v13863_v42 }
 0x992   : > { %8400 = vmatprep.mubr.msk.bf16.mxu0 %vm2425_vm11, %v5440_v1 }
 0x993   : > { %8401 = vmatmul.mubr.msk.bf16.gmra.mxu0 %vm2425_vm11, %v5441_v30  ;;  %v5316_v41 = vpop.permute.xlu1 %5315 }
 0x994   : > { %5373 = vst.msk [vmem:[#allocation3 + $0x140] sm:$0xff] %vm5345_vm10, %v5316_v41 }
 0x996   : > { %v8378_v16 = vpop.f32.mrf.mxu0 }
 0x997   : > { %v4747_v10 = vpop.permute.xlu1 %4746  ;;  %v5871_v59 = vrot.slane %v8378_v16, 2 }
 0x998   : > { %4808 = vst.msk [vmem:[#allocation3 + $0x158] sm:$0xff] %vm4778_vm8, %v4747_v10  ;;  %v5656_v19 = vpop.f32.mrf.mxu0  ;;  %v5415_v6 = vld [vmem:[#allocation3 + $0x148] sm:$0xff] }
 0x999   : > { %v5868_v42 = vrot.slane %v5656_v19, 2 }
 0x99a   : > { %v8379_v17 = vpop.f32.mrf.mxu0 }
 0x99b   : > { %v5414_v56 = vld [vmem:[#allocation3 + $0x140] sm:$0xff]  ;;  %v5873_v20 = vrot.slane %v8379_v17, 2 }
 0x99c   : > { %v5659_v31 = vpop.f32.mrf.mxu0  ;;  %v5442_v38 = vpack.c.bf16 %v5415_v6, %v5414_v56 }
 0x99d   : > { %v5869_v48 = vrot.slane %v5659_v31, 2 }
 0x99e   : > { %8404 = vmatprep.mubr.msk.bf16.mxu0 %vm2425_vm11, %v5442_v38 }
 0x99f   : > { %v5417_v44 = vld [vmem:[#allocation3 + $0x158] sm:$0xff]  ;;  %v13994_v63 = vsel %vm5847_vm4, %v5868_v42, %v5869_v48  ;;  %v13997_v43 = vsel %vm5847_vm4, %v5869_v48, %v5871_v59 }
 0x9a0   : > { %v5443_v62 = vpack.c.bf16 %v5417_v44, %v5416_v37 }
 0x9a2   : > { %8405 = vmatmul.mubr.msk.bf16.gmra.mxu0 %vm2425_vm11, %v5443_v62 }
 0x9a3   : > { %8408 = vmatprep.mubr.msk.bf16.mxu0 %vm2425_vm11, %v5444_v11 }
 0x9aa   : > { %8409 = vmatmul.mubr.msk.bf16.gmra.mxu0 %vm2425_vm11, %v5445_v51  ;;  %vm7434_vm11 = vcmask 261120  }
 0x9ab   : > { %8414 = vmatprep.mubr.msk.bf16.mxu0 %vm399_vm3, %v15001_v9 }
 0x9b2   : > { %8415 = vmatmul.mubr.msk.bf16.vlgmr.msra.gmra.mxu0 %vm399_vm3, %v15002_v7 }
 0x9b6   : > { %v8382_v18 = vpop.f32.mrf.mxu0 }
 0x9b7   : > { %v5878_v60 = vrot.slane %v8382_v18, 2 }
 0x9b8   : > { %v5672_v0 = vpop.f32.mrf.mxu0 }
 0x9b9   : > { %v5874_v15 = vrot.slane %v5672_v0, 2 }
 0x9ba   : > { %v8383_v23 = vpop.f32.mrf.mxu0 }
 0x9bb   : > { %v5879_v29 = vrot.slane %v8383_v23, 2  ;;  %v14009_v12 = vsel %vm5847_vm4, %v5873_v20, %v5874_v15 }
 0x9bc   : > { %v5675_v50 = vpop.f32.mrf.mxu0 }
 0x9bd   : > { %v5876_v25 = vrot.slane %v5675_v50, 2  ;;  %v14012_v57 = vsel %vm5847_vm4, %v5878_v60, %v5879_v29 }
 0x9bf   : > { %v14015_v47 = vsel %vm5847_vm4, %v5874_v15, %v5876_v25 }
 0x9ce   : > { %v8386_v14 = vpop.f32.mrf.mxu0 }
 0x9cf   : > { %v5884_v53 = vrot.slane %v8386_v14, 2 }
 0x9d0   : > { %v5688_v5 = vpop.f32.mrf.mxu0 }
 0x9d1   : > { %v5881_v52 = vrot.slane %v5688_v5, 2 }
 0x9d2   : > { %v8387_v39 = vpop.f32.mrf.mxu0 }
 0x9d3   : > { %v5886_v13 = vrot.slane %v8387_v39, 2  ;;  %v14018_v32 = vsel %vm5847_vm4, %v5879_v29, %v5881_v52 }
 0x9d4   : > { %v5691_v28 = vpop.f32.mrf.mxu0 }
 0x9d5   : > { %v5883_v35 = vrot.slane %v5691_v28, 2  ;;  %v14021_v22 = vsel %vm5847_vm4, %v5884_v53, %v5886_v13 }
 0x9d7   : > { %v14024_v4 = vsel %vm5847_vm4, %v5883_v35, %v5884_v53 }
 0x9f3   : > { %v8390_v34 = vpop.f32.mrf.mxu0 }
 0x9f4   : > { %v5891_v1 = vrot.slane %v8390_v34, 2 }
 0x9f5   : > { %v5704_v8 = vpop.f32.mrf.mxu0 }
 0x9f6   : > { %v5888_v33 = vrot.slane %v5704_v8, 2 }
 0x9f7   : > { %v8391_v26 = vpop.f32.mrf.mxu0 }
 0x9f8   : > { %v5893_v17 = vrot.slane %v8391_v26, 2 }
 0x9f9   : > { %v5707_v2 = vpop.f32.mrf.mxu0 }
 0x9fa   : > { %v5889_v30 = vrot.slane %v5707_v2, 2 }
 0x9fc   : > { %v14027_v41 = vsel %vm5847_vm4, %v5888_v33, %v5889_v30  ;;  %v14030_v16 = vsel %vm5847_vm4, %v5889_v30, %v5891_v1 }
 0xa16   : > { %v8394_v10 = vpop.f32.mrf.mxu0 }
 0xa17   : > { %v5898_v31 = vrot.slane %v8394_v10, 2 }
 0xa18   : > { %v5720_v19 = vpop.f32.mrf.mxu0 }
 0xa19   : > { %v5894_v56 = vrot.slane %v5720_v19, 2 }
 0xa1a   : > { %v8395_v6 = vpop.f32.mrf.mxu0 }
 0xa1b   : > { %v5899_v38 = vrot.slane %v8395_v6, 2  ;;  %v14033_v59 = vsel %vm5847_vm4, %v5893_v17, %v5894_v56 }
 0xa1c   : > { %v5723_v42 = vpop.f32.mrf.mxu0 }
 0xa1d   : > { %v5896_v48 = vrot.slane %v5723_v42, 2  ;;  %v14036_v49 = vsel %vm5847_vm4, %v5898_v31, %v5899_v38 }
 0xa1f   : > { %v14039_v37 = vsel %vm5847_vm4, %v5894_v56, %v5896_v48 }
 0xa2e   : > { %v8398_v44 = vpop.f32.mrf.mxu0 }
 0xa2f   : > { %v5904_v55 = vrot.slane %v8398_v44, 2 }
 0xa30   : > { %v5736_v62 = vpop.f32.mrf.mxu0 }
 0xa31   : > { %v5901_v54 = vrot.slane %v5736_v62, 2 }
 0xa32   : > { %v8399_v11 = vpop.f32.mrf.mxu0 }
 0xa33   : > { %v5906_v58 = vrot.slane %v8399_v11, 2  ;;  %v14042_v51 = vsel %vm5847_vm4, %v5899_v38, %v5901_v54  ;;  %v8420_v11 = vpop.f32.mrf.mxu1 }
 0xa34   : > { %v5739_v24 = vpop.f32.mrf.mxu0 }
 0xa35   : > { %v5903_v3 = vrot.slane %v5739_v24, 2  ;;  %v14045_v9 = vsel %vm5847_vm4, %v5904_v55, %v5906_v58  ;;  %v14096_v24 = vpop.permute.xlu0 %7049 }
 0xa37   : > { %v14048_v7 = vsel %vm5847_vm4, %v5903_v3, %v5904_v55  ;;  %v6938_v55 = vpop.f32.mrf.mxu1  ;;  %v14098_v3 = vpop.permute.xlu1 %7051 }
 0xa39   : > { %v8421_v58 = vpop.f32.mrf.mxu1 }
 0xa53   : > { %v8402_v18 = vpop.f32.mrf.mxu0 }
 0xa54   : > { %v5911_v23 = vrot.slane %v8402_v18, 2 }
 0xa55   : > { %v5752_v0 = vpop.f32.mrf.mxu0 }
 0xa56   : > { %v5908_v60 = vrot.slane %v5752_v0, 2 }
 0xa57   : > { %v8403_v20 = vpop.f32.mrf.mxu0 }
 0xa58   : > { %v5913_v52 = vrot.slane %v8403_v20, 2 }
 0xa59   : > { %v5755_v15 = vpop.f32.mrf.mxu0 }
 0xa5a   : > { %v5909_v29 = vrot.slane %v5755_v15, 2 }
 0xa5c   : > { %v14051_v50 = vsel %vm5847_vm4, %v5908_v60, %v5909_v29  ;;  %v14054_v25 = vsel %vm5847_vm4, %v5909_v29, %v5911_v23 }
 0xa62   : > { %v8406_v14 = vpop.f32.mrf.mxu0 }
 0xa63   : > { %v5918_v13 = vrot.slane %v8406_v14, 2 }
 0xa64   : > { %v5768_v5 = vpop.f32.mrf.mxu0 }
 0xa65   : > { %v5914_v39 = vrot.slane %v5768_v5, 2 }
 0xa66   : > { %v8407_v53 = vpop.f32.mrf.mxu0 }
 0xa67   : > { %v5919_v28 = vrot.slane %v8407_v53, 2  ;;  %v14057_v35 = vsel %vm5847_vm4, %v5913_v52, %v5914_v39 }
 0xa68   : > { %v5771_v34 = vpop.f32.mrf.mxu0 }
 0xa69   : > { %v5916_v8 = vrot.slane %v5771_v34, 2  ;;  %v14060_v26 = vsel %vm5847_vm4, %v5918_v13, %v5919_v28 }
 0xa6a   : > { %v8410_v2 = vpop.f32.mrf.mxu0 }
 0xa6b   : > { %v14063_v1 = vsel %vm5847_vm4, %v5914_v39, %v5916_v8  ;;  %v5924_v19 = vrot.slane %v8410_v2, 2 }
 0xa6c   : > { %v5784_v33 = vpop.f32.mrf.mxu0 }
 0xa6d   : > { %v5921_v30 = vrot.slane %v5784_v33, 2 }
 0xa6e   : > { %v8411_v10 = vpop.f32.mrf.mxu0 }
 0xa6f   : > { %v5926_v17 = vrot.slane %v8411_v10, 2  ;;  %v14066_v56 = vsel %vm5847_vm4, %v5919_v28, %v5921_v30 }
 0xa70   : > { %v5787_v6 = vpop.f32.mrf.mxu0 }
 0xa71   : > { %v5923_v31 = vrot.slane %v5787_v6, 2  ;;  %v14069_v38 = vsel %vm5847_vm4, %v5924_v19, %v5926_v17  ;;  %v15004_v6 = vld [vmem:[#allocation72_spill] sm:$0xff] }
 0xa72   : > { %v8416_v42 = vpop.f32.mrf.mxu0 }
 0xa73   : > { %v14072_v48 = vsel %vm5847_vm4, %v5923_v31, %v5924_v19 }
 0xa74   : > { %v6922_v44 = vpop.f32.mrf.mxu0 }
 0xa75   : > { %7273 = vrot.lane.b32.xlu1 %v6922_v44, %s8714_s19  ;;  %v15005_v44 = vld [vmem:[#allocation18_spill] sm:$0xff] }
 0xa76   : > { %v8417_v62 = vpop.f32.mrf.mxu0 }
 0xa78   : > { %v6925_v54 = vpop.f32.mrf.mxu0 }
 0xa79   : > { %7149 = vrot.lane.b32.xlu1 %v13939_v21, %s8713_s18  ;;  %7275 = vrot.lane.b32.xlu0 %v6925_v54, %s8714_s19  ;;  %v6941_v21 = vpop.f32.mrf.mxu1 }
 0xa7d   : > { %7151 = vrot.lane.b32.xlu1 %v13948_v46, %s8713_s18  ;;  %7277 = vrot.lane.b32.xlu0 %v8416_v42, %s8714_s19  ;;  %v8424_v46 = vpop.f32.mrf.mxu1 }
 0xa81   : > { %7153 = vrot.lane.b32.xlu1 %v13945_v27, %s8713_s18  ;;  %7279 = vrot.lane.b32.xlu0 %v8417_v62, %s8714_s19  ;;  %v6954_v27 = vpop.f32.mrf.mxu1  ;;  %v7369_v62 = vsel %vm399_vm3, %v15005_v44, %v14096_v24 }
 0xa85   : > { %7155 = vrot.lane.b32.xlu1 %v13965_v45, %s8713_s18  ;;  %7281 = vrot.lane.b32.xlu0 %v6938_v55, %s8714_s19  ;;  %v8425_v45 = vpop.f32.mrf.mxu1 }
 0xa89   : > { %7157 = vrot.lane.b32.xlu1 %v13974_v36, %s8713_s18  ;;  %7283 = vrot.lane.b32.xlu0 %v6941_v21, %s8714_s19  ;;  %v6957_v36 = vpop.f32.mrf.mxu1  ;;  %v15007_v21 = vld [vmem:[#allocation43_spill] sm:$0xff] }
 0xa8b   : > { %v8428_v18 = vpop.f32.mrf.mxu1 }
 0xa8d   : > { %7159 = vrot.lane.b32.xlu1 %v13970_v40, %s8713_s18  ;;  %7285 = vrot.lane.b32.xlu0 %v8420_v11, %s8714_s19  ;;  %v14106_v40 = vpop.permute.xlu0 %7053  ;;  %v6970_v0 = vpop.f32.mrf.mxu1 }
 0xa91   : > { %7161 = vrot.lane.b32.xlu1 %v13994_v63, %s8713_s18  ;;  %7287 = vrot.lane.b32.xlu0 %v8421_v58, %s8714_s19  ;;  %v14108_v63 = vpop.permute.xlu1 %7055 }
 0xa95   : > { %7163 = vrot.lane.b32.xlu1 %v13997_v43, %s8713_s18  ;;  %7289 = vrot.lane.b32.xlu0 %v6954_v27, %s8714_s19  ;;  %v14113_v43 = vpop.permute.xlu0 %7057  ;;  %v14115_v20 = vpop.permute.xlu1 %7059 }
 0xa99   : > { %7165 = vrot.lane.b32.xlu1 %v14009_v12, %s8713_s18  ;;  %7291 = vrot.lane.b32.xlu0 %v6957_v36, %s8714_s19  ;;  %v8429_v12 = vpop.f32.mrf.mxu1  ;;  %v14123_v15 = vpop.permute.xlu0 %7061 }
 0xa9b   : > { %v6973_v23 = vpop.f32.mrf.mxu1 }
 0xa9d   : > { %7167 = vrot.lane.b32.xlu1 %v14015_v47, %s8713_s18  ;;  %7293 = vrot.lane.b32.xlu0 %v8424_v46, %s8714_s19  ;;  %v14125_v47 = vpop.permute.xlu1 %7063  ;;  %v8432_v60 = vpop.f32.mrf.mxu1  ;;  %v7370_v46 = vsel %vm399_vm3, %v15007_v21, %v14098_v3 }
 0xaa1   : > { %7169 = vrot.lane.b32.xlu1 %v14012_v57, %s8713_s18  ;;  %7295 = vrot.lane.b32.xlu0 %v8425_v45, %s8714_s19  ;;  %v14130_v57 = vpop.permute.xlu0 %7065  ;;  %v14132_v29 = vpop.permute.xlu1 %7067 }
 0xaa5   : > { %7171 = vrot.lane.b32.xlu1 %v14018_v32, %s8713_s18  ;;  %7297 = vrot.lane.b32.xlu0 %v6970_v0, %s8714_s19  ;;  %v6986_v32 = vpop.f32.mrf.mxu1  ;;  %v14140_v14 = vpop.permute.xlu0 %7069 }
 0xaa7   : > { %v8433_v5 = vpop.f32.mrf.mxu1 }
 0xaa9   : > { %7173 = vrot.lane.b32.xlu1 %v14024_v4, %s8713_s18  ;;  %7299 = vrot.lane.b32.xlu0 %v6973_v23, %s8714_s19  ;;  %v14142_v4 = vpop.permute.xlu1 %7071  ;;  %v6989_v52 = vpop.f32.mrf.mxu1 }
 0xaad   : > { %7175 = vrot.lane.b32.xlu1 %v14021_v22, %s8713_s18  ;;  %7301 = vrot.lane.b32.xlu0 %v8428_v18, %s8714_s19  ;;  %v14147_v22 = vpop.permute.xlu0 %7073  ;;  %v14149_v39 = vpop.permute.xlu1 %7075 }
 0xab1   : > { %7177 = vrot.lane.b32.xlu1 %v14027_v41, %s8713_s18  ;;  %7303 = vrot.lane.b32.xlu0 %v8429_v12, %s8714_s19  ;;  %v8436_v41 = vpop.f32.mrf.mxu1  ;;  %v14157_v53 = vpop.permute.xlu0 %7077  ;;  %v15008_v12 = vld [vmem:[#allocation17_spill] sm:$0xff] }
 0xab2   : > { %v7371_v23 = vsel %vm399_vm3, %v15008_v12, %v14106_v40 }
 0xab3   : > { %v7002_v13 = vpop.f32.mrf.mxu1 }
 0xab5   : > { %7179 = vrot.lane.b32.xlu1 %v14030_v16, %s8713_s18  ;;  %7305 = vrot.lane.b32.xlu0 %v6986_v32, %s8714_s19  ;;  %v14159_v16 = vpop.permute.xlu1 %7079  ;;  %v8437_v28 = vpop.f32.mrf.mxu1  ;;  %v15009_v32 = vld [vmem:[#allocation76_spill] sm:$0xff] }
 0xab9   : > { %7181 = vrot.lane.b32.xlu1 %v14033_v59, %s8713_s18  ;;  %7307 = vrot.lane.b32.xlu0 %v6989_v52, %s8714_s19  ;;  %v14164_v59 = vpop.permute.xlu0 %7081  ;;  %v14166_v34 = vpop.permute.xlu1 %7083 }
 0xabd   : > { %7183 = vrot.lane.b32.xlu1 %v14039_v37, %s8713_s18  ;;  %7309 = vrot.lane.b32.xlu0 %v8432_v60, %s8714_s19  ;;  %v7005_v37 = vpop.f32.mrf.mxu1  ;;  %v14174_v8 = vpop.permute.xlu0 %7085 }
 0xabf   : > { %v8440_v2 = vpop.f32.mrf.mxu1 }
 0xac1   : > { %7185 = vrot.lane.b32.xlu1 %v14036_v49, %s8713_s18  ;;  %7311 = vrot.lane.b32.xlu0 %v8433_v5, %s8714_s19  ;;  %v14176_v49 = vpop.permute.xlu1 %7087  ;;  %v7018_v33 = vpop.f32.mrf.mxu1 }
 0xac5   : > { %7187 = vrot.lane.b32.xlu1 %v14042_v51, %s8713_s18  ;;  %7313 = vrot.lane.b32.xlu0 %v7002_v13, %s8714_s19  ;;  %v14181_v51 = vpop.permute.xlu0 %7089  ;;  %v14183_v30 = vpop.permute.xlu1 %7091 }
 0xac9   : > { %7189 = vrot.lane.b32.xlu1 %v14048_v7, %s8713_s18  ;;  %7315 = vrot.lane.b32.xlu0 %v7005_v37, %s8714_s19  ;;  %v8441_v7 = vpop.f32.mrf.mxu1  ;;  %v14191_v10 = vpop.permute.xlu0 %7093 }
 0xacb   : > { %v7021_v19 = vpop.f32.mrf.mxu1 }
 0xacd   : > { %7191 = vrot.lane.b32.xlu1 %v14045_v9, %s8713_s18  ;;  %7317 = vrot.lane.b32.xlu0 %v8436_v41, %s8714_s19  ;;  %v14193_v9 = vpop.permute.xlu1 %7095  ;;  %v14198_v17 = vpop.permute.xlu0 %7097 }
 0xace   : > { %v8444_v42 = vpop.f32.mrf.mxu1 }
 0xad1   : > { %7193 = vrot.lane.b32.xlu1 %v14051_v50, %s8713_s18  ;;  %7319 = vrot.lane.b32.xlu0 %v8437_v28, %s8714_s19  ;;  %v14200_v50 = vpop.permute.xlu1 %7099  ;;  %v14209_v31 = vpop.permute.xlu0 %7101 }
 0xad5   : > { %7195 = vrot.lane.b32.xlu1 %v14054_v25, %s8713_s18  ;;  %7321 = vrot.lane.b32.xlu0 %v7018_v33, %s8714_s19  ;;  %v15003_v25 = vld [vmem:[#allocation73_spill] sm:$0xff]  ;;  %v7148_v54 = vpop.permute.xlu0 %7147 }
 0xad6   : > { %v7403_v27 = vsel %vm7401_vm14, %v7370_v46, %v7148_v54 }
 0xad9   : > { %7197 = vrot.lane.b32.xlu1 %v14057_v35, %s8713_s18  ;;  %7323 = vrot.lane.b32.xlu0 %v7021_v19, %s8714_s19  ;;  %v7146_v35 = vpop.permute.xlu1 %7145 }
 0xada   : > { %v7402_v11 = vsel %vm7401_vm14, %v7369_v62, %v7146_v35 }
 0xadd   : > { %7325 = vrot.lane.b32.xlu1 %v8440_v2, %s8714_s19  ;;  %7103 = vrot.lane.b32.xlu0 %v15003_v25, %s8710_s13 }
 0xae1   : > { %7105 = vrot.lane.b32.xlu1 %v15004_v6, %s8710_s13  ;;  %7199 = vrot.lane.b32.xlu0 %v14063_v1, %s8713_s18  ;;  %v7034_v1 = vpop.f32.mrf.mxu1 }
 0xae3   : > { %v8445_v18 = vpop.f32.mrf.mxu1 }
 0xae5   : > { %7201 = vrot.lane.b32.xlu1 %v14060_v26, %s8713_s18  ;;  %7327 = vrot.lane.b32.xlu0 %v8441_v7, %s8714_s19  ;;  %v15006_v26 = vld [vmem:[#allocation74_spill] sm:$0xff]  ;;  %v7037_v2 = vpop.f32.mrf.mxu1 }
 0xae7   : > { %v7274_v55 = vpop.permute.xlu1 %7273 }
 0xae8   : > { %v7435_v58 = vsel %vm7434_vm11, %v7402_v11, %v7274_v55  ;;  %v15011_v11 = vld [vmem:[#allocation45_spill] sm:$0xff] }
 0xae9   : > { %7329 = vrot.lane.b32.xlu1 %v7034_v1, %s8714_s19  ;;  %7107 = vrot.lane.b32.xlu0 %v15006_v26, %s8710_s13  ;;  %v7468_v45 = vsel %vm7467_vm2, %v7435_v58, 0.0  ;;  %v7373_v55 = vsel %vm399_vm3, %v15011_v11, %v14113_v43 }
 0xaea   : > { %v7697_v3 = vmul.f32 %v7468_v45, %v7468_v45 }
 0xaeb   : > { %v7276_v24 = vpop.permute.xlu0 %7275  ;;  %v7150_v36 = vpop.permute.xlu1 %7149 }
 0xaec   : > { %v7436_v0 = vsel %vm7434_vm11, %v7403_v27, %v7276_v24  ;;  %v7404_v13 = vsel %vm7401_vm14, %v7371_v23, %v7150_v36 }
 0xaed   : > { %v7469_v60 = vsel %vm7467_vm2, %v7436_v0, 0.0  ;;  %7109 = vrot.lane.b32.xlu1 %v15009_v32, %s8710_s13  ;;  %7203 = vrot.lane.b32.xlu0 %v14066_v56, %s8713_s18  ;;  %v15010_v56 = vld [vmem:[#allocation19_spill] sm:$0xff] }
 0xaee   : > { %v8072_v5 = vpack.c.bf16 %v7469_v60, %v7468_v45  ;;  %v7660_v52 = vadd.f32 %v7469_v60, %v7468_v45  ;;  %v7698_v41 = vmul.f32 %v7469_v60, %v7469_v60  ;;  %v7372_v19 = vsel %vm399_vm3, %v15010_v56, %v14108_v63 }
 0xaef   : > { %v7278_v28 = vpop.permute.xlu0 %7277  ;;  %v7152_v37 = vpop.permute.xlu1 %7151 }
 0xaf0   : > { %8073 = vst [vmem:[%s14241_s10] sm:$0xff] %v8072_v5   ;;  %v7729_v40 = vadd.f32 %v7698_v41, %v7697_v3  ;;  %v7437_v33 = vsel %vm7434_vm11, %v7404_v13, %v7278_v28  ;;  %v7405_v35 = vsel %vm7401_vm14, %v7372_v19, %v7152_v37  ;;  %v15015_v19 = vld [vmem:[#allocation46_spill] sm:$0xff] }
 0xaf1   : > { %v7470_v7 = vsel %vm7467_vm2, %v7437_v33, 0.0  ;;  %7331 = vrot.lane.b32.xlu0 %v7037_v2, %s8714_s19  ;;  %7205 = vrot.lane.b32.xlu1 %v14072_v48, %s8713_s18  ;;  %v15012_v48 = vld [vmem:[#allocation75_spill] sm:$0xff] }
 0xaf2   : > { %v7661_v25 = vadd.f32 %v7660_v52, %v7470_v7  ;;  %v7699_v6 = vmul.f32 %v7470_v7, %v7470_v7 }
 0xaf3   : > { %v7280_v44 = vpop.permute.xlu0 %7279  ;;  %v7154_v62 = vpop.permute.xlu1 %7153 }
 0xaf4   : > { %v7438_v54 = vsel %vm7434_vm11, %v7405_v35, %v7280_v44  ;;  %v7730_v63 = vadd.f32 %v7729_v40, %v7699_v6  ;;  %v7406_v46 = vsel %vm7401_vm14, %v7373_v55, %v7154_v62 }
 0xaf5   : > { %v7471_v1 = vsel %vm7467_vm2, %v7438_v54, 0.0  ;;  %7111 = vrot.lane.b32.xlu0 %v15012_v48, %s8710_s13  ;;  %7333 = vrot.lane.b32.xlu1 %v8444_v42, %s8714_s19  ;;  %v15013_v42 = vld [vmem:[#allocation47_spill] sm:$0xff]  ;;  %s8068_s13 = sshll.u32 %s8802_s9, 11 }
 0xaf6   : > { %v8077_v58 = vpack.c.bf16 %v7471_v1, %v7470_v7  ;;  %v7662_v26 = vadd.f32 %v7661_v25, %v7471_v1  ;;  %v7700_v21 = vmul.f32 %v7471_v1, %v7471_v1  ;;  %v7374_v0 = vsel %vm399_vm3, %v15013_v42, %v14115_v20  ;;  %v15016_v1 = vld [vmem:[#allocation49_spill] sm:$0xff]  ;;  %s14443_s12 = scalar_lea.hbm %s14521_s7, %s8068_s13 }
 0xaf7   : > { %v7282_v27 = vpop.permute.xlu0 %7281  ;;  %v7156_v45 = vpop.permute.xlu1 %7155  ;;  %v7376_v25 = vsel %vm399_vm3, %v15015_v19, %v14125_v47  ;;  %v7377_v48 = vsel %vm399_vm3, %v15016_v1, %v14130_v57 }
 0xaf8   : > { %8149 = vst [vmem:[%s14241_s10 + $0x8] sm:$0xff] %v8077_v58   ;;  %v7731_v24 = vadd.f32 %v7730_v63, %v7700_v21  ;;  %v7439_v36 = vsel %vm7434_vm11, %v7406_v46, %v7282_v27  ;;  %v7407_v60 = vsel %vm7401_vm14, %v7374_v0, %v7156_v45 }
 0xaf9   : > { %v7472_v43 = vsel %vm7467_vm2, %v7439_v36, 0.0  ;;  %7207 = vrot.lane.b32.xlu0 %v14069_v38, %s8713_s18  ;;  %7335 = vrot.lane.b32.xlu1 %v8445_v18, %s8714_s19  ;;  %v15014_v38 = vld [vmem:[#allocation44_spill] sm:$0xff]  ;;  %v15017_v36 = vld [vmem:[#allocation51_spill] sm:$0xff]  ;;  %s7787_s18 = sshll.u32 %s14241_s10, 4  ;;  %s14445_s18 = int_to_ptr.vmem [resolvable:$true] %s7787_s18 }
 0xafa   : > { %v7663_v12 = vadd.f32 %v7662_v26, %v7472_v43  ;;  %v7701_v23 = vmul.f32 %v7472_v43, %v7472_v43  ;;  %v7375_v18 = vsel %vm399_vm3, %v15014_v38, %v14123_v15  ;;  %s8617_s24 = scalar_lea.vmem %s14445_s18, 2048  ;;  %p8624_p0 = scmp.lt.s32.totalorder %s14445_s18, %s8622_s20 }
 0xafb   : > { %v7284_v32 = vpop.permute.xlu0 %7283  ;;  %v7158_v3 = vpop.permute.xlu1 %7157  ;;  %p8618_p11 = scmp.ne.s32.totalorder %s14445_s18, %s8617_s24  ;;  %p8625_p1 = scmp.lt.s32.totalorder %s8623_s17, %s8617_s24 }
 0xafc   : > { %v7732_v5 = vadd.f32 %v7731_v24, %v7701_v23  ;;  %v7440_v52 = vsel %vm7434_vm11, %v7407_v60, %v7284_v32  ;;  %v7408_v20 = vsel %vm7401_vm14, %v7375_v18, %v7158_v3 }
 0xafd   : > { %v7473_v41 = vsel %vm7467_vm2, %v7440_v52, 0.0  ;;  %p8619_p12 = pnand %p8618_p11, %p8819_p5  ;;  %p8626_p2 = por %p8625_p1, %p8624_p0 }
 0xafe   : > { %v8082_v13 = vpack.c.bf16 %v7473_v41, %v7472_v43  ;;  %v7664_v28 = vadd.f32 %v7663_v12, %v7473_v41  ;;  %v7702_v37 = vmul.f32 %v7473_v41, %v7473_v41  ;;  %v7378_v43 = vsel %vm399_vm3, %v15017_v36, %v14132_v29 }
 0xaff   : > { %v7286_v2 = vpop.permute.xlu0 %7285  ;;  %v7160_v40 = vpop.permute.xlu1 %7159  ;;  %p8620_p13 = pneg %p8619_p12 }
 0xb00   : > { %8150 = vst [vmem:[%s14241_s10 + $0x10] sm:$0xff] %v8082_v13   ;;  %v7733_v33 = vadd.f32 %v7732_v5, %v7702_v37  ;;  %v7441_v7 = vsel %vm7434_vm11, %v7408_v20, %v7286_v2  ;;  %v7409_v35 = vsel %vm7401_vm14, %v7376_v25, %v7160_v40  ;;  %v15018_v5 = vld [vmem:[#allocation48_spill] sm:$0xff]  ;;  %v15019_v40 = vld [vmem:[#allocation50_spill] sm:$0xff] }
 0xb01   : > { %v7474_v56 = vsel %vm7467_vm2, %v7441_v7, 0.0  ;;  %v7379_v52 = vsel %vm399_vm3, %v15018_v5, %v14140_v14  ;;  %p8627_p3 = pnand %p8626_p2, %p8620_p13 }
 0xb02   : > { %v7665_v6 = vadd.f32 %v7664_v28, %v7474_v56  ;;  %v7703_v15 = vmul.f32 %v7474_v56, %v7474_v56 }
 0xb03   : > { %v7288_v44 = vpop.permute.xlu0 %7287  ;;  %v7162_v62 = vpop.permute.xlu1 %7161 }
 0xb04   : > { %v7734_v54 = vadd.f32 %v7733_v33, %v7703_v15  ;;  %v7442_v11 = vsel %vm7434_vm11, %v7409_v35, %v7288_v44  ;;  %v7410_v47 = vsel %vm7401_vm14, %v7377_v48, %v7162_v62  ;;  %v7380_v33 = vsel %vm399_vm3, %v15019_v40, %v14142_v4  ;;  %v15020_v44 = vld [vmem:[#allocation53_spill] sm:$0xff] }
 0xb05   : > { %v7475_v55 = vsel %vm7467_vm2, %v7442_v11, 0.0  ;;  %v7381_v62 = vsel %vm399_vm3, %v15020_v44, %v14147_v22 }
 0xb06   : > { %v8087_v63 = vpack.c.bf16 %v7475_v55, %v7474_v56  ;;  %v7666_v58 = vadd.f32 %v7665_v6, %v7475_v55  ;;  %v7704_v26 = vmul.f32 %v7475_v55, %v7475_v55 }
 0xb07   : > { %v7290_v21 = vpop.permute.xlu0 %7289  ;;  %v7164_v46 = vpop.permute.xlu1 %7163 }
 0xb08   : > { %8151 = vst [vmem:[%s14241_s10 + $0x18] sm:$0xff] %v8087_v63   ;;  %v7735_v27 = vadd.f32 %v7734_v54, %v7704_v26  ;;  %v7443_v45 = vsel %vm7434_vm11, %v7410_v47, %v7290_v21  ;;  %v7411_v0 = vsel %vm7401_vm14, %v7378_v43, %v7164_v46  ;;  %v15021_v47 = vld [vmem:[#allocation55_spill] sm:$0xff] }
 0xb09   : > { %v7476_v24 = vsel %vm7467_vm2, %v7443_v45, 0.0  ;;  %v7382_v21 = vsel %vm399_vm3, %v15021_v47, %v14149_v39 }
 0xb0a   : > { %v7667_v42 = vadd.f32 %v7666_v58, %v7476_v24  ;;  %v7705_v57 = vmul.f32 %v7476_v24, %v7476_v24 }
 0xb0b   : > { %v7292_v12 = vpop.permute.xlu0 %7291  ;;  %v7166_v23 = vpop.permute.xlu1 %7165 }
 0xb0c   : > { %v7736_v60 = vadd.f32 %v7735_v27, %v7705_v57  ;;  %v7444_v32 = vsel %vm7434_vm11, %v7411_v0, %v7292_v12  ;;  %v7412_v29 = vsel %vm7401_vm14, %v7379_v52, %v7166_v23  ;;  %v15022_v57 = vld [vmem:[#allocation52_spill] sm:$0xff] }
 0xb0d   : > { %v7477_v3 = vsel %vm7467_vm2, %v7444_v32, 0.0  ;;  %v7383_v0 = vsel %vm399_vm3, %v15022_v57, %v14157_v53 }
 0xb0e   : > { %v8092_v41 = vpack.c.bf16 %v7477_v3, %v7476_v24  ;;  %v7668_v38 = vadd.f32 %v7667_v42, %v7477_v3  ;;  %v7706_v18 = vmul.f32 %v7477_v3, %v7477_v3 }
 0xb0f   : > { %v7294_v13 = vpop.permute.xlu0 %7293  ;;  %v7168_v28 = vpop.permute.xlu1 %7167 }
 0xb10   : > { %8152 = vst [vmem:[%s14241_s10 + $0x20] sm:$0xff] %v8092_v41   ;;  %v7737_v37 = vadd.f32 %v7736_v60, %v7706_v18  ;;  %v7445_v20 = vsel %vm7434_vm11, %v7412_v29, %v7294_v13  ;;  %v7413_v56 = vsel %vm7401_vm14, %v7380_v33, %v7168_v28  ;;  %v15024_v33 = vld [vmem:[#allocation57_spill] sm:$0xff] }
 0xb11   : > { %v7478_v2 = vsel %vm7467_vm2, %v7445_v20, 0.0 }
 0xb12   : > { %v7669_v7 = vadd.f32 %v7668_v38, %v7478_v2  ;;  %v7707_v14 = vmul.f32 %v7478_v2, %v7478_v2  ;;  %v15023_v38 = vld [vmem:[#allocation54_spill] sm:$0xff] }
 0xb13   : > { %v7296_v19 = vpop.permute.xlu0 %7295  ;;  %v7170_v25 = vpop.permute.xlu1 %7169  ;;  %v7384_v18 = vsel %vm399_vm3, %v15023_v38, %v14159_v16 }
 0xb14   : > { %v7738_v6 = vadd.f32 %v7737_v37, %v7707_v14  ;;  %v7446_v15 = vsel %vm7434_vm11, %v7413_v56, %v7296_v19  ;;  %v7414_v4 = vsel %vm7401_vm14, %v7381_v62, %v7170_v25  ;;  %v15025_v62 = vld [vmem:[#allocation59_spill] sm:$0xff] }
 0xb15   : > { %v7479_v35 = vsel %vm7467_vm2, %v7446_v15, 0.0 }
 0xb16   : > { %v8097_v54 = vpack.c.bf16 %v7479_v35, %v7478_v2  ;;  %v7670_v11 = vadd.f32 %v7669_v7, %v7479_v35  ;;  %v7708_v55 = vmul.f32 %v7479_v35, %v7479_v35  ;;  %v7385_v7 = vsel %vm399_vm3, %v15024_v33, %v14164_v59 }
 0xb17   : > { %v7298_v1 = vpop.permute.xlu0 %7297  ;;  %v7172_v48 = vpop.permute.xlu1 %7171 }
 0xb18   : > { %8153 = vst [vmem:[%s14241_s10 + $0x28] sm:$0xff] %v8097_v54   ;;  %v7739_v63 = vadd.f32 %v7738_v6, %v7708_v55  ;;  %v7447_v58 = vsel %vm7434_vm11, %v7414_v4, %v7298_v1  ;;  %v7415_v27 = vsel %vm7401_vm14, %v7382_v21, %v7172_v48  ;;  %v7386_v54 = vsel %vm399_vm3, %v15025_v62, %v14166_v34 }
 0xb19   : > { %v7480_v26 = vsel %vm7467_vm2, %v7447_v58, 0.0 }
 0xb1a   : > { %v7671_v46 = vadd.f32 %v7670_v11, %v7480_v26  ;;  %v7709_v22 = vmul.f32 %v7480_v26, %v7480_v26 }
 0xb1b   : > { %v7300_v45 = vpop.permute.xlu0 %7299  ;;  %v7174_v24 = vpop.permute.xlu1 %7173 }
 0xb1c   : > { %v7740_v36 = vadd.f32 %v7739_v63, %v7709_v22  ;;  %v7448_v43 = vsel %vm7434_vm11, %v7415_v27, %v7300_v45  ;;  %v7416_v39 = vsel %vm7401_vm14, %v7383_v0, %v7174_v24 }
 0xb1d   : > { %v7481_v42 = vsel %vm7467_vm2, %v7448_v43, 0.0 }
 0xb1e   : > { %v8102_v12 = vpack.c.bf16 %v7481_v42, %v7480_v26  ;;  %v7672_v23 = vadd.f32 %v7671_v46, %v7481_v42  ;;  %v7710_v60 = vmul.f32 %v7481_v42, %v7481_v42  ;;  %v15026_v26 = vld [vmem:[#allocation56_spill] sm:$0xff]  ;;  %v15027_v42 = vld [vmem:[#allocation58_spill] sm:$0xff] }
 0xb1f   : > { %v7302_v32 = vpop.permute.xlu0 %7301  ;;  %v7176_v3 = vpop.permute.xlu1 %7175  ;;  %v7387_v47 = vsel %vm399_vm3, %v15026_v26, %v14174_v8  ;;  %v7388_v57 = vsel %vm399_vm3, %v15027_v42, %v14176_v49 }
 0xb20   : > { %8154 = vst [vmem:[%s14241_s10 + $0x30] sm:$0xff] %v8102_v12   ;;  %v7741_v5 = vadd.f32 %v7740_v36, %v7710_v60  ;;  %v7449_v52 = vsel %vm7434_vm11, %v7416_v39, %v7302_v32  ;;  %v7417_v13 = vsel %vm7401_vm14, %v7384_v18, %v7176_v3 }
 0xb21   : > { %v7482_v41 = vsel %vm7467_vm2, %v7449_v52, 0.0 }
 0xb22   : > { %v7673_v29 = vadd.f32 %v7672_v23, %v7482_v41  ;;  %v7711_v53 = vmul.f32 %v7482_v41, %v7482_v41 }
 0xb23   : > { %v7304_v28 = vpop.permute.xlu0 %7303  ;;  %v7178_v37 = vpop.permute.xlu1 %7177 }
 0xb24   : > { %v7742_v20 = vadd.f32 %v7741_v5, %v7711_v53  ;;  %v7450_v2 = vsel %vm7434_vm11, %v7417_v13, %v7304_v28  ;;  %v7418_v16 = vsel %vm7401_vm14, %v7385_v7, %v7178_v37  ;;  %v15028_v5 = vld [vmem:[#allocation61_spill] sm:$0xff] }
 0xb25   : > { %v7483_v40 = vsel %vm7467_vm2, %v7450_v2, 0.0  ;;  %v7389_v52 = vsel %vm399_vm3, %v15028_v5, %v14181_v51 }
 0xb26   : > { %v8107_v14 = vpack.c.bf16 %v7483_v40, %v7482_v41  ;;  %v7674_v56 = vadd.f32 %v7673_v29, %v7483_v40  ;;  %v7712_v19 = vmul.f32 %v7483_v40, %v7483_v40 }
 0xb27   : > { %v7306_v25 = vpop.permute.xlu0 %7305  ;;  %v7180_v6 = vpop.permute.xlu1 %7179 }
 0xb28   : > { %8155 = vst [vmem:[%s14241_s10 + $0x38] sm:$0xff] %v8107_v14   ;;  %v7743_v15 = vadd.f32 %v7742_v20, %v7712_v19  ;;  %v7451_v35 = vsel %vm7434_vm11, %v7418_v16, %v7306_v25  ;;  %v7419_v55 = vsel %vm7401_vm14, %v7386_v54, %v7180_v6  ;;  %v15029_v20 = vld [vmem:[#allocation63_spill] sm:$0xff]  ;;  %v15030_v25 = vld [vmem:[#allocation60_spill] sm:$0xff] }
 0xb29   : > { %v7484_v44 = vsel %vm7467_vm2, %v7451_v35, 0.0  ;;  %v7390_v2 = vsel %vm399_vm3, %v15029_v20, %v14183_v30  ;;  %v7391_v6 = vsel %vm399_vm3, %v15030_v25, %v14191_v10 }
 0xb2a   : > { %v7675_v11 = vadd.f32 %v7674_v56, %v7484_v44  ;;  %v7713_v59 = vmul.f32 %v7484_v44, %v7484_v44 }
 0xb2b   : > { %v7308_v4 = vpop.permute.xlu0 %7307  ;;  %v7182_v1 = vpop.permute.xlu1 %7181 }
 0xb2c   : > { %v7744_v48 = vadd.f32 %v7743_v15, %v7713_v59  ;;  %v7452_v63 = vsel %vm7434_vm11, %v7419_v55, %v7308_v4  ;;  %v7420_v34 = vsel %vm7401_vm14, %v7387_v47, %v7182_v1  ;;  %v15031_v4 = vld [vmem:[#allocation62_spill] sm:$0xff] }
 0xb2d   : > { %v7485_v58 = vsel %vm7467_vm2, %v7452_v63, 0.0  ;;  %v7392_v1 = vsel %vm399_vm3, %v15031_v4, %v14193_v9 }
 0xb2e   : > { %v8112_v21 = vpack.c.bf16 %v7485_v58, %v7484_v44  ;;  %v7676_v46 = vadd.f32 %v7675_v11, %v7485_v58  ;;  %v7714_v22 = vmul.f32 %v7485_v58, %v7485_v58 }
 0xb2f   : > { %v7310_v27 = vpop.permute.xlu0 %7309  ;;  %v7184_v45 = vpop.permute.xlu1 %7183 }
 0xb30   : > { %8156 = vst [vmem:[%s14241_s10 + $0x40] sm:$0xff] %v8112_v21   ;;  %v7745_v24 = vadd.f32 %v7744_v48, %v7714_v22  ;;  %v7453_v36 = vsel %vm7434_vm11, %v7420_v34, %v7310_v27  ;;  %v7421_v12 = vsel %vm7401_vm14, %v7388_v57, %v7184_v45  ;;  %v15032_v22 = vld [vmem:[#allocation65_spill] sm:$0xff] }
 0xb31   : > { %v7486_v43 = vsel %vm7467_vm2, %v7453_v36, 0.0  ;;  %v7393_v34 = vsel %vm399_vm3, %v15032_v22, %v14198_v17 }
 0xb32   : > { %v7677_v0 = vadd.f32 %v7676_v46, %v7486_v43  ;;  %v7715_v8 = vmul.f32 %v7486_v43, %v7486_v43 }
 0xb33   : > { %v7312_v23 = vpop.permute.xlu0 %7311  ;;  %v7186_v60 = vpop.permute.xlu1 %7185 }
 0xb34   : > { %v7746_v39 = vadd.f32 %v7745_v24, %v7715_v8  ;;  %v7454_v32 = vsel %vm7434_vm11, %v7421_v12, %v7312_v23  ;;  %v7422_v49 = vsel %vm7401_vm14, %v7389_v52, %v7186_v60  ;;  %v15033_v8 = vld [vmem:[#allocation67_spill] sm:$0xff] }
 0xb35   : > { %v7487_v3 = vsel %vm7467_vm2, %v7454_v32, 0.0  ;;  %v7394_v12 = vsel %vm399_vm3, %v15033_v8, %v14200_v50 }
 0xb36   : > { %v8117_v41 = vpack.c.bf16 %v7487_v3, %v7486_v43  ;;  %v7678_v38 = vadd.f32 %v7677_v0, %v7487_v3  ;;  %v7716_v18 = vmul.f32 %v7487_v3, %v7487_v3 }
 0xb37   : > { %v7314_v29 = vpop.permute.xlu0 %7313  ;;  %v7188_v53 = vpop.permute.xlu1 %7187 }
 0xb38   : > { %8157 = vst [vmem:[%s14241_s10 + $0x48] sm:$0xff] %v8117_v41   ;;  %v7747_v13 = vadd.f32 %v7746_v39, %v7716_v18  ;;  %v7455_v28 = vsel %vm7434_vm11, %v7422_v49, %v7314_v29  ;;  %v7423_v33 = vsel %vm7401_vm14, %v7390_v2, %v7188_v53  ;;  %v15035_v2 = vld [vmem:[#allocation66_spill] sm:$0xff] }
 0xb39   : > { %v7488_v37 = vsel %vm7467_vm2, %v7455_v28, 0.0  ;;  %v15034_v28 = vld [vmem:[#allocation64_spill] sm:$0xff] }
 0xb3a   : > { %v7679_v40 = vadd.f32 %v7678_v38, %v7488_v37  ;;  %v7717_v51 = vmul.f32 %v7488_v37, %v7488_v37 }
 0xb3b   : > { %v7316_v7 = vpop.permute.xlu0 %7315  ;;  %v7190_v14 = vpop.permute.xlu1 %7189 }
 0xb3c   : > { %v7748_v56 = vadd.f32 %v7747_v13, %v7717_v51  ;;  %v7456_v19 = vsel %vm7434_vm11, %v7423_v33, %v7316_v7  ;;  %v7424_v30 = vsel %vm7401_vm14, %v7391_v6, %v7190_v14 }
 0xb3d   : > { %v7489_v16 = vsel %vm7467_vm2, %v7456_v19, 0.0 }
 0xb3e   : > { %v8122_v15 = vpack.c.bf16 %v7489_v16, %v7488_v37  ;;  %v7680_v35 = vadd.f32 %v7679_v40, %v7489_v16  ;;  %v7718_v44 = vmul.f32 %v7489_v16, %v7489_v16  ;;  %v7395_v37 = vsel %vm399_vm3, %v15034_v28, %v14209_v31 }
 0xb3f   : > { %v7318_v62 = vpop.permute.xlu0 %7317  ;;  %v7192_v54 = vpop.permute.xlu1 %7191 }
 0xb40   : > { %8158 = vst [vmem:[%s14241_s10 + $0x50] sm:$0xff] %v8122_v15   ;;  %v7749_v11 = vadd.f32 %v7748_v56, %v7718_v44  ;;  %v7457_v59 = vsel %vm7434_vm11, %v7424_v30, %v7318_v62  ;;  %v7425_v63 = vsel %vm7401_vm14, %v7392_v1, %v7192_v54  ;;  %v15036_v15 = vld [vmem:[#allocation69_spill] sm:$0xff] }
 0xb41   : > { %v7490_v55 = vsel %vm7467_vm2, %v7457_v59, 0.0 }
 0xb42   : > { %v7681_v48 = vadd.f32 %v7680_v35, %v7490_v55  ;;  %v7719_v10 = vmul.f32 %v7490_v55, %v7490_v55 }
 0xb43   : > { %v7320_v58 = vpop.permute.xlu0 %7319  ;;  %v7194_v26 = vpop.permute.xlu1 %7193 }
 0xb44   : > { %v7750_v47 = vadd.f32 %v7749_v11, %v7719_v10  ;;  %v7458_v21 = vsel %vm7434_vm11, %v7425_v63, %v7320_v58  ;;  %v7426_v9 = vsel %vm7401_vm14, %v7393_v34, %v7194_v26  ;;  %v15037_v11 = vld [vmem:[#allocation71_spill] sm:$0xff] }
 0xb45   : > { %v7491_v46 = vsel %vm7467_vm2, %v7458_v21, 0.0  ;;  %v15038_v21 = vld [vmem:[#allocation68_spill] sm:$0xff] }
 0xb46   : > { %v8127_v27 = vpack.c.bf16 %v7491_v46, %v7490_v55  ;;  %v7682_v45 = vadd.f32 %v7681_v48, %v7491_v46  ;;  %v7720_v24 = vmul.f32 %v7491_v46, %v7491_v46 }
 0xb47   : > { %v7322_v36 = vpop.permute.xlu0 %7321  ;;  %v7196_v43 = vpop.permute.xlu1 %7195 }
 0xb48   : > { %8159 = vst [vmem:[%s14241_s10 + $0x58] sm:$0xff] %v8127_v27   ;;  %v7751_v42 = vadd.f32 %v7750_v47, %v7720_v24  ;;  %v7459_v57 = vsel %vm7434_vm11, %v7426_v9, %v7322_v36  ;;  %v7427_v60 = vsel %vm7401_vm14, %v7394_v12, %v7196_v43 }
 0xb49   : > { %v7492_v0 = vsel %vm7467_vm2, %v7459_v57, 0.0 }
 0xb4a   : > { %v7683_v23 = vadd.f32 %v7682_v45, %v7492_v0  ;;  %v7721_v17 = vmul.f32 %v7492_v0, %v7492_v0 }
 0xb4b   : > { %v7324_v39 = vpop.permute.xlu0 %7323  ;;  %v7198_v32 = vpop.permute.xlu1 %7197 }
 0xb4c   : > { %v7752_v3 = vadd.f32 %v7751_v42, %v7721_v17  ;;  %v7460_v5 = vsel %vm7434_vm11, %v7427_v60, %v7324_v39  ;;  %v7428_v20 = vsel %vm7401_vm14, %v7395_v37, %v7198_v32 }
 0xb4d   : > { %v7493_v52 = vsel %vm7467_vm2, %v7460_v5, 0.0 }
 0xb4e   : > { %v8132_v41 = vpack.c.bf16 %v7493_v52, %v7492_v0  ;;  %v7684_v38 = vadd.f32 %v7683_v23, %v7493_v52  ;;  %v7722_v18 = vmul.f32 %v7493_v52, %v7493_v52 }
 0xb4f   : > { %v7104_v49 = vpop.permute.xlu0 %7103  ;;  %v7326_v29 = vpop.permute.xlu1 %7325 }
 0xb50   : > { %8160 = vst [vmem:[%s14241_s10 + $0x60] sm:$0xff] %v8132_v41   ;;  %v7753_v53 = vadd.f32 %v7752_v3, %v7722_v18  ;;  %v7396_v40 = vsel %vm399_vm3, %v15035_v2, %v7104_v49  ;;  %v7461_v51 = vsel %vm7434_vm11, %v7428_v20, %v7326_v29 }
 0xb51   : > { %v7494_v19 = vsel %vm7467_vm2, %v7461_v51, 0.0 }
 0xb52   : > { %v7723_v55 = vmul.f32 %v7494_v19, %v7494_v19  ;;  %v7685_v58 = vadd.f32 %v7684_v38, %v7494_v19 }
 0xb53   : > { %v7200_v50 = vpop.permute.xlu0 %7199  ;;  %v7106_v13 = vpop.permute.xlu1 %7105 }
 0xb54   : > { %v7429_v33 = vsel %vm7401_vm14, %v7396_v40, %v7200_v50  ;;  %v7397_v35 = vsel %vm399_vm3, %v15036_v15, %v7106_v13  ;;  %v7754_v34 = vadd.f32 %v7753_v53, %v7723_v55 }
 0xb57   : > { %v7328_v7 = vpop.permute.xlu0 %7327  ;;  %v7202_v14 = vpop.permute.xlu1 %7201 }
 0xb58   : > { %v7462_v56 = vsel %vm7434_vm11, %v7429_v33, %v7328_v7  ;;  %v7430_v62 = vsel %vm7401_vm14, %v7397_v35, %v7202_v14 }
 0xb59   : > { %v7495_v16 = vsel %vm7467_vm2, %v7462_v56, 0.0 }
 0xb5a   : > { %v8137_v25 = vpack.c.bf16 %v7495_v16, %v7494_v19  ;;  %v7724_v26 = vmul.f32 %v7495_v16, %v7495_v16  ;;  %v7686_v27 = vadd.f32 %v7685_v58, %v7495_v16 }
 0xb5b   : > { %v7108_v6 = vpop.permute.xlu0 %7107  ;;  %v7330_v31 = vpop.permute.xlu1 %7329 }
 0xb5c   : > { %8161 = vst [vmem:[%s14241_s10 + $0x68] sm:$0xff] %v8137_v25   ;;  %v7463_v54 = vsel %vm7434_vm11, %v7430_v62, %v7330_v31  ;;  %v7398_v59 = vsel %vm399_vm3, %v15037_v11, %v7108_v6  ;;  %v7755_v42 = vadd.f32 %v7754_v34, %v7724_v26 }
 0xb5d   : > { %v7496_v10 = vsel %vm7467_vm2, %v7463_v54, 0.0 }
 0xb5e   : > { %v7725_v45 = vmul.f32 %v7496_v10, %v7496_v10  ;;  %v7687_v57 = vadd.f32 %v7686_v27, %v7496_v10 }
 0xb5f   : > { %v7204_v44 = vpop.permute.xlu0 %7203  ;;  %v7110_v30 = vpop.permute.xlu1 %7109 }
 0xb60   : > { %v7431_v4 = vsel %vm7401_vm14, %v7398_v59, %v7204_v44  ;;  %v7399_v46 = vsel %vm399_vm3, %v15038_v21, %v7110_v30  ;;  %v7756_v12 = vadd.f32 %v7755_v42, %v7725_v45 }
 0xb63   : > { %v7332_v1 = vpop.permute.xlu0 %7331  ;;  %v7206_v48 = vpop.permute.xlu1 %7205 }
 0xb64   : > { %v7464_v63 = vsel %vm7434_vm11, %v7431_v4, %v7332_v1  ;;  %v7432_v24 = vsel %vm7401_vm14, %v7399_v46, %v7206_v48 }
 0xb65   : > { %v7497_v47 = vsel %vm7467_vm2, %v7464_v63, 0.0 }
 0xb66   : > { %v8142_v22 = vpack.c.bf16 %v7497_v47, %v7496_v10  ;;  %v7726_v0 = vmul.f32 %v7497_v47, %v7497_v47  ;;  %v7688_v23 = vadd.f32 %v7687_v57, %v7497_v47 }
 0xb67   : > { %v7112_v9 = vpop.permute.xlu0 %7111  ;;  %v7334_v36 = vpop.permute.xlu1 %7333 }
 0xb68   : > { %8162 = vst [vmem:[%s14241_s10 + $0x70] sm:$0xff] %v8142_v22   ;;  %v7465_v43 = vsel %vm7434_vm11, %v7432_v24, %v7334_v36  ;;  %v7400_v17 = vsel %vm399_vm3, %v14957_v61, %v7112_v9  ;;  %v7757_v5 = vadd.f32 %v7756_v12, %v7726_v0 }
 0xb69   : > { %v7498_v8 = vsel %vm7467_vm2, %v7465_v43, 0.0 }
 0xb6a   : > { %v7727_v60 = vmul.f32 %v7498_v8, %v7498_v8  ;;  %v7689_v52 = vadd.f32 %v7688_v23, %v7498_v8 }
 0xb6b   : > { %v7208_v39 = vpop.permute.xlu0 %7207  ;;  %v7336_v32 = vpop.permute.xlu1 %7335 }
 0xb6c   : > { %v7433_v3 = vsel %vm7401_vm14, %v7400_v17, %v7208_v39  ;;  %v7758_v18 = vadd.f32 %v7757_v5, %v7727_v60 }
 0xb6d   : > { %v7466_v41 = vsel %vm7434_vm11, %v7433_v3, %v7336_v32 }
 0xb6e   : > { %v7499_v38 = vsel %vm7467_vm2, %v7466_v41, 0.0 }
 0xb6f   : > { %v8147_v49 = vpack.c.bf16 %v7499_v38, %v7498_v8  ;;  %v7690_v29 = vadd.f32 %v7689_v52, %v7499_v38  ;;  %v7728_v61 = vmul.f32 %v7499_v38, %v7499_v38 }
 0xb71   : > { %8163 = vst [vmem:[%s14241_s10 + $0x78] sm:$0xff] %v8147_v49   ;;  %v7691_v53 = vrot.slane %v7690_v29, 4  ;;  %v7759_v50 = vadd.f32 %v7758_v18, %v7728_v61 }
 0xb72   : > { %8630 = shalt.err (!%p8627_p3)
}
 0xb73   : > { %s8631_s10 = scalar_lea.hbm %s14443_s12, 2048  ;;  %s8635_s26 = scalar_lea.hbm %s14521_s7, 4096 }
 0xb74   : > { %p8632_p4 = scmp.ne.s32.totalorder %s14443_s12, %s8631_s10  ;;  %p8636_p9 = scmp.lt.s32.totalorder %s14443_s12, %s14521_s7 }
 0xb75   : > { %p8637_p10 = scmp.lt.s32.totalorder %s8635_s26, %s8631_s10 }
 0xb76   : > { %p8633_p7 = pnand %p8632_p4, %p8819_p5 }
 0xb77   : > { %p8638_p11 = por %p8637_p10, %p8636_p9 }
 0xb78   : > { %p8634_p8 = pneg %p8633_p7 }
 0xb7a   : > { %p8639_p12 = pnand %p8638_p11, %p8634_p8 }
 0xb7c   : > { %8642 = shalt.err (!%p8639_p12)
}
 0xb7d   : > { %s15039_s24 = smov 4   ;;  %s15040_s20 = smov 64   ;;  %v7692_v13 = vadd.f32 %v7691_v53, %v7690_v29  ;;  %v7760_v28 = vrot.slane %v7759_v50, 4 }
 0xb7e   : > { %8453 = dma.vmem_to_hbm [thread:$0]  (%p8819_p5), %s14445_s18, 2048, %s14443_s12, %s7769_s22, %s15040_s20, %s15040_s20, %s15039_s24  }
 0xb7f   : > { %v7693_v37 = vrot.slane %v7692_v13, 2  ;;  %v7761_v20 = vadd.f32 %v7760_v28, %v7759_v50  ;;  %s7899_s23 = sshll.u32 %s14219_s21, 1  ;;  %s8032_s17 = sshll.u32 %s8802_s9, 5 }
 0xb80   : > { %s309_s10 = scalar_lea.vmem [#allocation6], %s7899_s23  ;;  %s14477_s18 = scalar_lea.hbm %s14522_s8, %s8032_s17 }
 0xb81   : > { %v7694_v2 = vadd.f32 %v7693_v37, %v7692_v13  ;;  %v7762_v40 = vrot.slane %v7761_v20, 2  ;;  %s7803_s13 = sshll.u32 %s309_s10, 4  ;;  %s7774_s12 = scalar_lea.sflag [#allocation7], %s14219_s21  ;;  %s7804_s13 = int_to_ptr.vmem [resolvable:$true] %s7803_s13 }
 0xb82   : > { %s8643_s22 = scalar_lea.vmem %s7804_s13, 32  ;;  %s8735_s9 = smov [#allocation6]  }
 0xb83   : > { %v7695_v51 = vrot.slane %v7694_v2, 1  ;;  %v7763_v33 = vadd.f32 %v7762_v40, %v7761_v20  ;;  %p8644_p13 = scmp.ne.s32.totalorder %s7804_s13, %s8643_s22  ;;  %s8647_s25 = sshll.u32 %s8735_s9, 4  ;;  %s8648_s25 = int_to_ptr.vmem [resolvable:$false] %s8647_s25 }
 0xb84   : > { %s8649_s24 = scalar_lea.vmem %s8648_s25, 64  ;;  %p8650_p2 = scmp.lt.s32.totalorder %s7804_s13, %s8648_s25 }
 0xb85   : > { %v7764_v7 = vrot.slane %v7763_v33, 1  ;;  %v7696_v14 = vadd.f32 %v7695_v51, %v7694_v2  ;;  %p8645_p0 = pnand %p8644_p13, %p8819_p5  ;;  %p8651_p3 = scmp.lt.s32.totalorder %s8649_s24, %s8643_s22 }
 0xb87   : > { %v7765_v56 = vadd.f32 %v7764_v7, %v7763_v33  ;;  %p8646_p1 = pneg %p8645_p0  ;;  %p8652_p4 = por %p8651_p3, %p8650_p2 }
 0xb89   : > { %v7766_v19 = vsel %vm6409_vm1, %v7696_v14, %v7765_v56  ;;  %p8653_p7 = pnand %p8652_p4, %p8646_p1 }
 0xb8a   : > { %7767 = vst [vmem:[%s309_s10] sm:$0x3] %v7766_v19 }
 0xb8b   : > { %8656 = shalt.err (!%p8653_p7)
}
 0xb8c   : > { %s8657_s20 = scalar_lea.hbm %s14477_s18, 32  ;;  %s8661_s17 = scalar_lea.hbm %s14522_s8, 64 }
 0xb8d   : > { %p8658_p8 = scmp.ne.s32.totalorder %s14477_s18, %s8657_s20  ;;  %p8662_p11 = scmp.lt.s32.totalorder %s14477_s18, %s14522_s8 }
 0xb8e   : > { %p8663_p12 = scmp.lt.s32.totalorder %s8661_s17, %s8657_s20 }
 0xb8f   : > { %p8659_p9 = pnand %p8658_p8, %p8819_p5 }
 0xb90   : > { %p8664_p13 = por %p8663_p12, %p8662_p11 }
 0xb91   : > { %p8660_p10 = pneg %p8659_p9 }
 0xb93   : > { %p8665_p0 = pnand %p8664_p13, %p8660_p10 }
 0xb95   : > { %8668 = shalt.err (!%p8665_p0)
}
 0xb96   : > { %8454 = dma.vmem_to_hbm [thread:$0]  (%p8819_p5), %s7804_s13, 32, %s14477_s18, %s7774_s12  }
 0xb97 PF: > { %p8464_p1 = scmp.ge.s32.totalorder %s8707_s30, 2  ;;  %s7815_s26 = sand.u32 1, %s8695_s27  }
 0xb98   : > { %s7816_s22 = scalar_lea.sflag [#allocation5], %s7815_s26 }
 0xb99   : > { %p8458_p2 = pnand %p8464_p1, %p8823_p6 }
 0xb9b   : > { %p8459_p3 = pneg %p8458_p2 }
 0xb9d   : > { %8686 = dma.done.wait (%p8459_p3), %s7816_s22, 2048  }
 0xb9e   : > { %8688 = vsyncadd (%p8459_p3), %s7816_s22, 4294965248  ;;  %s7825_s9 = scalar_lea.sflag [#allocation7], %s7815_s26 }
 0xb9f   : > { %8690 = dma.done.wait (%p8459_p3), %s7825_s9, 32  }
 0xba0   : > { %8692 = vsyncadd (%p8459_p3), %s7825_s9, 4294967264  ;;  %p22_p5 = scmp.ge.s32.totalorder %s8806_s11, 4   ;;  %s15041_s27 = smov %s8699_s28 }
 0xba1   : > { %s15042_s28 = smov %s8703_s29  ;;  %s15043_s29 = smov %s8817_s14 }
 0xba2   : > { %s15044_s30 = smov %s8806_s11  ;;  %24 = sbr.rel (!%p22_p5) target bundleno = 5 (0x5), region = 105 }
 0xba7   :  { %7830 = vsyncpa [#allocation5], 1 }
 0xba8   :  { %7832 = vsyncpa [#allocation5 + $0x1], 1 }
 0xba9   :  { %7833 = vsyncpa [#allocation7], 1 }
 0xbaa   :  { %7835 = vsyncpa [#allocation7 + $0x1], 1 }

</bundles_post_ra>
